<compile_context>
chip_gen: v6e
topology: v6e:2x2x1
jax: 0.10.0
libtpu: 0.0.40
codegen_flags: <defaults>
</compile_context>

<pallas_src>
import functools
import math

import jax
import jax.numpy as jnp
import numpy as np
from jax.experimental import pallas as pl
from jax.experimental.pallas import tpu as pltpu


# ----------------------------- Pallas kernel -------------------------------


def _decoder_layer_kernel(*refs, num_heads, eps, causal):
    if causal:
        (x_ref, mem_ref, smask_ref,
         ln_a_ref, ln_b_ref,
         sa_w_ref, sa_b_ref, ca_w_ref, ca_b_ref,
         w1_ref, b1_ref, w2_ref, b2_ref,
         out_ref,
         kT_self_ref, v_self_ref, kT_mem_ref, v_mem_ref) = refs
        tmask_ref = None
    else:
        (x_ref, mem_ref, smask_ref, tmask_ref,
         ln_a_ref, ln_b_ref,
         sa_w_ref, sa_b_ref, ca_w_ref, ca_b_ref,
         w1_ref, b1_ref, w2_ref, b2_ref,
         out_ref,
         kT_self_ref, v_self_ref, kT_mem_ref, v_mem_ref) = refs

    t_blk = pl.program_id(1)
    tq = out_ref.shape[1]
    T = x_ref.shape[1]
    D = x_ref.shape[2]
    dh = D // num_heads
    inv_sqrt_dh = 1.0 / math.sqrt(dh)
    bf16 = jnp.bfloat16

    def layer_norm(v, a, b):
        # torch: a_2 * (x - mean) / (std + eps) + b_2 with UNBIASED std
        mean = jnp.mean(v, axis=-1, keepdims=True)
        c = v - mean
        var = jnp.sum(c * c, axis=-1, keepdims=True) / (D - 1)
        return a * c / (jnp.sqrt(var) + eps) + b

    # ------- per-batch K/V precompute (only at the first query tile) -------
    # Self-attn K/V come from LN0(x); src-attn K/V come from memory (NOT
    # layer-normalized, matching src_attn(x, m, m, src_mask)).  K is stored
    # TRANSPOSED ((D, Skv)) so every per-head score matmul contracts along the
    # major dim with no per-step XLU transposes.
    # TODO(synk): in causal mode K/V for key-block t could be projected
    # incrementally at step t and scores restricted to the causal key prefix;
    # that needs a flash-style inner key-block loop — not done here.
    @pl.when(t_blk == 0)
    def _():
        xn0 = layer_norm(x_ref[0], ln_a_ref[0], ln_b_ref[0]).astype(bf16)
        k0 = (jnp.dot(xn0, sa_w_ref[1], preferred_element_type=jnp.float32)
              + sa_b_ref[1])
        kT_self_ref[...] = k0.astype(bf16).T
        v_self_ref[...] = (
            jnp.dot(xn0, sa_w_ref[2], preferred_element_type=jnp.float32)
            + sa_b_ref[2]).astype(bf16)
        mem_bf = mem_ref[0].astype(bf16)
        km = (jnp.dot(mem_bf, ca_w_ref[1], preferred_element_type=jnp.float32)
              + ca_b_ref[1])
        kT_mem_ref[...] = km.astype(bf16).T
        v_mem_ref[...] = (
            jnp.dot(mem_bf, ca_w_ref[2], preferred_element_type=jnp.float32)
            + ca_b_ref[2]).astype(bf16)

    # ----------------------------- masks ------------------------------------
    if causal:
        row = jax.lax.broadcasted_iota(jnp.int32, (tq, T), 0) + t_blk * tq
        col = jax.lax.broadcasted_iota(jnp.int32, (tq, T), 1)
        tgt_keep = row >= col                       # (tq, T) bool, in-kernel
    else:
        tgt_keep = tmask_ref[0] != 0                # (tq, T) bool
    src_keep = smask_ref[0] != 0                    # (1, S) bool

    # ----------------------------- attention --------------------------------
    def attend(q_in, kT_ref, v_ref, w_ref, b_ref, keep):
        # q_in: (tq, D) f32; kT_ref: (D, Skv) bf16; v_ref: (Skv, D) bf16
        q = (jnp.dot(q_in.astype(bf16), w_ref[0],
                     preferred_element_type=jnp.float32)
             + b_ref[0]).astype(bf16)                # (tq, D)
        heads = []
        # TODO(synk): a lax.fori_loop over heads would bound live ranges of the
        # (tq, Skv) f32 score tiles for long sequences, but needs dynamic
        # lane-dim slicing at dh granularity; kept static (H is small).
        for h in range(num_heads):
            lo, hi = h * dh, (h + 1) * dh
            s = jnp.dot(q[:, lo:hi], kT_ref[lo:hi, :],
                        preferred_element_type=jnp.float32) * inv_sqrt_dh
            s = jnp.where(keep, s, -1e9)             # mask applied in f32
            s = s - jnp.max(s, axis=-1, keepdims=True)
            p = jnp.exp(s)
            p = p * pl.reciprocal(jnp.sum(p, axis=-1, keepdims=True),
                                  approx=True)
            heads.append(jnp.dot(p.astype(bf16), v_ref[:, lo:hi],
                                 preferred_element_type=jnp.float32).astype(bf16))
        o = jnp.concatenate(heads, axis=-1)          # (tq, D) contiguous
        # single K=D output projection (one MXU matmul instead of H rank-dh)
        return jnp.dot(o, w_ref[3], preferred_element_type=jnp.float32) + b_ref[3]

    # ----------------------------- sublayers ---------------------------------
    # Query tile sliced from the already-resident full-x block (no second DMA).
    q_start = pl.multiple_of(t_blk * tq, tq)
    x = x_ref[0, pl.ds(q_start, tq), :]              # (tq, D) f32

    # sublayer[0]: x + self_attn(LN0(x))   (dropout = identity in eval)
    xn = layer_norm(x, ln_a_ref[0], ln_b_ref[0])
    x = x + attend(xn, kT_self_ref, v_self_ref, sa_w_ref, sa_b_ref, tgt_keep)

    # sublayer[1]: x + src_attn(LN1(x), memory)
    xn = layer_norm(x, ln_a_ref[1], ln_b_ref[1])
    x = x + attend(xn, kT_mem_ref, v_mem_ref, ca_w_ref, ca_b_ref, src_keep)

    # sublayer[2]: x + FFN(LN2(x))
    xn = layer_norm(x, ln_a_ref[2], ln_b_ref[2])
    h = jnp.dot(xn.astype(bf16), w1_ref[...],
                preferred_element_type=jnp.float32) + b1_ref[...]
    h = jnp.maximum(h, 0.0)
    x = x + (jnp.dot(h.astype(bf16), w2_ref[...],
                     preferred_element_type=jnp.float32) + b2_ref[...])

    out_ref[0] = x.astype(out_ref.dtype)


# ------------------------------ wrapper -------------------------------------


def _pick_tq(T):
    # Prefer the largest tile (matmul M dim) that divides T.
    for cand in (256, 128, 64, 32, 16, 8):
        if T % cand == 0:
            return cand
    return T


def _default_vmem_limit():
    cap = 64 * 1024 * 1024
    try:
        info = pltpu.get_tpu_info()
        cap = int(getattr(info, "vmem_capacity_bytes", cap))
    except Exception:
        pass
    # ~75% of physical VMEM (96 MiB on v5e/v6e, 48 MiB on v7x), capped.
    return max(32 * 1024 * 1024, min(cap * 3 // 4, 100 * 1024 * 1024))


def decoder_layer(x, memory, src_mask, tgt_mask, params, *, num_heads,
                  eps=1e-6, tq=None, causal=False, out_dtype=jnp.float32,
                  weight_buffers=1, vmem_limit_bytes=None):
    B, T, D = x.shape
    S = memory.shape[1]
    F = params["w1"].shape[1]
    assert D % num_heads == 0

    if tq is None:
        tq = _pick_tq(T)
        # TODO(synk): for tiny T (captioning decode) fold several batch rows
        # into one grid step so the matmul M dimension reaches >= 128.
    assert T % tq == 0
    nt = T // tq

    bf16 = jnp.bfloat16
    # matmul weights in bf16 (f32 MXU accumulate); LN params and biases in f32
    sa_w = params["sa_w"].astype(bf16)
    ca_w = params["ca_w"].astype(bf16)
    w1 = params["w1"].astype(bf16)
    w2 = params["w2"].astype(bf16)

    if not causal:
        # int8 mask stream when the (32, 128) int8 tile rule is satisfied
        mask_dtype = jnp.int8 if tq % 32 == 0 else jnp.int32
        tgt_mask = tgt_mask.astype(mask_dtype)

    if vmem_limit_bytes is None:
        vmem_limit_bytes = _default_vmem_limit()

    kernel = functools.partial(_decoder_layer_kernel,
                               num_heads=num_heads, eps=eps, causal=causal)

    def run(pipeline_mode):
        def const_spec(shape):
            idx = (lambda b, t: (0, 0)) if len(shape) == 2 \
                else (lambda b, t: (0, 0, 0))
            if pipeline_mode is None:
                return pl.BlockSpec(shape, idx)
            return pl.BlockSpec(shape, idx, pipeline_mode=pipeline_mode)

        in_specs = [
            pl.BlockSpec((1, T, D), lambda b, t: (b, 0, 0)),   # x (full seq)
            pl.BlockSpec((1, S, D), lambda b, t: (b, 0, 0)),   # memory
            pl.BlockSpec((1, 1, S), lambda b, t: (b, 0, 0)),   # src_mask
        ]
        args = [x, memory, src_mask]
        if not causal:
            in_specs.append(pl.BlockSpec((1, tq, T), lambda b, t: (b, t, 0)))
            args.append(tgt_mask)
        # Constant-index blocks: weights / biases / LN params.
        # TODO(synk): for very large D/F (e.g. D>=1024, F>=4096) w1/w2 should
        # be streamed in K-tiled chunks instead of kept fully resident.
        in_specs += [
            const_spec((3, 1, D)),   # ln_a
            const_spec((3, 1, D)),   # ln_b
            const_spec((4, D, D)),   # self-attn [Wq,Wk,Wv,Wo] (bf16)
            const_spec((4, 1, D)),   # self-attn biases (f32)
            const_spec((4, D, D)),   # src-attn  [Wq,Wk,Wv,Wo] (bf16)
            const_spec((4, 1, D)),   # src-attn biases (f32)
            const_spec((D, F)),      # ffn W1 (bf16)
            const_spec((1, F)),      # ffn b1
            const_spec((F, D)),      # ffn W2 (bf16)
            const_spec((1, D)),      # ffn b2
        ]
        all_args = args + [params["ln_a"], params["ln_b"],
                           sa_w, params["sa_b"], ca_w, params["ca_b"],
                           w1, params["b1"], w2, params["b2"]]

        out = pl.pallas_call(
            kernel,
            out_shape=jax.ShapeDtypeStruct((B, T, D), out_dtype),
            grid=(B, nt),
            in_specs=in_specs,
            out_specs=pl.BlockSpec((1, tq, D), lambda b, t: (b, t, 0)),
            scratch_shapes=[
                pltpu.VMEM((D, T), bf16),   # K^T (self), persists across t
                pltpu.VMEM((T, D), bf16),   # V   (self)
                pltpu.VMEM((D, S), bf16),   # K^T (src)
                pltpu.VMEM((S, D), bf16),   # V   (src)
            ],
            compiler_params=pltpu.CompilerParams(
                # batch axis shards across cores (v7x megacore); the t axis
                # carries the per-batch K/V scratch, so it MUST stay
                # "arbitrary" and innermost.
                # TODO(synk): for B=1 on v7x, hoist the K/V projections out of
                # the kernel so the t axis can be made core-parallel.
                dimension_semantics=("parallel", "arbitrary"),
                vmem_limit_bytes=vmem_limit_bytes,
            ),
        )(*all_args)
        return jax.block_until_ready(out)

    if weight_buffers is None:
        return run(None)
    try:
        return run(pl.Buffered(weight_buffers))
    except Exception:
        # pipeline_mode on pallas_call BlockSpecs unsupported by this jax:
        # fall back to default double buffering for the constant blocks.
        return run(None)


# --------------------------- Pure-JAX reference -----------------------------


def decoder_layer_ref(x, memory, src_mask, tgt_mask, params, *, num_heads,
                      eps=1e-6):
    D = x.shape[-1]
    dh = D // num_heads

    def ln(v, a, b):
        mean = jnp.mean(v, axis=-1, keepdims=True)
        c = v - mean
        std = jnp.sqrt(jnp.sum(c * c, axis=-1, keepdims=True) / (D - 1))
        return a * c / (std + eps) + b

    def mha(q_in, kv_in, w, bias, mask):
        q, k, v = (q_in @ w[0] + bias[0], kv_in @ w[1] + bias[1],
                   kv_in @ w[2] + bias[2])
        outs = []
        for h in range(num_heads):
            qh = q[..., h * dh:(h + 1) * dh]
            kh = k[..., h * dh:(h + 1) * dh]
            vh = v[..., h * dh:(h + 1) * dh]
            s = jnp.einsum("btd,bsd->bts", qh, kh) / math.sqrt(dh)
            s = jnp.where(mask == 0, -1e9, s)
            p = jax.nn.softmax(s, axis=-1)
            outs.append(jnp.einsum("bts,bsd->btd", p, vh))
        return jnp.concatenate(outs, axis=-1) @ w[3] + bias[3]

    xn = ln(x, params["ln_a"][0], params["ln_b"][0])
    x = x + mha(xn, xn, params["sa_w"], params["sa_b"], tgt_mask)
    xn = ln(x, params["ln_a"][1], params["ln_b"][1])
    x = x + mha(xn, memory, params["ca_w"], params["ca_b"], src_mask)
    xn = ln(x, params["ln_a"][2], params["ln_b"][2])
    h = jnp.maximum(xn @ params["w1"] + params["b1"], 0.0)
    return x + h @ params["w2"] + params["b2"]


# --------------------------------- main -------------------------------------


if __name__ == "__main__":
    # Small lane-dense shapes: D, F multiples of 128; tq=8 gives a 2-step
    # query tiling so the scratch-reuse (t > 0) path is exercised.
    B, T, S, D, H, F = 2, 16, 32, 128, 4, 256

    key = jax.random.PRNGKey(0)
    ks = jax.random.split(key, 16)
    s_d = 1.0 / math.sqrt(D)
    s_f = 1.0 / math.sqrt(F)

    params = {
        "ln_a": 1.0 + 0.1 * jax.random.normal(ks[0], (3, 1, D), jnp.float32),
        "ln_b": 0.05 * jax.random.normal(ks[1], (3, 1, D), jnp.float32),
        "sa_w": s_d * jax.random.normal(ks[2], (4, D, D), jnp.float32),
        "sa_b": 0.01 * jax.random.normal(ks[3], (4, 1, D), jnp.float32),
        "ca_w": s_d * jax.random.normal(ks[4], (4, D, D), jnp.float32),
        "ca_b": 0.01 * jax.random.normal(ks[5], (4, 1, D), jnp.float32),
        "w1": s_d * jax.random.normal(ks[6], (D, F), jnp.float32),
        "b1": 0.01 * jax.random.normal(ks[7], (1, F), jnp.float32),
        "w2": s_f * jax.random.normal(ks[8], (F, D), jnp.float32),
        "b2": 0.01 * jax.random.normal(ks[9], (1, D), jnp.float32),
    }

    x = jax.random.normal(ks[10], (B, T, D), jnp.float32)
    memory = jax.random.normal(ks[11], (B, S, D), jnp.float32)

    # causal target mask (B, T, T); src mask (B, 1, S) with some padding masked
    tgt_mask = jnp.broadcast_to(
        jnp.tril(jnp.ones((T, T), jnp.int32)), (B, T, T)).astype(jnp.int32)
    src_mask = jnp.ones((B, 1, S), jnp.int32)
    src_mask = src_mask.at[1, 0, S - 3:].set(0)

    ref = decoder_layer_ref(x, memory, src_mask, tgt_mask, params, num_heads=H)
    ref = np.asarray(jax.block_until_ready(ref))

    # 1) general path: explicit (arbitrary) tgt_mask streamed per query tile
    out = decoder_layer(x, memory, src_mask, tgt_mask, params,
                        num_heads=H, tq=8)
    out = np.asarray(out)
    # bf16 matmul operands (f32 accumulate) -> slightly looser tolerance
    np.testing.assert_allclose(out, ref, rtol=5e-2, atol=5e-2)

    # 2) causal path: target mask generated in-kernel (no mask DMA at all)
    out_c = decoder_layer(x, memory, src_mask, None, params,
                          num_heads=H, tq=8, causal=True)
    out_c = np.asarray(out_c)
    np.testing.assert_allclose(out_c, ref, rtol=5e-2, atol=5e-2)

    print("KERNEL_OK")
</pallas_src>

<mosaic_0001>
module attributes {stable_mosaic.version = 11 : i64} {
  func.func @_decoder_layer_kernel(%arg0: i32, %arg1: i32, %arg2: memref<1x16x128xf32, #tpu.memory_space<vmem>>, %arg3: memref<1x32x128xf32, #tpu.memory_space<vmem>>, %arg4: memref<1x1x32xi32, #tpu.memory_space<vmem>>, %arg5: memref<1x8x16xi32, #tpu.memory_space<vmem>>, %arg6: memref<3x1x128xf32, #tpu.memory_space<vmem>>, %arg7: memref<3x1x128xf32, #tpu.memory_space<vmem>>, %arg8: memref<4x128x128xbf16, #tpu.memory_space<vmem>>, %arg9: memref<4x1x128xf32, #tpu.memory_space<vmem>>, %arg10: memref<4x128x128xbf16, #tpu.memory_space<vmem>>, %arg11: memref<4x1x128xf32, #tpu.memory_space<vmem>>, %arg12: memref<128x256xbf16, #tpu.memory_space<vmem>>, %arg13: memref<1x256xf32, #tpu.memory_space<vmem>>, %arg14: memref<256x128xbf16, #tpu.memory_space<vmem>>, %arg15: memref<1x128xf32, #tpu.memory_space<vmem>>, %arg16: memref<1x8x128xf32, #tpu.memory_space<vmem>>, %arg17: memref<128x16xbf16, #tpu.memory_space<vmem>>, %arg18: memref<16x128xbf16, #tpu.memory_space<vmem>>, %arg19: memref<128x32xbf16, #tpu.memory_space<vmem>>, %arg20: memref<32x128xbf16, #tpu.memory_space<vmem>>) attributes {dimension_semantics = [#tpu.dimension_semantics<parallel>, #tpu.dimension_semantics<arbitrary>], iteration_bounds = array<i64: 2, 2>, scalar_prefetch = 0 : i64, scratch_operands = 4 : i64, tpu.core_type = #tpu.core_type<tc>, window_params = [{transform_indices = @transform_0, window_bounds = array<i64: 1, 16, 128>}, {transform_indices = @transform_1, window_bounds = array<i64: 1, 32, 128>}, {transform_indices = @transform_2, window_bounds = array<i64: 1, 1, 32>}, {transform_indices = @transform_3, window_bounds = array<i64: 1, 8, 16>}, {pipeline_mode = #tpu.pipeline_mode<synchronous>, transform_indices = @transform_4, window_bounds = array<i64: 3, 1, 128>}, {pipeline_mode = #tpu.pipeline_mode<synchronous>, transform_indices = @transform_5, window_bounds = array<i64: 3, 1, 128>}, {pipeline_mode = #tpu.pipeline_mode<synchronous>, transform_indices = @transform_6, window_bounds = array<i64: 4, 128, 128>}, {pipeline_mode = #tpu.pipeline_mode<synchronous>, transform_indices = @transform_7, window_bounds = array<i64: 4, 1, 128>}, {pipeline_mode = #tpu.pipeline_mode<synchronous>, transform_indices = @transform_8, window_bounds = array<i64: 4, 128, 128>}, {pipeline_mode = #tpu.pipeline_mode<synchronous>, transform_indices = @transform_9, window_bounds = array<i64: 4, 1, 128>}, {pipeline_mode = #tpu.pipeline_mode<synchronous>, transform_indices = @transform_10, window_bounds = array<i64: 128, 256>}, {pipeline_mode = #tpu.pipeline_mode<synchronous>, transform_indices = @transform_11, window_bounds = array<i64: 1, 256>}, {pipeline_mode = #tpu.pipeline_mode<synchronous>, transform_indices = @transform_12, window_bounds = array<i64: 256, 128>}, {pipeline_mode = #tpu.pipeline_mode<synchronous>, transform_indices = @transform_13, window_bounds = array<i64: 1, 128>}, {transform_indices = @transform_14, window_bounds = array<i64: 1, 8, 128>}]} {
    %c0_i32 = arith.constant 0 : i32
    %0 = arith.cmpi eq, %arg1, %c0_i32 : i32
    %1 = arith.extui %0 : i1 to i32
    %c0_i32_0 = arith.constant 0 : i32
    %2 = arith.cmpi ne, %1, %c0_i32_0 : i32
    scf.if %2 {
      %c0_158 = arith.constant 0 : index
      %c0_159 = arith.constant 0 : index
      %c0_160 = arith.constant 0 : index
      %318 = vector.load %arg2[%c0_158, %c0_159, %c0_160] : memref<1x16x128xf32, #tpu.memory_space<vmem>>, vector<1x16x128xf32>
      %319 = vector.shape_cast %318 : vector<1x16x128xf32> to vector<16x128xf32>
      %c0_161 = arith.constant 0 : index
      %c0_162 = arith.constant 0 : index
      %c0_163 = arith.constant 0 : index
      %320 = vector.load %arg6[%c0_161, %c0_162, %c0_163] : memref<3x1x128xf32, #tpu.memory_space<vmem>>, vector<1x1x128xf32>
      %321 = vector.shape_cast %320 : vector<1x1x128xf32> to vector<1x128xf32>
      %c0_164 = arith.constant 0 : index
      %c0_165 = arith.constant 0 : index
      %c0_166 = arith.constant 0 : index
      %322 = vector.load %arg7[%c0_164, %c0_165, %c0_166] : memref<3x1x128xf32, #tpu.memory_space<vmem>>, vector<1x1x128xf32>
      %323 = vector.shape_cast %322 : vector<1x1x128xf32> to vector<1x128xf32>
      %cst_167 = arith.constant dense<0.000000e+00> : vector<16xf32>
      %324 = vector.multi_reduction <add>, %319, %cst_167 [1] : vector<16x128xf32> to vector<16xf32>
      %325 = vector.shape_cast %324 : vector<16xf32> to vector<16x1xf32>
      %cst_168 = arith.constant 1.280000e+02 : f32
      %326 = vector.broadcast %cst_168 : f32 to vector<16x1xf32>
      %327 = arith.divf %325, %326 : vector<16x1xf32>
      %328 = vector.broadcast %327 : vector<16x1xf32> to vector<16x128xf32>
      %329 = arith.subf %319, %328 : vector<16x128xf32>
      %330 = arith.mulf %329, %329 : vector<16x128xf32>
      %cst_169 = arith.constant dense<0.000000e+00> : vector<16xf32>
      %331 = vector.multi_reduction <add>, %330, %cst_169 [1] : vector<16x128xf32> to vector<16xf32>
      %332 = vector.shape_cast %331 : vector<16xf32> to vector<16x1xf32>
      %cst_170 = arith.constant 1.270000e+02 : f32
      %333 = vector.broadcast %cst_170 : f32 to vector<16x1xf32>
      %334 = arith.divf %332, %333 : vector<16x1xf32>
      %335 = vector.broadcast %321 : vector<1x128xf32> to vector<16x128xf32>
      %336 = arith.mulf %335, %329 : vector<16x128xf32>
      %337 = math.sqrt %334 : vector<16x1xf32>
      %cst_171 = arith.constant 9.99999997E-7 : f32
      %338 = vector.broadcast %cst_171 : f32 to vector<16x1xf32>
      %339 = arith.addf %337, %338 : vector<16x1xf32>
      %340 = vector.broadcast %339 : vector<16x1xf32> to vector<16x128xf32>
      %341 = arith.divf %336, %340 : vector<16x128xf32>
      %342 = vector.broadcast %323 : vector<1x128xf32> to vector<16x128xf32>
      %343 = arith.addf %341, %342 : vector<16x128xf32>
      %344 = arith.truncf %343 : vector<16x128xf32> to vector<16x128xbf16>
      %c1_172 = arith.constant 1 : index
      %c0_173 = arith.constant 0 : index
      %c0_174 = arith.constant 0 : index
      %345 = vector.load %arg8[%c1_172, %c0_173, %c0_174] : memref<4x128x128xbf16, #tpu.memory_space<vmem>>, vector<1x128x128xbf16>
      %346 = vector.shape_cast %345 : vector<1x128x128xbf16> to vector<128x128xbf16>
      %cst_175 = arith.constant dense<0.000000e+00> : vector<16x128xf32>
      %347 = tpu.matmul %344, %346, %cst_175 {dimension_numbers = #tpu.dot_dimension_numbers<[1], [0], [0], [1], [0, 0, 1, 1], [], []>} : vector<16x128xbf16>, vector<128x128xbf16>, vector<16x128xf32> -> vector<16x128xf32>
      %c1_176 = arith.constant 1 : index
      %c0_177 = arith.constant 0 : index
      %c0_178 = arith.constant 0 : index
      %348 = vector.load %arg9[%c1_176, %c0_177, %c0_178] : memref<4x1x128xf32, #tpu.memory_space<vmem>>, vector<1x1x128xf32>
      %349 = vector.shape_cast %348 : vector<1x1x128xf32> to vector<1x128xf32>
      %350 = vector.broadcast %349 : vector<1x128xf32> to vector<16x128xf32>
      %351 = arith.addf %347, %350 : vector<16x128xf32>
      %352 = arith.truncf %351 : vector<16x128xf32> to vector<16x128xbf16>
      %353 = tpu.transpose %352, [1, 0] : vector<16x128xbf16> -> vector<128x16xbf16>
      %c0_179 = arith.constant 0 : index
      %c0_180 = arith.constant 0 : index
      %354 = vector.load %arg17[%c0_179, %c0_180] : memref<128x16xbf16, #tpu.memory_space<vmem>>, vector<128x16xbf16>
      tpu.vector_store %arg17[%c0_179, %c0_180], %353 {strides = array<i32>} : memref<128x16xbf16, #tpu.memory_space<vmem>>, vector<128x16xbf16>,
      %c2_181 = arith.constant 2 : index
      %c0_182 = arith.constant 0 : index
      %c0_183 = arith.constant 0 : index
      %355 = vector.load %arg8[%c2_181, %c0_182, %c0_183] : memref<4x128x128xbf16, #tpu.memory_space<vmem>>, vector<1x128x128xbf16>
      %356 = vector.shape_cast %355 : vector<1x128x128xbf16> to vector<128x128xbf16>
      %cst_184 = arith.constant dense<0.000000e+00> : vector<16x128xf32>
      %357 = tpu.matmul %344, %356, %cst_184 {dimension_numbers = #tpu.dot_dimension_numbers<[1], [0], [0], [1], [0, 0, 1, 1], [], []>} : vector<16x128xbf16>, vector<128x128xbf16>, vector<16x128xf32> -> vector<16x128xf32>
      %c2_185 = arith.constant 2 : index
      %c0_186 = arith.constant 0 : index
      %c0_187 = arith.constant 0 : index
      %358 = vector.load %arg9[%c2_185, %c0_186, %c0_187] : memref<4x1x128xf32, #tpu.memory_space<vmem>>, vector<1x1x128xf32>
      %359 = vector.shape_cast %358 : vector<1x1x128xf32> to vector<1x128xf32>
      %360 = vector.broadcast %359 : vector<1x128xf32> to vector<16x128xf32>
      %361 = arith.addf %357, %360 : vector<16x128xf32>
      %362 = arith.truncf %361 : vector<16x128xf32> to vector<16x128xbf16>
      %c0_188 = arith.constant 0 : index
      %c0_189 = arith.constant 0 : index
      %363 = vector.load %arg18[%c0_188, %c0_189] : memref<16x128xbf16, #tpu.memory_space<vmem>>, vector<16x128xbf16>
      tpu.vector_store %arg18[%c0_188, %c0_189], %362 {strides = array<i32>} : memref<16x128xbf16, #tpu.memory_space<vmem>>, vector<16x128xbf16>,
      %c0_190 = arith.constant 0 : index
      %c0_191 = arith.constant 0 : index
      %c0_192 = arith.constant 0 : index
      %364 = vector.load %arg3[%c0_190, %c0_191, %c0_192] : memref<1x32x128xf32, #tpu.memory_space<vmem>>, vector<1x32x128xf32>
      %365 = vector.shape_cast %364 : vector<1x32x128xf32> to vector<32x128xf32>
      %366 = arith.truncf %365 : vector<32x128xf32> to vector<32x128xbf16>
      %c1_193 = arith.constant 1 : index
      %c0_194 = arith.constant 0 : index
      %c0_195 = arith.constant 0 : index
      %367 = vector.load %arg10[%c1_193, %c0_194, %c0_195] : memref<4x128x128xbf16, #tpu.memory_space<vmem>>, vector<1x128x128xbf16>
      %368 = vector.shape_cast %367 : vector<1x128x128xbf16> to vector<128x128xbf16>
      %cst_196 = arith.constant dense<0.000000e+00> : vector<32x128xf32>
      %369 = tpu.matmul %366, %368, %cst_196 {dimension_numbers = #tpu.dot_dimension_numbers<[1], [0], [0], [1], [0, 0, 1, 1], [], []>} : vector<32x128xbf16>, vector<128x128xbf16>, vector<32x128xf32> -> vector<32x128xf32>
      %c1_197 = arith.constant 1 : index
      %c0_198 = arith.constant 0 : index
      %c0_199 = arith.constant 0 : index
      %370 = vector.load %arg11[%c1_197, %c0_198, %c0_199] : memref<4x1x128xf32, #tpu.memory_space<vmem>>, vector<1x1x128xf32>
      %371 = vector.shape_cast %370 : vector<1x1x128xf32> to vector<1x128xf32>
      %372 = vector.broadcast %371 : vector<1x128xf32> to vector<32x128xf32>
      %373 = arith.addf %369, %372 : vector<32x128xf32>
      %374 = arith.truncf %373 : vector<32x128xf32> to vector<32x128xbf16>
      %375 = tpu.transpose %374, [1, 0] : vector<32x128xbf16> -> vector<128x32xbf16>
      %c0_200 = arith.constant 0 : index
      %c0_201 = arith.constant 0 : index
      %376 = vector.load %arg19[%c0_200, %c0_201] : memref<128x32xbf16, #tpu.memory_space<vmem>>, vector<128x32xbf16>
      tpu.vector_store %arg19[%c0_200, %c0_201], %375 {strides = array<i32>} : memref<128x32xbf16, #tpu.memory_space<vmem>>, vector<128x32xbf16>,
      %c2_202 = arith.constant 2 : index
      %c0_203 = arith.constant 0 : index
      %c0_204 = arith.constant 0 : index
      %377 = vector.load %arg10[%c2_202, %c0_203, %c0_204] : memref<4x128x128xbf16, #tpu.memory_space<vmem>>, vector<1x128x128xbf16>
      %378 = vector.shape_cast %377 : vector<1x128x128xbf16> to vector<128x128xbf16>
      %cst_205 = arith.constant dense<0.000000e+00> : vector<32x128xf32>
      %379 = tpu.matmul %366, %378, %cst_205 {dimension_numbers = #tpu.dot_dimension_numbers<[1], [0], [0], [1], [0, 0, 1, 1], [], []>} : vector<32x128xbf16>, vector<128x128xbf16>, vector<32x128xf32> -> vector<32x128xf32>
      %c2_206 = arith.constant 2 : index
      %c0_207 = arith.constant 0 : index
      %c0_208 = arith.constant 0 : index
      %380 = vector.load %arg11[%c2_206, %c0_207, %c0_208] : memref<4x1x128xf32, #tpu.memory_space<vmem>>, vector<1x1x128xf32>
      %381 = vector.shape_cast %380 : vector<1x1x128xf32> to vector<1x128xf32>
      %382 = vector.broadcast %381 : vector<1x128xf32> to vector<32x128xf32>
      %383 = arith.addf %379, %382 : vector<32x128xf32>
      %384 = arith.truncf %383 : vector<32x128xf32> to vector<32x128xbf16>
      %c0_209 = arith.constant 0 : index
      %c0_210 = arith.constant 0 : index
      %385 = vector.load %arg20[%c0_209, %c0_210] : memref<32x128xbf16, #tpu.memory_space<vmem>>, vector<32x128xbf16>
      tpu.vector_store %arg20[%c0_209, %c0_210], %384 {strides = array<i32>} : memref<32x128xbf16, #tpu.memory_space<vmem>>, vector<32x128xbf16>,
    } else {
    }
    %c0 = arith.constant 0 : index
    %c0_1 = arith.constant 0 : index
    %c0_2 = arith.constant 0 : index
    %3 = vector.load %arg5[%c0, %c0_1, %c0_2] : memref<1x8x16xi32, #tpu.memory_space<vmem>>, vector<1x8x16xi32>
    %4 = vector.shape_cast %3 : vector<1x8x16xi32> to vector<8x16xi32>
    %c0_i32_3 = arith.constant 0 : i32
    %5 = vector.broadcast %c0_i32_3 : i32 to vector<8x16xi32>
    %6 = arith.cmpi ne, %4, %5 : vector<8x16xi32>
    %c0_4 = arith.constant 0 : index
    %c0_5 = arith.constant 0 : index
    %c0_6 = arith.constant 0 : index
    %7 = vector.load %arg4[%c0_4, %c0_5, %c0_6] : memref<1x1x32xi32, #tpu.memory_space<vmem>>, vector<1x1x32xi32>
    %8 = vector.shape_cast %7 : vector<1x1x32xi32> to vector<1x32xi32>
    %c0_i32_7 = arith.constant 0 : i32
    %9 = vector.broadcast %c0_i32_7 : i32 to vector<1x32xi32>
    %10 = arith.cmpi ne, %8, %9 : vector<1x32xi32>
    %c8_i32 = arith.constant 8 : i32
    %11 = arith.muli %arg1, %c8_i32 : i32
    %12 = tpu.assume_multiple %11, 8 : i32
    %c0_8 = arith.constant 0 : index
    %13 = arith.index_cast %12 : i32 to index
    %c0_9 = arith.constant 0 : index
    %14 = vector.load %arg2[%c0_8, %13, %c0_9] : memref<1x16x128xf32, #tpu.memory_space<vmem>>, vector<1x8x128xf32>
    %15 = vector.shape_cast %14 : vector<1x8x128xf32> to vector<8x128xf32>
    %c0_10 = arith.constant 0 : index
    %c0_11 = arith.constant 0 : index
    %c0_12 = arith.constant 0 : index
    %16 = vector.load %arg6[%c0_10, %c0_11, %c0_12] : memref<3x1x128xf32, #tpu.memory_space<vmem>>, vector<1x1x128xf32>
    %17 = vector.shape_cast %16 : vector<1x1x128xf32> to vector<1x128xf32>
    %c0_13 = arith.constant 0 : index
    %c0_14 = arith.constant 0 : index
    %c0_15 = arith.constant 0 : index
    %18 = vector.load %arg7[%c0_13, %c0_14, %c0_15] : memref<3x1x128xf32, #tpu.memory_space<vmem>>, vector<1x1x128xf32>
    %19 = vector.shape_cast %18 : vector<1x1x128xf32> to vector<1x128xf32>
    %cst = arith.constant dense<0.000000e+00> : vector<8xf32>
    %20 = vector.multi_reduction <add>, %15, %cst [1] : vector<8x128xf32> to vector<8xf32>
    %21 = vector.shape_cast %20 : vector<8xf32> to vector<8x1xf32>
    %cst_16 = arith.constant 1.280000e+02 : f32
    %22 = vector.broadcast %cst_16 : f32 to vector<8x1xf32>
    %23 = arith.divf %21, %22 : vector<8x1xf32>
    %24 = vector.broadcast %23 : vector<8x1xf32> to vector<8x128xf32>
    %25 = arith.subf %15, %24 : vector<8x128xf32>
    %26 = arith.mulf %25, %25 : vector<8x128xf32>
    %cst_17 = arith.constant dense<0.000000e+00> : vector<8xf32>
    %27 = vector.multi_reduction <add>, %26, %cst_17 [1] : vector<8x128xf32> to vector<8xf32>
    %28 = vector.shape_cast %27 : vector<8xf32> to vector<8x1xf32>
    %cst_18 = arith.constant 1.270000e+02 : f32
    %29 = vector.broadcast %cst_18 : f32 to vector<8x1xf32>
    %30 = arith.divf %28, %29 : vector<8x1xf32>
    %31 = vector.broadcast %17 : vector<1x128xf32> to vector<8x128xf32>
    %32 = arith.mulf %31, %25 : vector<8x128xf32>
    %33 = math.sqrt %30 : vector<8x1xf32>
    %cst_19 = arith.constant 9.99999997E-7 : f32
    %34 = vector.broadcast %cst_19 : f32 to vector<8x1xf32>
    %35 = arith.addf %33, %34 : vector<8x1xf32>
    %36 = vector.broadcast %35 : vector<8x1xf32> to vector<8x128xf32>
    %37 = arith.divf %32, %36 : vector<8x128xf32>
    %38 = vector.broadcast %19 : vector<1x128xf32> to vector<8x128xf32>
    %39 = arith.addf %37, %38 : vector<8x128xf32>
    %40 = arith.truncf %39 : vector<8x128xf32> to vector<8x128xbf16>
    %c0_20 = arith.constant 0 : index
    %c0_21 = arith.constant 0 : index
    %c0_22 = arith.constant 0 : index
    %41 = vector.load %arg8[%c0_20, %c0_21, %c0_22] : memref<4x128x128xbf16, #tpu.memory_space<vmem>>, vector<1x128x128xbf16>
    %42 = vector.shape_cast %41 : vector<1x128x128xbf16> to vector<128x128xbf16>
    %cst_23 = arith.constant dense<0.000000e+00> : vector<8x128xf32>
    %43 = tpu.matmul %40, %42, %cst_23 {dimension_numbers = #tpu.dot_dimension_numbers<[1], [0], [0], [1], [0, 0, 1, 1], [], []>} : vector<8x128xbf16>, vector<128x128xbf16>, vector<8x128xf32> -> vector<8x128xf32>
    %c0_24 = arith.constant 0 : index
    %c0_25 = arith.constant 0 : index
    %c0_26 = arith.constant 0 : index
    %44 = vector.load %arg9[%c0_24, %c0_25, %c0_26] : memref<4x1x128xf32, #tpu.memory_space<vmem>>, vector<1x1x128xf32>
    %45 = vector.shape_cast %44 : vector<1x1x128xf32> to vector<1x128xf32>
    %46 = vector.broadcast %45 : vector<1x128xf32> to vector<8x128xf32>
    %47 = arith.addf %43, %46 : vector<8x128xf32>
    %48 = arith.truncf %47 : vector<8x128xf32> to vector<8x128xbf16>
    %49 = vector.extract_strided_slice %48 {offsets = [0, 0], sizes = [8, 32], strides = [1, 1]} : vector<8x128xbf16> to vector<8x32xbf16>
    %c0_27 = arith.constant 0 : index
    %c0_28 = arith.constant 0 : index
    %50 = vector.load %arg17[%c0_27, %c0_28] : memref<128x16xbf16, #tpu.memory_space<vmem>>, vector<32x16xbf16>
    %cst_29 = arith.constant dense<0.000000e+00> : vector<8x16xf32>
    %51 = tpu.matmul %49, %50, %cst_29 {dimension_numbers = #tpu.dot_dimension_numbers<[1], [0], [0], [1], [0, 0, 1, 1], [], []>} : vector<8x32xbf16>, vector<32x16xbf16>, vector<8x16xf32> -> vector<8x16xf32>
    %cst_30 = arith.constant 0.176776692 : f32
    %52 = vector.broadcast %cst_30 : f32 to vector<8x16xf32>
    %53 = arith.mulf %51, %52 : vector<8x16xf32>
    %cst_31 = arith.constant -1.000000e+09 : f32
    %54 = vector.broadcast %cst_31 : f32 to vector<8x16xf32>
    %55 = arith.select %6, %53, %54 : vector<8x16xi1>, vector<8x16xf32>
    %cst_32 = arith.constant dense<0xFF800000> : vector<8xf32>
    %56 = vector.multi_reduction <maximumf>, %55, %cst_32 [1] : vector<8x16xf32> to vector<8xf32>
    %57 = vector.shape_cast %56 : vector<8xf32> to vector<8x1xf32>
    %58 = vector.broadcast %57 : vector<8x1xf32> to vector<8x16xf32>
    %59 = arith.subf %55, %58 : vector<8x16xf32>
    %60 = math.exp %59 : vector<8x16xf32>
    %cst_33 = arith.constant dense<0.000000e+00> : vector<8xf32>
    %61 = vector.multi_reduction <add>, %60, %cst_33 [1] : vector<8x16xf32> to vector<8xf32>
    %62 = vector.shape_cast %61 : vector<8xf32> to vector<8x1xf32>
    %63 = tpu.reciprocal %62 {approx = true} : vector<8x1xf32> -> vector<8x1xf32>
    %64 = vector.broadcast %63 : vector<8x1xf32> to vector<8x16xf32>
    %65 = arith.mulf %60, %64 : vector<8x16xf32>
    %66 = arith.truncf %65 : vector<8x16xf32> to vector<8x16xbf16>
    %c0_34 = arith.constant 0 : index
    %c0_35 = arith.constant 0 : index
    %67 = vector.load %arg18[%c0_34, %c0_35] : memref<16x128xbf16, #tpu.memory_space<vmem>>, vector<16x32xbf16>
    %cst_36 = arith.constant dense<0.000000e+00> : vector<8x32xf32>
    %68 = tpu.matmul %66, %67, %cst_36 {dimension_numbers = #tpu.dot_dimension_numbers<[1], [0], [0], [1], [0, 0, 1, 1], [], []>} : vector<8x16xbf16>, vector<16x32xbf16>, vector<8x32xf32> -> vector<8x32xf32>
    %69 = arith.truncf %68 : vector<8x32xf32> to vector<8x32xbf16>
    %70 = vector.extract_strided_slice %48 {offsets = [0, 32], sizes = [8, 32], strides = [1, 1]} : vector<8x128xbf16> to vector<8x32xbf16>
    %c32 = arith.constant 32 : index
    %c0_37 = arith.constant 0 : index
    %71 = vector.load %arg17[%c32, %c0_37] : memref<128x16xbf16, #tpu.memory_space<vmem>>, vector<32x16xbf16>
    %cst_38 = arith.constant dense<0.000000e+00> : vector<8x16xf32>
    %72 = tpu.matmul %70, %71, %cst_38 {dimension_numbers = #tpu.dot_dimension_numbers<[1], [0], [0], [1], [0, 0, 1, 1], [], []>} : vector<8x32xbf16>, vector<32x16xbf16>, vector<8x16xf32> -> vector<8x16xf32>
    %cst_39 = arith.constant 0.176776692 : f32
    %73 = vector.broadcast %cst_39 : f32 to vector<8x16xf32>
    %74 = arith.mulf %72, %73 : vector<8x16xf32>
    %cst_40 = arith.constant -1.000000e+09 : f32
    %75 = vector.broadcast %cst_40 : f32 to vector<8x16xf32>
    %76 = arith.select %6, %74, %75 : vector<8x16xi1>, vector<8x16xf32>
    %cst_41 = arith.constant dense<0xFF800000> : vector<8xf32>
    %77 = vector.multi_reduction <maximumf>, %76, %cst_41 [1] : vector<8x16xf32> to vector<8xf32>
    %78 = vector.shape_cast %77 : vector<8xf32> to vector<8x1xf32>
    %79 = vector.broadcast %78 : vector<8x1xf32> to vector<8x16xf32>
    %80 = arith.subf %76, %79 : vector<8x16xf32>
    %81 = math.exp %80 : vector<8x16xf32>
    %cst_42 = arith.constant dense<0.000000e+00> : vector<8xf32>
    %82 = vector.multi_reduction <add>, %81, %cst_42 [1] : vector<8x16xf32> to vector<8xf32>
    %83 = vector.shape_cast %82 : vector<8xf32> to vector<8x1xf32>
    %84 = tpu.reciprocal %83 {approx = true} : vector<8x1xf32> -> vector<8x1xf32>
    %85 = vector.broadcast %84 : vector<8x1xf32> to vector<8x16xf32>
    %86 = arith.mulf %81, %85 : vector<8x16xf32>
    %87 = arith.truncf %86 : vector<8x16xf32> to vector<8x16xbf16>
    %c0_43 = arith.constant 0 : index
    %c32_44 = arith.constant 32 : index
    %88 = vector.load %arg18[%c0_43, %c32_44] : memref<16x128xbf16, #tpu.memory_space<vmem>>, vector<16x32xbf16>
    %cst_45 = arith.constant dense<0.000000e+00> : vector<8x32xf32>
    %89 = tpu.matmul %87, %88, %cst_45 {dimension_numbers = #tpu.dot_dimension_numbers<[1], [0], [0], [1], [0, 0, 1, 1], [], []>} : vector<8x16xbf16>, vector<16x32xbf16>, vector<8x32xf32> -> vector<8x32xf32>
    %90 = arith.truncf %89 : vector<8x32xf32> to vector<8x32xbf16>
    %91 = vector.extract_strided_slice %48 {offsets = [0, 64], sizes = [8, 32], strides = [1, 1]} : vector<8x128xbf16> to vector<8x32xbf16>
    %c64 = arith.constant 64 : index
    %c0_46 = arith.constant 0 : index
    %92 = vector.load %arg17[%c64, %c0_46] : memref<128x16xbf16, #tpu.memory_space<vmem>>, vector<32x16xbf16>
    %cst_47 = arith.constant dense<0.000000e+00> : vector<8x16xf32>
    %93 = tpu.matmul %91, %92, %cst_47 {dimension_numbers = #tpu.dot_dimension_numbers<[1], [0], [0], [1], [0, 0, 1, 1], [], []>} : vector<8x32xbf16>, vector<32x16xbf16>, vector<8x16xf32> -> vector<8x16xf32>
    %cst_48 = arith.constant 0.176776692 : f32
    %94 = vector.broadcast %cst_48 : f32 to vector<8x16xf32>
    %95 = arith.mulf %93, %94 : vector<8x16xf32>
    %cst_49 = arith.constant -1.000000e+09 : f32
    %96 = vector.broadcast %cst_49 : f32 to vector<8x16xf32>
    %97 = arith.select %6, %95, %96 : vector<8x16xi1>, vector<8x16xf32>
    %cst_50 = arith.constant dense<0xFF800000> : vector<8xf32>
    %98 = vector.multi_reduction <maximumf>, %97, %cst_50 [1] : vector<8x16xf32> to vector<8xf32>
    %99 = vector.shape_cast %98 : vector<8xf32> to vector<8x1xf32>
    %100 = vector.broadcast %99 : vector<8x1xf32> to vector<8x16xf32>
    %101 = arith.subf %97, %100 : vector<8x16xf32>
    %102 = math.exp %101 : vector<8x16xf32>
    %cst_51 = arith.constant dense<0.000000e+00> : vector<8xf32>
    %103 = vector.multi_reduction <add>, %102, %cst_51 [1] : vector<8x16xf32> to vector<8xf32>
    %104 = vector.shape_cast %103 : vector<8xf32> to vector<8x1xf32>
    %105 = tpu.reciprocal %104 {approx = true} : vector<8x1xf32> -> vector<8x1xf32>
    %106 = vector.broadcast %105 : vector<8x1xf32> to vector<8x16xf32>
    %107 = arith.mulf %102, %106 : vector<8x16xf32>
    %108 = arith.truncf %107 : vector<8x16xf32> to vector<8x16xbf16>
    %c0_52 = arith.constant 0 : index
    %c64_53 = arith.constant 64 : index
    %109 = vector.load %arg18[%c0_52, %c64_53] : memref<16x128xbf16, #tpu.memory_space<vmem>>, vector<16x32xbf16>
    %cst_54 = arith.constant dense<0.000000e+00> : vector<8x32xf32>
    %110 = tpu.matmul %108, %109, %cst_54 {dimension_numbers = #tpu.dot_dimension_numbers<[1], [0], [0], [1], [0, 0, 1, 1], [], []>} : vector<8x16xbf16>, vector<16x32xbf16>, vector<8x32xf32> -> vector<8x32xf32>
    %111 = arith.truncf %110 : vector<8x32xf32> to vector<8x32xbf16>
    %112 = vector.extract_strided_slice %48 {offsets = [0, 96], sizes = [8, 32], strides = [1, 1]} : vector<8x128xbf16> to vector<8x32xbf16>
    %c96 = arith.constant 96 : index
    %c0_55 = arith.constant 0 : index
    %113 = vector.load %arg17[%c96, %c0_55] : memref<128x16xbf16, #tpu.memory_space<vmem>>, vector<32x16xbf16>
    %cst_56 = arith.constant dense<0.000000e+00> : vector<8x16xf32>
    %114 = tpu.matmul %112, %113, %cst_56 {dimension_numbers = #tpu.dot_dimension_numbers<[1], [0], [0], [1], [0, 0, 1, 1], [], []>} : vector<8x32xbf16>, vector<32x16xbf16>, vector<8x16xf32> -> vector<8x16xf32>
    %cst_57 = arith.constant 0.176776692 : f32
    %115 = vector.broadcast %cst_57 : f32 to vector<8x16xf32>
    %116 = arith.mulf %114, %115 : vector<8x16xf32>
    %cst_58 = arith.constant -1.000000e+09 : f32
    %117 = vector.broadcast %cst_58 : f32 to vector<8x16xf32>
    %118 = arith.select %6, %116, %117 : vector<8x16xi1>, vector<8x16xf32>
    %cst_59 = arith.constant dense<0xFF800000> : vector<8xf32>
    %119 = vector.multi_reduction <maximumf>, %118, %cst_59 [1] : vector<8x16xf32> to vector<8xf32>
    %120 = vector.shape_cast %119 : vector<8xf32> to vector<8x1xf32>
    %121 = vector.broadcast %120 : vector<8x1xf32> to vector<8x16xf32>
    %122 = arith.subf %118, %121 : vector<8x16xf32>
    %123 = math.exp %122 : vector<8x16xf32>
    %cst_60 = arith.constant dense<0.000000e+00> : vector<8xf32>
    %124 = vector.multi_reduction <add>, %123, %cst_60 [1] : vector<8x16xf32> to vector<8xf32>
    %125 = vector.shape_cast %124 : vector<8xf32> to vector<8x1xf32>
    %126 = tpu.reciprocal %125 {approx = true} : vector<8x1xf32> -> vector<8x1xf32>
    %127 = vector.broadcast %126 : vector<8x1xf32> to vector<8x16xf32>
    %128 = arith.mulf %123, %127 : vector<8x16xf32>
    %129 = arith.truncf %128 : vector<8x16xf32> to vector<8x16xbf16>
    %c0_61 = arith.constant 0 : index
    %c96_62 = arith.constant 96 : index
    %130 = vector.load %arg18[%c0_61, %c96_62] : memref<16x128xbf16, #tpu.memory_space<vmem>>, vector<16x32xbf16>
    %cst_63 = arith.constant dense<0.000000e+00> : vector<8x32xf32>
    %131 = tpu.matmul %129, %130, %cst_63 {dimension_numbers = #tpu.dot_dimension_numbers<[1], [0], [0], [1], [0, 0, 1, 1], [], []>} : vector<8x16xbf16>, vector<16x32xbf16>, vector<8x32xf32> -> vector<8x32xf32>
    %132 = arith.truncf %131 : vector<8x32xf32> to vector<8x32xbf16>
    %133 = tpu.concatenate %69, %90, %111, %132 in 1 : vector<8x32xbf16>, vector<8x32xbf16>, vector<8x32xbf16>, vector<8x32xbf16> -> vector<8x128xbf16>
    %c3 = arith.constant 3 : index
    %c0_64 = arith.constant 0 : index
    %c0_65 = arith.constant 0 : index
    %134 = vector.load %arg8[%c3, %c0_64, %c0_65] : memref<4x128x128xbf16, #tpu.memory_space<vmem>>, vector<1x128x128xbf16>
    %135 = vector.shape_cast %134 : vector<1x128x128xbf16> to vector<128x128xbf16>
    %cst_66 = arith.constant dense<0.000000e+00> : vector<8x128xf32>
    %136 = tpu.matmul %133, %135, %cst_66 {dimension_numbers = #tpu.dot_dimension_numbers<[1], [0], [0], [1], [0, 0, 1, 1], [], []>} : vector<8x128xbf16>, vector<128x128xbf16>, vector<8x128xf32> -> vector<8x128xf32>
    %c3_67 = arith.constant 3 : index
    %c0_68 = arith.constant 0 : index
    %c0_69 = arith.constant 0 : index
    %137 = vector.load %arg9[%c3_67, %c0_68, %c0_69] : memref<4x1x128xf32, #tpu.memory_space<vmem>>, vector<1x1x128xf32>
    %138 = vector.shape_cast %137 : vector<1x1x128xf32> to vector<1x128xf32>
    %139 = vector.broadcast %138 : vector<1x128xf32> to vector<8x128xf32>
    %140 = arith.addf %136, %139 : vector<8x128xf32>
    %141 = arith.addf %15, %140 : vector<8x128xf32>
    %c1 = arith.constant 1 : index
    %c0_70 = arith.constant 0 : index
    %c0_71 = arith.constant 0 : index
    %142 = vector.load %arg6[%c1, %c0_70, %c0_71] : memref<3x1x128xf32, #tpu.memory_space<vmem>>, vector<1x1x128xf32>
    %143 = vector.shape_cast %142 : vector<1x1x128xf32> to vector<1x128xf32>
    %c1_72 = arith.constant 1 : index
    %c0_73 = arith.constant 0 : index
    %c0_74 = arith.constant 0 : index
    %144 = vector.load %arg7[%c1_72, %c0_73, %c0_74] : memref<3x1x128xf32, #tpu.memory_space<vmem>>, vector<1x1x128xf32>
    %145 = vector.shape_cast %144 : vector<1x1x128xf32> to vector<1x128xf32>
    %cst_75 = arith.constant dense<0.000000e+00> : vector<8xf32>
    %146 = vector.multi_reduction <add>, %141, %cst_75 [1] : vector<8x128xf32> to vector<8xf32>
    %147 = vector.shape_cast %146 : vector<8xf32> to vector<8x1xf32>
    %cst_76 = arith.constant 1.280000e+02 : f32
    %148 = vector.broadcast %cst_76 : f32 to vector<8x1xf32>
    %149 = arith.divf %147, %148 : vector<8x1xf32>
    %150 = vector.broadcast %149 : vector<8x1xf32> to vector<8x128xf32>
    %151 = arith.subf %141, %150 : vector<8x128xf32>
    %152 = arith.mulf %151, %151 : vector<8x128xf32>
    %cst_77 = arith.constant dense<0.000000e+00> : vector<8xf32>
    %153 = vector.multi_reduction <add>, %152, %cst_77 [1] : vector<8x128xf32> to vector<8xf32>
    %154 = vector.shape_cast %153 : vector<8xf32> to vector<8x1xf32>
    %cst_78 = arith.constant 1.270000e+02 : f32
    %155 = vector.broadcast %cst_78 : f32 to vector<8x1xf32>
    %156 = arith.divf %154, %155 : vector<8x1xf32>
    %157 = vector.broadcast %143 : vector<1x128xf32> to vector<8x128xf32>
    %158 = arith.mulf %157, %151 : vector<8x128xf32>
    %159 = math.sqrt %156 : vector<8x1xf32>
    %cst_79 = arith.constant 9.99999997E-7 : f32
    %160 = vector.broadcast %cst_79 : f32 to vector<8x1xf32>
    %161 = arith.addf %159, %160 : vector<8x1xf32>
    %162 = vector.broadcast %161 : vector<8x1xf32> to vector<8x128xf32>
    %163 = arith.divf %158, %162 : vector<8x128xf32>
    %164 = vector.broadcast %145 : vector<1x128xf32> to vector<8x128xf32>
    %165 = arith.addf %163, %164 : vector<8x128xf32>
    %166 = arith.truncf %165 : vector<8x128xf32> to vector<8x128xbf16>
    %c0_80 = arith.constant 0 : index
    %c0_81 = arith.constant 0 : index
    %c0_82 = arith.constant 0 : index
    %167 = vector.load %arg10[%c0_80, %c0_81, %c0_82] : memref<4x128x128xbf16, #tpu.memory_space<vmem>>, vector<1x128x128xbf16>
    %168 = vector.shape_cast %167 : vector<1x128x128xbf16> to vector<128x128xbf16>
    %cst_83 = arith.constant dense<0.000000e+00> : vector<8x128xf32>
    %169 = tpu.matmul %166, %168, %cst_83 {dimension_numbers = #tpu.dot_dimension_numbers<[1], [0], [0], [1], [0, 0, 1, 1], [], []>} : vector<8x128xbf16>, vector<128x128xbf16>, vector<8x128xf32> -> vector<8x128xf32>
    %c0_84 = arith.constant 0 : index
    %c0_85 = arith.constant 0 : index
    %c0_86 = arith.constant 0 : index
    %170 = vector.load %arg11[%c0_84, %c0_85, %c0_86] : memref<4x1x128xf32, #tpu.memory_space<vmem>>, vector<1x1x128xf32>
    %171 = vector.shape_cast %170 : vector<1x1x128xf32> to vector<1x128xf32>
    %172 = vector.broadcast %171 : vector<1x128xf32> to vector<8x128xf32>
    %173 = arith.addf %169, %172 : vector<8x128xf32>
    %174 = arith.truncf %173 : vector<8x128xf32> to vector<8x128xbf16>
    %175 = vector.extract_strided_slice %174 {offsets = [0, 0], sizes = [8, 32], strides = [1, 1]} : vector<8x128xbf16> to vector<8x32xbf16>
    %c0_87 = arith.constant 0 : index
    %c0_88 = arith.constant 0 : index
    %176 = vector.load %arg19[%c0_87, %c0_88] : memref<128x32xbf16, #tpu.memory_space<vmem>>, vector<32x32xbf16>
    %cst_89 = arith.constant dense<0.000000e+00> : vector<8x32xf32>
    %177 = tpu.matmul %175, %176, %cst_89 {dimension_numbers = #tpu.dot_dimension_numbers<[1], [0], [0], [1], [0, 0, 1, 1], [], []>} : vector<8x32xbf16>, vector<32x32xbf16>, vector<8x32xf32> -> vector<8x32xf32>
    %cst_90 = arith.constant 0.176776692 : f32
    %178 = vector.broadcast %cst_90 : f32 to vector<8x32xf32>
    %179 = arith.mulf %177, %178 : vector<8x32xf32>
    %cst_91 = arith.constant -1.000000e+09 : f32
    %180 = vector.shape_cast %10 : vector<1x32xi1> to vector<1x32xi1>
    %181 = vector.broadcast %180 : vector<1x32xi1> to vector<8x32xi1>
    %182 = vector.broadcast %cst_91 : f32 to vector<8x32xf32>
    %183 = arith.select %181, %179, %182 : vector<8x32xi1>, vector<8x32xf32>
    %cst_92 = arith.constant dense<0xFF800000> : vector<8xf32>
    %184 = vector.multi_reduction <maximumf>, %183, %cst_92 [1] : vector<8x32xf32> to vector<8xf32>
    %185 = vector.shape_cast %184 : vector<8xf32> to vector<8x1xf32>
    %186 = vector.broadcast %185 : vector<8x1xf32> to vector<8x32xf32>
    %187 = arith.subf %183, %186 : vector<8x32xf32>
    %188 = math.exp %187 : vector<8x32xf32>
    %cst_93 = arith.constant dense<0.000000e+00> : vector<8xf32>
    %189 = vector.multi_reduction <add>, %188, %cst_93 [1] : vector<8x32xf32> to vector<8xf32>
    %190 = vector.shape_cast %189 : vector<8xf32> to vector<8x1xf32>
    %191 = tpu.reciprocal %190 {approx = true} : vector<8x1xf32> -> vector<8x1xf32>
    %192 = vector.broadcast %191 : vector<8x1xf32> to vector<8x32xf32>
    %193 = arith.mulf %188, %192 : vector<8x32xf32>
    %194 = arith.truncf %193 : vector<8x32xf32> to vector<8x32xbf16>
    %c0_94 = arith.constant 0 : index
    %c0_95 = arith.constant 0 : index
    %195 = vector.load %arg20[%c0_94, %c0_95] : memref<32x128xbf16, #tpu.memory_space<vmem>>, vector<32x32xbf16>
    %cst_96 = arith.constant dense<0.000000e+00> : vector<8x32xf32>
    %196 = tpu.matmul %194, %195, %cst_96 {dimension_numbers = #tpu.dot_dimension_numbers<[1], [0], [0], [1], [0, 0, 1, 1], [], []>} : vector<8x32xbf16>, vector<32x32xbf16>, vector<8x32xf32> -> vector<8x32xf32>
    %197 = arith.truncf %196 : vector<8x32xf32> to vector<8x32xbf16>
    %198 = vector.extract_strided_slice %174 {offsets = [0, 32], sizes = [8, 32], strides = [1, 1]} : vector<8x128xbf16> to vector<8x32xbf16>
    %c32_97 = arith.constant 32 : index
    %c0_98 = arith.constant 0 : index
    %199 = vector.load %arg19[%c32_97, %c0_98] : memref<128x32xbf16, #tpu.memory_space<vmem>>, vector<32x32xbf16>
    %cst_99 = arith.constant dense<0.000000e+00> : vector<8x32xf32>
    %200 = tpu.matmul %198, %199, %cst_99 {dimension_numbers = #tpu.dot_dimension_numbers<[1], [0], [0], [1], [0, 0, 1, 1], [], []>} : vector<8x32xbf16>, vector<32x32xbf16>, vector<8x32xf32> -> vector<8x32xf32>
    %cst_100 = arith.constant 0.176776692 : f32
    %201 = vector.broadcast %cst_100 : f32 to vector<8x32xf32>
    %202 = arith.mulf %200, %201 : vector<8x32xf32>
    %cst_101 = arith.constant -1.000000e+09 : f32
    %203 = vector.shape_cast %10 : vector<1x32xi1> to vector<1x32xi1>
    %204 = vector.broadcast %203 : vector<1x32xi1> to vector<8x32xi1>
    %205 = vector.broadcast %cst_101 : f32 to vector<8x32xf32>
    %206 = arith.select %204, %202, %205 : vector<8x32xi1>, vector<8x32xf32>
    %cst_102 = arith.constant dense<0xFF800000> : vector<8xf32>
    %207 = vector.multi_reduction <maximumf>, %206, %cst_102 [1] : vector<8x32xf32> to vector<8xf32>
    %208 = vector.shape_cast %207 : vector<8xf32> to vector<8x1xf32>
    %209 = vector.broadcast %208 : vector<8x1xf32> to vector<8x32xf32>
    %210 = arith.subf %206, %209 : vector<8x32xf32>
    %211 = math.exp %210 : vector<8x32xf32>
    %cst_103 = arith.constant dense<0.000000e+00> : vector<8xf32>
    %212 = vector.multi_reduction <add>, %211, %cst_103 [1] : vector<8x32xf32> to vector<8xf32>
    %213 = vector.shape_cast %212 : vector<8xf32> to vector<8x1xf32>
    %214 = tpu.reciprocal %213 {approx = true} : vector<8x1xf32> -> vector<8x1xf32>
    %215 = vector.broadcast %214 : vector<8x1xf32> to vector<8x32xf32>
    %216 = arith.mulf %211, %215 : vector<8x32xf32>
    %217 = arith.truncf %216 : vector<8x32xf32> to vector<8x32xbf16>
    %c0_104 = arith.constant 0 : index
    %c32_105 = arith.constant 32 : index
    %218 = vector.load %arg20[%c0_104, %c32_105] : memref<32x128xbf16, #tpu.memory_space<vmem>>, vector<32x32xbf16>
    %cst_106 = arith.constant dense<0.000000e+00> : vector<8x32xf32>
    %219 = tpu.matmul %217, %218, %cst_106 {dimension_numbers = #tpu.dot_dimension_numbers<[1], [0], [0], [1], [0, 0, 1, 1], [], []>} : vector<8x32xbf16>, vector<32x32xbf16>, vector<8x32xf32> -> vector<8x32xf32>
    %220 = arith.truncf %219 : vector<8x32xf32> to vector<8x32xbf16>
    %221 = vector.extract_strided_slice %174 {offsets = [0, 64], sizes = [8, 32], strides = [1, 1]} : vector<8x128xbf16> to vector<8x32xbf16>
    %c64_107 = arith.constant 64 : index
    %c0_108 = arith.constant 0 : index
    %222 = vector.load %arg19[%c64_107, %c0_108] : memref<128x32xbf16, #tpu.memory_space<vmem>>, vector<32x32xbf16>
    %cst_109 = arith.constant dense<0.000000e+00> : vector<8x32xf32>
    %223 = tpu.matmul %221, %222, %cst_109 {dimension_numbers = #tpu.dot_dimension_numbers<[1], [0], [0], [1], [0, 0, 1, 1], [], []>} : vector<8x32xbf16>, vector<32x32xbf16>, vector<8x32xf32> -> vector<8x32xf32>
    %cst_110 = arith.constant 0.176776692 : f32
    %224 = vector.broadcast %cst_110 : f32 to vector<8x32xf32>
    %225 = arith.mulf %223, %224 : vector<8x32xf32>
    %cst_111 = arith.constant -1.000000e+09 : f32
    %226 = vector.shape_cast %10 : vector<1x32xi1> to vector<1x32xi1>
    %227 = vector.broadcast %226 : vector<1x32xi1> to vector<8x32xi1>
    %228 = vector.broadcast %cst_111 : f32 to vector<8x32xf32>
    %229 = arith.select %227, %225, %228 : vector<8x32xi1>, vector<8x32xf32>
    %cst_112 = arith.constant dense<0xFF800000> : vector<8xf32>
    %230 = vector.multi_reduction <maximumf>, %229, %cst_112 [1] : vector<8x32xf32> to vector<8xf32>
    %231 = vector.shape_cast %230 : vector<8xf32> to vector<8x1xf32>
    %232 = vector.broadcast %231 : vector<8x1xf32> to vector<8x32xf32>
    %233 = arith.subf %229, %232 : vector<8x32xf32>
    %234 = math.exp %233 : vector<8x32xf32>
    %cst_113 = arith.constant dense<0.000000e+00> : vector<8xf32>
    %235 = vector.multi_reduction <add>, %234, %cst_113 [1] : vector<8x32xf32> to vector<8xf32>
    %236 = vector.shape_cast %235 : vector<8xf32> to vector<8x1xf32>
    %237 = tpu.reciprocal %236 {approx = true} : vector<8x1xf32> -> vector<8x1xf32>
    %238 = vector.broadcast %237 : vector<8x1xf32> to vector<8x32xf32>
    %239 = arith.mulf %234, %238 : vector<8x32xf32>
    %240 = arith.truncf %239 : vector<8x32xf32> to vector<8x32xbf16>
    %c0_114 = arith.constant 0 : index
    %c64_115 = arith.constant 64 : index
    %241 = vector.load %arg20[%c0_114, %c64_115] : memref<32x128xbf16, #tpu.memory_space<vmem>>, vector<32x32xbf16>
    %cst_116 = arith.constant dense<0.000000e+00> : vector<8x32xf32>
    %242 = tpu.matmul %240, %241, %cst_116 {dimension_numbers = #tpu.dot_dimension_numbers<[1], [0], [0], [1], [0, 0, 1, 1], [], []>} : vector<8x32xbf16>, vector<32x32xbf16>, vector<8x32xf32> -> vector<8x32xf32>
    %243 = arith.truncf %242 : vector<8x32xf32> to vector<8x32xbf16>
    %244 = vector.extract_strided_slice %174 {offsets = [0, 96], sizes = [8, 32], strides = [1, 1]} : vector<8x128xbf16> to vector<8x32xbf16>
    %c96_117 = arith.constant 96 : index
    %c0_118 = arith.constant 0 : index
    %245 = vector.load %arg19[%c96_117, %c0_118] : memref<128x32xbf16, #tpu.memory_space<vmem>>, vector<32x32xbf16>
    %cst_119 = arith.constant dense<0.000000e+00> : vector<8x32xf32>
    %246 = tpu.matmul %244, %245, %cst_119 {dimension_numbers = #tpu.dot_dimension_numbers<[1], [0], [0], [1], [0, 0, 1, 1], [], []>} : vector<8x32xbf16>, vector<32x32xbf16>, vector<8x32xf32> -> vector<8x32xf32>
    %cst_120 = arith.constant 0.176776692 : f32
    %247 = vector.broadcast %cst_120 : f32 to vector<8x32xf32>
    %248 = arith.mulf %246, %247 : vector<8x32xf32>
    %cst_121 = arith.constant -1.000000e+09 : f32
    %249 = vector.shape_cast %10 : vector<1x32xi1> to vector<1x32xi1>
    %250 = vector.broadcast %249 : vector<1x32xi1> to vector<8x32xi1>
    %251 = vector.broadcast %cst_121 : f32 to vector<8x32xf32>
    %252 = arith.select %250, %248, %251 : vector<8x32xi1>, vector<8x32xf32>
    %cst_122 = arith.constant dense<0xFF800000> : vector<8xf32>
    %253 = vector.multi_reduction <maximumf>, %252, %cst_122 [1] : vector<8x32xf32> to vector<8xf32>
    %254 = vector.shape_cast %253 : vector<8xf32> to vector<8x1xf32>
    %255 = vector.broadcast %254 : vector<8x1xf32> to vector<8x32xf32>
    %256 = arith.subf %252, %255 : vector<8x32xf32>
    %257 = math.exp %256 : vector<8x32xf32>
    %cst_123 = arith.constant dense<0.000000e+00> : vector<8xf32>
    %258 = vector.multi_reduction <add>, %257, %cst_123 [1] : vector<8x32xf32> to vector<8xf32>
    %259 = vector.shape_cast %258 : vector<8xf32> to vector<8x1xf32>
    %260 = tpu.reciprocal %259 {approx = true} : vector<8x1xf32> -> vector<8x1xf32>
    %261 = vector.broadcast %260 : vector<8x1xf32> to vector<8x32xf32>
    %262 = arith.mulf %257, %261 : vector<8x32xf32>
    %263 = arith.truncf %262 : vector<8x32xf32> to vector<8x32xbf16>
    %c0_124 = arith.constant 0 : index
    %c96_125 = arith.constant 96 : index
    %264 = vector.load %arg20[%c0_124, %c96_125] : memref<32x128xbf16, #tpu.memory_space<vmem>>, vector<32x32xbf16>
    %cst_126 = arith.constant dense<0.000000e+00> : vector<8x32xf32>
    %265 = tpu.matmul %263, %264, %cst_126 {dimension_numbers = #tpu.dot_dimension_numbers<[1], [0], [0], [1], [0, 0, 1, 1], [], []>} : vector<8x32xbf16>, vector<32x32xbf16>, vector<8x32xf32> -> vector<8x32xf32>
    %266 = arith.truncf %265 : vector<8x32xf32> to vector<8x32xbf16>
    %267 = tpu.concatenate %197, %220, %243, %266 in 1 : vector<8x32xbf16>, vector<8x32xbf16>, vector<8x32xbf16>, vector<8x32xbf16> -> vector<8x128xbf16>
    %c3_127 = arith.constant 3 : index
    %c0_128 = arith.constant 0 : index
    %c0_129 = arith.constant 0 : index
    %268 = vector.load %arg10[%c3_127, %c0_128, %c0_129] : memref<4x128x128xbf16, #tpu.memory_space<vmem>>, vector<1x128x128xbf16>
    %269 = vector.shape_cast %268 : vector<1x128x128xbf16> to vector<128x128xbf16>
    %cst_130 = arith.constant dense<0.000000e+00> : vector<8x128xf32>
    %270 = tpu.matmul %267, %269, %cst_130 {dimension_numbers = #tpu.dot_dimension_numbers<[1], [0], [0], [1], [0, 0, 1, 1], [], []>} : vector<8x128xbf16>, vector<128x128xbf16>, vector<8x128xf32> -> vector<8x128xf32>
    %c3_131 = arith.constant 3 : index
    %c0_132 = arith.constant 0 : index
    %c0_133 = arith.constant 0 : index
    %271 = vector.load %arg11[%c3_131, %c0_132, %c0_133] : memref<4x1x128xf32, #tpu.memory_space<vmem>>, vector<1x1x128xf32>
    %272 = vector.shape_cast %271 : vector<1x1x128xf32> to vector<1x128xf32>
    %273 = vector.broadcast %272 : vector<1x128xf32> to vector<8x128xf32>
    %274 = arith.addf %270, %273 : vector<8x128xf32>
    %275 = arith.addf %141, %274 : vector<8x128xf32>
    %c2 = arith.constant 2 : index
    %c0_134 = arith.constant 0 : index
    %c0_135 = arith.constant 0 : index
    %276 = vector.load %arg6[%c2, %c0_134, %c0_135] : memref<3x1x128xf32, #tpu.memory_space<vmem>>, vector<1x1x128xf32>
    %277 = vector.shape_cast %276 : vector<1x1x128xf32> to vector<1x128xf32>
    %c2_136 = arith.constant 2 : index
    %c0_137 = arith.constant 0 : index
    %c0_138 = arith.constant 0 : index
    %278 = vector.load %arg7[%c2_136, %c0_137, %c0_138] : memref<3x1x128xf32, #tpu.memory_space<vmem>>, vector<1x1x128xf32>
    %279 = vector.shape_cast %278 : vector<1x1x128xf32> to vector<1x128xf32>
    %cst_139 = arith.constant dense<0.000000e+00> : vector<8xf32>
    %280 = vector.multi_reduction <add>, %275, %cst_139 [1] : vector<8x128xf32> to vector<8xf32>
    %281 = vector.shape_cast %280 : vector<8xf32> to vector<8x1xf32>
    %cst_140 = arith.constant 1.280000e+02 : f32
    %282 = vector.broadcast %cst_140 : f32 to vector<8x1xf32>
    %283 = arith.divf %281, %282 : vector<8x1xf32>
    %284 = vector.broadcast %283 : vector<8x1xf32> to vector<8x128xf32>
    %285 = arith.subf %275, %284 : vector<8x128xf32>
    %286 = arith.mulf %285, %285 : vector<8x128xf32>
    %cst_141 = arith.constant dense<0.000000e+00> : vector<8xf32>
    %287 = vector.multi_reduction <add>, %286, %cst_141 [1] : vector<8x128xf32> to vector<8xf32>
    %288 = vector.shape_cast %287 : vector<8xf32> to vector<8x1xf32>
    %cst_142 = arith.constant 1.270000e+02 : f32
    %289 = vector.broadcast %cst_142 : f32 to vector<8x1xf32>
    %290 = arith.divf %288, %289 : vector<8x1xf32>
    %291 = vector.broadcast %277 : vector<1x128xf32> to vector<8x128xf32>
    %292 = arith.mulf %291, %285 : vector<8x128xf32>
    %293 = math.sqrt %290 : vector<8x1xf32>
    %cst_143 = arith.constant 9.99999997E-7 : f32
    %294 = vector.broadcast %cst_143 : f32 to vector<8x1xf32>
    %295 = arith.addf %293, %294 : vector<8x1xf32>
    %296 = vector.broadcast %295 : vector<8x1xf32> to vector<8x128xf32>
    %297 = arith.divf %292, %296 : vector<8x128xf32>
    %298 = vector.broadcast %279 : vector<1x128xf32> to vector<8x128xf32>
    %299 = arith.addf %297, %298 : vector<8x128xf32>
    %300 = arith.truncf %299 : vector<8x128xf32> to vector<8x128xbf16>
    %c0_144 = arith.constant 0 : index
    %c0_145 = arith.constant 0 : index
    %301 = vector.load %arg12[%c0_144, %c0_145] : memref<128x256xbf16, #tpu.memory_space<vmem>>, vector<128x256xbf16>
    %cst_146 = arith.constant dense<0.000000e+00> : vector<8x256xf32>
    %302 = tpu.matmul %300, %301, %cst_146 {dimension_numbers = #tpu.dot_dimension_numbers<[1], [0], [0], [1], [0, 0, 1, 1], [], []>} : vector<8x128xbf16>, vector<128x256xbf16>, vector<8x256xf32> -> vector<8x256xf32>
    %c0_147 = arith.constant 0 : index
    %c0_148 = arith.constant 0 : index
    %303 = vector.load %arg13[%c0_147, %c0_148] : memref<1x256xf32, #tpu.memory_space<vmem>>, vector<1x256xf32>
    %304 = vector.broadcast %303 : vector<1x256xf32> to vector<8x256xf32>
    %305 = arith.addf %302, %304 : vector<8x256xf32>
    %cst_149 = arith.constant 0.000000e+00 : f32
    %306 = vector.broadcast %cst_149 : f32 to vector<8x256xf32>
    %307 = arith.maximumf %305, %306 : vector<8x256xf32>
    %308 = arith.truncf %307 : vector<8x256xf32> to vector<8x256xbf16>
    %c0_150 = arith.constant 0 : index
    %c0_151 = arith.constant 0 : index
    %309 = vector.load %arg14[%c0_150, %c0_151] : memref<256x128xbf16, #tpu.memory_space<vmem>>, vector<256x128xbf16>
    %cst_152 = arith.constant dense<0.000000e+00> : vector<8x128xf32>
    %310 = tpu.matmul %308, %309, %cst_152 {dimension_numbers = #tpu.dot_dimension_numbers<[1], [0], [0], [1], [0, 0, 1, 1], [], []>} : vector<8x256xbf16>, vector<256x128xbf16>, vector<8x128xf32> -> vector<8x128xf32>
    %c0_153 = arith.constant 0 : index
    %c0_154 = arith.constant 0 : index
    %311 = vector.load %arg15[%c0_153, %c0_154] : memref<1x128xf32, #tpu.memory_space<vmem>>, vector<1x128xf32>
    %312 = vector.broadcast %311 : vector<1x128xf32> to vector<8x128xf32>
    %313 = arith.addf %310, %312 : vector<8x128xf32>
    %314 = arith.addf %275, %313 : vector<8x128xf32>
    %c0_155 = arith.constant 0 : index
    %c0_156 = arith.constant 0 : index
    %c0_157 = arith.constant 0 : index
    %315 = vector.load %arg16[%c0_155, %c0_156, %c0_157] : memref<1x8x128xf32, #tpu.memory_space<vmem>>, vector<1x8x128xf32>
    %316 = vector.shape_cast %315 : vector<1x8x128xf32> to vector<8x128xf32>
    %317 = vector.shape_cast %314 : vector<8x128xf32> to vector<1x8x128xf32>
    tpu.vector_store %arg16[%c0_155, %c0_156, %c0_157], %317 {strides = array<i32>} : memref<1x8x128xf32, #tpu.memory_space<vmem>>, vector<1x8x128xf32>,
    return
  }
  func.func @transform_0(%arg0: i32, %arg1: i32) -> (i32, i32, i32) {
    %c0_i32 = arith.constant 0 : i32
    %c0_i32_0 = arith.constant 0 : i32
    %c0_i32_1 = arith.constant 0 : i32
    return %arg0, %c0_i32, %c0_i32_0 : i32, i32, i32
  }
  func.func @transform_1(%arg0: i32, %arg1: i32) -> (i32, i32, i32) {
    %c0_i32 = arith.constant 0 : i32
    %c0_i32_0 = arith.constant 0 : i32
    %c0_i32_1 = arith.constant 0 : i32
    return %arg0, %c0_i32, %c0_i32_0 : i32, i32, i32
  }
  func.func @transform_2(%arg0: i32, %arg1: i32) -> (i32, i32, i32) {
    %c0_i32 = arith.constant 0 : i32
    %c0_i32_0 = arith.constant 0 : i32
    %c0_i32_1 = arith.constant 0 : i32
    return %arg0, %c0_i32, %c0_i32_0 : i32, i32, i32
  }
  func.func @transform_3(%arg0: i32, %arg1: i32) -> (i32, i32, i32) {
    %c0_i32 = arith.constant 0 : i32
    %c0_i32_0 = arith.constant 0 : i32
    return %arg0, %arg1, %c0_i32 : i32, i32, i32
  }
  func.func @transform_4(%arg0: i32, %arg1: i32) -> (i32, i32, i32) {
    %c0_i32 = arith.constant 0 : i32
    %c0_i32_0 = arith.constant 0 : i32
    %c0_i32_1 = arith.constant 0 : i32
    %c0_i32_2 = arith.constant 0 : i32
    return %c0_i32, %c0_i32_0, %c0_i32_1 : i32, i32, i32
  }
  func.func @transform_5(%arg0: i32, %arg1: i32) -> (i32, i32, i32) {
    %c0_i32 = arith.constant 0 : i32
    %c0_i32_0 = arith.constant 0 : i32
    %c0_i32_1 = arith.constant 0 : i32
    %c0_i32_2 = arith.constant 0 : i32
    return %c0_i32, %c0_i32_0, %c0_i32_1 : i32, i32, i32
  }
  func.func @transform_6(%arg0: i32, %arg1: i32) -> (i32, i32, i32) {
    %c0_i32 = arith.constant 0 : i32
    %c0_i32_0 = arith.constant 0 : i32
    %c0_i32_1 = arith.constant 0 : i32
    %c0_i32_2 = arith.constant 0 : i32
    return %c0_i32, %c0_i32_0, %c0_i32_1 : i32, i32, i32
  }
  func.func @transform_7(%arg0: i32, %arg1: i32) -> (i32, i32, i32) {
    %c0_i32 = arith.constant 0 : i32
    %c0_i32_0 = arith.constant 0 : i32
    %c0_i32_1 = arith.constant 0 : i32
    %c0_i32_2 = arith.constant 0 : i32
    return %c0_i32, %c0_i32_0, %c0_i32_1 : i32, i32, i32
  }
  func.func @transform_8(%arg0: i32, %arg1: i32) -> (i32, i32, i32) {
    %c0_i32 = arith.constant 0 : i32
    %c0_i32_0 = arith.constant 0 : i32
    %c0_i32_1 = arith.constant 0 : i32
    %c0_i32_2 = arith.constant 0 : i32
    return %c0_i32, %c0_i32_0, %c0_i32_1 : i32, i32, i32
  }
  func.func @transform_9(%arg0: i32, %arg1: i32) -> (i32, i32, i32) {
    %c0_i32 = arith.constant 0 : i32
    %c0_i32_0 = arith.constant 0 : i32
    %c0_i32_1 = arith.constant 0 : i32
    %c0_i32_2 = arith.constant 0 : i32
    return %c0_i32, %c0_i32_0, %c0_i32_1 : i32, i32, i32
  }
  func.func @transform_10(%arg0: i32, %arg1: i32) -> (i32, i32) {
    %c0_i32 = arith.constant 0 : i32
    %c0_i32_0 = arith.constant 0 : i32
    %c0_i32_1 = arith.constant 0 : i32
    return %c0_i32, %c0_i32_0 : i32, i32
  }
  func.func @transform_11(%arg0: i32, %arg1: i32) -> (i32, i32) {
    %c0_i32 = arith.constant 0 : i32
    %c0_i32_0 = arith.constant 0 : i32
    %c0_i32_1 = arith.constant 0 : i32
    return %c0_i32, %c0_i32_0 : i32, i32
  }
  func.func @transform_12(%arg0: i32, %arg1: i32) -> (i32, i32) {
    %c0_i32 = arith.constant 0 : i32
    %c0_i32_0 = arith.constant 0 : i32
    %c0_i32_1 = arith.constant 0 : i32
    return %c0_i32, %c0_i32_0 : i32, i32
  }
  func.func @transform_13(%arg0: i32, %arg1: i32) -> (i32, i32) {
    %c0_i32 = arith.constant 0 : i32
    %c0_i32_0 = arith.constant 0 : i32
    %c0_i32_1 = arith.constant 0 : i32
    return %c0_i32, %c0_i32_0 : i32, i32
  }
  func.func @transform_14(%arg0: i32, %arg1: i32) -> (i32, i32, i32) {
    %c0_i32 = arith.constant 0 : i32
    %c0_i32_0 = arith.constant 0 : i32
    return %arg0, %arg1, %c0_i32 : i32, i32, i32
  }
}

module attributes {stable_mosaic.version = 11 : i64} {
  func.func @_decoder_layer_kernel(%arg0: i32, %arg1: i32, %arg2: memref<1x16x128xf32, #tpu.memory_space<vmem>>, %arg3: memref<1x32x128xf32, #tpu.memory_space<vmem>>, %arg4: memref<1x1x32xi32, #tpu.memory_space<vmem>>, %arg5: memref<1x8x16xi32, #tpu.memory_space<vmem>>, %arg6: memref<3x1x128xf32, #tpu.memory_space<vmem>>, %arg7: memref<3x1x128xf32, #tpu.memory_space<vmem>>, %arg8: memref<4x128x128xbf16, #tpu.memory_space<vmem>>, %arg9: memref<4x1x128xf32, #tpu.memory_space<vmem>>, %arg10: memref<4x128x128xbf16, #tpu.memory_space<vmem>>, %arg11: memref<4x1x128xf32, #tpu.memory_space<vmem>>, %arg12: memref<128x256xbf16, #tpu.memory_space<vmem>>, %arg13: memref<1x256xf32, #tpu.memory_space<vmem>>, %arg14: memref<256x128xbf16, #tpu.memory_space<vmem>>, %arg15: memref<1x128xf32, #tpu.memory_space<vmem>>, %arg16: memref<1x8x128xf32, #tpu.memory_space<vmem>>, %arg17: memref<128x16xbf16, #tpu.memory_space<vmem>>, %arg18: memref<16x128xbf16, #tpu.memory_space<vmem>>, %arg19: memref<128x32xbf16, #tpu.memory_space<vmem>>, %arg20: memref<32x128xbf16, #tpu.memory_space<vmem>>) attributes {dimension_semantics = [#tpu.dimension_semantics<parallel>, #tpu.dimension_semantics<arbitrary>], iteration_bounds = array<i64: 2, 2>, scalar_prefetch = 0 : i64, scratch_operands = 4 : i64, tpu.core_type = #tpu.core_type<tc>, window_params = [{transform_indices = @transform_0, window_bounds = array<i64: 1, 16, 128>}, {transform_indices = @transform_1, window_bounds = array<i64: 1, 32, 128>}, {transform_indices = @transform_2, window_bounds = array<i64: 1, 1, 32>}, {transform_indices = @transform_3, window_bounds = array<i64: 1, 8, 16>}, {pipeline_mode = #tpu.pipeline_mode<synchronous>, transform_indices = @transform_4, window_bounds = array<i64: 3, 1, 128>}, {pipeline_mode = #tpu.pipeline_mode<synchronous>, transform_indices = @transform_5, window_bounds = array<i64: 3, 1, 128>}, {pipeline_mode = #tpu.pipeline_mode<synchronous>, transform_indices = @transform_6, window_bounds = array<i64: 4, 128, 128>}, {pipeline_mode = #tpu.pipeline_mode<synchronous>, transform_indices = @transform_7, window_bounds = array<i64: 4, 1, 128>}, {pipeline_mode = #tpu.pipeline_mode<synchronous>, transform_indices = @transform_8, window_bounds = array<i64: 4, 128, 128>}, {pipeline_mode = #tpu.pipeline_mode<synchronous>, transform_indices = @transform_9, window_bounds = array<i64: 4, 1, 128>}, {pipeline_mode = #tpu.pipeline_mode<synchronous>, transform_indices = @transform_10, window_bounds = array<i64: 128, 256>}, {pipeline_mode = #tpu.pipeline_mode<synchronous>, transform_indices = @transform_11, window_bounds = array<i64: 1, 256>}, {pipeline_mode = #tpu.pipeline_mode<synchronous>, transform_indices = @transform_12, window_bounds = array<i64: 256, 128>}, {pipeline_mode = #tpu.pipeline_mode<synchronous>, transform_indices = @transform_13, window_bounds = array<i64: 1, 128>}, {transform_indices = @transform_14, window_bounds = array<i64: 1, 8, 128>}]} {
    %c0_i32 = arith.constant 0 : i32
    %0 = arith.cmpi eq, %arg1, %c0_i32 : i32
    %1 = arith.extui %0 : i1 to i32
    %c0_i32_0 = arith.constant 0 : i32
    %2 = arith.cmpi ne, %1, %c0_i32_0 : i32
    scf.if %2 {
      %c0_158 = arith.constant 0 : index
      %c0_159 = arith.constant 0 : index
      %c0_160 = arith.constant 0 : index
      %318 = vector.load %arg2[%c0_158, %c0_159, %c0_160] : memref<1x16x128xf32, #tpu.memory_space<vmem>>, vector<1x16x128xf32>
      %319 = vector.shape_cast %318 : vector<1x16x128xf32> to vector<16x128xf32>
      %c0_161 = arith.constant 0 : index
      %c0_162 = arith.constant 0 : index
      %c0_163 = arith.constant 0 : index
      %320 = vector.load %arg6[%c0_161, %c0_162, %c0_163] : memref<3x1x128xf32, #tpu.memory_space<vmem>>, vector<1x1x128xf32>
      %321 = vector.shape_cast %320 : vector<1x1x128xf32> to vector<1x128xf32>
      %c0_164 = arith.constant 0 : index
      %c0_165 = arith.constant 0 : index
      %c0_166 = arith.constant 0 : index
      %322 = vector.load %arg7[%c0_164, %c0_165, %c0_166] : memref<3x1x128xf32, #tpu.memory_space<vmem>>, vector<1x1x128xf32>
      %323 = vector.shape_cast %322 : vector<1x1x128xf32> to vector<1x128xf32>
      %cst_167 = arith.constant dense<0.000000e+00> : vector<16xf32>
      %324 = vector.multi_reduction <add>, %319, %cst_167 [1] : vector<16x128xf32> to vector<16xf32>
      %325 = vector.shape_cast %324 : vector<16xf32> to vector<16x1xf32>
      %cst_168 = arith.constant 1.280000e+02 : f32
      %326 = vector.broadcast %cst_168 : f32 to vector<16x1xf32>
      %327 = arith.divf %325, %326 : vector<16x1xf32>
      %328 = vector.broadcast %327 : vector<16x1xf32> to vector<16x128xf32>
      %329 = arith.subf %319, %328 : vector<16x128xf32>
      %330 = arith.mulf %329, %329 : vector<16x128xf32>
      %cst_169 = arith.constant dense<0.000000e+00> : vector<16xf32>
      %331 = vector.multi_reduction <add>, %330, %cst_169 [1] : vector<16x128xf32> to vector<16xf32>
      %332 = vector.shape_cast %331 : vector<16xf32> to vector<16x1xf32>
      %cst_170 = arith.constant 1.270000e+02 : f32
      %333 = vector.broadcast %cst_170 : f32 to vector<16x1xf32>
      %334 = arith.divf %332, %333 : vector<16x1xf32>
      %335 = vector.broadcast %321 : vector<1x128xf32> to vector<16x128xf32>
      %336 = arith.mulf %335, %329 : vector<16x128xf32>
      %337 = math.sqrt %334 : vector<16x1xf32>
      %cst_171 = arith.constant 9.99999997E-7 : f32
      %338 = vector.broadcast %cst_171 : f32 to vector<16x1xf32>
      %339 = arith.addf %337, %338 : vector<16x1xf32>
      %340 = vector.broadcast %339 : vector<16x1xf32> to vector<16x128xf32>
      %341 = arith.divf %336, %340 : vector<16x128xf32>
      %342 = vector.broadcast %323 : vector<1x128xf32> to vector<16x128xf32>
      %343 = arith.addf %341, %342 : vector<16x128xf32>
      %344 = arith.truncf %343 : vector<16x128xf32> to vector<16x128xbf16>
      %c1_172 = arith.constant 1 : index
      %c0_173 = arith.constant 0 : index
      %c0_174 = arith.constant 0 : index
      %345 = vector.load %arg8[%c1_172, %c0_173, %c0_174] : memref<4x128x128xbf16, #tpu.memory_space<vmem>>, vector<1x128x128xbf16>
      %346 = vector.shape_cast %345 : vector<1x128x128xbf16> to vector<128x128xbf16>
      %cst_175 = arith.constant dense<0.000000e+00> : vector<16x128xf32>
      %347 = tpu.matmul %344, %346, %cst_175 {dimension_numbers = #tpu.dot_dimension_numbers<[1], [0], [0], [1], [0, 0, 1, 1], [], []>} : vector<16x128xbf16>, vector<128x128xbf16>, vector<16x128xf32> -> vector<16x128xf32>
      %c1_176 = arith.constant 1 : index
      %c0_177 = arith.constant 0 : index
      %c0_178 = arith.constant 0 : index
      %348 = vector.load %arg9[%c1_176, %c0_177, %c0_178] : memref<4x1x128xf32, #tpu.memory_space<vmem>>, vector<1x1x128xf32>
      %349 = vector.shape_cast %348 : vector<1x1x128xf32> to vector<1x128xf32>
      %350 = vector.broadcast %349 : vector<1x128xf32> to vector<16x128xf32>
      %351 = arith.addf %347, %350 : vector<16x128xf32>
      %352 = arith.truncf %351 : vector<16x128xf32> to vector<16x128xbf16>
      %353 = tpu.transpose %352, [1, 0] : vector<16x128xbf16> -> vector<128x16xbf16>
      %c0_179 = arith.constant 0 : index
      %c0_180 = arith.constant 0 : index
      %354 = vector.load %arg17[%c0_179, %c0_180] : memref<128x16xbf16, #tpu.memory_space<vmem>>, vector<128x16xbf16>
      tpu.vector_store %arg17[%c0_179, %c0_180], %353 {strides = array<i32>} : memref<128x16xbf16, #tpu.memory_space<vmem>>, vector<128x16xbf16>,
      %c2_181 = arith.constant 2 : index
      %c0_182 = arith.constant 0 : index
      %c0_183 = arith.constant 0 : index
      %355 = vector.load %arg8[%c2_181, %c0_182, %c0_183] : memref<4x128x128xbf16, #tpu.memory_space<vmem>>, vector<1x128x128xbf16>
      %356 = vector.shape_cast %355 : vector<1x128x128xbf16> to vector<128x128xbf16>
      %cst_184 = arith.constant dense<0.000000e+00> : vector<16x128xf32>
      %357 = tpu.matmul %344, %356, %cst_184 {dimension_numbers = #tpu.dot_dimension_numbers<[1], [0], [0], [1], [0, 0, 1, 1], [], []>} : vector<16x128xbf16>, vector<128x128xbf16>, vector<16x128xf32> -> vector<16x128xf32>
      %c2_185 = arith.constant 2 : index
      %c0_186 = arith.constant 0 : index
      %c0_187 = arith.constant 0 : index
      %358 = vector.load %arg9[%c2_185, %c0_186, %c0_187] : memref<4x1x128xf32, #tpu.memory_space<vmem>>, vector<1x1x128xf32>
      %359 = vector.shape_cast %358 : vector<1x1x128xf32> to vector<1x128xf32>
      %360 = vector.broadcast %359 : vector<1x128xf32> to vector<16x128xf32>
      %361 = arith.addf %357, %360 : vector<16x128xf32>
      %362 = arith.truncf %361 : vector<16x128xf32> to vector<16x128xbf16>
      %c0_188 = arith.constant 0 : index
      %c0_189 = arith.constant 0 : index
      %363 = vector.load %arg18[%c0_188, %c0_189] : memref<16x128xbf16, #tpu.memory_space<vmem>>, vector<16x128xbf16>
      tpu.vector_store %arg18[%c0_188, %c0_189], %362 {strides = array<i32>} : memref<16x128xbf16, #tpu.memory_space<vmem>>, vector<16x128xbf16>,
      %c0_190 = arith.constant 0 : index
      %c0_191 = arith.constant 0 : index
      %c0_192 = arith.constant 0 : index
      %364 = vector.load %arg3[%c0_190, %c0_191, %c0_192] : memref<1x32x128xf32, #tpu.memory_space<vmem>>, vector<1x32x128xf32>
      %365 = vector.shape_cast %364 : vector<1x32x128xf32> to vector<32x128xf32>
      %366 = arith.truncf %365 : vector<32x128xf32> to vector<32x128xbf16>
      %c1_193 = arith.constant 1 : index
      %c0_194 = arith.constant 0 : index
      %c0_195 = arith.constant 0 : index
      %367 = vector.load %arg10[%c1_193, %c0_194, %c0_195] : memref<4x128x128xbf16, #tpu.memory_space<vmem>>, vector<1x128x128xbf16>
      %368 = vector.shape_cast %367 : vector<1x128x128xbf16> to vector<128x128xbf16>
      %cst_196 = arith.constant dense<0.000000e+00> : vector<32x128xf32>
      %369 = tpu.matmul %366, %368, %cst_196 {dimension_numbers = #tpu.dot_dimension_numbers<[1], [0], [0], [1], [0, 0, 1, 1], [], []>} : vector<32x128xbf16>, vector<128x128xbf16>, vector<32x128xf32> -> vector<32x128xf32>
      %c1_197 = arith.constant 1 : index
      %c0_198 = arith.constant 0 : index
      %c0_199 = arith.constant 0 : index
      %370 = vector.load %arg11[%c1_197, %c0_198, %c0_199] : memref<4x1x128xf32, #tpu.memory_space<vmem>>, vector<1x1x128xf32>
      %371 = vector.shape_cast %370 : vector<1x1x128xf32> to vector<1x128xf32>
      %372 = vector.broadcast %371 : vector<1x128xf32> to vector<32x128xf32>
      %373 = arith.addf %369, %372 : vector<32x128xf32>
      %374 = arith.truncf %373 : vector<32x128xf32> to vector<32x128xbf16>
      %375 = tpu.transpose %374, [1, 0] : vector<32x128xbf16> -> vector<128x32xbf16>
      %c0_200 = arith.constant 0 : index
      %c0_201 = arith.constant 0 : index
      %376 = vector.load %arg19[%c0_200, %c0_201] : memref<128x32xbf16, #tpu.memory_space<vmem>>, vector<128x32xbf16>
      tpu.vector_store %arg19[%c0_200, %c0_201], %375 {strides = array<i32>} : memref<128x32xbf16, #tpu.memory_space<vmem>>, vector<128x32xbf16>,
      %c2_202 = arith.constant 2 : index
      %c0_203 = arith.constant 0 : index
      %c0_204 = arith.constant 0 : index
      %377 = vector.load %arg10[%c2_202, %c0_203, %c0_204] : memref<4x128x128xbf16, #tpu.memory_space<vmem>>, vector<1x128x128xbf16>
      %378 = vector.shape_cast %377 : vector<1x128x128xbf16> to vector<128x128xbf16>
      %cst_205 = arith.constant dense<0.000000e+00> : vector<32x128xf32>
      %379 = tpu.matmul %366, %378, %cst_205 {dimension_numbers = #tpu.dot_dimension_numbers<[1], [0], [0], [1], [0, 0, 1, 1], [], []>} : vector<32x128xbf16>, vector<128x128xbf16>, vector<32x128xf32> -> vector<32x128xf32>
      %c2_206 = arith.constant 2 : index
      %c0_207 = arith.constant 0 : index
      %c0_208 = arith.constant 0 : index
      %380 = vector.load %arg11[%c2_206, %c0_207, %c0_208] : memref<4x1x128xf32, #tpu.memory_space<vmem>>, vector<1x1x128xf32>
      %381 = vector.shape_cast %380 : vector<1x1x128xf32> to vector<1x128xf32>
      %382 = vector.broadcast %381 : vector<1x128xf32> to vector<32x128xf32>
      %383 = arith.addf %379, %382 : vector<32x128xf32>
      %384 = arith.truncf %383 : vector<32x128xf32> to vector<32x128xbf16>
      %c0_209 = arith.constant 0 : index
      %c0_210 = arith.constant 0 : index
      %385 = vector.load %arg20[%c0_209, %c0_210] : memref<32x128xbf16, #tpu.memory_space<vmem>>, vector<32x128xbf16>
      tpu.vector_store %arg20[%c0_209, %c0_210], %384 {strides = array<i32>} : memref<32x128xbf16, #tpu.memory_space<vmem>>, vector<32x128xbf16>,
    } else {
    }
    %c0 = arith.constant 0 : index
    %c0_1 = arith.constant 0 : index
    %c0_2 = arith.constant 0 : index
    %3 = vector.load %arg5[%c0, %c0_1, %c0_2] : memref<1x8x16xi32, #tpu.memory_space<vmem>>, vector<1x8x16xi32>
    %4 = vector.shape_cast %3 : vector<1x8x16xi32> to vector<8x16xi32>
    %c0_i32_3 = arith.constant 0 : i32
    %5 = vector.broadcast %c0_i32_3 : i32 to vector<8x16xi32>
    %6 = arith.cmpi ne, %4, %5 : vector<8x16xi32>
    %c0_4 = arith.constant 0 : index
    %c0_5 = arith.constant 0 : index
    %c0_6 = arith.constant 0 : index
    %7 = vector.load %arg4[%c0_4, %c0_5, %c0_6] : memref<1x1x32xi32, #tpu.memory_space<vmem>>, vector<1x1x32xi32>
    %8 = vector.shape_cast %7 : vector<1x1x32xi32> to vector<1x32xi32>
    %c0_i32_7 = arith.constant 0 : i32
    %9 = vector.broadcast %c0_i32_7 : i32 to vector<1x32xi32>
    %10 = arith.cmpi ne, %8, %9 : vector<1x32xi32>
    %c8_i32 = arith.constant 8 : i32
    %11 = arith.muli %arg1, %c8_i32 : i32
    %12 = tpu.assume_multiple %11, 8 : i32
    %c0_8 = arith.constant 0 : index
    %13 = arith.index_cast %12 : i32 to index
    %c0_9 = arith.constant 0 : index
    %14 = vector.load %arg2[%c0_8, %13, %c0_9] : memref<1x16x128xf32, #tpu.memory_space<vmem>>, vector<1x8x128xf32>
    %15 = vector.shape_cast %14 : vector<1x8x128xf32> to vector<8x128xf32>
    %c0_10 = arith.constant 0 : index
    %c0_11 = arith.constant 0 : index
    %c0_12 = arith.constant 0 : index
    %16 = vector.load %arg6[%c0_10, %c0_11, %c0_12] : memref<3x1x128xf32, #tpu.memory_space<vmem>>, vector<1x1x128xf32>
    %17 = vector.shape_cast %16 : vector<1x1x128xf32> to vector<1x128xf32>
    %c0_13 = arith.constant 0 : index
    %c0_14 = arith.constant 0 : index
    %c0_15 = arith.constant 0 : index
    %18 = vector.load %arg7[%c0_13, %c0_14, %c0_15] : memref<3x1x128xf32, #tpu.memory_space<vmem>>, vector<1x1x128xf32>
    %19 = vector.shape_cast %18 : vector<1x1x128xf32> to vector<1x128xf32>
    %cst = arith.constant dense<0.000000e+00> : vector<8xf32>
    %20 = vector.multi_reduction <add>, %15, %cst [1] : vector<8x128xf32> to vector<8xf32>
    %21 = vector.shape_cast %20 : vector<8xf32> to vector<8x1xf32>
    %cst_16 = arith.constant 1.280000e+02 : f32
    %22 = vector.broadcast %cst_16 : f32 to vector<8x1xf32>
    %23 = arith.divf %21, %22 : vector<8x1xf32>
    %24 = vector.broadcast %23 : vector<8x1xf32> to vector<8x128xf32>
    %25 = arith.subf %15, %24 : vector<8x128xf32>
    %26 = arith.mulf %25, %25 : vector<8x128xf32>
    %cst_17 = arith.constant dense<0.000000e+00> : vector<8xf32>
    %27 = vector.multi_reduction <add>, %26, %cst_17 [1] : vector<8x128xf32> to vector<8xf32>
    %28 = vector.shape_cast %27 : vector<8xf32> to vector<8x1xf32>
    %cst_18 = arith.constant 1.270000e+02 : f32
    %29 = vector.broadcast %cst_18 : f32 to vector<8x1xf32>
    %30 = arith.divf %28, %29 : vector<8x1xf32>
    %31 = vector.broadcast %17 : vector<1x128xf32> to vector<8x128xf32>
    %32 = arith.mulf %31, %25 : vector<8x128xf32>
    %33 = math.sqrt %30 : vector<8x1xf32>
    %cst_19 = arith.constant 9.99999997E-7 : f32
    %34 = vector.broadcast %cst_19 : f32 to vector<8x1xf32>
    %35 = arith.addf %33, %34 : vector<8x1xf32>
    %36 = vector.broadcast %35 : vector<8x1xf32> to vector<8x128xf32>
    %37 = arith.divf %32, %36 : vector<8x128xf32>
    %38 = vector.broadcast %19 : vector<1x128xf32> to vector<8x128xf32>
    %39 = arith.addf %37, %38 : vector<8x128xf32>
    %40 = arith.truncf %39 : vector<8x128xf32> to vector<8x128xbf16>
    %c0_20 = arith.constant 0 : index
    %c0_21 = arith.constant 0 : index
    %c0_22 = arith.constant 0 : index
    %41 = vector.load %arg8[%c0_20, %c0_21, %c0_22] : memref<4x128x128xbf16, #tpu.memory_space<vmem>>, vector<1x128x128xbf16>
    %42 = vector.shape_cast %41 : vector<1x128x128xbf16> to vector<128x128xbf16>
    %cst_23 = arith.constant dense<0.000000e+00> : vector<8x128xf32>
    %43 = tpu.matmul %40, %42, %cst_23 {dimension_numbers = #tpu.dot_dimension_numbers<[1], [0], [0], [1], [0, 0, 1, 1], [], []>} : vector<8x128xbf16>, vector<128x128xbf16>, vector<8x128xf32> -> vector<8x128xf32>
    %c0_24 = arith.constant 0 : index
    %c0_25 = arith.constant 0 : index
    %c0_26 = arith.constant 0 : index
    %44 = vector.load %arg9[%c0_24, %c0_25, %c0_26] : memref<4x1x128xf32, #tpu.memory_space<vmem>>, vector<1x1x128xf32>
    %45 = vector.shape_cast %44 : vector<1x1x128xf32> to vector<1x128xf32>
    %46 = vector.broadcast %45 : vector<1x128xf32> to vector<8x128xf32>
    %47 = arith.addf %43, %46 : vector<8x128xf32>
    %48 = arith.truncf %47 : vector<8x128xf32> to vector<8x128xbf16>
    %49 = vector.extract_strided_slice %48 {offsets = [0, 0], sizes = [8, 32], strides = [1, 1]} : vector<8x128xbf16> to vector<8x32xbf16>
    %c0_27 = arith.constant 0 : index
    %c0_28 = arith.constant 0 : index
    %50 = vector.load %arg17[%c0_27, %c0_28] : memref<128x16xbf16, #tpu.memory_space<vmem>>, vector<32x16xbf16>
    %cst_29 = arith.constant dense<0.000000e+00> : vector<8x16xf32>
    %51 = tpu.matmul %49, %50, %cst_29 {dimension_numbers = #tpu.dot_dimension_numbers<[1], [0], [0], [1], [0, 0, 1, 1], [], []>} : vector<8x32xbf16>, vector<32x16xbf16>, vector<8x16xf32> -> vector<8x16xf32>
    %cst_30 = arith.constant 0.176776692 : f32
    %52 = vector.broadcast %cst_30 : f32 to vector<8x16xf32>
    %53 = arith.mulf %51, %52 : vector<8x16xf32>
    %cst_31 = arith.constant -1.000000e+09 : f32
    %54 = vector.broadcast %cst_31 : f32 to vector<8x16xf32>
    %55 = arith.select %6, %53, %54 : vector<8x16xi1>, vector<8x16xf32>
    %cst_32 = arith.constant dense<0xFF800000> : vector<8xf32>
    %56 = vector.multi_reduction <maximumf>, %55, %cst_32 [1] : vector<8x16xf32> to vector<8xf32>
    %57 = vector.shape_cast %56 : vector<8xf32> to vector<8x1xf32>
    %58 = vector.broadcast %57 : vector<8x1xf32> to vector<8x16xf32>
    %59 = arith.subf %55, %58 : vector<8x16xf32>
    %60 = math.exp %59 : vector<8x16xf32>
    %cst_33 = arith.constant dense<0.000000e+00> : vector<8xf32>
    %61 = vector.multi_reduction <add>, %60, %cst_33 [1] : vector<8x16xf32> to vector<8xf32>
    %62 = vector.shape_cast %61 : vector<8xf32> to vector<8x1xf32>
    %63 = tpu.reciprocal %62 {approx = true} : vector<8x1xf32> -> vector<8x1xf32>
    %64 = vector.broadcast %63 : vector<8x1xf32> to vector<8x16xf32>
    %65 = arith.mulf %60, %64 : vector<8x16xf32>
    %66 = arith.truncf %65 : vector<8x16xf32> to vector<8x16xbf16>
    %c0_34 = arith.constant 0 : index
    %c0_35 = arith.constant 0 : index
    %67 = vector.load %arg18[%c0_34, %c0_35] : memref<16x128xbf16, #tpu.memory_space<vmem>>, vector<16x32xbf16>
    %cst_36 = arith.constant dense<0.000000e+00> : vector<8x32xf32>
    %68 = tpu.matmul %66, %67, %cst_36 {dimension_numbers = #tpu.dot_dimension_numbers<[1], [0], [0], [1], [0, 0, 1, 1], [], []>} : vector<8x16xbf16>, vector<16x32xbf16>, vector<8x32xf32> -> vector<8x32xf32>
    %69 = arith.truncf %68 : vector<8x32xf32> to vector<8x32xbf16>
    %70 = vector.extract_strided_slice %48 {offsets = [0, 32], sizes = [8, 32], strides = [1, 1]} : vector<8x128xbf16> to vector<8x32xbf16>
    %c32 = arith.constant 32 : index
    %c0_37 = arith.constant 0 : index
    %71 = vector.load %arg17[%c32, %c0_37] : memref<128x16xbf16, #tpu.memory_space<vmem>>, vector<32x16xbf16>
    %cst_38 = arith.constant dense<0.000000e+00> : vector<8x16xf32>
    %72 = tpu.matmul %70, %71, %cst_38 {dimension_numbers = #tpu.dot_dimension_numbers<[1], [0], [0], [1], [0, 0, 1, 1], [], []>} : vector<8x32xbf16>, vector<32x16xbf16>, vector<8x16xf32> -> vector<8x16xf32>
    %cst_39 = arith.constant 0.176776692 : f32
    %73 = vector.broadcast %cst_39 : f32 to vector<8x16xf32>
    %74 = arith.mulf %72, %73 : vector<8x16xf32>
    %cst_40 = arith.constant -1.000000e+09 : f32
    %75 = vector.broadcast %cst_40 : f32 to vector<8x16xf32>
    %76 = arith.select %6, %74, %75 : vector<8x16xi1>, vector<8x16xf32>
    %cst_41 = arith.constant dense<0xFF800000> : vector<8xf32>
    %77 = vector.multi_reduction <maximumf>, %76, %cst_41 [1] : vector<8x16xf32> to vector<8xf32>
    %78 = vector.shape_cast %77 : vector<8xf32> to vector<8x1xf32>
    %79 = vector.broadcast %78 : vector<8x1xf32> to vector<8x16xf32>
    %80 = arith.subf %76, %79 : vector<8x16xf32>
    %81 = math.exp %80 : vector<8x16xf32>
    %cst_42 = arith.constant dense<0.000000e+00> : vector<8xf32>
    %82 = vector.multi_reduction <add>, %81, %cst_42 [1] : vector<8x16xf32> to vector<8xf32>
    %83 = vector.shape_cast %82 : vector<8xf32> to vector<8x1xf32>
    %84 = tpu.reciprocal %83 {approx = true} : vector<8x1xf32> -> vector<8x1xf32>
    %85 = vector.broadcast %84 : vector<8x1xf32> to vector<8x16xf32>
    %86 = arith.mulf %81, %85 : vector<8x16xf32>
    %87 = arith.truncf %86 : vector<8x16xf32> to vector<8x16xbf16>
    %c0_43 = arith.constant 0 : index
    %c32_44 = arith.constant 32 : index
    %88 = vector.load %arg18[%c0_43, %c32_44] : memref<16x128xbf16, #tpu.memory_space<vmem>>, vector<16x32xbf16>
    %cst_45 = arith.constant dense<0.000000e+00> : vector<8x32xf32>
    %89 = tpu.matmul %87, %88, %cst_45 {dimension_numbers = #tpu.dot_dimension_numbers<[1], [0], [0], [1], [0, 0, 1, 1], [], []>} : vector<8x16xbf16>, vector<16x32xbf16>, vector<8x32xf32> -> vector<8x32xf32>
    %90 = arith.truncf %89 : vector<8x32xf32> to vector<8x32xbf16>
    %91 = vector.extract_strided_slice %48 {offsets = [0, 64], sizes = [8, 32], strides = [1, 1]} : vector<8x128xbf16> to vector<8x32xbf16>
    %c64 = arith.constant 64 : index
    %c0_46 = arith.constant 0 : index
    %92 = vector.load %arg17[%c64, %c0_46] : memref<128x16xbf16, #tpu.memory_space<vmem>>, vector<32x16xbf16>
    %cst_47 = arith.constant dense<0.000000e+00> : vector<8x16xf32>
    %93 = tpu.matmul %91, %92, %cst_47 {dimension_numbers = #tpu.dot_dimension_numbers<[1], [0], [0], [1], [0, 0, 1, 1], [], []>} : vector<8x32xbf16>, vector<32x16xbf16>, vector<8x16xf32> -> vector<8x16xf32>
    %cst_48 = arith.constant 0.176776692 : f32
    %94 = vector.broadcast %cst_48 : f32 to vector<8x16xf32>
    %95 = arith.mulf %93, %94 : vector<8x16xf32>
    %cst_49 = arith.constant -1.000000e+09 : f32
    %96 = vector.broadcast %cst_49 : f32 to vector<8x16xf32>
    %97 = arith.select %6, %95, %96 : vector<8x16xi1>, vector<8x16xf32>
    %cst_50 = arith.constant dense<0xFF800000> : vector<8xf32>
    %98 = vector.multi_reduction <maximumf>, %97, %cst_50 [1] : vector<8x16xf32> to vector<8xf32>
    %99 = vector.shape_cast %98 : vector<8xf32> to vector<8x1xf32>
    %100 = vector.broadcast %99 : vector<8x1xf32> to vector<8x16xf32>
    %101 = arith.subf %97, %100 : vector<8x16xf32>
    %102 = math.exp %101 : vector<8x16xf32>
    %cst_51 = arith.constant dense<0.000000e+00> : vector<8xf32>
    %103 = vector.multi_reduction <add>, %102, %cst_51 [1] : vector<8x16xf32> to vector<8xf32>
    %104 = vector.shape_cast %103 : vector<8xf32> to vector<8x1xf32>
    %105 = tpu.reciprocal %104 {approx = true} : vector<8x1xf32> -> vector<8x1xf32>
    %106 = vector.broadcast %105 : vector<8x1xf32> to vector<8x16xf32>
    %107 = arith.mulf %102, %106 : vector<8x16xf32>
    %108 = arith.truncf %107 : vector<8x16xf32> to vector<8x16xbf16>
    %c0_52 = arith.constant 0 : index
    %c64_53 = arith.constant 64 : index
    %109 = vector.load %arg18[%c0_52, %c64_53] : memref<16x128xbf16, #tpu.memory_space<vmem>>, vector<16x32xbf16>
    %cst_54 = arith.constant dense<0.000000e+00> : vector<8x32xf32>
    %110 = tpu.matmul %108, %109, %cst_54 {dimension_numbers = #tpu.dot_dimension_numbers<[1], [0], [0], [1], [0, 0, 1, 1], [], []>} : vector<8x16xbf16>, vector<16x32xbf16>, vector<8x32xf32> -> vector<8x32xf32>
    %111 = arith.truncf %110 : vector<8x32xf32> to vector<8x32xbf16>
    %112 = vector.extract_strided_slice %48 {offsets = [0, 96], sizes = [8, 32], strides = [1, 1]} : vector<8x128xbf16> to vector<8x32xbf16>
    %c96 = arith.constant 96 : index
    %c0_55 = arith.constant 0 : index
    %113 = vector.load %arg17[%c96, %c0_55] : memref<128x16xbf16, #tpu.memory_space<vmem>>, vector<32x16xbf16>
    %cst_56 = arith.constant dense<0.000000e+00> : vector<8x16xf32>
    %114 = tpu.matmul %112, %113, %cst_56 {dimension_numbers = #tpu.dot_dimension_numbers<[1], [0], [0], [1], [0, 0, 1, 1], [], []>} : vector<8x32xbf16>, vector<32x16xbf16>, vector<8x16xf32> -> vector<8x16xf32>
    %cst_57 = arith.constant 0.176776692 : f32
    %115 = vector.broadcast %cst_57 : f32 to vector<8x16xf32>
    %116 = arith.mulf %114, %115 : vector<8x16xf32>
    %cst_58 = arith.constant -1.000000e+09 : f32
    %117 = vector.broadcast %cst_58 : f32 to vector<8x16xf32>
    %118 = arith.select %6, %116, %117 : vector<8x16xi1>, vector<8x16xf32>
    %cst_59 = arith.constant dense<0xFF800000> : vector<8xf32>
    %119 = vector.multi_reduction <maximumf>, %118, %cst_59 [1] : vector<8x16xf32> to vector<8xf32>
    %120 = vector.shape_cast %119 : vector<8xf32> to vector<8x1xf32>
    %121 = vector.broadcast %120 : vector<8x1xf32> to vector<8x16xf32>
    %122 = arith.subf %118, %121 : vector<8x16xf32>
    %123 = math.exp %122 : vector<8x16xf32>
    %cst_60 = arith.constant dense<0.000000e+00> : vector<8xf32>
    %124 = vector.multi_reduction <add>, %123, %cst_60 [1] : vector<8x16xf32> to vector<8xf32>
    %125 = vector.shape_cast %124 : vector<8xf32> to vector<8x1xf32>
    %126 = tpu.reciprocal %125 {approx = true} : vector<8x1xf32> -> vector<8x1xf32>
    %127 = vector.broadcast %126 : vector<8x1xf32> to vector<8x16xf32>
    %128 = arith.mulf %123, %127 : vector<8x16xf32>
    %129 = arith.truncf %128 : vector<8x16xf32> to vector<8x16xbf16>
    %c0_61 = arith.constant 0 : index
    %c96_62 = arith.constant 96 : index
    %130 = vector.load %arg18[%c0_61, %c96_62] : memref<16x128xbf16, #tpu.memory_space<vmem>>, vector<16x32xbf16>
    %cst_63 = arith.constant dense<0.000000e+00> : vector<8x32xf32>
    %131 = tpu.matmul %129, %130, %cst_63 {dimension_numbers = #tpu.dot_dimension_numbers<[1], [0], [0], [1], [0, 0, 1, 1], [], []>} : vector<8x16xbf16>, vector<16x32xbf16>, vector<8x32xf32> -> vector<8x32xf32>
    %132 = arith.truncf %131 : vector<8x32xf32> to vector<8x32xbf16>
    %133 = tpu.concatenate %69, %90, %111, %132 in 1 : vector<8x32xbf16>, vector<8x32xbf16>, vector<8x32xbf16>, vector<8x32xbf16> -> vector<8x128xbf16>
    %c3 = arith.constant 3 : index
    %c0_64 = arith.constant 0 : index
    %c0_65 = arith.constant 0 : index
    %134 = vector.load %arg8[%c3, %c0_64, %c0_65] : memref<4x128x128xbf16, #tpu.memory_space<vmem>>, vector<1x128x128xbf16>
    %135 = vector.shape_cast %134 : vector<1x128x128xbf16> to vector<128x128xbf16>
    %cst_66 = arith.constant dense<0.000000e+00> : vector<8x128xf32>
    %136 = tpu.matmul %133, %135, %cst_66 {dimension_numbers = #tpu.dot_dimension_numbers<[1], [0], [0], [1], [0, 0, 1, 1], [], []>} : vector<8x128xbf16>, vector<128x128xbf16>, vector<8x128xf32> -> vector<8x128xf32>
    %c3_67 = arith.constant 3 : index
    %c0_68 = arith.constant 0 : index
    %c0_69 = arith.constant 0 : index
    %137 = vector.load %arg9[%c3_67, %c0_68, %c0_69] : memref<4x1x128xf32, #tpu.memory_space<vmem>>, vector<1x1x128xf32>
    %138 = vector.shape_cast %137 : vector<1x1x128xf32> to vector<1x128xf32>
    %139 = vector.broadcast %138 : vector<1x128xf32> to vector<8x128xf32>
    %140 = arith.addf %136, %139 : vector<8x128xf32>
    %141 = arith.addf %15, %140 : vector<8x128xf32>
    %c1 = arith.constant 1 : index
    %c0_70 = arith.constant 0 : index
    %c0_71 = arith.constant 0 : index
    %142 = vector.load %arg6[%c1, %c0_70, %c0_71] : memref<3x1x128xf32, #tpu.memory_space<vmem>>, vector<1x1x128xf32>
    %143 = vector.shape_cast %142 : vector<1x1x128xf32> to vector<1x128xf32>
    %c1_72 = arith.constant 1 : index
    %c0_73 = arith.constant 0 : index
    %c0_74 = arith.constant 0 : index
    %144 = vector.load %arg7[%c1_72, %c0_73, %c0_74] : memref<3x1x128xf32, #tpu.memory_space<vmem>>, vector<1x1x128xf32>
    %145 = vector.shape_cast %144 : vector<1x1x128xf32> to vector<1x128xf32>
    %cst_75 = arith.constant dense<0.000000e+00> : vector<8xf32>
    %146 = vector.multi_reduction <add>, %141, %cst_75 [1] : vector<8x128xf32> to vector<8xf32>
    %147 = vector.shape_cast %146 : vector<8xf32> to vector<8x1xf32>
    %cst_76 = arith.constant 1.280000e+02 : f32
    %148 = vector.broadcast %cst_76 : f32 to vector<8x1xf32>
    %149 = arith.divf %147, %148 : vector<8x1xf32>
    %150 = vector.broadcast %149 : vector<8x1xf32> to vector<8x128xf32>
    %151 = arith.subf %141, %150 : vector<8x128xf32>
    %152 = arith.mulf %151, %151 : vector<8x128xf32>
    %cst_77 = arith.constant dense<0.000000e+00> : vector<8xf32>
    %153 = vector.multi_reduction <add>, %152, %cst_77 [1] : vector<8x128xf32> to vector<8xf32>
    %154 = vector.shape_cast %153 : vector<8xf32> to vector<8x1xf32>
    %cst_78 = arith.constant 1.270000e+02 : f32
    %155 = vector.broadcast %cst_78 : f32 to vector<8x1xf32>
    %156 = arith.divf %154, %155 : vector<8x1xf32>
    %157 = vector.broadcast %143 : vector<1x128xf32> to vector<8x128xf32>
    %158 = arith.mulf %157, %151 : vector<8x128xf32>
    %159 = math.sqrt %156 : vector<8x1xf32>
    %cst_79 = arith.constant 9.99999997E-7 : f32
    %160 = vector.broadcast %cst_79 : f32 to vector<8x1xf32>
    %161 = arith.addf %159, %160 : vector<8x1xf32>
    %162 = vector.broadcast %161 : vector<8x1xf32> to vector<8x128xf32>
    %163 = arith.divf %158, %162 : vector<8x128xf32>
    %164 = vector.broadcast %145 : vector<1x128xf32> to vector<8x128xf32>
    %165 = arith.addf %163, %164 : vector<8x128xf32>
    %166 = arith.truncf %165 : vector<8x128xf32> to vector<8x128xbf16>
    %c0_80 = arith.constant 0 : index
    %c0_81 = arith.constant 0 : index
    %c0_82 = arith.constant 0 : index
    %167 = vector.load %arg10[%c0_80, %c0_81, %c0_82] : memref<4x128x128xbf16, #tpu.memory_space<vmem>>, vector<1x128x128xbf16>
    %168 = vector.shape_cast %167 : vector<1x128x128xbf16> to vector<128x128xbf16>
    %cst_83 = arith.constant dense<0.000000e+00> : vector<8x128xf32>
    %169 = tpu.matmul %166, %168, %cst_83 {dimension_numbers = #tpu.dot_dimension_numbers<[1], [0], [0], [1], [0, 0, 1, 1], [], []>} : vector<8x128xbf16>, vector<128x128xbf16>, vector<8x128xf32> -> vector<8x128xf32>
    %c0_84 = arith.constant 0 : index
    %c0_85 = arith.constant 0 : index
    %c0_86 = arith.constant 0 : index
    %170 = vector.load %arg11[%c0_84, %c0_85, %c0_86] : memref<4x1x128xf32, #tpu.memory_space<vmem>>, vector<1x1x128xf32>
    %171 = vector.shape_cast %170 : vector<1x1x128xf32> to vector<1x128xf32>
    %172 = vector.broadcast %171 : vector<1x128xf32> to vector<8x128xf32>
    %173 = arith.addf %169, %172 : vector<8x128xf32>
    %174 = arith.truncf %173 : vector<8x128xf32> to vector<8x128xbf16>
    %175 = vector.extract_strided_slice %174 {offsets = [0, 0], sizes = [8, 32], strides = [1, 1]} : vector<8x128xbf16> to vector<8x32xbf16>
    %c0_87 = arith.constant 0 : index
    %c0_88 = arith.constant 0 : index
    %176 = vector.load %arg19[%c0_87, %c0_88] : memref<128x32xbf16, #tpu.memory_space<vmem>>, vector<32x32xbf16>
    %cst_89 = arith.constant dense<0.000000e+00> : vector<8x32xf32>
    %177 = tpu.matmul %175, %176, %cst_89 {dimension_numbers = #tpu.dot_dimension_numbers<[1], [0], [0], [1], [0, 0, 1, 1], [], []>} : vector<8x32xbf16>, vector<32x32xbf16>, vector<8x32xf32> -> vector<8x32xf32>
    %cst_90 = arith.constant 0.176776692 : f32
    %178 = vector.broadcast %cst_90 : f32 to vector<8x32xf32>
    %179 = arith.mulf %177, %178 : vector<8x32xf32>
    %cst_91 = arith.constant -1.000000e+09 : f32
    %180 = vector.shape_cast %10 : vector<1x32xi1> to vector<1x32xi1>
    %181 = vector.broadcast %180 : vector<1x32xi1> to vector<8x32xi1>
    %182 = vector.broadcast %cst_91 : f32 to vector<8x32xf32>
    %183 = arith.select %181, %179, %182 : vector<8x32xi1>, vector<8x32xf32>
    %cst_92 = arith.constant dense<0xFF800000> : vector<8xf32>
    %184 = vector.multi_reduction <maximumf>, %183, %cst_92 [1] : vector<8x32xf32> to vector<8xf32>
    %185 = vector.shape_cast %184 : vector<8xf32> to vector<8x1xf32>
    %186 = vector.broadcast %185 : vector<8x1xf32> to vector<8x32xf32>
    %187 = arith.subf %183, %186 : vector<8x32xf32>
    %188 = math.exp %187 : vector<8x32xf32>
    %cst_93 = arith.constant dense<0.000000e+00> : vector<8xf32>
    %189 = vector.multi_reduction <add>, %188, %cst_93 [1] : vector<8x32xf32> to vector<8xf32>
    %190 = vector.shape_cast %189 : vector<8xf32> to vector<8x1xf32>
    %191 = tpu.reciprocal %190 {approx = true} : vector<8x1xf32> -> vector<8x1xf32>
    %192 = vector.broadcast %191 : vector<8x1xf32> to vector<8x32xf32>
    %193 = arith.mulf %188, %192 : vector<8x32xf32>
    %194 = arith.truncf %193 : vector<8x32xf32> to vector<8x32xbf16>
    %c0_94 = arith.constant 0 : index
    %c0_95 = arith.constant 0 : index
    %195 = vector.load %arg20[%c0_94, %c0_95] : memref<32x128xbf16, #tpu.memory_space<vmem>>, vector<32x32xbf16>
    %cst_96 = arith.constant dense<0.000000e+00> : vector<8x32xf32>
    %196 = tpu.matmul %194, %195, %cst_96 {dimension_numbers = #tpu.dot_dimension_numbers<[1], [0], [0], [1], [0, 0, 1, 1], [], []>} : vector<8x32xbf16>, vector<32x32xbf16>, vector<8x32xf32> -> vector<8x32xf32>
    %197 = arith.truncf %196 : vector<8x32xf32> to vector<8x32xbf16>
    %198 = vector.extract_strided_slice %174 {offsets = [0, 32], sizes = [8, 32], strides = [1, 1]} : vector<8x128xbf16> to vector<8x32xbf16>
    %c32_97 = arith.constant 32 : index
    %c0_98 = arith.constant 0 : index
    %199 = vector.load %arg19[%c32_97, %c0_98] : memref<128x32xbf16, #tpu.memory_space<vmem>>, vector<32x32xbf16>
    %cst_99 = arith.constant dense<0.000000e+00> : vector<8x32xf32>
    %200 = tpu.matmul %198, %199, %cst_99 {dimension_numbers = #tpu.dot_dimension_numbers<[1], [0], [0], [1], [0, 0, 1, 1], [], []>} : vector<8x32xbf16>, vector<32x32xbf16>, vector<8x32xf32> -> vector<8x32xf32>
    %cst_100 = arith.constant 0.176776692 : f32
    %201 = vector.broadcast %cst_100 : f32 to vector<8x32xf32>
    %202 = arith.mulf %200, %201 : vector<8x32xf32>
    %cst_101 = arith.constant -1.000000e+09 : f32
    %203 = vector.shape_cast %10 : vector<1x32xi1> to vector<1x32xi1>
    %204 = vector.broadcast %203 : vector<1x32xi1> to vector<8x32xi1>
    %205 = vector.broadcast %cst_101 : f32 to vector<8x32xf32>
    %206 = arith.select %204, %202, %205 : vector<8x32xi1>, vector<8x32xf32>
    %cst_102 = arith.constant dense<0xFF800000> : vector<8xf32>
    %207 = vector.multi_reduction <maximumf>, %206, %cst_102 [1] : vector<8x32xf32> to vector<8xf32>
    %208 = vector.shape_cast %207 : vector<8xf32> to vector<8x1xf32>
    %209 = vector.broadcast %208 : vector<8x1xf32> to vector<8x32xf32>
    %210 = arith.subf %206, %209 : vector<8x32xf32>
    %211 = math.exp %210 : vector<8x32xf32>
    %cst_103 = arith.constant dense<0.000000e+00> : vector<8xf32>
    %212 = vector.multi_reduction <add>, %211, %cst_103 [1] : vector<8x32xf32> to vector<8xf32>
    %213 = vector.shape_cast %212 : vector<8xf32> to vector<8x1xf32>
    %214 = tpu.reciprocal %213 {approx = true} : vector<8x1xf32> -> vector<8x1xf32>
    %215 = vector.broadcast %214 : vector<8x1xf32> to vector<8x32xf32>
    %216 = arith.mulf %211, %215 : vector<8x32xf32>
    %217 = arith.truncf %216 : vector<8x32xf32> to vector<8x32xbf16>
    %c0_104 = arith.constant 0 : index
    %c32_105 = arith.constant 32 : index
    %218 = vector.load %arg20[%c0_104, %c32_105] : memref<32x128xbf16, #tpu.memory_space<vmem>>, vector<32x32xbf16>
    %cst_106 = arith.constant dense<0.000000e+00> : vector<8x32xf32>
    %219 = tpu.matmul %217, %218, %cst_106 {dimension_numbers = #tpu.dot_dimension_numbers<[1], [0], [0], [1], [0, 0, 1, 1], [], []>} : vector<8x32xbf16>, vector<32x32xbf16>, vector<8x32xf32> -> vector<8x32xf32>
    %220 = arith.truncf %219 : vector<8x32xf32> to vector<8x32xbf16>
    %221 = vector.extract_strided_slice %174 {offsets = [0, 64], sizes = [8, 32], strides = [1, 1]} : vector<8x128xbf16> to vector<8x32xbf16>
    %c64_107 = arith.constant 64 : index
    %c0_108 = arith.constant 0 : index
    %222 = vector.load %arg19[%c64_107, %c0_108] : memref<128x32xbf16, #tpu.memory_space<vmem>>, vector<32x32xbf16>
    %cst_109 = arith.constant dense<0.000000e+00> : vector<8x32xf32>
    %223 = tpu.matmul %221, %222, %cst_109 {dimension_numbers = #tpu.dot_dimension_numbers<[1], [0], [0], [1], [0, 0, 1, 1], [], []>} : vector<8x32xbf16>, vector<32x32xbf16>, vector<8x32xf32> -> vector<8x32xf32>
    %cst_110 = arith.constant 0.176776692 : f32
    %224 = vector.broadcast %cst_110 : f32 to vector<8x32xf32>
    %225 = arith.mulf %223, %224 : vector<8x32xf32>
    %cst_111 = arith.constant -1.000000e+09 : f32
    %226 = vector.shape_cast %10 : vector<1x32xi1> to vector<1x32xi1>
    %227 = vector.broadcast %226 : vector<1x32xi1> to vector<8x32xi1>
    %228 = vector.broadcast %cst_111 : f32 to vector<8x32xf32>
    %229 = arith.select %227, %225, %228 : vector<8x32xi1>, vector<8x32xf32>
    %cst_112 = arith.constant dense<0xFF800000> : vector<8xf32>
    %230 = vector.multi_reduction <maximumf>, %229, %cst_112 [1] : vector<8x32xf32> to vector<8xf32>
    %231 = vector.shape_cast %230 : vector<8xf32> to vector<8x1xf32>
    %232 = vector.broadcast %231 : vector<8x1xf32> to vector<8x32xf32>
    %233 = arith.subf %229, %232 : vector<8x32xf32>
    %234 = math.exp %233 : vector<8x32xf32>
    %cst_113 = arith.constant dense<0.000000e+00> : vector<8xf32>
    %235 = vector.multi_reduction <add>, %234, %cst_113 [1] : vector<8x32xf32> to vector<8xf32>
    %236 = vector.shape_cast %235 : vector<8xf32> to vector<8x1xf32>
    %237 = tpu.reciprocal %236 {approx = true} : vector<8x1xf32> -> vector<8x1xf32>
    %238 = vector.broadcast %237 : vector<8x1xf32> to vector<8x32xf32>
    %239 = arith.mulf %234, %238 : vector<8x32xf32>
    %240 = arith.truncf %239 : vector<8x32xf32> to vector<8x32xbf16>
    %c0_114 = arith.constant 0 : index
    %c64_115 = arith.constant 64 : index
    %241 = vector.load %arg20[%c0_114, %c64_115] : memref<32x128xbf16, #tpu.memory_space<vmem>>, vector<32x32xbf16>
    %cst_116 = arith.constant dense<0.000000e+00> : vector<8x32xf32>
    %242 = tpu.matmul %240, %241, %cst_116 {dimension_numbers = #tpu.dot_dimension_numbers<[1], [0], [0], [1], [0, 0, 1, 1], [], []>} : vector<8x32xbf16>, vector<32x32xbf16>, vector<8x32xf32> -> vector<8x32xf32>
    %243 = arith.truncf %242 : vector<8x32xf32> to vector<8x32xbf16>
    %244 = vector.extract_strided_slice %174 {offsets = [0, 96], sizes = [8, 32], strides = [1, 1]} : vector<8x128xbf16> to vector<8x32xbf16>
    %c96_117 = arith.constant 96 : index
    %c0_118 = arith.constant 0 : index
    %245 = vector.load %arg19[%c96_117, %c0_118] : memref<128x32xbf16, #tpu.memory_space<vmem>>, vector<32x32xbf16>
    %cst_119 = arith.constant dense<0.000000e+00> : vector<8x32xf32>
    %246 = tpu.matmul %244, %245, %cst_119 {dimension_numbers = #tpu.dot_dimension_numbers<[1], [0], [0], [1], [0, 0, 1, 1], [], []>} : vector<8x32xbf16>, vector<32x32xbf16>, vector<8x32xf32> -> vector<8x32xf32>
    %cst_120 = arith.constant 0.176776692 : f32
    %247 = vector.broadcast %cst_120 : f32 to vector<8x32xf32>
    %248 = arith.mulf %246, %247 : vector<8x32xf32>
    %cst_121 = arith.constant -1.000000e+09 : f32
    %249 = vector.shape_cast %10 : vector<1x32xi1> to vector<1x32xi1>
    %250 = vector.broadcast %249 : vector<1x32xi1> to vector<8x32xi1>
    %251 = vector.broadcast %cst_121 : f32 to vector<8x32xf32>
    %252 = arith.select %250, %248, %251 : vector<8x32xi1>, vector<8x32xf32>
    %cst_122 = arith.constant dense<0xFF800000> : vector<8xf32>
    %253 = vector.multi_reduction <maximumf>, %252, %cst_122 [1] : vector<8x32xf32> to vector<8xf32>
    %254 = vector.shape_cast %253 : vector<8xf32> to vector<8x1xf32>
    %255 = vector.broadcast %254 : vector<8x1xf32> to vector<8x32xf32>
    %256 = arith.subf %252, %255 : vector<8x32xf32>
    %257 = math.exp %256 : vector<8x32xf32>
    %cst_123 = arith.constant dense<0.000000e+00> : vector<8xf32>
    %258 = vector.multi_reduction <add>, %257, %cst_123 [1] : vector<8x32xf32> to vector<8xf32>
    %259 = vector.shape_cast %258 : vector<8xf32> to vector<8x1xf32>
    %260 = tpu.reciprocal %259 {approx = true} : vector<8x1xf32> -> vector<8x1xf32>
    %261 = vector.broadcast %260 : vector<8x1xf32> to vector<8x32xf32>
    %262 = arith.mulf %257, %261 : vector<8x32xf32>
    %263 = arith.truncf %262 : vector<8x32xf32> to vector<8x32xbf16>
    %c0_124 = arith.constant 0 : index
    %c96_125 = arith.constant 96 : index
    %264 = vector.load %arg20[%c0_124, %c96_125] : memref<32x128xbf16, #tpu.memory_space<vmem>>, vector<32x32xbf16>
    %cst_126 = arith.constant dense<0.000000e+00> : vector<8x32xf32>
    %265 = tpu.matmul %263, %264, %cst_126 {dimension_numbers = #tpu.dot_dimension_numbers<[1], [0], [0], [1], [0, 0, 1, 1], [], []>} : vector<8x32xbf16>, vector<32x32xbf16>, vector<8x32xf32> -> vector<8x32xf32>
    %266 = arith.truncf %265 : vector<8x32xf32> to vector<8x32xbf16>
    %267 = tpu.concatenate %197, %220, %243, %266 in 1 : vector<8x32xbf16>, vector<8x32xbf16>, vector<8x32xbf16>, vector<8x32xbf16> -> vector<8x128xbf16>
    %c3_127 = arith.constant 3 : index
    %c0_128 = arith.constant 0 : index
    %c0_129 = arith.constant 0 : index
    %268 = vector.load %arg10[%c3_127, %c0_128, %c0_129] : memref<4x128x128xbf16, #tpu.memory_space<vmem>>, vector<1x128x128xbf16>
    %269 = vector.shape_cast %268 : vector<1x128x128xbf16> to vector<128x128xbf16>
    %cst_130 = arith.constant dense<0.000000e+00> : vector<8x128xf32>
    %270 = tpu.matmul %267, %269, %cst_130 {dimension_numbers = #tpu.dot_dimension_numbers<[1], [0], [0], [1], [0, 0, 1, 1], [], []>} : vector<8x128xbf16>, vector<128x128xbf16>, vector<8x128xf32> -> vector<8x128xf32>
    %c3_131 = arith.constant 3 : index
    %c0_132 = arith.constant 0 : index
    %c0_133 = arith.constant 0 : index
    %271 = vector.load %arg11[%c3_131, %c0_132, %c0_133] : memref<4x1x128xf32, #tpu.memory_space<vmem>>, vector<1x1x128xf32>
    %272 = vector.shape_cast %271 : vector<1x1x128xf32> to vector<1x128xf32>
    %273 = vector.broadcast %272 : vector<1x128xf32> to vector<8x128xf32>
    %274 = arith.addf %270, %273 : vector<8x128xf32>
    %275 = arith.addf %141, %274 : vector<8x128xf32>
    %c2 = arith.constant 2 : index
    %c0_134 = arith.constant 0 : index
    %c0_135 = arith.constant 0 : index
    %276 = vector.load %arg6[%c2, %c0_134, %c0_135] : memref<3x1x128xf32, #tpu.memory_space<vmem>>, vector<1x1x128xf32>
    %277 = vector.shape_cast %276 : vector<1x1x128xf32> to vector<1x128xf32>
    %c2_136 = arith.constant 2 : index
    %c0_137 = arith.constant 0 : index
    %c0_138 = arith.constant 0 : index
    %278 = vector.load %arg7[%c2_136, %c0_137, %c0_138] : memref<3x1x128xf32, #tpu.memory_space<vmem>>, vector<1x1x128xf32>
    %279 = vector.shape_cast %278 : vector<1x1x128xf32> to vector<1x128xf32>
    %cst_139 = arith.constant dense<0.000000e+00> : vector<8xf32>
    %280 = vector.multi_reduction <add>, %275, %cst_139 [1] : vector<8x128xf32> to vector<8xf32>
    %281 = vector.shape_cast %280 : vector<8xf32> to vector<8x1xf32>
    %cst_140 = arith.constant 1.280000e+02 : f32
    %282 = vector.broadcast %cst_140 : f32 to vector<8x1xf32>
    %283 = arith.divf %281, %282 : vector<8x1xf32>
    %284 = vector.broadcast %283 : vector<8x1xf32> to vector<8x128xf32>
    %285 = arith.subf %275, %284 : vector<8x128xf32>
    %286 = arith.mulf %285, %285 : vector<8x128xf32>
    %cst_141 = arith.constant dense<0.000000e+00> : vector<8xf32>
    %287 = vector.multi_reduction <add>, %286, %cst_141 [1] : vector<8x128xf32> to vector<8xf32>
    %288 = vector.shape_cast %287 : vector<8xf32> to vector<8x1xf32>
    %cst_142 = arith.constant 1.270000e+02 : f32
    %289 = vector.broadcast %cst_142 : f32 to vector<8x1xf32>
    %290 = arith.divf %288, %289 : vector<8x1xf32>
    %291 = vector.broadcast %277 : vector<1x128xf32> to vector<8x128xf32>
    %292 = arith.mulf %291, %285 : vector<8x128xf32>
    %293 = math.sqrt %290 : vector<8x1xf32>
    %cst_143 = arith.constant 9.99999997E-7 : f32
    %294 = vector.broadcast %cst_143 : f32 to vector<8x1xf32>
    %295 = arith.addf %293, %294 : vector<8x1xf32>
    %296 = vector.broadcast %295 : vector<8x1xf32> to vector<8x128xf32>
    %297 = arith.divf %292, %296 : vector<8x128xf32>
    %298 = vector.broadcast %279 : vector<1x128xf32> to vector<8x128xf32>
    %299 = arith.addf %297, %298 : vector<8x128xf32>
    %300 = arith.truncf %299 : vector<8x128xf32> to vector<8x128xbf16>
    %c0_144 = arith.constant 0 : index
    %c0_145 = arith.constant 0 : index
    %301 = vector.load %arg12[%c0_144, %c0_145] : memref<128x256xbf16, #tpu.memory_space<vmem>>, vector<128x256xbf16>
    %cst_146 = arith.constant dense<0.000000e+00> : vector<8x256xf32>
    %302 = tpu.matmul %300, %301, %cst_146 {dimension_numbers = #tpu.dot_dimension_numbers<[1], [0], [0], [1], [0, 0, 1, 1], [], []>} : vector<8x128xbf16>, vector<128x256xbf16>, vector<8x256xf32> -> vector<8x256xf32>
    %c0_147 = arith.constant 0 : index
    %c0_148 = arith.constant 0 : index
    %303 = vector.load %arg13[%c0_147, %c0_148] : memref<1x256xf32, #tpu.memory_space<vmem>>, vector<1x256xf32>
    %304 = vector.broadcast %303 : vector<1x256xf32> to vector<8x256xf32>
    %305 = arith.addf %302, %304 : vector<8x256xf32>
    %cst_149 = arith.constant 0.000000e+00 : f32
    %306 = vector.broadcast %cst_149 : f32 to vector<8x256xf32>
    %307 = arith.maximumf %305, %306 : vector<8x256xf32>
    %308 = arith.truncf %307 : vector<8x256xf32> to vector<8x256xbf16>
    %c0_150 = arith.constant 0 : index
    %c0_151 = arith.constant 0 : index
    %309 = vector.load %arg14[%c0_150, %c0_151] : memref<256x128xbf16, #tpu.memory_space<vmem>>, vector<256x128xbf16>
    %cst_152 = arith.constant dense<0.000000e+00> : vector<8x128xf32>
    %310 = tpu.matmul %308, %309, %cst_152 {dimension_numbers = #tpu.dot_dimension_numbers<[1], [0], [0], [1], [0, 0, 1, 1], [], []>} : vector<8x256xbf16>, vector<256x128xbf16>, vector<8x128xf32> -> vector<8x128xf32>
    %c0_153 = arith.constant 0 : index
    %c0_154 = arith.constant 0 : index
    %311 = vector.load %arg15[%c0_153, %c0_154] : memref<1x128xf32, #tpu.memory_space<vmem>>, vector<1x128xf32>
    %312 = vector.broadcast %311 : vector<1x128xf32> to vector<8x128xf32>
    %313 = arith.addf %310, %312 : vector<8x128xf32>
    %314 = arith.addf %275, %313 : vector<8x128xf32>
    %c0_155 = arith.constant 0 : index
    %c0_156 = arith.constant 0 : index
    %c0_157 = arith.constant 0 : index
    %315 = vector.load %arg16[%c0_155, %c0_156, %c0_157] : memref<1x8x128xf32, #tpu.memory_space<vmem>>, vector<1x8x128xf32>
    %316 = vector.shape_cast %315 : vector<1x8x128xf32> to vector<8x128xf32>
    %317 = vector.shape_cast %314 : vector<8x128xf32> to vector<1x8x128xf32>
    tpu.vector_store %arg16[%c0_155, %c0_156, %c0_157], %317 {strides = array<i32>} : memref<1x8x128xf32, #tpu.memory_space<vmem>>, vector<1x8x128xf32>,
    return
  }
  func.func @transform_0(%arg0: i32, %arg1: i32) -> (i32, i32, i32) {
    %c0_i32 = arith.constant 0 : i32
    %c0_i32_0 = arith.constant 0 : i32
    %c0_i32_1 = arith.constant 0 : i32
    return %arg0, %c0_i32, %c0_i32_0 : i32, i32, i32
  }
  func.func @transform_1(%arg0: i32, %arg1: i32) -> (i32, i32, i32) {
    %c0_i32 = arith.constant 0 : i32
    %c0_i32_0 = arith.constant 0 : i32
    %c0_i32_1 = arith.constant 0 : i32
    return %arg0, %c0_i32, %c0_i32_0 : i32, i32, i32
  }
  func.func @transform_2(%arg0: i32, %arg1: i32) -> (i32, i32, i32) {
    %c0_i32 = arith.constant 0 : i32
    %c0_i32_0 = arith.constant 0 : i32
    %c0_i32_1 = arith.constant 0 : i32
    return %arg0, %c0_i32, %c0_i32_0 : i32, i32, i32
  }
  func.func @transform_3(%arg0: i32, %arg1: i32) -> (i32, i32, i32) {
    %c0_i32 = arith.constant 0 : i32
    %c0_i32_0 = arith.constant 0 : i32
    return %arg0, %arg1, %c0_i32 : i32, i32, i32
  }
  func.func @transform_4(%arg0: i32, %arg1: i32) -> (i32, i32, i32) {
    %c0_i32 = arith.constant 0 : i32
    %c0_i32_0 = arith.constant 0 : i32
    %c0_i32_1 = arith.constant 0 : i32
    %c0_i32_2 = arith.constant 0 : i32
    return %c0_i32, %c0_i32_0, %c0_i32_1 : i32, i32, i32
  }
  func.func @transform_5(%arg0: i32, %arg1: i32) -> (i32, i32, i32) {
    %c0_i32 = arith.constant 0 : i32
    %c0_i32_0 = arith.constant 0 : i32
    %c0_i32_1 = arith.constant 0 : i32
    %c0_i32_2 = arith.constant 0 : i32
    return %c0_i32, %c0_i32_0, %c0_i32_1 : i32, i32, i32
  }
  func.func @transform_6(%arg0: i32, %arg1: i32) -> (i32, i32, i32) {
    %c0_i32 = arith.constant 0 : i32
    %c0_i32_0 = arith.constant 0 : i32
    %c0_i32_1 = arith.constant 0 : i32
    %c0_i32_2 = arith.constant 0 : i32
    return %c0_i32, %c0_i32_0, %c0_i32_1 : i32, i32, i32
  }
  func.func @transform_7(%arg0: i32, %arg1: i32) -> (i32, i32, i32) {
    %c0_i32 = arith.constant 0 : i32
    %c0_i32_0 = arith.constant 0 : i32
    %c0_i32_1 = arith.constant 0 : i32
    %c0_i32_2 = arith.constant 0 : i32
    return %c0_i32, %c0_i32_0, %c0_i32_1 : i32, i32, i32
  }
  func.func @transform_8(%arg0: i32, %arg1: i32) -> (i32, i32, i32) {
    %c0_i32 = arith.constant 0 : i32
    %c0_i32_0 = arith.constant 0 : i32
    %c0_i32_1 = arith.constant 0 : i32
    %c0_i32_2 = arith.constant 0 : i32
    return %c0_i32, %c0_i32_0, %c0_i32_1 : i32, i32, i32
  }
  func.func @transform_9(%arg0: i32, %arg1: i32) -> (i32, i32, i32) {
    %c0_i32 = arith.constant 0 : i32
    %c0_i32_0 = arith.constant 0 : i32
    %c0_i32_1 = arith.constant 0 : i32
    %c0_i32_2 = arith.constant 0 : i32
    return %c0_i32, %c0_i32_0, %c0_i32_1 : i32, i32, i32
  }
  func.func @transform_10(%arg0: i32, %arg1: i32) -> (i32, i32) {
    %c0_i32 = arith.constant 0 : i32
    %c0_i32_0 = arith.constant 0 : i32
    %c0_i32_1 = arith.constant 0 : i32
    return %c0_i32, %c0_i32_0 : i32, i32
  }
  func.func @transform_11(%arg0: i32, %arg1: i32) -> (i32, i32) {
    %c0_i32 = arith.constant 0 : i32
    %c0_i32_0 = arith.constant 0 : i32
    %c0_i32_1 = arith.constant 0 : i32
    return %c0_i32, %c0_i32_0 : i32, i32
  }
  func.func @transform_12(%arg0: i32, %arg1: i32) -> (i32, i32) {
    %c0_i32 = arith.constant 0 : i32
    %c0_i32_0 = arith.constant 0 : i32
    %c0_i32_1 = arith.constant 0 : i32
    return %c0_i32, %c0_i32_0 : i32, i32
  }
  func.func @transform_13(%arg0: i32, %arg1: i32) -> (i32, i32) {
    %c0_i32 = arith.constant 0 : i32
    %c0_i32_0 = arith.constant 0 : i32
    %c0_i32_1 = arith.constant 0 : i32
    return %c0_i32, %c0_i32_0 : i32, i32
  }
  func.func @transform_14(%arg0: i32, %arg1: i32) -> (i32, i32, i32) {
    %c0_i32 = arith.constant 0 : i32
    %c0_i32_0 = arith.constant 0 : i32
    return %arg0, %arg1, %c0_i32 : i32, i32, i32
  }
}

</mosaic_0001>

<bundles_post_ra>
// kernel: tpu_custom_call.1
= control target key start
LH: loop header
LB: loop body
LE: loop exit
PB: predicated region body
PF: predicated region fallthrough
CT: control target
= control target key end

     0   :  { %s5863_s0 = inlined_call_operand.hbm [shape: f32[2,16,128], index: 0, kind: input, shape index: {}]   ;;  %s5864_s1 = inlined_call_operand.hbm [shape: f32[2,32,128], index: 1, kind: input, shape index: {}]   ;;  %s5865_s2 = inlined_call_operand.hbm [shape: s32[2,1,32], index: 2, kind: input, shape index: {}]   ;;  %s5866_s3 = inlined_call_operand.hbm [shape: s32[2,16,16], index: 3, kind: input, shape index: {}]   ;;  %s5867_s4 = inlined_call_operand.hbm [shape: f32[3,1,128], index: 4, kind: input, shape index: {}]   ;;  %s5868_s5 = inlined_call_operand.hbm [shape: f32[3,1,128], index: 5, kind: input, shape index: {}]   ;;  %s5869_s6 = inlined_call_operand.hbm [shape: bf16[4,128,128], index: 6, kind: input, shape index: {}]   ;;  %s5870_s7 = inlined_call_operand.vmem [shape: f32[4,1,128], index: 7, kind: input, shape index: {}]   ;;  %s5871_s8 = inlined_call_operand.hbm [shape: bf16[4,128,128], index: 8, kind: input, shape index: {}]   ;;  %s5872_s9 = inlined_call_operand.vmem [shape: f32[4,1,128], index: 9, kind: input, shape index: {}]   ;;  %s5873_s10 = inlined_call_operand.hbm [shape: bf16[128,256], index: 10, kind: input, shape index: {}]   ;;  %s5874_s11 = inlined_call_operand.vmem [shape: f32[1,256], index: 11, kind: input, shape index: {}]   ;;  %s5875_s12 = inlined_call_operand.hbm [shape: bf16[256,128], index: 12, kind: input, shape index: {}]   ;;  %s5876_s13 = inlined_call_operand.vmem [shape: f32[1,128], index: 13, kind: input, shape index: {}]   ;;  %s5877_s14 = inlined_call_operand.hbm [shape: f32[2,16,128], index: 14, kind: output, shape index: {}]  }
   0x1   :  { %5902 = sst [smem:[#allocation38_spill]] %s5863_s0 }
   0x2   :  { %5903 = sst [smem:[#allocation39_spill]] %s5864_s1 }
   0x3   :  { %5904 = sst [smem:[#allocation40_spill]] %s5865_s2 }
   0x4   :  { %5905 = sst [smem:[#allocation41_spill]] %s5866_s3 }
   0x5   :  { %5906 = sst [smem:[#allocation42_spill]] %s5867_s4 }
   0x6   :  { %5907 = sst [smem:[#allocation43_spill]] %s5868_s5 }
   0x7   :  { %5908 = sst [smem:[#allocation44_spill]] %s5869_s6 }
   0x8   :  { %5909 = sst [smem:[#allocation45_spill]] %s5870_s7 }
   0x9   :  { %5910 = sst [smem:[#allocation46_spill]] %s5871_s8 }
   0xa   :  { %5911 = sst [smem:[#allocation47_spill]] %s5872_s9 }
   0xb   :  { %5912 = sst [smem:[#allocation48_spill]] %s5873_s10 }
   0xc   :  { %5913 = sst [smem:[#allocation49_spill]] %s5874_s11 }
   0xd   :  { %5914 = sst [smem:[#allocation50_spill]] %s5875_s12 }
   0xe   :  { %5915 = sst [smem:[#allocation51_spill]] %s5876_s13 }
   0xf   :  { %5916 = sst [smem:[#allocation52_spill]] %s5877_s14 }
  0x10   :  { %19 = vsyncpa [#allocation7], 0 }
  0x11   :  { %21 = vsyncpa [#allocation7 + $0x1], 0 }
  0x12   :  { %22 = vsyncpa [#allocation10], 0 }
  0x13   :  { %24 = vsyncpa [#allocation10 + $0x1], 0 }
  0x14   :  { %25 = vsyncpa [#allocation13], 0 }
  0x15   :  { %27 = vsyncpa [#allocation13 + $0x1], 0 }
  0x16   :  { %28 = vsyncpa [#allocation16], 0 }
  0x17   :  { %29 = vsyncpa [#allocation19], 0 }
  0x18   :  { %30 = vsyncpa [#allocation22], 0 }
  0x19   :  { %31 = vsyncpa [#allocation8], 0 }
  0x1a   :  { %33 = vsyncpa [#allocation8 + $0x1], 0  ;;  %s5176_s29 = smov 0   ;;  %s5178_s30 = smov 0  }
  0x1b   :  { %s5180_s15 = smov 0   ;;  %s5182_s16 = smov 0  }
  0x1c   :  { %s5184_s17 = smov 0   ;;  %s5186_s18 = smov 0  }
  0x1d   :  { %s5188_s19 = smov 0   ;;  %s5190_s20 = smov 0  }
  0x1e   :  { %s5192_s21 = smov 0   ;;  %s5194_s22 = smov 0  }
  0x1f   :  { %s5196_s23 = smov 0  }
  0x20 LB: > { %5917 = sst [smem:[#allocation32_spill]] %s5050_s17  ;;  %s5232_s24 = sadd.s32 4294967295, %s5074_s23   ;;  %s5074_s23 = sphi %s5196_s23, %s39_s23   ;;  %s5070_s22 = sphi %s5194_s22, %s5986_s22   ;;  %s5066_s21 = sphi %s5192_s21, %s5985_s21   ;;  %s5062_s20 = sphi %s5190_s20, %s5984_s20   ;;  %s5058_s19 = sphi %s5188_s19, %s5983_s19   ;;  %s5054_s18 = sphi %s5186_s18, %s5982_s18   ;;  %s5050_s17 = sphi %s5184_s17, %s5981_s17   ;;  %s5046_s16 = sphi %s5182_s16, %s5977_s16   ;;  %s5042_s15 = sphi %s5180_s15, %s5980_s15   ;;  %s5038_s30 = sphi %s5178_s30, %s5979_s30   ;;  %s5034_s29 = sphi %s5176_s29, %s5978_s29  }
  0x21   : > { %5918 = sst [smem:[#allocation33_spill]] %s5058_s19  ;;  %p3622_p0 = scmp.ge.s32.totalorder %s5074_s23, 1 }
  0x22   : > { %5919 = sst [smem:[#allocation34_spill]] %s5062_s20  ;;  %p5896_p1 = scmp.eq.s32.totalorder %s5232_s24, 0 }
  0x23   : > { %5920 = sst [smem:[#allocation35_spill]] %s5232_s24  ;;  %p400_p2 = scmp.lt.s32.totalorder %s5074_s23, 5 }
  0x24   : > { %s5076_s26 = smov [#allocation14]   ;;  %s5077_s14 = smov [#allocation15]  }
  0x25   : > { %p5237_p3 = pnand %p3622_p0, %p400_p2  ;;  %s412_s27 = sshll.u32 %s5076_s26, 4  ;;  %s413_s27 = int_to_ptr.vmem [resolvable:$true] %s412_s27 }
  0x26   : > { %s425_s13 = sshll.u32 %s5077_s14, 4  ;;  %s4673_s11 = scalar_lea.vmem %s413_s27, 48  ;;  %s426_s13 = int_to_ptr.vmem [resolvable:$true] %s425_s13 }
  0x27   : > { %s5921_s25 = scalar_select %p5237_p3, 1, 0 }
  0x28   : > { %p4328_p4 = pneg %p5237_p3  ;;  %p4674_p7 = scmp.ne.s32.totalorder %s413_s27, %s4673_s11 }
  0x29   : > { %5922 = sst [smem:[#allocation36_spill]] %s5921_s25  ;;  %s4680_s26 = scalar_lea.vmem %s413_s27, 64 }
  0x2a   : > { %p5245_p5 = pnand %p4328_p4, %p5896_p1  ;;  %p4681_p10 = scmp.lt.s32.totalorder %s413_s27, %s413_s27 }
  0x2b   : > { %p4682_p11 = scmp.lt.s32.totalorder %s4680_s26, %s4673_s11 }
  0x2c   : > { %p5251_p6 = pneg %p5245_p5 }
  0x2d   : > { %p4683_p12 = por %p4682_p11, %p4681_p10 }
  0x2e   : > { %p4676_p8 = pnand %p4674_p7, %p5251_p6 }
  0x30   : > { %p4677_p9 = pneg %p4676_p8 }
  0x32   : > { %p4684_p13 = pnand %p4683_p12, %p4677_p9 }
  0x34   : > { %4687 = shalt.err (!%p4684_p13)
}
  0x35   : > { %s5078_s9 = smov 16   ;;  %s5079_s14 = smov 1  }
  0x36   : > { %s5925_s4 = sld [smem:[#allocation42_spill]]  ;;  %s4699_s25 = scalar_lea.vmem %s426_s13, 48 }
  0x37   : > { %p4700_p0 = scmp.ne.s32.totalorder %s426_s13, %s4699_s25  ;;  %s4706_s3 = scalar_lea.vmem %s426_s13, 64 }
  0x38   : > { %p4707_p7 = scmp.lt.s32.totalorder %s426_s13, %s426_s13  ;;  %p4708_p8 = scmp.lt.s32.totalorder %s4706_s3, %s4699_s25 }
  0x39   : > { %p4702_p2 = pnand %p4700_p0, %p5251_p6 }
  0x3a   : > { %p4709_p10 = por %p4708_p8, %p4707_p7 }
  0x3b   : > { %p4703_p4 = pneg %p4702_p2 }
  0x3c   : > { %4331 = dma.hbm_to_vmem [thread:$0]  (!%p5245_p5), %s5925_s4, 48, %s413_s27, [#allocation13], %s5078_s9, %s5078_s9, %s5079_s14  }
  0x3d   : > { %p4710_p9 = pnand %p4709_p10, %p4703_p4 }
  0x3f   : > { %4713 = shalt.err (!%p4710_p9)
}
  0x40   : > { %s5926_s5 = sld [smem:[#allocation43_spill]]  ;;  %s5080_s7 = smov [#allocation18]  }
  0x41   : > { %s454_s19 = sshll.u32 %s5080_s7, 4  ;;  %s455_s19 = int_to_ptr.vmem [resolvable:$true] %s454_s19 }
  0x42   : > { %s4725_s27 = scalar_lea.vmem %s455_s19, 4096  ;;  %p4733_p0 = scmp.lt.s32.totalorder %s455_s19, %s455_s19 }
  0x43   : > { %p4726_p11 = scmp.ne.s32.totalorder %s455_s19, %s4725_s27  ;;  %p4734_p2 = scmp.lt.s32.totalorder %s4725_s27, %s4725_s27 }
  0x45   : > { %p4728_p12 = pnand %p4726_p11, %p5251_p6  ;;  %p4735_p7 = por %p4734_p2, %p4733_p0 }
  0x46   : > { %4334 = dma.hbm_to_vmem [thread:$0]  (!%p5245_p5), %s5926_s5, 48, %s426_s13, [#allocation16], %s5078_s9, %s5078_s9, %s5079_s14  }
  0x47   : > { %p4729_p13 = pneg %p4728_p12 }
  0x49   : > { %p4736_p4 = pnand %p4735_p7, %p4729_p13 }
  0x4b   : > { %4739 = shalt.err (!%p4736_p4)
}
  0x4c   : > { %s5885_s3 = smov 64   ;;  %s5887_s9 = smov 4  }
  0x4d   : > { %s5927_s8 = sld [smem:[#allocation46_spill]]  ;;  %p65_p8 = scmp.ne.s32.totalorder %s5054_s18, %s5050_s17 }
  0x4e   : > { %p5897_p10 = scmp.eq.s32.totalorder %s5074_s23, 0  ;;  %p71_p9 = scmp.ne.s32.totalorder %s5050_s17, %s5046_s16 }
  0x4f   : > { %p5895_p13 = scmp.lt.s32.totalorder %s5074_s23, 4  ;;  %s5294_s11 = sand.u32 1, %s5054_s18  }
  0x50   : > { %p67_p11 = por %p5897_p10, %p65_p8  ;;  %p5288_p12 = por %p5896_p1, %p71_p9 }
  0x51   : > { %s5899_s26 = sand.u32 1, %s5074_s23   ;;  %s3633_s7 = sshll.u32 %s5294_s11, 5 }
  0x52   : > { %s5928_s14 = scalar_select %p5288_p12, 1, 0 }
  0x53   : > { %4340 = dma.hbm_to_vmem [thread:$0]  (!%p5245_p5), %s5927_s8, 4096, %s455_s19, [#allocation19], %s5885_s3, %s5885_s3, %s5887_s9  }
  0x54   : > { %5929 = sst [smem:[#allocation37_spill]] %s5928_s14  ;;  %p5300_p0 = pnand %p5895_p13, %p67_p11 }
  0x55   : > { %s3851_s16 = sshll.u32 %s5070_s22, 9  ;;  %s5931_s1 = sld [smem:[#allocation39_spill]] }
  0x56   : > { %s528_s3 = scalar_lea.vmem [#allocation9], %s3633_s7  ;;  %s5083_s4 = smov [#allocation17]  }
  0x57   : > { %s535_s9 = sshll.u32 %s528_s3, 4  ;;  %s438_s5 = sshll.u32 %s5083_s4, 4  ;;  %s536_s9 = int_to_ptr.vmem [resolvable:$true] %s535_s9  ;;  %s439_s5 = int_to_ptr.vmem [resolvable:$true] %s438_s5 }
  0x58   : > { %s5310_s8 = scalar_lea.sflag [#allocation10], %s5899_s26  ;;  %p5898_p2 = pneg %p5300_p0 }
  0x59   : > { %s4753_s14 = scalar_lea.vmem %s536_s9, 512  ;;  %s5084_s17 = smov [#allocation9]  }
  0x5a   : > { %p4754_p7 = scmp.ne.s32.totalorder %s536_s9, %s4753_s14  ;;  %s4758_s24 = sshll.u32 %s5084_s17, 4  ;;  %s4759_s24 = int_to_ptr.vmem [resolvable:$false] %s4758_s24 }
  0x5b   : > { %s534_s25 = scalar_lea.hbm %s5931_s1, %s3851_s16  ;;  %s4760_s16 = scalar_lea.vmem %s4759_s24, 1024 }
  0x5c   : > { %p4756_p4 = pnand %p4754_p7, %p5898_p2  ;;  %p4761_p9 = scmp.lt.s32.totalorder %s536_s9, %s4759_s24 }
  0x5d   : > { %p4762_p11 = scmp.lt.s32.totalorder %s4760_s16, %s4753_s14 }
  0x5e   : > { %p4757_p8 = pneg %p4756_p4 }
  0x5f   : > { %p4763_p13 = por %p4762_p11, %p4761_p9 }
  0x61   : > { %p4764_p1 = pnand %p4763_p13, %p4757_p8 }
  0x63   : > { %4767 = shalt.err (!%p4764_p1)
}
  0x64   : > { %s5900_s4 = smov 128   ;;  %s5901_s3 = smov 8  }
  0x65   : > { %4353 = dma.hbm_to_vmem [thread:$0]  (!%p5300_p0), %s534_s25, 512, %s536_s9, %s5310_s8, %s5900_s4, %s5900_s4, %s5901_s3  }
  0x66   : > { %s4779_s7 = scalar_lea.vmem %s439_s5, 4096  ;;  %p4787_p2 = scmp.lt.s32.totalorder %s439_s5, %s439_s5 }
  0x67   : > { %p4780_p7 = scmp.ne.s32.totalorder %s439_s5, %s4779_s7  ;;  %p4788_p9 = scmp.lt.s32.totalorder %s4779_s7, %s4779_s7 }
  0x69   : > { %p4782_p4 = pnand %p4780_p7, %p5251_p6  ;;  %p4789_p13 = por %p4788_p9, %p4787_p2 }
  0x6b   : > { %p4783_p10 = pneg %p4782_p4 }
  0x6d   : > { %p4790_p1 = pnand %p4789_p13, %p4783_p10 }
  0x6f   : > { %4793 = shalt.err (!%p4790_p1)
}
  0x70   : > { %s5932_s17 = smov 4   ;;  %s5933_s24 = smov 64  }
  0x71   : > { %s5934_s6 = sld [smem:[#allocation44_spill]]  ;;  %s5087_s9 = smov [#allocation20]  }
  0x72   : > { %s470_s13 = sshll.u32 %s5087_s9, 4  ;;  %s5088_s25 = smov [#allocation21]   ;;  %s471_s13 = int_to_ptr.vmem [resolvable:$true] %s470_s13 }
  0x73   : > { %s486_s16 = sshll.u32 %s5088_s25, 4  ;;  %s4805_s26 = scalar_lea.vmem %s471_s13, 2048  ;;  %s487_s16 = int_to_ptr.vmem [resolvable:$true] %s486_s16 }
  0x74   : > { %p4806_p8 = scmp.ne.s32.totalorder %s471_s13, %s4805_s26  ;;  %p4813_p11 = scmp.lt.s32.totalorder %s471_s13, %s471_s13 }
  0x75   : > { %p4814_p7 = scmp.lt.s32.totalorder %s4805_s26, %s4805_s26 }
  0x76   : > { %p4808_p10 = pnand %p4806_p8, %p5251_p6 }
  0x77   : > { %4337 = dma.hbm_to_vmem [thread:$0]  (!%p5245_p5), %s5934_s6, 4096, %s439_s5, [#allocation16], %s5933_s24, %s5933_s24, %s5932_s17  }
  0x78   : > { %p4809_p2 = pneg %p4808_p10  ;;  %p4815_p4 = por %p4814_p7, %p4813_p11 }
  0x7a   : > { %p4816_p9 = pnand %p4815_p4, %p4809_p2 }
  0x7c   : > { %4819 = shalt.err (!%p4816_p9)
}
  0x7d   : > { %s5935_s10 = sld [smem:[#allocation48_spill]]  ;;  %s4831_s14 = scalar_lea.vmem %s487_s16, 2048 }
  0x7e   : > { %p4832_p13 = scmp.ne.s32.totalorder %s487_s16, %s4831_s14  ;;  %p4839_p10 = scmp.lt.s32.totalorder %s487_s16, %s487_s16 }
  0x7f   : > { %p4840_p11 = scmp.lt.s32.totalorder %s4831_s14, %s4831_s14 }
  0x80   : > { %p4834_p1 = pnand %p4832_p13, %p5251_p6 }
  0x81   : > { %p4841_p2 = por %p4840_p11, %p4839_p10 }
  0x82   : > { %p4835_p8 = pneg %p4834_p1 }
  0x83   : > { %4343 = dma.hbm_to_vmem [thread:$0]  (!%p5245_p5), %s5935_s10, 2048, %s471_s13, [#allocation19], %s5900_s4, %s5900_s4, %s5901_s3  }
  0x84   : > { %p4842_p7 = pnand %p4841_p2, %p4835_p8 }
  0x86   : > { %4845 = shalt.err (!%p4842_p7)
}
  0x87   : > { %s5936_s12 = sld [smem:[#allocation50_spill]]  ;;  %s3630_s20 = sshll.u32 %s5294_s11, 4 }
  0x88   : > { %s3850_s9 = sshll.u32 %s5070_s22, 8  ;;  %s5937_s0 = sld [smem:[#allocation38_spill]] }
  0x89   : > { %s507_s7 = scalar_lea.vmem [#allocation6], %s3630_s20  ;;  %s3636_s14 = sshll.u32 %s5070_s22, 4 }
  0x8a   : > { %s514_s28 = sshll.u32 %s507_s7, 4  ;;  %s504_s4 = scalar_lea.sflag [#allocation7], %s5294_s11  ;;  %s515_s28 = int_to_ptr.vmem [resolvable:$true] %s514_s28 }
  0x8b   : > { %s4859_s3 = scalar_lea.vmem %s515_s28, 256  ;;  %p5938_p4 = pneg %p5300_p0 }
  0x8c   : > { %p4860_p6 = scmp.ne.s32.totalorder %s515_s28, %s4859_s3  ;;  %s5089_s26 = smov [#allocation6]  }
  0x8d   : > { %4346 = dma.hbm_to_vmem [thread:$0]  (!%p5245_p5), %s5936_s12, 2048, %s487_s16, [#allocation22], %s5933_s24, %s5933_s24, %s5932_s17  }
  0x8e   : > { %s513_s5 = scalar_lea.hbm %s5937_s0, %s3850_s9  ;;  %p4862_p9 = pnand %p4860_p6, %p5938_p4 }
  0x8f   : > { %s4864_s27 = sshll.u32 %s5089_s26, 4  ;;  %s4865_s27 = int_to_ptr.vmem [resolvable:$false] %s4864_s27 }
  0x90   : > { %p4863_p13 = pneg %p4862_p9  ;;  %s4866_s17 = scalar_lea.vmem %s4865_s27, 512 }
  0x91   : > { %p4867_p5 = scmp.lt.s32.totalorder %s515_s28, %s4865_s27  ;;  %p4868_p1 = scmp.lt.s32.totalorder %s4866_s17, %s4859_s3 }
  0x93   : > { %p4869_p8 = por %p4868_p1, %p4867_p5 }
  0x95   : > { %p4870_p10 = pnand %p4869_p8, %p4863_p13 }
  0x97   : > { %4873 = shalt.err (!%p4870_p10)
}
  0x98   : > { %s5939_s24 = smov 8   ;;  %s5940_s16 = smov 128  }
  0x99   : > { %4350 = dma.hbm_to_vmem [thread:$0]  (!%p5300_p0), %s513_s5, 256, %s515_s28, %s504_s4, %s5940_s16, %s5940_s16, %s5939_s24  }
  0x9a   : > { %s5941_s2 = sld [smem:[#allocation40_spill]]  ;;  %s548_s25 = scalar_lea.vmem [#allocation11], %s5294_s11 }
  0x9b   : > { %s555_s7 = sshll.u32 %s548_s25, 4  ;;  %p5942_p2 = pmov %p5938_p4  ;;  %s556_s7 = int_to_ptr.vmem [resolvable:$true] %s555_s7 }
  0x9c   : > { %s4887_s26 = scalar_lea.vmem %s556_s7, 16  ;;  %s5090_s3 = smov [#allocation11]  }
  0x9d   : > { %p4888_p11 = scmp.ne.s32.totalorder %s556_s7, %s4887_s26  ;;  %s4892_s27 = sshll.u32 %s5090_s3, 4  ;;  %s4893_s27 = int_to_ptr.vmem [resolvable:$false] %s4892_s27 }
  0x9e   : > { %s4894_s17 = scalar_lea.vmem %s4893_s27, 32  ;;  %p4895_p4 = scmp.lt.s32.totalorder %s556_s7, %s4893_s27 }
  0x9f   : > { %p4890_p7 = pnand %p4888_p11, %p5942_p2  ;;  %p4896_p9 = scmp.lt.s32.totalorder %s4894_s17, %s4887_s26 }
  0xa0   : > { %s553_s13 = scalar_lea.hbm %s5941_s2, %s3636_s14 }
  0xa1   : > { %p4891_p6 = pneg %p4890_p7  ;;  %p4897_p13 = por %p4896_p9, %p4895_p4 }
  0xa3   : > { %p4898_p5 = pnand %p4897_p13, %p4891_p6 }
  0xa5   : > { %4901 = shalt.err (!%p4898_p5)
}
  0xa6   : > { %s5943_s11 = sld [smem:[#allocation35_spill]]  ;;  %s3621_s4 = sadd.s32 4294967294, %s5074_s23  }
  0xa7   : > { %4356 = dma.hbm_to_vmem [thread:$0]  (!%p5300_p0), %s553_s13, 16, %s556_s7, %s5310_s8  }
  0xa8   : > { %s48_s5 = sadd.s32 1, %s5066_s21  ;;  %s51_s28 = sadd.s32 1, %s5070_s22 }
  0xa9   : > { %p49_p1 = scmp.ge.s32.totalorder %s48_s5, 2  ;;  %s58_s19 = sadd.s32 1, %s5054_s18 }
  0xaa   : > { %s138_s14 = sadd.s32 1, %s5042_s15  ;;  %p145_p8 = scmp.ne.s32.totalorder %s5042_s15, %s5038_s30 }
  0xab   : > { %s5988_s5 = smov (%p49_p1, %s48_s5), 0  ;;  %s5990_s28 = smov (!%p49_p1, %s51_s28), %s5070_s22 }
  0xac   : > { %s134_s24 = ssub.s32 %s5066_s21, %s5988_s5  ;;  %p5944_p10 = scmp.eq.s32.totalorder %s5074_s23, 0 }
  0xad   : > { %p53_p0 = scmp.ge.s32.totalorder %s5990_s28, 2  ;;  %p151_p2 = scmp.ne.s32.totalorder %s5038_s30, %s5034_s29 }
  0xae   : > { %p5392_p11 = por %p145_p8, %p5944_p10  ;;  %p387_p7 = scmp.eq.s32.totalorder %s5943_s11, 3 }
  0xaf   : > { %p393_p6 = scmp.eq.s32.totalorder %s3621_s4, 3  ;;  %s5992_s28 = smov (%p53_p0, %s5990_s28), 0 }
  0xb0   : > { %p5946_p4 = scmp.eq.s32.totalorder %s5943_s11, 0  ;;  %p5407_p13 = por %p387_p7, %p145_p8 }
  0xb1   : > { %s55_s9 = ssub.s32 %s5070_s22, %s5992_s28  ;;  %p5413_p5 = por %p393_p6, %p151_p2 }
  0xb2   : > { %p5403_p9 = por %p151_p2, %p5946_p4  ;;  %p56_p1 = scmp.eq.s32.totalorder %s55_s9, 0 }
  0xb3   : > { %s5949_s13 = scalar_select %p5413_p5, 1, 0 }
  0xb4   : > { %s135_s25 = sor.u32 %s134_s24, %s55_s9  ;;  %s564_s3 = sand.u32 1, %s5042_s15  }
  0xb5   : > { %p136_p10 = scmp.eq.s32.totalorder %s135_s25, 0  ;;  %s3638_s27 = sshll.u32 %s5070_s22, 1 }
  0xb6   : > { %s5418_s7 = scalar_select %p56_p1, %s5054_s18, %s58_s19  }
  0xb7   : > { %s5421_s26 = scalar_select %p136_p10, %s5042_s15, %s138_s14  }
  0xb8   : > { %s3637_s17 = sshll.u32 %s564_s3, 3  ;;  %s571_s11 = sadd.s32 %s5066_s21, %s3638_s27 }
  0xb9   : > { %s3639_s4 = sshll.u32 %s571_s11, 7  ;;  %s5950_s2 = sld [smem:[#allocation41_spill]] }
  0xba   : > { %s566_s10 = scalar_lea.vmem [#allocation12], %s3637_s17  ;;  %p5951_p8 = scmp.lt.s32.totalorder %s5074_s23, 4 }
  0xbb   : > { %s575_s12 = sshll.u32 %s566_s10, 4  ;;  %s5953_s19 = sand.u32 1, %s5074_s23   ;;  %s576_s12 = int_to_ptr.vmem [resolvable:$true] %s575_s12 }
  0xbc   : > { %p5433_p0 = pnand %p5951_p8, %p5392_p11  ;;  %s563_s14 = scalar_lea.sflag [#allocation13], %s5953_s19 }
  0xbd   : > { %s4915_s9 = scalar_lea.vmem %s576_s12, 128  ;;  %s5091_s0 = smov [#allocation12]  }
  0xbe   : > { %p4904_p2 = pneg %p5433_p0  ;;  %p4916_p7 = scmp.ne.s32.totalorder %s576_s12, %s4915_s9 }
  0xbf   : > { %s573_s6 = scalar_lea.hbm %s5950_s2, %s3639_s4  ;;  %s4920_s1 = sshll.u32 %s5091_s0, 4  ;;  %s4921_s1 = int_to_ptr.vmem [resolvable:$false] %s4920_s1 }
  0xc0   : > { %p4918_p6 = pnand %p4916_p7, %p4904_p2  ;;  %s4922_s2 = scalar_lea.vmem %s4921_s1, 256 }
  0xc1   : > { %p4923_p1 = scmp.lt.s32.totalorder %s576_s12, %s4921_s1  ;;  %p4924_p10 = scmp.lt.s32.totalorder %s4922_s2, %s4915_s9 }
  0xc2   : > { %p4919_p4 = pneg %p4918_p6 }
  0xc3   : > { %p4925_p5 = por %p4924_p10, %p4923_p1 }
  0xc5   : > { %p4926_p11 = pnand %p4925_p5, %p4919_p4 }
  0xc7   : > { %4929 = shalt.err (!%p4926_p11)
}
  0xc8   : > { %4359 = dma.hbm_to_vmem [thread:$0]  (!%p5433_p0), %s573_s6, 128, %s576_s12, %s563_s14  }
  0xc9   : > { %584 = sbr.rel (%p5237_p3) target bundleno = 6492 (0x195c), region = 76  ;;  %s5955_s8 = sld [smem:[#allocation32_spill]] (!%p5237_p3) }
  0xcf   : > { %s5446_s3 = sand.u32 1, %s5955_s8  }
  0xd0   : > { %s3641_s27 = sshll.u32 %s5446_s3, 4  ;;  %s587_s17 = scalar_lea.sflag [#allocation7], %s5446_s3 }
  0xd1   : > { %s5450_s11 = scalar_lea.vmem [#allocation6], %s3641_s27 }
  0xd2   : > { %5001 = dma.done.wait (%p5288_p12), %s587_s17, 256  }
  0xd3   : > { %5003 = vsyncadd (%p5288_p12), %s587_s17, 4294967040  ;;  %s5957_s4 = sld [smem:[#allocation35_spill]]  ;;  %s3642_s12 = sshll.u32 %s5446_s3, 5 }
  0xd4   : > { %s5458_s19 = scalar_lea.vmem [#allocation9], %s3642_s12 }
  0xd9   : > { %s595_s6 = sand.u32 1, %s5957_s4  }
  0xda   : > { %s596_s24 = scalar_lea.sflag [#allocation10], %s595_s6 }
  0xdb   : > { %5005 = dma.done.wait (%p5288_p12), %s596_s24, 528  }
  0xdc   : > { %5007 = vsyncadd (%p5288_p12), %s596_s24, 4294966768  ;;  %s614_s14 = sand.u32 1, %s5038_s30   ;;  %s607_s0 = scalar_lea.vmem [#allocation11], %s5446_s3 }
  0xdd   : > { %s5467_s9 = sshll.u32 %s614_s14, 3  ;;  %s613_s1 = scalar_lea.sflag [#allocation13], %s595_s6 }
  0xde   : > { %s616_s2 = scalar_lea.vmem [#allocation12], %s5467_s9 }
  0xdf   : > { %5009 = dma.done.wait (%p5403_p9), %s613_s1, 128  }
  0xe0   : > { %5011 = vsyncadd (%p5403_p9), %s613_s1, 4294967168  ;;  %p5958_p3 = scmp.eq.s32.totalorder %s5957_s4, 0 }
  0xe2   : > { %5013 = dma.done.wait (%p5958_p3), [#allocation13], 48   ;;  %p5959_p12 = pmov %p5958_p3 }
  0xe3   : > { %p5960_p5 = pmov %p5958_p3 }
  0xe4   : > { %5015 = vsyncadd (%p5959_p12), [#allocation13], 4294967248 }
  0xe5   : > { %5017 = dma.done.wait (%p5960_p5), [#allocation16], 4144   ;;  %p5961_p8 = pmov %p5958_p3 }
  0xe6   : > { %p5962_p0 = pmov %p5958_p3 }
  0xe7   : > { %5019 = vsyncadd (%p5961_p8), [#allocation16], 4294963152 }
  0xe8   : > { %5021 = dma.done.wait (%p5962_p0), [#allocation19], 6144   ;;  %p5963_p2 = pmov %p5962_p0 }
  0xe9   : > { %p5964_p9 = pmov %p5962_p0 }
  0xea   : > { %5023 = vsyncadd (%p5963_p2), [#allocation19], 4294961152 }
  0xeb   : > { %5025 = dma.done.wait (%p5964_p9), [#allocation22], 2048   ;;  %p5965_p7 = pmov %p5962_p0 }
  0xec   : > { %s698_s16 = scalar_lea.vmem [#allocation23], %s5467_s9  ;;  %s5966_s10 = sld [smem:[#allocation33_spill]] }
  0xed   : > { %5027 = vsyncadd (%p5965_p7), [#allocation22], 4294965248 }
  0xf2   : > { %p3651_p6 = scmp.ne.s32.totalorder %s5966_s10, 0 }
  0xf3   : > { %s5967_s27 = sld [smem:[#allocation45_spill]] (!%p3651_p6) }
  0xf4   : > { %703 = sbr.rel (%p3651_p6) target bundleno = 943 (0x3af), region = 120  ;;  %s5968_s24 = sld [smem:[#allocation47_spill]] (!%p3651_p6) }
  0xf9   : > { %v704_v0 = vld [vmem:[%s5450_s11] sm:$0xff]  ;;  %v705_v1 = vld [vmem:[%s5450_s11 + $0x8] sm:$0xff]  ;;  %v5092_v11 = vmov 0.0   ;;  %vm5093_vm0 = vmmov 0   ;;  %vm950_vm5 = vcmask 125952   ;;  %vm1293_vm6 = vcmask 257024  }
  0xfa   : > { %708 = vadd.xlane.f32.xlu0 %v704_v0  ;;  %v4487_v10 = vld [vmem:[#allocation17 + $0x78] sm:$0xff]   ;;  %4014 = vmatprep.subr.bf16.mxu0 %v5092_v11  ;;  %v4489_v13 = vld [vmem:[#allocation17 + $0x70] sm:$0xff]   ;;  %v4491_v15 = vld [vmem:[#allocation17 + $0x68] sm:$0xff]  }
  0xfb   : > { %4034 = vmatprep.subr.bf16.mxu1 %v5092_v11  ;;  %v4488_v12 = vld [vmem:[#allocation17 + $0xb8] sm:$0xff]   ;;  %4015 = vmatpush3.bf16.msra.mxu0 %v4487_v10  ;;  %v4490_v14 = vld [vmem:[#allocation17 + $0xb0] sm:$0xff]   ;;  %v4492_v16 = vld [vmem:[#allocation17 + $0xa8] sm:$0xff]  }
  0xfc   : > { %4035 = vmatpush3.bf16.msra.mxu1 %v4488_v12  ;;  %4016 = vmatprep.subr.bf16.mxu0 %v5092_v11  ;;  %v4493_v17 = vld [vmem:[#allocation17 + $0x60] sm:$0xff]   ;;  %v4495_v19 = vld [vmem:[#allocation17 + $0x58] sm:$0xff]   ;;  %v4497_v21 = vld [vmem:[#allocation17 + $0x50] sm:$0xff]  }
  0xfd   : > { %4036 = vmatprep.subr.bf16.mxu1 %v5092_v11  ;;  %v4494_v18 = vld [vmem:[#allocation17 + $0xa0] sm:$0xff]   ;;  %v4496_v20 = vld [vmem:[#allocation17 + $0x98] sm:$0xff]   ;;  %4030 = vmatprep.mubr.msk.bf16.mxu0 %vm5093_vm0, %v5092_v11  ;;  %v4498_v22 = vld [vmem:[#allocation17 + $0x90] sm:$0xff]  }
  0xfe   : > { %710 = vadd.xlane.f32.xlu0 %v705_v1  ;;  %4050 = vmatprep.mubr.msk.bf16.mxu1 %vm5093_vm0, %v5092_v11  ;;  %v4499_v23 = vld [vmem:[#allocation17 + $0x48] sm:$0xff]   ;;  %v4501_v25 = vld [vmem:[#allocation17 + $0x40] sm:$0xff]   ;;  %v4503_v27 = vld [vmem:[#allocation18 + $0x78] sm:$0xff]  }
  0xff   : > { %4017 = vmatpush3.bf16.msra.mxu0 %v4489_v13  ;;  %v4500_v24 = vld [vmem:[#allocation17 + $0x88] sm:$0xff]   ;;  %v4502_v26 = vld [vmem:[#allocation17 + $0x80] sm:$0xff]   ;;  %v4511_v28 = vld [vmem:[#allocation18 + $0xb8] sm:$0xff]  }
 0x100   : > { %4037 = vmatpush3.bf16.msra.mxu1 %v4490_v14  ;;  %4018 = vmatprep.subr.bf16.mxu0 %v5092_v11  ;;  %v3652_v45 = vld [vmem:[#allocation14] ss:$0 sm:$0xff]  ;;  %v3653_v51 = vld [vmem:[#allocation15] ss:$0 sm:$0xff]  ;;  %v1091_v53 = vld [vmem:[%s5458_s19] sm:$0xff] }
 0x101   : > { %4038 = vmatprep.subr.bf16.mxu1 %v5092_v11  ;;  %v1092_v54 = vld [vmem:[%s5458_s19 + $0x8] sm:$0xff]  ;;  %v4506_v63 = vld [vmem:[#allocation18 + $0x60] sm:$0xff]  }
 0x102   : > { %v1095_v57 = vpack.c.bf16 %v1092_v54, %v1091_v53  ;;  %v4504_v59 = vld [vmem:[#allocation18 + $0x70] sm:$0xff]   ;;  %v4505_v61 = vld [vmem:[#allocation18 + $0x68] sm:$0xff]   ;;  %v1094_v10 = vld [vmem:[%s5458_s19 + $0x18] sm:$0xff] }
 0x103   : > { %4019 = vmatpush3.bf16.msra.mxu0 %v4491_v15  ;;  %v4512_v60 = vld [vmem:[#allocation18 + $0xb0] sm:$0xff]   ;;  %v4513_v62 = vld [vmem:[#allocation18 + $0xa8] sm:$0xff]  }
 0x104   : > { %4039 = vmatpush3.bf16.msra.mxu1 %v4492_v16  ;;  %4020 = vmatprep.subr.bf16.mxu0 %v5092_v11  ;;  %v3655_v14 = vld [vmem:[%s5967_s27 + $0x1] ss:$0 sm:$0xff]  ;;  %v3681_v15 = vld [vmem:[%s5967_s27 + $0x2] ss:$0 sm:$0xff] }
 0x105   : > { %4040 = vmatprep.subr.bf16.mxu1 %v5092_v11 }
 0x107   : > { %4021 = vmatpush3.bf16.msra.mxu0 %v4493_v17 }
 0x108   : > { %4041 = vmatpush3.bf16.msra.mxu1 %v4494_v18  ;;  %4022 = vmatprep.subr.bf16.mxu0 %v5092_v11 }
 0x109   : > { %4042 = vmatprep.subr.bf16.mxu1 %v5092_v11 }
 0x10b   : > { %4023 = vmatpush3.bf16.msra.mxu0 %v4495_v19 }
 0x10c   : > { %4043 = vmatpush3.bf16.msra.mxu1 %v4496_v20  ;;  %4024 = vmatprep.subr.bf16.mxu0 %v5092_v11 }
 0x10d   : > { %4044 = vmatprep.subr.bf16.mxu1 %v5092_v11 }
 0x10f   : > { %4025 = vmatpush3.bf16.msra.mxu0 %v4497_v21 }
 0x110   : > { %4045 = vmatpush3.bf16.msra.mxu1 %v4498_v22  ;;  %4026 = vmatprep.subr.bf16.mxu0 %v5092_v11 }
 0x111   : > { %4046 = vmatprep.subr.bf16.mxu1 %v5092_v11 }
 0x113   : > { %4027 = vmatpush3.bf16.msra.mxu0 %v4499_v23 }
 0x114   : > { %4047 = vmatpush3.bf16.msra.mxu1 %v4500_v24  ;;  %4028 = vmatprep.subr.bf16.mxu0 %v5092_v11 }
 0x115   : > { %4048 = vmatprep.subr.bf16.mxu1 %v5092_v11 }
 0x117   : > { %4029 = vmatpush3.bf16.msra.mxu0 %v4501_v25 }
 0x118   : > { %4049 = vmatpush3.bf16.msra.mxu1 %v4502_v26  ;;  %4054 = vmatprep.subr.bf16.mxu0 %v4503_v27 }
 0x119   : > { %4074 = vmatprep.subr.bf16.mxu1 %v4511_v28 }
 0x183   : > { %v709_v2 = vpop.xlane.xlu0 %708 }
 0x184   : > { %v713_v3 = vmul.f32 0.0078125, %v709_v2  ;;  %v4515_v2 = vld [vmem:[#allocation18 + $0x98] sm:$0xff]  }
 0x186   : > { %v5495_v4 = vsub.f32 %v704_v0, %v713_v3  ;;  %v4514_v0 = vld [vmem:[#allocation18 + $0xa0] sm:$0xff]   ;;  %v4508_v3 = vld [vmem:[#allocation18 + $0x50] sm:$0xff]  }
 0x187   : > { %v711_v5 = vpop.xlane.xlu0 %710 }
 0x188   : > { %v714_v6 = vmul.f32 0.0078125, %v711_v5  ;;  %v717_v7 = vmul.f32 %v5495_v4, %v5495_v4  ;;  %v732_v47 = vmul.f32 %v3652_v45, %v5495_v4  ;;  %v4516_v4 = vld [vmem:[#allocation18 + $0x90] sm:$0xff]   ;;  %v4509_v5 = vld [vmem:[#allocation18 + $0x48] sm:$0xff]  }
 0x18a   : > { %v5499_v8 = vsub.f32 %v705_v1, %v714_v6  ;;  %719 = vadd.xlane.f32.xlu1 %v717_v7  ;;  %v4507_v1 = vld [vmem:[#allocation18 + $0x58] sm:$0xff]   ;;  %v4517_v6 = vld [vmem:[#allocation18 + $0x88] sm:$0xff]   ;;  %v4510_v7 = vld [vmem:[#allocation18 + $0x40] sm:$0xff]  }
 0x18c   : > { %v718_v9 = vmul.f32 %v5499_v8, %v5499_v8  ;;  %v733_v48 = vmul.f32 %v3652_v45, %v5499_v8  ;;  %v4518_v8 = vld [vmem:[#allocation18 + $0x80] sm:$0xff]  }
 0x18e   : > { %721 = vadd.xlane.f32.xlu1 %v718_v9  ;;  %v1093_v9 = vld [vmem:[%s5458_s19 + $0x10] sm:$0xff] }
 0x18f   : > { %v1096_v11 = vpack.c.bf16 %v1094_v10, %v1093_v9 }
 0x213   : > { %v720_v29 = vpop.xlane.xlu1 %719 }
 0x214   : > { %v724_v30 = vmul.f32 0.007874016, %v720_v29 }
 0x216   : > { %4519 = vrsqrt.f32 %v724_v30  ;;  %vm736_vm1 = vcmp.eq.f32.partialorder %v724_v30, inf  ;;  %v739_v35 = vand.u32 2147483648, %v724_v30  ;;  %vm738_vm2 = vcmp.eq.f32.partialorder %v724_v30, 0.0 }
 0x217   : > { %v722_v31 = vpop.xlane.xlu1 %721 }
 0x218   : > { %v725_v32 = vmul.f32 0.007874016, %v722_v31 }
 0x21a   : > { %4521 = vrsqrt.f32 %v725_v32  ;;  %vm743_vm3 = vcmp.eq.f32.partialorder %v725_v32, inf  ;;  %v746_v41 = vand.u32 2147483648, %v725_v32  ;;  %vm745_vm4 = vcmp.eq.f32.partialorder %v725_v32, 0.0 }
 0x223   : > { %v4520_v33 = vpop.eup %4519 }
 0x224   : > { %v735_v34 = vmul.f32 %v4520_v33, %v724_v30 }
 0x226   : > { %v737_v36 = vsel %vm736_vm1, %v724_v30, %v735_v34  ;;  %v3719_v30 = vld [vmem:[%s5968_s24 + $0x2] ss:$0 sm:$0xff] }
 0x227   : > { %v4522_v37 = vpop.eup %4521  ;;  %v740_v38 = vsel %vm738_vm2, %v739_v35, %v737_v36  ;;  %v3693_v36 = vld [vmem:[%s5968_s24 + $0x1] ss:$0 sm:$0xff] }
 0x228   : > { %v748_v39 = vadd.f32 1e-06, %v740_v38  ;;  %v742_v40 = vmul.f32 %v4522_v37, %v725_v32 }
 0x22a   : > { %4523 = vrcp.f32 %v748_v39  ;;  %v744_v42 = vsel %vm743_vm3, %v725_v32, %v742_v40 }
 0x22b   : > { %v747_v43 = vsel %vm745_vm4, %v746_v41, %v744_v42 }
 0x22c   : > { %v749_v44 = vadd.f32 1e-06, %v747_v43 }
 0x22e   : > { %4525 = vrcp.f32 %v749_v44 }
 0x237   : > { %v4524_v46 = vpop.eup %4523 }
 0x238   : > { %v751_v49 = vmul.f32 %v4524_v46, %v732_v47 }
 0x23a   : > { %v760_v55 = vadd.f32 %v3653_v51, %v751_v49 }
 0x23b   : > { %v4526_v50 = vpop.eup %4525 }
 0x23c   : > { %v753_v52 = vmul.f32 %v4526_v50, %v733_v48 }
 0x23e   : > { %v761_v56 = vadd.f32 %v3653_v51, %v753_v52 }
 0x240   : > { %v762_v58 = vpack.c.bf16 %v761_v56, %v760_v55 }
 0x242   : > { %4031 = vmatmul.mubr.bf16.vlgmr.msra.gmra.mxu0 %v762_v58  ;;  %4051 = vmatmul.mubr.bf16.vlgmr.msra.gmra.mxu1 %v762_v58 }
 0x243   : > { %4055 = vmatpush3.bf16.msra.mxu0 %v4503_v27  ;;  %4070 = vmatprep.mubr.bf16.mxu0 %v1095_v57 }
 0x244   : > { %4056 = vmatprep.subr.bf16.mxu0 %v4504_v59  ;;  %4075 = vmatpush3.bf16.msra.mxu1 %v4511_v28 }
 0x245   : > { %4076 = vmatprep.subr.bf16.mxu1 %v4512_v60  ;;  %4090 = vmatprep.mubr.bf16.mxu1 %v1095_v57 }
 0x247   : > { %4057 = vmatpush3.bf16.msra.mxu0 %v4504_v59 }
 0x248   : > { %4058 = vmatprep.subr.bf16.mxu0 %v4505_v61  ;;  %4077 = vmatpush3.bf16.msra.mxu1 %v4512_v60 }
 0x249   : > { %4078 = vmatprep.subr.bf16.mxu1 %v4513_v62 }
 0x24b   : > { %4059 = vmatpush3.bf16.msra.mxu0 %v4505_v61 }
 0x24c   : > { %4060 = vmatprep.subr.bf16.mxu0 %v4506_v63  ;;  %4079 = vmatpush3.bf16.msra.mxu1 %v4513_v62 }
 0x24d   : > { %4080 = vmatprep.subr.bf16.mxu1 %v4514_v0 }
 0x24f   : > { %4061 = vmatpush3.bf16.msra.mxu0 %v4506_v63 }
 0x250   : > { %4062 = vmatprep.subr.bf16.mxu0 %v4507_v1  ;;  %4081 = vmatpush3.bf16.msra.mxu1 %v4514_v0 }
 0x251   : > { %4082 = vmatprep.subr.bf16.mxu1 %v4515_v2 }
 0x253   : > { %4063 = vmatpush3.bf16.msra.mxu0 %v4507_v1 }
 0x254   : > { %4064 = vmatprep.subr.bf16.mxu0 %v4508_v3  ;;  %4083 = vmatpush3.bf16.msra.mxu1 %v4515_v2 }
 0x255   : > { %4084 = vmatprep.subr.bf16.mxu1 %v4516_v4 }
 0x257   : > { %4065 = vmatpush3.bf16.msra.mxu0 %v4508_v3 }
 0x258   : > { %4066 = vmatprep.subr.bf16.mxu0 %v4509_v5  ;;  %4085 = vmatpush3.bf16.msra.mxu1 %v4516_v4 }
 0x259   : > { %4086 = vmatprep.subr.bf16.mxu1 %v4517_v6 }
 0x25b   : > { %4067 = vmatpush3.bf16.msra.mxu0 %v4509_v5 }
 0x25c   : > { %4068 = vmatprep.subr.bf16.mxu0 %v4510_v7  ;;  %4087 = vmatpush3.bf16.msra.mxu1 %v4517_v6 }
 0x25d   : > { %4088 = vmatprep.subr.bf16.mxu1 %v4518_v8 }
 0x25f   : > { %4069 = vmatpush3.bf16.msra.mxu0 %v4510_v7 }
 0x260   : > { %4089 = vmatpush3.bf16.msra.mxu1 %v4518_v8 }
 0x262   : > { %4071 = vmatmul.mubr.bf16.vlgmr.msra.gmra.mxu0 %v1096_v11 }
 0x263   : > { %4091 = vmatmul.mubr.bf16.vlgmr.msra.gmra.mxu1 %v1096_v11 }
 0x302   : > { %v870_v12 = vpop.f32.mrf.mxu0  ;;  %v1074_v13 = vpop.f32.mrf.mxu1 }
 0x303   : > { %v871_v20 = vadd.f32 %v3655_v14, %v870_v12  ;;  %v1075_v21 = vadd.f32 %v3681_v15, %v1074_v13 }
 0x304   : > { %v4032_v16 = vpop.f32.mrf.mxu0  ;;  %v4052_v17 = vpop.f32.mrf.mxu1 }
 0x306   : > { %v873_v18 = vpop.f32.mrf.mxu0  ;;  %v1077_v19 = vpop.f32.mrf.mxu1 }
 0x307   : > { %v874_v22 = vadd.f32 %v3655_v14, %v873_v18  ;;  %v1078_v23 = vadd.f32 %v3681_v15, %v1077_v19 }
 0x308   : > { %v4033_v24 = vpop.f32.mrf.mxu0  ;;  %v4053_v25 = vpop.f32.mrf.mxu1 }
 0x309   : > { %v3861_v26 = vpack.c.bf16 %v1078_v23, %v1075_v21  ;;  %v877_v27 = vpack.c.bf16 %v874_v22, %v871_v20 }
 0x30b   : > { %3862 = vst [vmem:[#allocation3] sm:$0xff] %v3861_v26   ;;  %878 = vxpose.xlu0.c.b16.start.end [1/1] (short) %v877_v27, 128 }
 0x322   : > { %v4072_v28 = vpop.f32.mrf.mxu0 }
 0x323   : > { %v4092_v29 = vpop.f32.mrf.mxu1  ;;  %v1213_v48 = vadd.f32 %v4072_v28, %v3693_v36 }
 0x324   : > { %v1204_v31 = vpop.f32.mrf.mxu0  ;;  %v1426_v34 = vadd.f32 %v4092_v29, %v3719_v30 }
 0x325   : > { %v1417_v32 = vpop.f32.mrf.mxu1  ;;  %v1205_v40 = vadd.f32 %v3693_v36, %v1204_v31 }
 0x326   : > { %v4073_v33 = vpop.f32.mrf.mxu0  ;;  %v1418_v38 = vadd.f32 %v3719_v30, %v1417_v32 }
 0x327   : > { %v4093_v35 = vpop.f32.mrf.mxu1  ;;  %v1216_v45 = vadd.f32 %v4073_v33, %v3693_v36 }
 0x328   : > { %v1207_v37 = vpop.f32.mrf.mxu0  ;;  %v1429_v39 = vadd.f32 %v4093_v35, %v3719_v30 }
 0x329   : > { %v1208_v41 = vadd.f32 %v3693_v36, %v1207_v37  ;;  %v1420_v42 = vpop.f32.mrf.mxu1  ;;  %v1220_v49 = vpack.c.bf16 %v1216_v45, %v1213_v48 }
 0x32a   : > { %v3871_v43 = vpack.c.bf16 %v1429_v39, %v1426_v34  ;;  %v1421_v44 = vadd.f32 %v3719_v30, %v1420_v42 }
 0x32b   : > { %v1219_v46 = vpack.c.bf16 %v1208_v41, %v1205_v40 }
 0x32c   : > { %3873 = vst [vmem:[#allocation5 + $0x8] sm:$0xff] %v3871_v43   ;;  %v3866_v47 = vpack.c.bf16 %v1421_v44, %v1418_v38 }
 0x32d   : > { %1221 = vxpose.xlu1.c.b16.start [1/2] (short) %v1219_v46, 128 }
 0x32e   : > { %3867 = vst [vmem:[#allocation5] sm:$0xff] %v3866_v47  }
 0x331   : > { %1222 = vxpose.xlu1.c.b16.end [2/2] (short) %v1220_v49, 128 }
 0x36d   : > { %v886_v50 = vpop.trf.xlu0 }
 0x36e   : > { %v3664_v51 = vcombine.low %v886_v50, %v886_v50  ;;  %v3665_v52 = vcombine.high %v886_v50, %v886_v50 }
 0x370   : > { %951 = vst.msk [vmem:[#allocation2] sm:$0xf] %vm950_vm5, %v3664_v51  ;;  %952 = vst.msk [vmem:[#allocation2 + $0x4] sm:$0xf] %vm950_vm5, %v3665_v52 }
 0x371   : > { %v887_v53 = vpop.trf.xlu0 }
 0x372   : > { %v3666_v54 = vcombine.low %v887_v53, %v887_v53  ;;  %v3667_v55 = vcombine.high %v887_v53, %v887_v53 }
 0x374   : > { %953 = vst.msk [vmem:[#allocation2 + $0x8] sm:$0xf] %vm950_vm5, %v3666_v54  ;;  %954 = vst.msk [vmem:[#allocation2 + $0xc] sm:$0xf] %vm950_vm5, %v3667_v55 }
 0x375   : > { %v888_v56 = vpop.trf.xlu0 }
 0x376   : > { %v3668_v57 = vcombine.low %v888_v56, %v888_v56  ;;  %v3669_v58 = vcombine.high %v888_v56, %v888_v56 }
 0x378   : > { %955 = vst.msk [vmem:[#allocation2 + $0x10] sm:$0xf] %vm950_vm5, %v3668_v57  ;;  %956 = vst.msk [vmem:[#allocation2 + $0x14] sm:$0xf] %vm950_vm5, %v3669_v58 }
 0x379   : > { %v889_v59 = vpop.trf.xlu0 }
 0x37a   : > { %v3670_v60 = vcombine.low %v889_v59, %v889_v59  ;;  %v3671_v61 = vcombine.high %v889_v59, %v889_v59 }
 0x37c   : > { %957 = vst.msk [vmem:[#allocation2 + $0x18] sm:$0xf] %vm950_vm5, %v3670_v60  ;;  %958 = vst.msk [vmem:[#allocation2 + $0x1c] sm:$0xf] %vm950_vm5, %v3671_v61 }
 0x37d   : > { %v890_v62 = vpop.trf.xlu0 }
 0x37e   : > { %v3672_v63 = vcombine.low %v890_v62, %v890_v62  ;;  %v3673_v0 = vcombine.high %v890_v62, %v890_v62 }
 0x380   : > { %959 = vst.msk [vmem:[#allocation2 + $0x20] sm:$0xf] %vm950_vm5, %v3672_v63  ;;  %960 = vst.msk [vmem:[#allocation2 + $0x24] sm:$0xf] %vm950_vm5, %v3673_v0 }
 0x381   : > { %v891_v1 = vpop.trf.xlu0 }
 0x382   : > { %v3674_v2 = vcombine.low %v891_v1, %v891_v1  ;;  %v3675_v3 = vcombine.high %v891_v1, %v891_v1 }
 0x384   : > { %961 = vst.msk [vmem:[#allocation2 + $0x28] sm:$0xf] %vm950_vm5, %v3674_v2  ;;  %962 = vst.msk [vmem:[#allocation2 + $0x2c] sm:$0xf] %vm950_vm5, %v3675_v3 }
 0x385   : > { %v892_v4 = vpop.trf.xlu0 }
 0x386   : > { %v3676_v5 = vcombine.low %v892_v4, %v892_v4  ;;  %v3677_v6 = vcombine.high %v892_v4, %v892_v4 }
 0x388   : > { %963 = vst.msk [vmem:[#allocation2 + $0x30] sm:$0xf] %vm950_vm5, %v3676_v5  ;;  %964 = vst.msk [vmem:[#allocation2 + $0x34] sm:$0xf] %vm950_vm5, %v3677_v6 }
 0x389   : > { %v893_v7 = vpop.trf.xlu0 }
 0x38a   : > { %v3678_v8 = vcombine.low %v893_v7, %v893_v7  ;;  %v3679_v9 = vcombine.high %v893_v7, %v893_v7 }
 0x38c   : > { %965 = vst.msk [vmem:[#allocation2 + $0x38] sm:$0xf] %vm950_vm5, %v3678_v8  ;;  %966 = vst.msk [vmem:[#allocation2 + $0x3c] sm:$0xf] %vm950_vm5, %v3679_v9 }
 0x38f   : > { %v1229_v10 = vpop.trf.xlu1 }
 0x390   : > { %v3702_v11 = vcombine.low %v1229_v10, %v1229_v10  ;;  %v3703_v12 = vcombine.high %v1229_v10, %v1229_v10 }
 0x392   : > { %1294 = vst.msk [vmem:[#allocation4] sm:$0xf] %vm1293_vm6, %v3702_v11  ;;  %1295 = vst.msk [vmem:[#allocation4 + $0x4] sm:$0xf] %vm1293_vm6, %v3703_v12 }
 0x393   : > { %v1230_v13 = vpop.trf.xlu1 }
 0x394   : > { %v3704_v14 = vcombine.low %v1230_v13, %v1230_v13  ;;  %v3705_v15 = vcombine.high %v1230_v13, %v1230_v13 }
 0x396   : > { %1296 = vst.msk [vmem:[#allocation4 + $0x8] sm:$0xf] %vm1293_vm6, %v3704_v14  ;;  %1297 = vst.msk [vmem:[#allocation4 + $0xc] sm:$0xf] %vm1293_vm6, %v3705_v15 }
 0x397   : > { %v1231_v16 = vpop.trf.xlu1 }
 0x398   : > { %v3706_v17 = vcombine.low %v1231_v16, %v1231_v16  ;;  %v3707_v18 = vcombine.high %v1231_v16, %v1231_v16 }
 0x39a   : > { %1298 = vst.msk [vmem:[#allocation4 + $0x10] sm:$0xf] %vm1293_vm6, %v3706_v17  ;;  %1299 = vst.msk [vmem:[#allocation4 + $0x14] sm:$0xf] %vm1293_vm6, %v3707_v18 }
 0x39b   : > { %v1232_v19 = vpop.trf.xlu1 }
 0x39c   : > { %v3708_v20 = vcombine.low %v1232_v19, %v1232_v19  ;;  %v3709_v21 = vcombine.high %v1232_v19, %v1232_v19 }
 0x39e   : > { %1300 = vst.msk [vmem:[#allocation4 + $0x18] sm:$0xf] %vm1293_vm6, %v3708_v20  ;;  %1301 = vst.msk [vmem:[#allocation4 + $0x1c] sm:$0xf] %vm1293_vm6, %v3709_v21 }
 0x39f   : > { %v1233_v22 = vpop.trf.xlu1 }
 0x3a0   : > { %v3710_v23 = vcombine.low %v1233_v22, %v1233_v22  ;;  %v3711_v24 = vcombine.high %v1233_v22, %v1233_v22 }
 0x3a2   : > { %1302 = vst.msk [vmem:[#allocation4 + $0x20] sm:$0xf] %vm1293_vm6, %v3710_v23  ;;  %1303 = vst.msk [vmem:[#allocation4 + $0x24] sm:$0xf] %vm1293_vm6, %v3711_v24 }
 0x3a3   : > { %v1234_v25 = vpop.trf.xlu1 }
 0x3a4   : > { %v3712_v26 = vcombine.low %v1234_v25, %v1234_v25  ;;  %v3713_v27 = vcombine.high %v1234_v25, %v1234_v25 }
 0x3a6   : > { %1304 = vst.msk [vmem:[#allocation4 + $0x28] sm:$0xf] %vm1293_vm6, %v3712_v26  ;;  %1305 = vst.msk [vmem:[#allocation4 + $0x2c] sm:$0xf] %vm1293_vm6, %v3713_v27 }
 0x3a7   : > { %v1235_v28 = vpop.trf.xlu1 }
 0x3a8   : > { %v3714_v29 = vcombine.low %v1235_v28, %v1235_v28  ;;  %v3715_v30 = vcombine.high %v1235_v28, %v1235_v28 }
 0x3aa   : > { %1306 = vst.msk [vmem:[#allocation4 + $0x30] sm:$0xf] %vm1293_vm6, %v3714_v29  ;;  %1307 = vst.msk [vmem:[#allocation4 + $0x34] sm:$0xf] %vm1293_vm6, %v3715_v30 }
 0x3ab   : > { %v1236_v31 = vpop.trf.xlu1 }
 0x3ac   : > { %v3716_v32 = vcombine.low %v1236_v31, %v1236_v31  ;;  %v3717_v33 = vcombine.high %v1236_v31, %v1236_v31 }
 0x3ae   : > { %1308 = vst.msk [vmem:[#allocation4 + $0x38] sm:$0xf] %vm1293_vm6, %v3716_v32  ;;  %1309 = vst.msk [vmem:[#allocation4 + $0x3c] sm:$0xf] %vm1293_vm6, %v3717_v33 }
 0x3af PF: > { %s5969_s10 = sld [smem:[#allocation33_spill]]  ;;  %v4527_v39 = vld [vmem:[#allocation17 + $0x38] sm:$0xff]   ;;  %v5094_v40 = vmov 0.0   ;;  %v4528_v41 = vld [vmem:[#allocation17 + $0x30] sm:$0xff]   ;;  %v4529_v42 = vld [vmem:[#allocation17 + $0x28] sm:$0xff]   ;;  %vm5095_vm7 = vmmov 0  }
 0x3b0   : > { %4094 = vmatprep.subr.bf16.mxu0 %v5094_v40  ;;  %4114 = vmatprep.subr.bf16.mxu1 %v5094_v40  ;;  %v4530_v43 = vld [vmem:[#allocation17 + $0x20] sm:$0xff]   ;;  %v4531_v44 = vld [vmem:[#allocation17 + $0x18] sm:$0xff]   ;;  %v4532_v45 = vld [vmem:[#allocation17 + $0x10] sm:$0xff]   ;;  %s5970_s17 = sld [smem:[#allocation45_spill]]  ;;  %vm1624_vm10 = vcmask 261120   ;;  %s5096_s4 = smov 96  }
 0x3b1   : > { %4095 = vmatpush3.bf16.msra.mxu0 %v4527_v39  ;;  %4110 = vmatprep.mubr.msk.bf16.mxu0 %vm5095_vm7, %v5094_v40  ;;  %v4533_v46 = vld [vmem:[#allocation17 + $0x8] sm:$0xff]   ;;  %v4534_v47 = vld [vmem:[#allocation17] sm:$0xff]   ;;  %v4535_v48 = vld [vmem:[#allocation2 + $0x8] sm:$0xff]   ;;  %s5097_s6 = smov 64   ;;  %vm1670_vm12 = vcmask 130048   ;;  %vm2114_vm13 = vcmask 523264  }
 0x3b2   : > { %4096 = vmatprep.subr.bf16.mxu0 %v5094_v40  ;;  %4118 = vmatprep.mubr.msk.bf16.mxu1 %vm5095_vm7, %v5094_v40  ;;  %v3733_v57 = vld [vmem:[#allocation14] ss:$0 sm:$0xff]  ;;  %v3734_v60 = vld [vmem:[#allocation15] ss:$0 sm:$0xff]  ;;  %v4536_v0 = vld [vmem:[#allocation2] sm:$0xff]   ;;  %vm2117_vm14 = vcmask 785408  }
 0x3b3   : > { %4115 = vmatpush3.bf16.msra.mxu1 %v4535_v48  ;;  %v5592_v8 = vld [vmem:[%s616_s2] sm:$0xff]  ;;  %v4539_v27 = vld [vmem:[#allocation2 + $0x10] sm:$0xff]   ;;  %s5098_s2 = smov 32   ;;  %s5972_s27 = sld [smem:[#allocation49_spill]] }
 0x3b4   : > { %4116 = vmatprep.subr.bf16.mxu1 %v5094_v40  ;;  %vm1453_vm11 = vcmp.ne.s32.totalorder %v5592_v8, 0  ;;  %v5599_v21 = vld [vmem:[#allocation3] sm:$0xff]   ;;  %v4538_v25 = vld [vmem:[#allocation2 + $0x18] sm:$0xff]   ;;  %s5974_s24 = sld [smem:[#allocation51_spill]]  ;;  %s3413_s1 = sshll.u32 %s698_s16, 4  ;;  %s3414_s1 = int_to_ptr.vmem [resolvable:$true] %s3413_s1 }
 0x3b5   : > { %s3732_s8 = sshll.u32 %s5969_s10, 3  ;;  %4097 = vmatpush3.bf16.msra.mxu0 %v4528_v41 }
 0x3b6   : > { %s1457_s25 = scalar_lea.vmem %s5450_s11, %s3732_s8 [#allocation6]  ;;  %4098 = vmatprep.subr.bf16.mxu0 %v5094_v40  ;;  %v3735_v1 = vld [vmem:[%s5970_s17] ss:$0 sm:$0xff]  ;;  %s5971_s8 = sld [smem:[#allocation47_spill]] }
 0x3b7   : > { %v5555_v34 = vld [vmem:[%s1457_s25] sm:$0xff]  ;;  %4117 = vmatpush3.bf16.msra.mxu1 %v4536_v0  ;;  %s4930_s11 = scalar_lea.vmem %s3414_s1, 128 }
 0x3b8   : > { %1461 = vadd.xlane.f32.xlu0 %v5555_v34  ;;  %4122 = vmatprep.subr.bf16.mxu1 %v5094_v40  ;;  %p4931_p4 = scmp.ne.s32.totalorder %s3414_s1, %s4930_s11 }
 0x3b9   : > { %4099 = vmatpush3.bf16.msra.mxu0 %v4529_v42 }
 0x3ba   : > { %4100 = vmatprep.subr.bf16.mxu0 %v5094_v40  ;;  %p4932_p1 = pnand %p4931_p4, %p5407_p13 }
 0x3bc   : > { %p4933_p10 = pneg %p4932_p1 }
 0x3bd   : > { %4101 = vmatpush3.bf16.msra.mxu0 %v4530_v43 }
 0x3be   : > { %4102 = vmatprep.subr.bf16.mxu0 %v5094_v40 }
 0x3c1   : > { %4103 = vmatpush3.bf16.msra.mxu0 %v4531_v44 }
 0x3c2   : > { %4104 = vmatprep.subr.bf16.mxu0 %v5094_v40 }
 0x3c5   : > { %4105 = vmatpush3.bf16.msra.mxu0 %v4532_v45 }
 0x3c6   : > { %4106 = vmatprep.subr.bf16.mxu0 %v5094_v40 }
 0x3c9   : > { %4107 = vmatpush3.bf16.msra.mxu0 %v4533_v46 }
 0x3ca   : > { %4108 = vmatprep.subr.bf16.mxu0 %v5094_v40 }
 0x3cd   : > { %4109 = vmatpush3.bf16.msra.mxu0 %v4534_v47 }
 0x3ce   : > { %4170 = vmatprep.subr.bf16.mxu0 %v5094_v40 }
 0x441   : > { %v1462_v35 = vpop.xlane.xlu0 %1461 }
 0x442   : > { %v1464_v36 = vmul.f32 0.0078125, %v1462_v35 }
 0x444   : > { %v1465_v37 = vsub.f32 %v5555_v34, %v1464_v36 }
 0x446   : > { %v1466_v38 = vmul.f32 %v1465_v37, %v1465_v37  ;;  %v1477_v58 = vmul.f32 %v3733_v57, %v1465_v37 }
 0x448   : > { %1467 = vadd.xlane.f32.xlu0 %v1466_v38 }
 0x4d1   : > { %v1468_v49 = vpop.xlane.xlu0 %1467 }
 0x4d2   : > { %v1470_v50 = vmul.f32 0.007874016, %v1468_v49 }
 0x4d4   : > { %4618 = vrsqrt.f32 %v1470_v50  ;;  %vm1480_vm8 = vcmp.eq.f32.partialorder %v1470_v50, inf  ;;  %v1483_v53 = vand.u32 2147483648, %v1470_v50  ;;  %vm1482_vm9 = vcmp.eq.f32.partialorder %v1470_v50, 0.0 }
 0x4e1   : > { %v4619_v51 = vpop.eup %4618 }
 0x4e2   : > { %v1479_v52 = vmul.f32 %v4619_v51, %v1470_v50  ;;  %v4540_v51 = vld [vmem:[#allocation2 + $0x28] sm:$0xff]  }
 0x4e4   : > { %v1481_v54 = vsel %vm1480_vm8, %v1470_v50, %v1479_v52 }
 0x4e5   : > { %v1484_v55 = vsel %vm1482_vm9, %v1483_v53, %v1481_v54  ;;  %v4541_v53 = vld [vmem:[#allocation2 + $0x20] sm:$0xff]  }
 0x4e6   : > { %v1485_v56 = vadd.f32 1e-06, %v1484_v55 }
 0x4e8   : > { %4620 = vrcp.f32 %v1485_v56 }
 0x4f5   : > { %v4621_v59 = vpop.eup %4620 }
 0x4f6   : > { %v1487_v61 = vmul.f32 %v4621_v59, %v1477_v58 }
 0x4f8   : > { %v1494_v62 = vadd.f32 %v3734_v60, %v1487_v61 }
 0x4fa   : > { %v1495_v63 = vpack.c.bf16 %v1494_v62, %v1494_v62 }
 0x4fc   : > { %4111 = vmatmul.mubr.bf16.vlgmr.msra.gmra.mxu0 %v1495_v63 }
 0x4fd   : > { %4186 = vmatprep.mubr.msk.bf16.mxu0 %vm5095_vm7, %v5094_v40 }
 0x5bc   : > { %v1601_v2 = vpop.f32.mrf.mxu0 }
 0x5bd   : > { %v1602_v3 = vadd.f32 %v3735_v1, %v1601_v2 }
 0x5be   : > { %v4112_v4 = vpop.f32.mrf.mxu0 }
 0x5bf   : > { %v5580_v5 = vpack.c.bf16 %v1602_v3, %v1602_v3 }
 0x5c0   : > { %v1604_v6 = vpop.f32.mrf.mxu0 }
 0x5c1   : > { %1740 = vrot.lane.b32.xlu0 %v5580_v5, %s5096_s4  ;;  %4119 = vmatmul.mubr.msk.bf16.vlgmr.msra.gmra.mxu1 %vm1624_vm10, %v5580_v5 }
 0x5c2   : > { %v4113_v7 = vpop.f32.mrf.mxu0  ;;  %4124 = vmatprep.mubr.msk.bf16.mxu1 %vm5095_vm7, %v5094_v40  ;;  %4123 = vmatpush3.bf16.msra.mxu1 %v5599_v21 }
 0x5c3   : > { %4128 = vmatprep.subr.bf16.mxu1 %v5094_v40 }
 0x5c5   : > { %1862 = vrot.lane.b32.xlu0 %v5580_v5, %s5097_s6 }
 0x633   : > { %v1741_v28 = vpop.permute.xlu0 %1740 }
 0x637   : > { %v1863_v54 = vpop.permute.xlu0 %1862 }
 0x681   : > { %v1662_v9 = vpop.f32.mrf.mxu1 }
 0x682   : > { %v1668_v10 = vmul.f32 0.17677669, %v1662_v9 }
 0x683   : > { %v4120_v11 = vpop.f32.mrf.mxu1 }
 0x684   : > { %v1669_v12 = vsel %vm1453_vm11, %v1668_v10, -1e+09 }
 0x685   : > { %v1665_v13 = vpop.f32.mrf.mxu1  ;;  %v1671_v14 = vsel %vm1670_vm12, %v1669_v12, -inf }
 0x686   : > { %1672 = vmax.xlane.f32.xlu1 %v1671_v14  ;;  %v4543_v14 = vld [vmem:[#allocation2 + $0x30] sm:$0xff]  }
 0x687   : > { %v4121_v15 = vpop.f32.mrf.mxu1 }
 0x70f   : > { %v1673_v16 = vpop.xlane.xlu1 %1672 }
 0x710   : > { %v1674_v17 = vsub.f32 %v1669_v12, %v1673_v16 }
 0x712   : > { %v1675_v18 = vmul.f32 1.442695, %v1674_v17 }
 0x714   : > { %4622 = vpow2.f32 %v1675_v18 }
 0x721   : > { %v4623_v19 = vpop.eup %4622 }
 0x722   : > { %v1677_v20 = vsel %vm1670_vm12, %v4623_v19, 0.0 }
 0x723   : > { %1678 = vadd.xlane.f32.xlu1 %v1677_v20 }
 0x7ac   : > { %v1679_v22 = vpop.xlane.xlu1 %1678 }
 0x7ad   : > { %4624 = vrcp.f32 %v1679_v22 }
 0x7ba   : > { %v4625_v23 = vpop.eup %4624 }
 0x7bb   : > { %v1681_v24 = vmul.f32 %v4625_v23, %v4623_v19 }
 0x7bd   : > { %v1682_v26 = vpack.c.bf16 %v1681_v24, %v1681_v24 }
 0x7bf   : > { %4125 = vmatmul.mubr.msk.bf16.vlgmr.msra.gmra.mxu1 %vm1670_vm12, %v1682_v26 }
 0x7c0   : > { %4129 = vmatpush3.bf16.msra.mxu1 %v4538_v25  ;;  %4132 = vmatprep.mubr.msk.bf16.mxu1 %vm5095_vm7, %v5094_v40 }
 0x7c1   : > { %4130 = vmatprep.subr.bf16.mxu1 %v5094_v40 }
 0x7c4   : > { %4131 = vmatpush3.bf16.msra.mxu1 %v4539_v27 }
 0x7c5   : > { %4136 = vmatprep.subr.bf16.mxu1 %v5094_v40 }
 0x7c7   : > { %4133 = vmatmul.mubr.msk.bf16.vlgmr.msra.gmra.mxu1 %vm1624_vm10, %v1741_v28 }
 0x7c8   : > { %4138 = vmatprep.mubr.msk.bf16.mxu1 %vm5095_vm7, %v5094_v40 }
 0x87f   : > { %v5611_v29 = vpop.f32.mrf.mxu1 }
 0x881   : > { %v4126_v30 = vpop.f32.mrf.mxu1 }
 0x883   : > { %v1731_v31 = vpop.f32.mrf.mxu1 }
 0x885   : > { %v4127_v32 = vpop.f32.mrf.mxu1 }
 0x887   : > { %v1791_v33 = vpop.f32.mrf.mxu1 }
 0x888   : > { %v1797_v35 = vmul.f32 0.17677669, %v1791_v33 }
 0x889   : > { %v4134_v36 = vpop.f32.mrf.mxu1 }
 0x88a   : > { %v1798_v37 = vsel %vm1453_vm11, %v1797_v35, -1e+09 }
 0x88b   : > { %v1794_v38 = vpop.f32.mrf.mxu1  ;;  %v1799_v39 = vsel %vm1670_vm12, %v1798_v37, -inf }
 0x88c   : > { %1800 = vmax.xlane.f32.xlu1 %v1799_v39 }
 0x88d   : > { %v4135_v41 = vpop.f32.mrf.mxu1 }
 0x915   : > { %v1801_v42 = vpop.xlane.xlu1 %1800 }
 0x916   : > { %v1802_v43 = vsub.f32 %v1798_v37, %v1801_v42  ;;  %v4544_v42 = vld [vmem:[#allocation17 + $0xf8] sm:$0xff]  }
 0x917   : > { %4171 = vmatpush3.bf16.msra.mxu0 %v4544_v42 }
 0x918   : > { %v1803_v44 = vmul.f32 1.442695, %v1802_v43  ;;  %v4545_v43 = vld [vmem:[#allocation17 + $0xf0] sm:$0xff]   ;;  %4172 = vmatprep.subr.bf16.mxu0 %v5094_v40 }
 0x91a   : > { %4626 = vpow2.f32 %v1803_v44  ;;  %v4547_v44 = vld [vmem:[#allocation17 + $0xe0] sm:$0xff]  }
 0x91b   : > { %4173 = vmatpush3.bf16.msra.mxu0 %v4545_v43  ;;  %v4563_v43 = vld [vmem:[#allocation4 + $0x10] sm:$0xff]  }
 0x91c   : > { %4174 = vmatprep.subr.bf16.mxu0 %v5094_v40 }
 0x927   : > { %v4627_v45 = vpop.eup %4626 }
 0x928   : > { %v1805_v46 = vsel %vm1670_vm12, %v4627_v45, 0.0 }
 0x929   : > { %1806 = vadd.xlane.f32.xlu1 %v1805_v46  ;;  %v4549_v46 = vld [vmem:[#allocation17 + $0xd0] sm:$0xff]  }
 0x93a   : > { %1811 = vrot.lane.b32.xlu1 %v5599_v21, %s5096_s4 }
 0x9b2   : > { %v1807_v47 = vpop.xlane.xlu1 %1806 }
 0x9b3   : > { %4628 = vrcp.f32 %v1807_v47  ;;  %v4550_v47 = vld [vmem:[#allocation17 + $0xc8] sm:$0xff]  }
 0x9b6   : > { %v1812_v48 = vpop.permute.xlu1 %1811 }
 0x9b7   : > { %4137 = vmatpush3.bf16.msra.mxu1 %v1812_v48  ;;  %v4551_v48 = vld [vmem:[#allocation17 + $0xc0] sm:$0xff]  }
 0x9b8   : > { %4142 = vmatprep.subr.bf16.mxu1 %v5094_v40 }
 0x9c0   : > { %v4629_v49 = vpop.eup %4628 }
 0x9c1   : > { %v1809_v50 = vmul.f32 %v4629_v49, %v4627_v45  ;;  %v4548_v45 = vld [vmem:[#allocation17 + $0xd8] sm:$0xff]  }
 0x9c3   : > { %v1810_v52 = vpack.c.bf16 %v1809_v50, %v1809_v50 }
 0x9c5   : > { %4139 = vmatmul.mubr.msk.bf16.vlgmr.msra.gmra.mxu1 %vm1670_vm12, %v1810_v52 }
 0x9c6   : > { %4143 = vmatpush3.bf16.msra.mxu1 %v4540_v51  ;;  %4146 = vmatprep.mubr.msk.bf16.mxu1 %vm5095_vm7, %v5094_v40 }
 0x9c7   : > { %4144 = vmatprep.subr.bf16.mxu1 %v5094_v40 }
 0x9ca   : > { %4145 = vmatpush3.bf16.msra.mxu1 %v4541_v53 }
 0x9cb   : > { %4150 = vmatprep.subr.bf16.mxu1 %v5094_v40 }
 0x9cd   : > { %4147 = vmatmul.mubr.msk.bf16.vlgmr.msra.gmra.mxu1 %vm1624_vm10, %v1863_v54 }
 0x9ce   : > { %4152 = vmatprep.mubr.msk.bf16.mxu1 %vm5095_vm7, %v5094_v40 }
 0xa85   : > { %v1851_v55 = vpop.f32.mrf.mxu1 }
 0xa86   : > { %v1857_v28 = vpack.c.bf16 %v1851_v55, %v1851_v55  ;;  %v1734_v55 = vpack.c.bf16 %v5611_v29, %v5611_v29 }
 0xa87   : > { %v4140_v56 = vpop.f32.mrf.mxu1 }
 0xa89   : > { %v1854_v57 = vpop.f32.mrf.mxu1 }
 0xa8b   : > { %v4141_v58 = vpop.f32.mrf.mxu1 }
 0xa8d   : > { %v1913_v59 = vpop.f32.mrf.mxu1 }
 0xa8e   : > { %v1919_v60 = vmul.f32 0.17677669, %v1913_v59 }
 0xa8f   : > { %v4148_v61 = vpop.f32.mrf.mxu1 }
 0xa90   : > { %v1920_v62 = vsel %vm1453_vm11, %v1919_v60, -1e+09  ;;  %v3762_v61 = vld [vmem:[%s5970_s17 + $0x3] ss:$0 sm:$0xff]  ;;  %s5973_s17 = sld [smem:[#allocation34_spill]] }
 0xa91   : > { %v1916_v63 = vpop.f32.mrf.mxu1  ;;  %v1921_v0 = vsel %vm1670_vm12, %v1920_v62, -inf }
 0xa92   : > { %1922 = vmax.xlane.f32.xlu1 %v1921_v0 }
 0xa93   : > { %v4149_v1 = vpop.f32.mrf.mxu1 }
 0xaa3   : > { %1984 = vrot.lane.b32.xlu1 %v5580_v5, %s5098_s2  ;;  %v4542_v5 = vld [vmem:[#allocation2 + $0x38] sm:$0xff]  }
 0xb1b   : > { %v1923_v2 = vpop.xlane.xlu1 %1922 }
 0xb1c   : > { %v1924_v3 = vsub.f32 %v1920_v62, %v1923_v2 }
 0xb1e   : > { %v1925_v4 = vmul.f32 1.442695, %v1924_v3 }
 0xb1f   : > { %v1985_v15 = vpop.permute.xlu1 %1984 }
 0xb20   : > { %4630 = vpow2.f32 %v1925_v4 }
 0xb2d   : > { %v4631_v6 = vpop.eup %4630 }
 0xb2e   : > { %v1927_v7 = vsel %vm1670_vm12, %v4631_v6, 0.0 }
 0xb2f   : > { %1928 = vadd.xlane.f32.xlu0 %v1927_v7 }
 0xb45   : > { %1933 = vrot.lane.b32.xlu0 %v5599_v21, %s5097_s6 }
 0xbb8   : > { %v1929_v9 = vpop.xlane.xlu0 %1928 }
 0xbb9   : > { %4632 = vrcp.f32 %v1929_v9  ;;  %v4552_v9 = vld [vmem:[#allocation18 + $0x38] sm:$0xff]  }
 0xbbc   : > { %v1934_v10 = vpop.permute.xlu0 %1933 }
 0xbbd   : > { %4151 = vmatpush3.bf16.msra.mxu1 %v1934_v10  ;;  %v4553_v10 = vld [vmem:[#allocation18 + $0x30] sm:$0xff]  }
 0xbbe   : > { %4156 = vmatprep.subr.bf16.mxu1 %v5094_v40 }
 0xbc6   : > { %v4633_v11 = vpop.eup %4632 }
 0xbc7   : > { %v1931_v12 = vmul.f32 %v4633_v11, %v4631_v6  ;;  %v4555_v11 = vld [vmem:[#allocation18 + $0x20] sm:$0xff]  }
 0xbc9   : > { %v1932_v13 = vpack.c.bf16 %v1931_v12, %v1931_v12  ;;  %v4556_v12 = vld [vmem:[#allocation18 + $0x18] sm:$0xff]  }
 0xbcb   : > { %4153 = vmatmul.mubr.msk.bf16.vlgmr.msra.gmra.mxu1 %vm1670_vm12, %v1932_v13  ;;  %v4558_v13 = vld [vmem:[#allocation18 + $0x8] sm:$0xff]  }
 0xbcc   : > { %4157 = vmatpush3.bf16.msra.mxu1 %v4542_v5  ;;  %4160 = vmatprep.mubr.msk.bf16.mxu1 %vm5095_vm7, %v5094_v40  ;;  %v4557_v5 = vld [vmem:[#allocation18 + $0x10] sm:$0xff]  }
 0xbcd   : > { %4158 = vmatprep.subr.bf16.mxu1 %v5094_v40 }
 0xbd0   : > { %4159 = vmatpush3.bf16.msra.mxu1 %v4543_v14  ;;  %v4559_v14 = vld [vmem:[#allocation18] sm:$0xff]  }
 0xbd1   : > { %4164 = vmatprep.subr.bf16.mxu1 %v5094_v40 }
 0xbd3   : > { %4161 = vmatmul.mubr.msk.bf16.vlgmr.msra.gmra.mxu1 %vm1624_vm10, %v1985_v15  ;;  %v4560_v15 = vld [vmem:[#allocation4 + $0x8] sm:$0xff]  }
 0xbd4   : > { %4166 = vmatprep.mubr.msk.bf16.mxu1 %vm5095_vm7, %v5094_v40 }
 0xc8b   : > { %v1973_v16 = vpop.f32.mrf.mxu1 }
 0xc8c   : > { %v1979_v30 = vpack.c.bf16 %v1973_v16, %v1973_v16 }
 0xc8d   : > { %v4154_v17 = vpop.f32.mrf.mxu1 }
 0xc8f   : > { %v1976_v18 = vpop.f32.mrf.mxu1 }
 0xc91   : > { %v4155_v19 = vpop.f32.mrf.mxu1 }
 0xc93   : > { %v2035_v20 = vpop.f32.mrf.mxu1 }
 0xc94   : > { %v2041_v22 = vmul.f32 0.17677669, %v2035_v20 }
 0xc95   : > { %v4162_v23 = vpop.f32.mrf.mxu1 }
 0xc96   : > { %v2042_v24 = vsel %vm1453_vm11, %v2041_v22, -1e+09 }
 0xc97   : > { %v2038_v25 = vpop.f32.mrf.mxu1  ;;  %v2043_v26 = vsel %vm1670_vm12, %v2042_v24, -inf }
 0xc98   : > { %2044 = vmax.xlane.f32.xlu1 %v2043_v26  ;;  %v3771_v25 = vld [vmem:[#allocation14 + $0x1] ss:$0 sm:$0xff] }
 0xc99   : > { %v4163_v27 = vpop.f32.mrf.mxu1 }
 0xca9   : > { %2103 = vrot.lane.b32.xlu1 %v1857_v28, %s5098_s2  ;;  %v3772_v28 = vld [vmem:[#allocation15 + $0x1] ss:$0 sm:$0xff] }
 0xcad   : > { %2106 = vrot.lane.b32.xlu1 %v1979_v30, %s5097_s6 }
 0xd21   : > { %v2045_v31 = vpop.xlane.xlu1 %2044 }
 0xd22   : > { %v2046_v32 = vsub.f32 %v2042_v24, %v2045_v31 }
 0xd24   : > { %v2047_v33 = vmul.f32 1.442695, %v2046_v32 }
 0xd25   : > { %v2104_v54 = vpop.permute.xlu1 %2103 }
 0xd26   : > { %4634 = vpow2.f32 %v2047_v33  ;;  %v2113_v57 = vsel %vm1624_vm10, %v1734_v55, %v2104_v54  ;;  %v4561_v33 = vld [vmem:[#allocation4] sm:$0xff]   ;;  %v5099_v54 = vmov 0  }
 0xd29   : > { %v2107_v56 = vpop.permute.xlu1 %2106 }
 0xd2a   : > { %v2116_v58 = vsel %vm2114_vm13, %v2113_v57, %v2107_v56 }
 0xd33   : > { %v4635_v35 = vpop.eup %4634 }
 0xd34   : > { %v2049_v36 = vsel %vm1670_vm12, %v4635_v35, 0.0 }
 0xd35   : > { %2050 = vadd.xlane.f32.xlu0 %v2049_v36 }
 0xd4b   : > { %2055 = vrot.lane.b32.xlu0 %v5599_v21, %s5098_s2  ;;  %v4546_v21 = vld [vmem:[#allocation17 + $0xe8] sm:$0xff]  }
 0xd4c   : > { %4175 = vmatpush3.bf16.msra.mxu0 %v4546_v21  ;;  %v4564_v21 = vld [vmem:[#allocation4 + $0x28] sm:$0xff]  }
 0xd4d   : > { %4176 = vmatprep.subr.bf16.mxu0 %v5094_v40 }
 0xd50   : > { %4177 = vmatpush3.bf16.msra.mxu0 %v4547_v44 }
 0xd51   : > { %4178 = vmatprep.subr.bf16.mxu0 %v5094_v40 }
 0xd54   : > { %4179 = vmatpush3.bf16.msra.mxu0 %v4548_v45  ;;  %v4565_v45 = vld [vmem:[#allocation4 + $0x20] sm:$0xff]  }
 0xd55   : > { %4180 = vmatprep.subr.bf16.mxu0 %v5094_v40 }
 0xd58   : > { %4181 = vmatpush3.bf16.msra.mxu0 %v4549_v46  ;;  %v4566_v46 = vld [vmem:[#allocation4 + $0x38] sm:$0xff]  }
 0xd59   : > { %4182 = vmatprep.subr.bf16.mxu0 %v5094_v40 }
 0xd5c   : > { %4183 = vmatpush3.bf16.msra.mxu0 %v4550_v47 }
 0xd5d   : > { %4184 = vmatprep.subr.bf16.mxu0 %v5094_v40 }
 0xd60   : > { %4185 = vmatpush3.bf16.msra.mxu0 %v4551_v48  ;;  %v4567_v48 = vld [vmem:[#allocation4 + $0x30] sm:$0xff]  }
 0xd61   : > { %4210 = vmatprep.subr.bf16.mxu0 %v5094_v40 }
 0xdbe   : > { %v2051_v8 = vpop.xlane.xlu0 %2050 }
 0xdbf   : > { %4636 = vrcp.f32 %v2051_v8 }
 0xdc2   : > { %v2056_v37 = vpop.permute.xlu0 %2055 }
 0xdc3   : > { %4165 = vmatpush3.bf16.msra.mxu1 %v2056_v37 }
 0xdc4   : > { %4190 = vmatprep.subr.bf16.mxu1 %v5094_v40 }
 0xdcc   : > { %v4637_v38 = vpop.eup %4636 }
 0xdcd   : > { %v2053_v39 = vmul.f32 %v4637_v38, %v4635_v35  ;;  %v3773_v35 = vld [vmem:[%s5971_s8] ss:$0 sm:$0xff] }
 0xdcf   : > { %v2054_v41 = vpack.c.bf16 %v2053_v39, %v2053_v39  ;;  %v4562_v39 = vld [vmem:[#allocation4 + $0x18] sm:$0xff]  }
 0xdd1   : > { %4167 = vmatmul.mubr.msk.bf16.vlgmr.msra.gmra.mxu1 %vm1670_vm12, %v2054_v41 }
 0xdd2   : > { %4206 = vmatprep.mubr.msk.bf16.mxu1 %vm5095_vm7, %v5094_v40  ;;  %4191 = vmatpush3.bf16.msra.mxu1 %v4552_v9 }
 0xdd3   : > { %4192 = vmatprep.subr.bf16.mxu1 %v5094_v40 }
 0xdd6   : > { %4193 = vmatpush3.bf16.msra.mxu1 %v4553_v10 }
 0xdd7   : > { %4194 = vmatprep.subr.bf16.mxu1 %v5094_v40 }
 0xe91   : > { %v2095_v49 = vpop.f32.mrf.mxu1 }
 0xe92   : > { %v2101_v50 = vpack.c.bf16 %v2095_v49, %v2095_v49 }
 0xe93   : > { %v4168_v51 = vpop.f32.mrf.mxu1 }
 0xe94   : > { %2109 = vrot.lane.b32.xlu0 %v2101_v50, %s5096_s4  ;;  %v2445_v50 = vlaneseq  ;;  %v1454_v51 = vld [vmem:[%s607_s0] sm:$0x1]  ;;  %s5975_s0 = sld [smem:[#allocation52_spill]] }
 0xe95   : > { %v2098_v52 = vpop.f32.mrf.mxu1  ;;  %vm1455_vm1 = vcmp.ne.s32.totalorder %v1454_v51, 0 }
 0xe96   : > { %v5719_v52 = vshrl.u32 %v2445_v50, 7  ;;  %v2444_v55 = vsel %vm1455_vm1, 1, %v5099_v54 }
 0xe97   : > { %v4169_v53 = vpop.f32.mrf.mxu1 }
 0xe98   : > { %v2447_v53 = vsub.s32 0, %v5719_v52 }
 0xe9a   : > { %v2448_v56 = vrot.slane %v2444_v55, %v2447_v53 }
 0xe9c   : > { %vm2449_vm2 = vcmp.eq.s32.totalorder %v2448_v56, 1 }
 0xf06   : > { %v2110_v59 = vpop.permute.xlu0 %2109 }
 0xf07   : > { %v2119_v60 = vsel %vm2117_vm14, %v2116_v58, %v2110_v59 }
 0xf08   : > { %4187 = vmatmul.mubr.bf16.vlgmr.msra.gmra.mxu0 %v2119_v60 }
 0xf09   : > { %4214 = vmatprep.mubr.msk.bf16.mxu0 %vm5095_vm7, %v5094_v40  ;;  %4211 = vmatpush3.bf16.msra.mxu0 %v4560_v15 }
 0xf0a   : > { %4212 = vmatprep.subr.bf16.mxu0 %v5094_v40 }
 0xf0d   : > { %4213 = vmatpush3.bf16.msra.mxu0 %v4561_v33 }
 0xf0e   : > { %4226 = vmatprep.subr.bf16.mxu0 %v5094_v40 }
 0xfc8   : > { %v2228_v62 = vpop.f32.mrf.mxu0 }
 0xfc9   : > { %v2229_v29 = vadd.f32 %v3762_v61, %v2228_v62 }
 0xfca   : > { %v4188_v63 = vpop.f32.mrf.mxu0 }
 0xfcb   : > { %v5677_v0 = vadd.f32 %v2229_v29, %v5555_v34  ;;  %v4554_v34 = vld [vmem:[#allocation18 + $0x28] sm:$0xff]   ;;  %v4568_v63 = vld [vmem:[#allocation5 + $0x8] sm:$0xff]  }
 0xfcc   : > { %v2231_v1 = vpop.f32.mrf.mxu0  ;;  %4195 = vmatpush3.bf16.msra.mxu1 %v4554_v34 }
 0xfcd   : > { %2239 = vadd.xlane.f32.xlu1 %v5677_v0  ;;  %4196 = vmatprep.subr.bf16.mxu1 %v5094_v40  ;;  %v5728_v1 = vld [vmem:[#allocation5] sm:$0xff]  }
 0xfce   : > { %v4189_v2 = vpop.f32.mrf.mxu0 }
 0xfd0   : > { %4197 = vmatpush3.bf16.msra.mxu1 %v4555_v11 }
 0xfd1   : > { %4198 = vmatprep.subr.bf16.mxu1 %v5094_v40 }
 0xfd4   : > { %4199 = vmatpush3.bf16.msra.mxu1 %v4556_v12 }
 0xfd5   : > { %4200 = vmatprep.subr.bf16.mxu1 %v5094_v40 }
 0xfd8   : > { %4201 = vmatpush3.bf16.msra.mxu1 %v4557_v5 }
 0xfd9   : > { %4202 = vmatprep.subr.bf16.mxu1 %v5094_v40 }
 0xfdc   : > { %4203 = vmatpush3.bf16.msra.mxu1 %v4558_v13 }
 0xfdd   : > { %4204 = vmatprep.subr.bf16.mxu1 %v5094_v40 }
 0xfe0   : > { %4205 = vmatpush3.bf16.msra.mxu1 %v4559_v14 }
 0xfe1   : > { %4218 = vmatprep.subr.bf16.mxu1 %v5094_v40 }
0x1056   : > { %v2240_v3 = vpop.xlane.xlu1 %2239 }
0x1057   : > { %v2241_v4 = vmul.f32 0.0078125, %v2240_v3 }
0x1059   : > { %v2242_v6 = vsub.f32 %v5677_v0, %v2241_v4 }
0x105b   : > { %v2243_v7 = vmul.f32 %v2242_v6, %v2242_v6  ;;  %v2253_v26 = vmul.f32 %v3771_v25, %v2242_v6 }
0x105d   : > { %2244 = vadd.xlane.f32.xlu0 %v2243_v7 }
0x10e6   : > { %v2245_v16 = vpop.xlane.xlu0 %2244 }
0x10e7   : > { %v2246_v17 = vmul.f32 0.007874016, %v2245_v16 }
0x10e9   : > { %4638 = vrsqrt.f32 %v2246_v17  ;;  %vm2256_vm15 = vcmp.eq.f32.partialorder %v2246_v17, inf  ;;  %v2259_v20 = vand.u32 2147483648, %v2246_v17  ;;  %vm2258_vm0 = vcmp.eq.f32.partialorder %v2246_v17, 0.0 }
0x10f6   : > { %v4639_v18 = vpop.eup %4638 }
0x10f7   : > { %v2255_v19 = vmul.f32 %v4639_v18, %v2246_v17 }
0x10f9   : > { %v2257_v22 = vsel %vm2256_vm15, %v2246_v17, %v2255_v19 }
0x10fa   : > { %v2260_v23 = vsel %vm2258_vm0, %v2259_v20, %v2257_v22 }
0x10fb   : > { %v2261_v24 = vadd.f32 1e-06, %v2260_v23 }
0x10fd   : > { %4640 = vrcp.f32 %v2261_v24 }
0x110a   : > { %v4641_v27 = vpop.eup %4640 }
0x110b   : > { %v2263_v30 = vmul.f32 %v4641_v27, %v2253_v26 }
0x110d   : > { %v2270_v31 = vadd.f32 %v3772_v28, %v2263_v30 }
0x110f   : > { %v2271_v32 = vpack.c.bf16 %v2270_v31, %v2270_v31 }
0x1111   : > { %4207 = vmatmul.mubr.bf16.vlgmr.msra.gmra.mxu1 %v2271_v32 }
0x1112   : > { %4222 = vmatprep.mubr.msk.bf16.mxu1 %vm5095_vm7, %v5094_v40  ;;  %4219 = vmatpush3.bf16.msra.mxu1 %v4568_v63 }
0x1113   : > { %4220 = vmatprep.subr.bf16.mxu1 %v5094_v40 }
0x1116   : > { %4221 = vmatpush3.bf16.msra.mxu1 %v5728_v1 }
0x1117   : > { %4234 = vmatprep.subr.bf16.mxu1 %v5094_v40 }
0x11d1   : > { %v2377_v36 = vpop.f32.mrf.mxu1 }
0x11d2   : > { %v2378_v8 = vadd.f32 %v3773_v35, %v2377_v36 }
0x11d3   : > { %v4208_v37 = vpop.f32.mrf.mxu1 }
0x11d4   : > { %v2383_v38 = vpack.c.bf16 %v2378_v8, %v2378_v8 }
0x11d5   : > { %v2380_v41 = vpop.f32.mrf.mxu1 }
0x11d6   : > { %2653 = vrot.lane.b32.xlu1 %v2383_v38, %s5097_s6  ;;  %2528 = vrot.lane.b32.xlu0 %v2383_v38, %s5096_s4 }
0x11d7   : > { %4215 = vmatmul.mubr.msk.bf16.vlgmr.msra.gmra.mxu0 %vm1624_vm10, %v2383_v38  ;;  %v4209_v42 = vpop.f32.mrf.mxu1 }
0x11d8   : > { %4227 = vmatpush3.bf16.msra.mxu0 %v4562_v39  ;;  %4230 = vmatprep.mubr.msk.bf16.mxu0 %vm5095_vm7, %v5094_v40 }
0x11d9   : > { %4228 = vmatprep.subr.bf16.mxu0 %v5094_v40 }
0x11da   : > { %2778 = vrot.lane.b32.xlu1 %v2383_v38, %s5098_s2 }
0x11dc   : > { %4229 = vmatpush3.bf16.msra.mxu0 %v4563_v43 }
0x11dd   : > { %4242 = vmatprep.subr.bf16.mxu0 %v5094_v40 }
0x1248   : > { %v2529_v44 = vpop.permute.xlu0 %2528  ;;  %v2654_v47 = vpop.permute.xlu1 %2653 }
0x1249   : > { %4231 = vmatmul.mubr.msk.bf16.vlgmr.msra.gmra.mxu0 %vm1624_vm10, %v2529_v44 }
0x124a   : > { %4243 = vmatpush3.bf16.msra.mxu0 %v4564_v21  ;;  %4246 = vmatprep.mubr.msk.bf16.mxu0 %vm5095_vm7, %v5094_v40 }
0x124b   : > { %4244 = vmatprep.subr.bf16.mxu0 %v5094_v40 }
0x124c   : > { %v2779_v49 = vpop.permute.xlu1 %2778 }
0x124e   : > { %4245 = vmatpush3.bf16.msra.mxu0 %v4565_v45 }
0x124f   : > { %4258 = vmatprep.subr.bf16.mxu0 %v5094_v40 }
0x1251   : > { %4247 = vmatmul.mubr.msk.bf16.vlgmr.msra.gmra.mxu0 %vm1624_vm10, %v2654_v47 }
0x1252   : > { %4259 = vmatpush3.bf16.msra.mxu0 %v4566_v46  ;;  %4262 = vmatprep.mubr.msk.bf16.mxu0 %vm5095_vm7, %v5094_v40 }
0x1253   : > { %4260 = vmatprep.subr.bf16.mxu0 %v5094_v40 }
0x1256   : > { %4261 = vmatpush3.bf16.msra.mxu0 %v4567_v48 }
0x1257   : > { %4274 = vmatprep.subr.bf16.mxu0 %v5094_v40 }
0x1259   : > { %4263 = vmatmul.mubr.msk.bf16.vlgmr.msra.gmra.mxu0 %vm1624_vm10, %v2779_v49 }
0x125a   : > { %4290 = vmatprep.mubr.msk.bf16.mxu0 %vm5095_vm7, %v5094_v40 }
0x1297   : > { %v2437_v57 = vpop.f32.mrf.mxu0 }
0x1298   : > { %v2443_v58 = vmul.f32 0.17677669, %v2437_v57 }
0x1299   : > { %v4216_v59 = vpop.f32.mrf.mxu0 }
0x129a   : > { %v2450_v60 = vsel %vm2449_vm2, %v2443_v58, -1e+09 }
0x129b   : > { %v2440_v61 = vpop.f32.mrf.mxu0  ;;  %v2451_v62 = vsel %vm1624_vm10, %v2450_v60, -inf }
0x129c   : > { %2452 = vmax.xlane.f32.xlu0 %v2451_v62 }
0x129d   : > { %v4217_v29 = vpop.f32.mrf.mxu0 }
0x1309   : > { %v2579_v2 = vpop.f32.mrf.mxu0 }
0x130a   : > { %v2585_v3 = vmul.f32 0.17677669, %v2579_v2 }
0x130b   : > { %v4232_v4 = vpop.f32.mrf.mxu0 }
0x130c   : > { %v2586_v6 = vsel %vm2449_vm2, %v2585_v3, -1e+09 }
0x130d   : > { %v2582_v7 = vpop.f32.mrf.mxu0  ;;  %v2587_v9 = vsel %vm1624_vm10, %v2586_v6, -inf }
0x130e   : > { %2588 = vmax.xlane.f32.xlu1 %v2587_v9 }
0x130f   : > { %v4233_v10 = vpop.f32.mrf.mxu0 }
0x1311   : > { %v2704_v34 = vpop.f32.mrf.mxu0 }
0x1312   : > { %v2710_v11 = vmul.f32 0.17677669, %v2704_v34 }
0x1313   : > { %v4248_v12 = vpop.f32.mrf.mxu0 }
0x1314   : > { %v2711_v5 = vsel %vm2449_vm2, %v2710_v11, -1e+09  ;;  %v4570_v11 = vld [vmem:[#allocation18 + $0xf8] sm:$0xff]  }
0x1315   : > { %v2707_v13 = vpop.f32.mrf.mxu0  ;;  %v2712_v14 = vsel %vm1624_vm10, %v2711_v5, -inf  ;;  %4275 = vmatpush3.bf16.msra.mxu0 %v4570_v11  ;;  %v4607_v11 = vld [vmem:[#allocation21 + $0x28] sm:$0xff]  }
0x1316   : > { %2713 = vmax.xlane.f32.xlu0 %v2712_v14  ;;  %4276 = vmatprep.subr.bf16.mxu0 %v5094_v40 }
0x1317   : > { %v4249_v15 = vpop.f32.mrf.mxu0 }
0x1319   : > { %v2829_v16 = vpop.f32.mrf.mxu0 }
0x131a   : > { %v2835_v17 = vmul.f32 0.17677669, %v2829_v16  ;;  %v4572_v16 = vld [vmem:[#allocation18 + $0xe8] sm:$0xff]  }
0x131b   : > { %v4264_v18 = vpop.f32.mrf.mxu0 }
0x131c   : > { %v2836_v19 = vsel %vm2449_vm2, %v2835_v17, -1e+09  ;;  %v4573_v18 = vld [vmem:[#allocation18 + $0xe0] sm:$0xff]  }
0x131d   : > { %v2832_v20 = vpop.f32.mrf.mxu0  ;;  %v2837_v22 = vsel %vm1624_vm10, %v2836_v19, -inf }
0x131e   : > { %2838 = vmax.xlane.f32.xlu0 %v2837_v22 }
0x131f   : > { %v4265_v23 = vpop.f32.mrf.mxu0  ;;  %2599 = vrot.lane.b32.xlu1 %v5728_v1, %s5096_s4 }
0x1320   : > { %v4574_v23 = vld [vmem:[#allocation18 + $0xd8] sm:$0xff]  }
0x1323   : > { %2726 = vrot.lane.b32.xlu1 %v4568_v63, %s5097_s6 }
0x1325   : > { %v2453_v24 = vpop.xlane.xlu0 %2452 }
0x1326   : > { %v2454_v25 = vsub.f32 %v2450_v60, %v2453_v24 }
0x1328   : > { %v2455_v26 = vmul.f32 1.442695, %v2454_v25  ;;  %v4575_v25 = vld [vmem:[#allocation18 + $0xd0] sm:$0xff]  }
0x132a   : > { %4642 = vpow2.f32 %v2455_v26  ;;  %v4576_v26 = vld [vmem:[#allocation18 + $0xc8] sm:$0xff]  }
0x1337   : > { %v4643_v27 = vpop.eup %4642 }
0x1338   : > { %v2457_v28 = vsel %vm1624_vm10, %v4643_v27, 0.0 }
0x1339   : > { %2458 = vadd.xlane.f32.xlu0 %v2457_v28 }
0x134f   : > { %2601 = vrot.lane.b32.xlu0 %v4568_v63, %s5096_s4 }
0x1397   : > { %v2589_v30 = vpop.xlane.xlu1 %2588 }
0x1398   : > { %v2590_v31 = vsub.f32 %v2586_v6, %v2589_v30 }
0x139a   : > { %v2591_v32 = vmul.f32 1.442695, %v2590_v31 }
0x139b   : > { %v2600_v48 = vpop.permute.xlu1 %2599 }
0x139c   : > { %4644 = vpow2.f32 %v2591_v32 }
0x139f   : > { %v2714_v33 = vpop.xlane.xlu0 %2713  ;;  %v2727_v51 = vpop.permute.xlu1 %2726 }
0x13a0   : > { %v2715_v35 = vsub.f32 %v2711_v5, %v2714_v33  ;;  %v4571_v5 = vld [vmem:[#allocation18 + $0xf0] sm:$0xff]  }
0x13a1   : > { %4277 = vmatpush3.bf16.msra.mxu0 %v4571_v5  ;;  %v4609_v5 = vld [vmem:[#allocation21 + $0x20] sm:$0xff]  }
0x13a2   : > { %v2716_v36 = vmul.f32 1.442695, %v2715_v35  ;;  %4278 = vmatprep.subr.bf16.mxu0 %v5094_v40 }
0x13a4   : > { %4646 = vpow2.f32 %v2716_v36 }
0x13a5   : > { %4279 = vmatpush3.bf16.msra.mxu0 %v4572_v16  ;;  %v4613_v16 = vld [vmem:[#allocation21 + $0x10] sm:$0xff]  }
0x13a6   : > { %4280 = vmatprep.subr.bf16.mxu0 %v5094_v40 }
0x13a7   : > { %v2839_v41 = vpop.xlane.xlu0 %2838 }
0x13a8   : > { %v2840_v43 = vsub.f32 %v2836_v19, %v2839_v41 }
0x13a9   : > { %v4645_v8 = vpop.eup %4644  ;;  %4281 = vmatpush3.bf16.msra.mxu0 %v4573_v18 }
0x13aa   : > { %v2593_v37 = vsel %vm1624_vm10, %v4645_v8, 0.0  ;;  %v2841_v21 = vmul.f32 1.442695, %v2840_v43  ;;  %4282 = vmatprep.subr.bf16.mxu0 %v5094_v40 }
0x13ab   : > { %2594 = vadd.xlane.f32.xlu1 %v2593_v37 }
0x13ad   : > { %4283 = vmatpush3.bf16.msra.mxu0 %v4574_v23 }
0x13ae   : > { %4284 = vmatprep.subr.bf16.mxu0 %v5094_v40 }
0x13b1   : > { %v4647_v38 = vpop.eup %4646  ;;  %4285 = vmatpush3.bf16.msra.mxu0 %v4575_v25  ;;  %v3810_v25 = vld [vmem:[#allocation14 + $0x2] ss:$0 sm:$0xff] }
0x13b2   : > { %v2718_v39 = vsel %vm1624_vm10, %v4647_v38, 0.0  ;;  %4286 = vmatprep.subr.bf16.mxu0 %v5094_v40 }
0x13b3   : > { %2719 = vadd.xlane.f32.xlu0 %v2718_v39 }
0x13b5   : > { %4287 = vmatpush3.bf16.msra.mxu0 %v4576_v26 }
0x13b6   : > { %4288 = vmatprep.subr.bf16.mxu0 %v5094_v40 }
0x13bc   : > { %2724 = vrot.lane.b32.xlu1 %v5728_v1, %s5097_s6 }
0x13c2   : > { %v2459_v42 = vpop.xlane.xlu0 %2458 }
0x13c3   : > { %4648 = vrcp.f32 %v2459_v42 }
0x13c4   : > { %4650 = vpow2.f32 %v2841_v21 }
0x13c6   : > { %v2602_v47 = vpop.permute.xlu0 %2601 }
0x13c9   : > { %2851 = vrot.lane.b32.xlu0 %v4568_v63, %s5098_s2 }
0x13d0   : > { %v4649_v44 = vpop.eup %4648 }
0x13d1   : > { %v2461_v45 = vmul.f32 %v4649_v44, %v4643_v27  ;;  %v4651_v49 = vpop.eup %4650  ;;  %v4577_v27 = vld [vmem:[#allocation18 + $0xc0] sm:$0xff]  }
0x13d2   : > { %v2843_v50 = vsel %vm1624_vm10, %v4651_v49, 0.0  ;;  %4289 = vmatpush3.bf16.msra.mxu0 %v4577_v27 }
0x13d3   : > { %v2462_v46 = vpack.c.bf16 %v2461_v45, %v2461_v45 }
0x13d5   : > { %4223 = vmatmul.mubr.msk.bf16.vlgmr.msra.gmra.mxu1 %vm1624_vm10, %v2462_v46 }
0x13d6   : > { %4235 = vmatpush3.bf16.msra.mxu1 %v2602_v47  ;;  %4238 = vmatprep.mubr.msk.bf16.mxu1 %vm5095_vm7, %v5094_v40 }
0x13d7   : > { %4236 = vmatprep.subr.bf16.mxu1 %v5094_v40 }
0x13da   : > { %4237 = vmatpush3.bf16.msra.mxu1 %v2600_v48 }
0x13db   : > { %4250 = vmatprep.subr.bf16.mxu1 %v5094_v40 }
0x13e0   : > { %2844 = vadd.xlane.f32.xlu1 %v2843_v50 }
0x13f1   : > { %2849 = vrot.lane.b32.xlu1 %v5728_v1, %s5098_s2 }
0x1434   : > { %v2595_v55 = vpop.xlane.xlu1 %2594 }
0x1435   : > { %4652 = vrcp.f32 %v2595_v55  ;;  %v4578_v55 = vld [vmem:[#allocation20 + $0x70] ss:$8 sps:$4 sm:$0xff]  }
0x1438   : > { %v2725_v61 = vpop.permute.xlu1 %2724 }
0x143c   : > { %v2720_v56 = vpop.xlane.xlu0 %2719 }
0x143d   : > { %4654 = vrcp.f32 %v2720_v56  ;;  %v4583_v56 = vld [vmem:[#allocation20 + $0x64] ss:$8 sps:$4 sm:$0xff]  }
0x1440   : > { %v2852_v63 = vpop.permute.xlu0 %2851 }
0x1442   : > { %v4653_v57 = vpop.eup %4652 }
0x1443   : > { %v2597_v58 = vmul.f32 %v4653_v57, %v4645_v8  ;;  %v4586_v57 = vld [vmem:[#allocation20 + $0x54] ss:$8 sps:$4 sm:$0xff]  }
0x1445   : > { %v2598_v59 = vpack.c.bf16 %v2597_v58, %v2597_v58  ;;  %v4584_v58 = vld [vmem:[#allocation20 + $0x50] ss:$8 sps:$4 sm:$0xff]  }
0x1447   : > { %4239 = vmatmul.mubr.msk.bf16.vlgmr.msra.gmra.mxu1 %vm1624_vm10, %v2598_v59  ;;  %v4589_v59 = vld [vmem:[#allocation20 + $0x44] ss:$8 sps:$4 sm:$0xff]  }
0x1448   : > { %4251 = vmatpush3.bf16.msra.mxu1 %v2727_v51  ;;  %4254 = vmatprep.mubr.msk.bf16.mxu1 %vm5095_vm7, %v5094_v40  ;;  %v4580_v51 = vld [vmem:[#allocation20 + $0x74] ss:$8 sps:$4 sm:$0xff]  }
0x1449   : > { %4252 = vmatprep.subr.bf16.mxu1 %v5094_v40 }
0x144a   : > { %v4655_v60 = vpop.eup %4654 }
0x144b   : > { %v2722_v62 = vmul.f32 %v4655_v60, %v4647_v38  ;;  %v4587_v60 = vld [vmem:[#allocation20 + $0x40] ss:$8 sps:$4 sm:$0xff]  }
0x144c   : > { %4253 = vmatpush3.bf16.msra.mxu1 %v2725_v61  ;;  %v4592_v61 = vld [vmem:[#allocation20 + $0x34] ss:$8 sps:$4 sm:$0xff]  }
0x144d   : > { %v2723_v29 = vpack.c.bf16 %v2722_v62, %v2722_v62  ;;  %4266 = vmatprep.subr.bf16.mxu1 %v5094_v40  ;;  %v4590_v62 = vld [vmem:[#allocation20 + $0x30] ss:$8 sps:$4 sm:$0xff]  }
0x144f   : > { %4255 = vmatmul.mubr.msk.bf16.vlgmr.msra.gmra.mxu1 %vm1624_vm10, %v2723_v29  ;;  %v4595_v29 = vld [vmem:[#allocation20 + $0x24] ss:$8 sps:$4 sm:$0xff]  }
0x1450   : > { %4267 = vmatpush3.bf16.msra.mxu1 %v2852_v63  ;;  %4270 = vmatprep.mubr.msk.bf16.mxu1 %vm5095_vm7, %v5094_v40  ;;  %v4593_v63 = vld [vmem:[#allocation20 + $0x20] ss:$8 sps:$4 sm:$0xff]  }
0x1451   : > { %4268 = vmatprep.subr.bf16.mxu1 %v5094_v40  ;;  %v3801_v40 = vld [vmem:[%s5971_s8 + $0x3] ss:$0 sm:$0xff] }
0x1469   : > { %v2845_v1 = vpop.xlane.xlu1 %2844 }
0x146a   : > { %4656 = vrcp.f32 %v2845_v1  ;;  %v4598_v1 = vld [vmem:[#allocation20 + $0x14] ss:$8 sps:$4 sm:$0xff]  }
0x146d   : > { %v2850_v2 = vpop.permute.xlu1 %2849 }
0x146e   : > { %4269 = vmatpush3.bf16.msra.mxu1 %v2850_v2  ;;  %v4596_v2 = vld [vmem:[#allocation20 + $0x10] ss:$8 sps:$4 sm:$0xff]  }
0x146f   : > { %3175 = vmatprep.subr.bf16.mxu1 %v4580_v51 }
0x1477   : > { %v4657_v3 = vpop.eup %4656 }
0x1478   : > { %v2847_v4 = vmul.f32 %v4657_v3, %v4651_v49  ;;  %v4601_v3 = vld [vmem:[#allocation20 + $0x4] ss:$8 sps:$4 sm:$0xff]  }
0x147a   : > { %v2848_v6 = vpack.c.bf16 %v2847_v4, %v2847_v4  ;;  %v4599_v4 = vld [vmem:[#allocation20] ss:$8 sps:$4 sm:$0xff]  }
0x147c   : > { %4271 = vmatmul.mubr.msk.bf16.vlgmr.msra.gmra.mxu1 %vm1624_vm10, %v2848_v6  ;;  %v4602_v6 = vld [vmem:[#allocation21 + $0x78] sm:$0xff]  }
0x147d   : > { %3207 = vmatprep.mubr.bf16.mxu1 %v5099_v54  ;;  %3176 = vmatpush1.bf16.msra.mxu1 %v4578_v55 }
0x147e   : > { %3177 = vmatprep.subr.bf16.mxu1 %v4583_v56  ;;  %3992 = vmatprep.subr.bf16.mxu0 %v4602_v6 }
0x1495   : > { %v2516_v7 = vpop.f32.mrf.mxu1 }
0x1496   : > { %v2522_v36 = vpack.c.bf16 %v2516_v7, %v2516_v7  ;;  %v4603_v7 = vld [vmem:[#allocation21 + $0x38] sm:$0xff]  }
0x1497   : > { %v4224_v9 = vpop.f32.mrf.mxu1 }
0x1498   : > { %v4604_v9 = vld [vmem:[#allocation21 + $0x70] sm:$0xff]  }
0x1499   : > { %v2519_v10 = vpop.f32.mrf.mxu1 }
0x149a   : > { %v4605_v10 = vld [vmem:[#allocation21 + $0x30] sm:$0xff]  }
0x149b   : > { %v4225_v34 = vpop.f32.mrf.mxu1 }
0x149c   : > { %v4606_v34 = vld [vmem:[#allocation21 + $0x68] sm:$0xff]  }
0x1507   : > { %v2642_v12 = vpop.f32.mrf.mxu1 }
0x1508   : > { %v2648_v13 = vpack.c.bf16 %v2642_v12, %v2642_v12  ;;  %v4608_v12 = vld [vmem:[#allocation21 + $0x60] sm:$0xff]  }
0x1509   : > { %v4240_v14 = vpop.f32.mrf.mxu1 }
0x150a   : > { %2900 = vrot.lane.b32.xlu0 %v2648_v13, %s5098_s2  ;;  %v4610_v13 = vld [vmem:[#allocation21 + $0x58] sm:$0xff]  }
0x150b   : > { %v2645_v15 = vpop.f32.mrf.mxu1  ;;  %v4611_v14 = vld [vmem:[#allocation21 + $0x18] sm:$0xff]  }
0x150c   : > { %v4612_v15 = vld [vmem:[#allocation21 + $0x50] sm:$0xff]  }
0x150d   : > { %v4241_v54 = vpop.f32.mrf.mxu1 }
0x150f   : > { %v2767_v17 = vpop.f32.mrf.mxu1 }
0x1510   : > { %v2773_v19 = vpack.c.bf16 %v2767_v17, %v2767_v17 }
0x1511   : > { %v4256_v20 = vpop.f32.mrf.mxu1 }
0x1512   : > { %2903 = vrot.lane.b32.xlu1 %v2773_v19, %s5097_s6 }
0x1513   : > { %v2770_v22 = vpop.f32.mrf.mxu1 }
0x1515   : > { %v4257_v24 = vpop.f32.mrf.mxu1 }
0x153c   : > { %v2892_v28 = vpop.f32.mrf.mxu1 }
0x153d   : > { %v2898_v30 = vpack.c.bf16 %v2892_v28, %v2892_v28  ;;  %v3811_v28 = vld [vmem:[#allocation15 + $0x2] ss:$0 sm:$0xff] }
0x153e   : > { %v4272_v31 = vpop.f32.mrf.mxu1 }
0x153f   : > { %2906 = vrot.lane.b32.xlu0 %v2898_v30, %s5096_s4  ;;  %s3846_s4 = sshll.u32 %s5973_s17, 1 }
0x1540   : > { %v2895_v32 = vpop.f32.mrf.mxu1  ;;  %s3409_s6 = sadd.s32 %s5969_s10, %s3846_s4  ;;  %s3398_s10 = scalar_lea.sflag [#allocation8], %s614_s14 }
0x1541   : > { %s3847_s19 = sshll.u32 %s3409_s6, 7 }
0x1542   : > { %v4273_v33 = vpop.f32.mrf.mxu1  ;;  %s3411_s25 = scalar_lea.hbm %s5975_s0, %s3847_s19 }
0x1543   : > { %v4614_v33 = vld [vmem:[#allocation21 + $0x48] sm:$0xff]  }
0x157c   : > { %v2901_v35 = vpop.permute.xlu0 %2900 }
0x157d   : > { %v2910_v37 = vsel %vm1624_vm10, %v2522_v36, %v2901_v35  ;;  %v4615_v35 = vld [vmem:[#allocation21 + $0x8] sm:$0xff]   ;;  %v4616_v36 = vld [vmem:[#allocation21 + $0x40] sm:$0xff]  }
0x1584   : > { %v2904_v8 = vpop.permute.xlu1 %2903 }
0x1585   : > { %v2912_v38 = vsel %vm2114_vm13, %v2910_v37, %v2904_v8  ;;  %v4617_v8 = vld [vmem:[#allocation21] sm:$0xff]   ;;  %v3083_v37 = vld [vmem:[%s5972_s27] sm:$0x3]  ;;  %s5100_s27 = smov [#allocation23]  }
0x1586   : > { %s4934_s17 = sshll.u32 %s5100_s27, 4  ;;  %s4935_s17 = int_to_ptr.vmem [resolvable:$false] %s4934_s17 }
0x1587   : > { %s4936_s4 = scalar_lea.vmem %s4935_s17, 256  ;;  %p4937_p11 = scmp.lt.s32.totalorder %s3414_s1, %s4935_s17 }
0x1588   : > { %p4938_p3 = scmp.lt.s32.totalorder %s4936_s4, %s4930_s11 }
0x158a   : > { %p4939_p12 = por %p4938_p3, %p4937_p11 }
0x158c   : > { %p4940_p5 = pnand %p4939_p12, %p4933_p10 }
0x15b1   : > { %v2907_v39 = vpop.permute.xlu0 %2906 }
0x15b2   : > { %v2914_v41 = vsel %vm2117_vm14, %v2912_v38, %v2907_v39  ;;  %v3091_v38 = vsub.s32 1, %v5719_v52  ;;  %v3088_v39 = vrot.slane %v3083_v37, %v2447_v53  ;;  %v3828_v53 = vld [vmem:[%s5974_s24] ss:$0 sm:$0xff] }
0x15b3   : > { %4291 = vmatmul.mubr.bf16.vlgmr.msra.gmra.mxu0 %v2914_v41 }
0x15b4   : > { %3993 = vmatpush3.bf16.msra.mxu0 %v4603_v7  ;;  %v3092_v41 = vrot.slane %v3083_v37, %v3091_v38 }
0x15b5   : > { %3994 = vmatprep.subr.bf16.mxu0 %v4604_v9 }
0x15b8   : > { %3995 = vmatpush3.bf16.msra.mxu0 %v4605_v10 }
0x15b9   : > { %3996 = vmatprep.subr.bf16.mxu0 %v4606_v34 }
0x15bc   : > { %3997 = vmatpush3.bf16.msra.mxu0 %v4607_v11 }
0x15bd   : > { %3998 = vmatprep.subr.bf16.mxu0 %v4608_v12 }
0x15c0   : > { %3999 = vmatpush3.bf16.msra.mxu0 %v4609_v5 }
0x15c1   : > { %4000 = vmatprep.subr.bf16.mxu0 %v4610_v13 }
0x15c4   : > { %4001 = vmatpush3.bf16.msra.mxu0 %v4611_v14 }
0x15c5   : > { %4002 = vmatprep.subr.bf16.mxu0 %v4612_v15 }
0x15c8   : > { %4003 = vmatpush3.bf16.msra.mxu0 %v4613_v16 }
0x15c9   : > { %4004 = vmatprep.subr.bf16.mxu0 %v4614_v33 }
0x15cc   : > { %4005 = vmatpush3.bf16.msra.mxu0 %v4615_v35 }
0x15cd   : > { %4006 = vmatprep.subr.bf16.mxu0 %v4616_v36 }
0x15d0   : > { %4007 = vmatpush3.bf16.msra.mxu0 %v4617_v8 }
0x1673   : > { %v3023_v42 = vpop.f32.mrf.mxu0 }
0x1674   : > { %v3024_v43 = vadd.f32 %v3801_v40, %v3023_v42 }
0x1675   : > { %v4292_v21 = vpop.f32.mrf.mxu0 }
0x1676   : > { %v5784_v44 = vadd.f32 %v3024_v43, %v5677_v0  ;;  %v4581_v0 = vld [vmem:[#allocation20 + $0x60] ss:$8 sps:$4 sm:$0xff]  }
0x1677   : > { %v3026_v45 = vpop.f32.mrf.mxu0  ;;  %3178 = vmatpush1.bf16.msra.mxu1 %v4581_v0 }
0x1678   : > { %3034 = vadd.xlane.f32.xlu1 %v5784_v44  ;;  %3179 = vmatprep.subr.bf16.mxu1 %v4586_v57 }
0x1679   : > { %v4293_v46 = vpop.f32.mrf.mxu0 }
0x167b   : > { %3180 = vmatpush1.bf16.msra.mxu1 %v4584_v58 }
0x167c   : > { %3181 = vmatprep.subr.bf16.mxu1 %v4589_v59 }
0x167f   : > { %3182 = vmatpush1.bf16.msra.mxu1 %v4587_v60 }
0x1680   : > { %3183 = vmatprep.subr.bf16.mxu1 %v4592_v61 }
0x1683   : > { %3184 = vmatpush1.bf16.msra.mxu1 %v4590_v62 }
0x1684   : > { %3185 = vmatprep.subr.bf16.mxu1 %v4595_v29 }
0x1687   : > { %3186 = vmatpush1.bf16.msra.mxu1 %v4593_v63 }
0x1688   : > { %3187 = vmatprep.subr.bf16.mxu1 %v4598_v1 }
0x168b   : > { %3188 = vmatpush1.bf16.msra.mxu1 %v4596_v2 }
0x168c   : > { %3189 = vmatprep.subr.bf16.mxu1 %v4601_v3 }
0x168f   : > { %3190 = vmatpush1.bf16.msra.mxu1 %v4599_v4 }
0x1701   : > { %v3035_v47 = vpop.xlane.xlu1 %3034 }
0x1702   : > { %v3036_v48 = vmul.f32 0.0078125, %v3035_v47 }
0x1704   : > { %v5788_v49 = vsub.f32 %v5784_v44, %v3036_v48 }
0x1706   : > { %v3038_v50 = vmul.f32 %v5788_v49, %v5788_v49  ;;  %v3048_v26 = vmul.f32 %v3810_v25, %v5788_v49 }
0x1708   : > { %3039 = vadd.xlane.f32.xlu0 %v3038_v50 }
0x1791   : > { %v3040_v54 = vpop.xlane.xlu0 %3039 }
0x1792   : > { %v3041_v17 = vmul.f32 0.007874016, %v3040_v54 }
0x1794   : > { %4658 = vrsqrt.f32 %v3041_v17  ;;  %vm3051_vm3 = vcmp.eq.f32.partialorder %v3041_v17, inf  ;;  %v3054_v20 = vand.u32 2147483648, %v3041_v17  ;;  %vm3053_vm4 = vcmp.eq.f32.partialorder %v3041_v17, 0.0 }
0x17a1   : > { %v4659_v18 = vpop.eup %4658 }
0x17a2   : > { %v3050_v19 = vmul.f32 %v4659_v18, %v3041_v17 }
0x17a4   : > { %v3052_v22 = vsel %vm3051_vm3, %v3041_v17, %v3050_v19 }
0x17a5   : > { %v3055_v23 = vsel %vm3053_vm4, %v3054_v20, %v3052_v22 }
0x17a6   : > { %v3056_v24 = vadd.f32 1e-06, %v3055_v23 }
0x17a8   : > { %4660 = vrcp.f32 %v3056_v24 }
0x17b5   : > { %v4661_v27 = vpop.eup %4660 }
0x17b6   : > { %v3058_v30 = vmul.f32 %v4661_v27, %v3048_v26 }
0x17b8   : > { %v3065_v31 = vadd.f32 %v3811_v28, %v3058_v30 }
0x17ba   : > { %v3066_v32 = vpack.c.bf16 %v3065_v31, %v3065_v31 }
0x17bc   : > { %3208 = vmatmul.mubr.bf16.vlgmr.msra.gmra.mxu1 %v3066_v32 }
0x187c   : > { %v3209_v40 = vpop.f32.mrf.mxu1 }
0x187d   : > { %v3210_v42 = vadd.f32 %v3209_v40, %v3088_v39 }
0x187e   : > { %v3211_v43 = vpop.f32.mrf.mxu1 }
0x187f   : > { %v3212_v21 = vadd.f32 %v3211_v43, %v3092_v41  ;;  %v3216_v45 = vmax.f32 %v3210_v42, 0.0 }
0x1880   : > { %v3213_v46 = vpop.f32.mrf.mxu1 }
0x1881   : > { %v3217_v47 = vmax.f32 %v3212_v21, 0.0  ;;  %v3218_v50 = vpack.c.bf16 %v3216_v45, %v3216_v45 }
0x1882   : > { %v3214_v48 = vpop.f32.mrf.mxu1 }
0x1883   : > { %v3219_v49 = vpack.c.bf16 %v3217_v47, %v3217_v47 }
0x1885   : > { %3387 = vmatprep.mubr.bf16.mxu0 %v3219_v49 }
0x1886   : > { %3388 = vmatmul.mubr.bf16.vlgmr.msra.gmra.mxu0 %v3218_v50 }
0x1946   : > { %v4008_v52 = vpop.f32.mrf.mxu0 }
0x1948   : > { %v4009_v51 = vpop.f32.mrf.mxu0 }
0x1949   : > { %v4010_v55 = vadd.f32 %v4009_v51, %v4008_v52 }
0x194a   : > { %v4011_v56 = vpop.f32.mrf.mxu0 }
0x194b   : > { %v3390_v0 = vadd.f32 %v4010_v55, %v3828_v53 }
0x194c   : > { %v4012_v57 = vpop.f32.mrf.mxu0 }
0x194d   : > { %v3395_v58 = vadd.f32 %v3390_v0, %v5784_v44 }
0x194f   : > { %3396 = vst [vmem:[%s698_s16] sm:$0xff] %v3395_v58 }
0x1950   : > { %4943 = shalt.err (!%p4940_p5)
}
0x1951   : > { %s4944_s6 = scalar_lea.hbm %s3411_s25, 128  ;;  %s4948_s16 = scalar_lea.hbm %s5975_s0, 512 }
0x1952   : > { %p4945_p8 = scmp.ne.s32.totalorder %s3411_s25, %s4944_s6  ;;  %p4949_p9 = scmp.lt.s32.totalorder %s3411_s25, %s5975_s0 }
0x1953   : > { %p4950_p7 = scmp.lt.s32.totalorder %s4948_s16, %s4944_s6 }
0x1954   : > { %p4946_p0 = pnand %p4945_p8, %p5407_p13 }
0x1955   : > { %p4951_p6 = por %p4950_p7, %p4949_p9 }
0x1956   : > { %p4947_p2 = pneg %p4946_p0 }
0x1958   : > { %p4952_p4 = pnand %p4951_p6, %p4947_p2 }
0x195a   : > { %4955 = shalt.err (!%p4952_p4)
}
0x195b   : > { %4326 = dma.vmem_to_hbm [thread:$0]  (%p5407_p13), %s3414_s1, 128, %s3411_s25, %s3398_s10  }
0x195c PF: > { %p4377_p1 = scmp.ge.s32.totalorder %s5074_s23, 2  ;;  %s3425_s24 = sand.u32 1, %s5034_s29  }
0x195d   : > { %p5976_p10 = scmp.ne.s32.totalorder %s5949_s13, 0  ;;  %s3426_s19 = scalar_lea.sflag [#allocation8], %s3425_s24 }
0x195f   : > { %p4361_p11 = pnand %p4377_p1, %p5976_p10 }
0x1961   : > { %p4362_p3 = pneg %p4361_p11 }
0x1963   : > { %5029 = dma.done.wait (%p4362_p3), %s3426_s19, 128  }
0x1964   : > { %5031 = vsyncadd (%p4362_p3), %s3426_s19, 4294967168  ;;  %s39_s23 = sadd.s32 1, %s5074_s23   ;;  %s5977_s16 = sld [smem:[#allocation32_spill]] }
0x1965   : > { %p36_p12 = scmp.ge.s32.totalorder %s39_s23, 6   ;;  %s5978_s29 = smov %s5038_s30 }
0x1966   : > { %s5979_s30 = smov %s5042_s15  ;;  %s5980_s15 = smov %s5421_s26 }
0x1967   : > { %s5981_s17 = smov %s5054_s18  ;;  %s5982_s18 = smov %s5418_s7 }
0x1968   : > { %s5983_s19 = smov %s5066_s21  ;;  %s5984_s20 = smov %s5070_s22 }
0x1969   : > { %s5985_s21 = smov %s5988_s5  ;;  %s5986_s22 = smov %s5992_s28 }
0x196a   :  { %38 = sbr.rel (!%p36_p12) target bundleno = 32 (0x20), region = 203 }
0x196f   :  { %3431 = vsyncpa [#allocation7], 1 }
0x1970   :  { %3433 = vsyncpa [#allocation7 + $0x1], 1 }
0x1971   :  { %3434 = vsyncpa [#allocation10], 1 }
0x1972   :  { %3436 = vsyncpa [#allocation10 + $0x1], 1 }
0x1973   :  { %3437 = vsyncpa [#allocation13], 1 }
0x1974   :  { %3439 = vsyncpa [#allocation13 + $0x1], 1 }
0x1975   :  { %3440 = vsyncpa [#allocation16], 1 }
0x1976   :  { %3441 = vsyncpa [#allocation19], 1 }
0x1977   :  { %3442 = vsyncpa [#allocation22], 1 }
0x1978   :  { %3443 = vsyncpa [#allocation8], 1 }
0x1979   :  { %3445 = vsyncpa [#allocation8 + $0x1], 1 }

// kernel: tpu_custom_call.1
= control target key start
LH: loop header
LB: loop body
LE: loop exit
PB: predicated region body
PF: predicated region fallthrough
CT: control target
= control target key end

     0   :  { %s5863_s0 = inlined_call_operand.hbm [shape: f32[2,16,128], index: 0, kind: input, shape index: {}]   ;;  %s5864_s1 = inlined_call_operand.hbm [shape: f32[2,32,128], index: 1, kind: input, shape index: {}]   ;;  %s5865_s2 = inlined_call_operand.hbm [shape: s32[2,1,32], index: 2, kind: input, shape index: {}]   ;;  %s5866_s3 = inlined_call_operand.hbm [shape: s32[2,16,16], index: 3, kind: input, shape index: {}]   ;;  %s5867_s4 = inlined_call_operand.hbm [shape: f32[3,1,128], index: 4, kind: input, shape index: {}]   ;;  %s5868_s5 = inlined_call_operand.hbm [shape: f32[3,1,128], index: 5, kind: input, shape index: {}]   ;;  %s5869_s6 = inlined_call_operand.hbm [shape: bf16[4,128,128], index: 6, kind: input, shape index: {}]   ;;  %s5870_s7 = inlined_call_operand.vmem [shape: f32[4,1,128], index: 7, kind: input, shape index: {}]   ;;  %s5871_s8 = inlined_call_operand.hbm [shape: bf16[4,128,128], index: 8, kind: input, shape index: {}]   ;;  %s5872_s9 = inlined_call_operand.vmem [shape: f32[4,1,128], index: 9, kind: input, shape index: {}]   ;;  %s5873_s10 = inlined_call_operand.hbm [shape: bf16[128,256], index: 10, kind: input, shape index: {}]   ;;  %s5874_s11 = inlined_call_operand.vmem [shape: f32[1,256], index: 11, kind: input, shape index: {}]   ;;  %s5875_s12 = inlined_call_operand.hbm [shape: bf16[256,128], index: 12, kind: input, shape index: {}]   ;;  %s5876_s13 = inlined_call_operand.vmem [shape: f32[1,128], index: 13, kind: input, shape index: {}]   ;;  %s5877_s14 = inlined_call_operand.hbm [shape: f32[2,16,128], index: 14, kind: output, shape index: {}]  }
   0x1   :  { %5902 = sst [smem:[#allocation38_spill]] %s5863_s0 }
   0x2   :  { %5903 = sst [smem:[#allocation39_spill]] %s5864_s1 }
   0x3   :  { %5904 = sst [smem:[#allocation40_spill]] %s5865_s2 }
   0x4   :  { %5905 = sst [smem:[#allocation41_spill]] %s5866_s3 }
   0x5   :  { %5906 = sst [smem:[#allocation42_spill]] %s5867_s4 }
   0x6   :  { %5907 = sst [smem:[#allocation43_spill]] %s5868_s5 }
   0x7   :  { %5908 = sst [smem:[#allocation44_spill]] %s5869_s6 }
   0x8   :  { %5909 = sst [smem:[#allocation45_spill]] %s5870_s7 }
   0x9   :  { %5910 = sst [smem:[#allocation46_spill]] %s5871_s8 }
   0xa   :  { %5911 = sst [smem:[#allocation47_spill]] %s5872_s9 }
   0xb   :  { %5912 = sst [smem:[#allocation48_spill]] %s5873_s10 }
   0xc   :  { %5913 = sst [smem:[#allocation49_spill]] %s5874_s11 }
   0xd   :  { %5914 = sst [smem:[#allocation50_spill]] %s5875_s12 }
   0xe   :  { %5915 = sst [smem:[#allocation51_spill]] %s5876_s13 }
   0xf   :  { %5916 = sst [smem:[#allocation52_spill]] %s5877_s14 }
  0x10   :  { %19 = vsyncpa [#allocation7], 0 }
  0x11   :  { %21 = vsyncpa [#allocation7 + $0x1], 0 }
  0x12   :  { %22 = vsyncpa [#allocation10], 0 }
  0x13   :  { %24 = vsyncpa [#allocation10 + $0x1], 0 }
  0x14   :  { %25 = vsyncpa [#allocation13], 0 }
  0x15   :  { %27 = vsyncpa [#allocation13 + $0x1], 0 }
  0x16   :  { %28 = vsyncpa [#allocation16], 0 }
  0x17   :  { %29 = vsyncpa [#allocation19], 0 }
  0x18   :  { %30 = vsyncpa [#allocation22], 0 }
  0x19   :  { %31 = vsyncpa [#allocation8], 0 }
  0x1a   :  { %33 = vsyncpa [#allocation8 + $0x1], 0  ;;  %s5176_s29 = smov 0   ;;  %s5178_s30 = smov 0  }
  0x1b   :  { %s5180_s15 = smov 0   ;;  %s5182_s16 = smov 0  }
  0x1c   :  { %s5184_s17 = smov 0   ;;  %s5186_s18 = smov 0  }
  0x1d   :  { %s5188_s19 = smov 0   ;;  %s5190_s20 = smov 0  }
  0x1e   :  { %s5192_s21 = smov 0   ;;  %s5194_s22 = smov 0  }
  0x1f   :  { %s5196_s23 = smov 0  }
  0x20 LB: > { %5917 = sst [smem:[#allocation32_spill]] %s5050_s17  ;;  %s5232_s24 = sadd.s32 4294967295, %s5074_s23   ;;  %s5074_s23 = sphi %s5196_s23, %s39_s23   ;;  %s5070_s22 = sphi %s5194_s22, %s5986_s22   ;;  %s5066_s21 = sphi %s5192_s21, %s5985_s21   ;;  %s5062_s20 = sphi %s5190_s20, %s5984_s20   ;;  %s5058_s19 = sphi %s5188_s19, %s5983_s19   ;;  %s5054_s18 = sphi %s5186_s18, %s5982_s18   ;;  %s5050_s17 = sphi %s5184_s17, %s5981_s17   ;;  %s5046_s16 = sphi %s5182_s16, %s5977_s16   ;;  %s5042_s15 = sphi %s5180_s15, %s5980_s15   ;;  %s5038_s30 = sphi %s5178_s30, %s5979_s30   ;;  %s5034_s29 = sphi %s5176_s29, %s5978_s29  }
  0x21   : > { %5918 = sst [smem:[#allocation33_spill]] %s5058_s19  ;;  %p3622_p0 = scmp.ge.s32.totalorder %s5074_s23, 1 }
  0x22   : > { %5919 = sst [smem:[#allocation34_spill]] %s5062_s20  ;;  %p5896_p1 = scmp.eq.s32.totalorder %s5232_s24, 0 }
  0x23   : > { %5920 = sst [smem:[#allocation35_spill]] %s5232_s24  ;;  %p400_p2 = scmp.lt.s32.totalorder %s5074_s23, 5 }
  0x24   : > { %s5076_s26 = smov [#allocation14]   ;;  %s5077_s14 = smov [#allocation15]  }
  0x25   : > { %p5237_p3 = pnand %p3622_p0, %p400_p2  ;;  %s412_s27 = sshll.u32 %s5076_s26, 4  ;;  %s413_s27 = int_to_ptr.vmem [resolvable:$true] %s412_s27 }
  0x26   : > { %s425_s13 = sshll.u32 %s5077_s14, 4  ;;  %s4673_s11 = scalar_lea.vmem %s413_s27, 48  ;;  %s426_s13 = int_to_ptr.vmem [resolvable:$true] %s425_s13 }
  0x27   : > { %s5921_s25 = scalar_select %p5237_p3, 1, 0 }
  0x28   : > { %p4328_p4 = pneg %p5237_p3  ;;  %p4674_p7 = scmp.ne.s32.totalorder %s413_s27, %s4673_s11 }
  0x29   : > { %5922 = sst [smem:[#allocation36_spill]] %s5921_s25  ;;  %s4680_s26 = scalar_lea.vmem %s413_s27, 64 }
  0x2a   : > { %p5245_p5 = pnand %p4328_p4, %p5896_p1  ;;  %p4681_p10 = scmp.lt.s32.totalorder %s413_s27, %s413_s27 }
  0x2b   : > { %p4682_p11 = scmp.lt.s32.totalorder %s4680_s26, %s4673_s11 }
  0x2c   : > { %p5251_p6 = pneg %p5245_p5 }
  0x2d   : > { %p4683_p12 = por %p4682_p11, %p4681_p10 }
  0x2e   : > { %p4676_p8 = pnand %p4674_p7, %p5251_p6 }
  0x30   : > { %p4677_p9 = pneg %p4676_p8 }
  0x32   : > { %p4684_p13 = pnand %p4683_p12, %p4677_p9 }
  0x34   : > { %4687 = shalt.err (!%p4684_p13)
}
  0x35   : > { %s5078_s9 = smov 16   ;;  %s5079_s14 = smov 1  }
  0x36   : > { %s5925_s4 = sld [smem:[#allocation42_spill]]  ;;  %s4699_s25 = scalar_lea.vmem %s426_s13, 48 }
  0x37   : > { %p4700_p0 = scmp.ne.s32.totalorder %s426_s13, %s4699_s25  ;;  %s4706_s3 = scalar_lea.vmem %s426_s13, 64 }
  0x38   : > { %p4707_p7 = scmp.lt.s32.totalorder %s426_s13, %s426_s13  ;;  %p4708_p8 = scmp.lt.s32.totalorder %s4706_s3, %s4699_s25 }
  0x39   : > { %p4702_p2 = pnand %p4700_p0, %p5251_p6 }
  0x3a   : > { %p4709_p10 = por %p4708_p8, %p4707_p7 }
  0x3b   : > { %p4703_p4 = pneg %p4702_p2 }
  0x3c   : > { %4331 = dma.hbm_to_vmem [thread:$0]  (!%p5245_p5), %s5925_s4, 48, %s413_s27, [#allocation13], %s5078_s9, %s5078_s9, %s5079_s14  }
  0x3d   : > { %p4710_p9 = pnand %p4709_p10, %p4703_p4 }
  0x3f   : > { %4713 = shalt.err (!%p4710_p9)
}
  0x40   : > { %s5926_s5 = sld [smem:[#allocation43_spill]]  ;;  %s5080_s7 = smov [#allocation18]  }
  0x41   : > { %s454_s19 = sshll.u32 %s5080_s7, 4  ;;  %s455_s19 = int_to_ptr.vmem [resolvable:$true] %s454_s19 }
  0x42   : > { %s4725_s27 = scalar_lea.vmem %s455_s19, 4096  ;;  %p4733_p0 = scmp.lt.s32.totalorder %s455_s19, %s455_s19 }
  0x43   : > { %p4726_p11 = scmp.ne.s32.totalorder %s455_s19, %s4725_s27  ;;  %p4734_p2 = scmp.lt.s32.totalorder %s4725_s27, %s4725_s27 }
  0x45   : > { %p4728_p12 = pnand %p4726_p11, %p5251_p6  ;;  %p4735_p7 = por %p4734_p2, %p4733_p0 }
  0x46   : > { %4334 = dma.hbm_to_vmem [thread:$0]  (!%p5245_p5), %s5926_s5, 48, %s426_s13, [#allocation16], %s5078_s9, %s5078_s9, %s5079_s14  }
  0x47   : > { %p4729_p13 = pneg %p4728_p12 }
  0x49   : > { %p4736_p4 = pnand %p4735_p7, %p4729_p13 }
  0x4b   : > { %4739 = shalt.err (!%p4736_p4)
}
  0x4c   : > { %s5885_s3 = smov 64   ;;  %s5887_s9 = smov 4  }
  0x4d   : > { %s5927_s8 = sld [smem:[#allocation46_spill]]  ;;  %p65_p8 = scmp.ne.s32.totalorder %s5054_s18, %s5050_s17 }
  0x4e   : > { %p5897_p10 = scmp.eq.s32.totalorder %s5074_s23, 0  ;;  %p71_p9 = scmp.ne.s32.totalorder %s5050_s17, %s5046_s16 }
  0x4f   : > { %p5895_p13 = scmp.lt.s32.totalorder %s5074_s23, 4  ;;  %s5294_s11 = sand.u32 1, %s5054_s18  }
  0x50   : > { %p67_p11 = por %p5897_p10, %p65_p8  ;;  %p5288_p12 = por %p5896_p1, %p71_p9 }
  0x51   : > { %s5899_s26 = sand.u32 1, %s5074_s23   ;;  %s3633_s7 = sshll.u32 %s5294_s11, 5 }
  0x52   : > { %s5928_s14 = scalar_select %p5288_p12, 1, 0 }
  0x53   : > { %4340 = dma.hbm_to_vmem [thread:$0]  (!%p5245_p5), %s5927_s8, 4096, %s455_s19, [#allocation19], %s5885_s3, %s5885_s3, %s5887_s9  }
  0x54   : > { %5929 = sst [smem:[#allocation37_spill]] %s5928_s14  ;;  %p5300_p0 = pnand %p5895_p13, %p67_p11 }
  0x55   : > { %s3851_s16 = sshll.u32 %s5070_s22, 9  ;;  %s5931_s1 = sld [smem:[#allocation39_spill]] }
  0x56   : > { %s528_s3 = scalar_lea.vmem [#allocation9], %s3633_s7  ;;  %s5083_s4 = smov [#allocation17]  }
  0x57   : > { %s535_s9 = sshll.u32 %s528_s3, 4  ;;  %s438_s5 = sshll.u32 %s5083_s4, 4  ;;  %s536_s9 = int_to_ptr.vmem [resolvable:$true] %s535_s9  ;;  %s439_s5 = int_to_ptr.vmem [resolvable:$true] %s438_s5 }
  0x58   : > { %s5310_s8 = scalar_lea.sflag [#allocation10], %s5899_s26  ;;  %p5898_p2 = pneg %p5300_p0 }
  0x59   : > { %s4753_s14 = scalar_lea.vmem %s536_s9, 512  ;;  %s5084_s17 = smov [#allocation9]  }
  0x5a   : > { %p4754_p7 = scmp.ne.s32.totalorder %s536_s9, %s4753_s14  ;;  %s4758_s24 = sshll.u32 %s5084_s17, 4  ;;  %s4759_s24 = int_to_ptr.vmem [resolvable:$false] %s4758_s24 }
  0x5b   : > { %s534_s25 = scalar_lea.hbm %s5931_s1, %s3851_s16  ;;  %s4760_s16 = scalar_lea.vmem %s4759_s24, 1024 }
  0x5c   : > { %p4756_p4 = pnand %p4754_p7, %p5898_p2  ;;  %p4761_p9 = scmp.lt.s32.totalorder %s536_s9, %s4759_s24 }
  0x5d   : > { %p4762_p11 = scmp.lt.s32.totalorder %s4760_s16, %s4753_s14 }
  0x5e   : > { %p4757_p8 = pneg %p4756_p4 }
  0x5f   : > { %p4763_p13 = por %p4762_p11, %p4761_p9 }
  0x61   : > { %p4764_p1 = pnand %p4763_p13, %p4757_p8 }
  0x63   : > { %4767 = shalt.err (!%p4764_p1)
}
  0x64   : > { %s5900_s4 = smov 128   ;;  %s5901_s3 = smov 8  }
  0x65   : > { %4353 = dma.hbm_to_vmem [thread:$0]  (!%p5300_p0), %s534_s25, 512, %s536_s9, %s5310_s8, %s5900_s4, %s5900_s4, %s5901_s3  }
  0x66   : > { %s4779_s7 = scalar_lea.vmem %s439_s5, 4096  ;;  %p4787_p2 = scmp.lt.s32.totalorder %s439_s5, %s439_s5 }
  0x67   : > { %p4780_p7 = scmp.ne.s32.totalorder %s439_s5, %s4779_s7  ;;  %p4788_p9 = scmp.lt.s32.totalorder %s4779_s7, %s4779_s7 }
  0x69   : > { %p4782_p4 = pnand %p4780_p7, %p5251_p6  ;;  %p4789_p13 = por %p4788_p9, %p4787_p2 }
  0x6b   : > { %p4783_p10 = pneg %p4782_p4 }
  0x6d   : > { %p4790_p1 = pnand %p4789_p13, %p4783_p10 }
  0x6f   : > { %4793 = shalt.err (!%p4790_p1)
}
  0x70   : > { %s5932_s17 = smov 4   ;;  %s5933_s24 = smov 64  }
  0x71   : > { %s5934_s6 = sld [smem:[#allocation44_spill]]  ;;  %s5087_s9 = smov [#allocation20]  }
  0x72   : > { %s470_s13 = sshll.u32 %s5087_s9, 4  ;;  %s5088_s25 = smov [#allocation21]   ;;  %s471_s13 = int_to_ptr.vmem [resolvable:$true] %s470_s13 }
  0x73   : > { %s486_s16 = sshll.u32 %s5088_s25, 4  ;;  %s4805_s26 = scalar_lea.vmem %s471_s13, 2048  ;;  %s487_s16 = int_to_ptr.vmem [resolvable:$true] %s486_s16 }
  0x74   : > { %p4806_p8 = scmp.ne.s32.totalorder %s471_s13, %s4805_s26  ;;  %p4813_p11 = scmp.lt.s32.totalorder %s471_s13, %s471_s13 }
  0x75   : > { %p4814_p7 = scmp.lt.s32.totalorder %s4805_s26, %s4805_s26 }
  0x76   : > { %p4808_p10 = pnand %p4806_p8, %p5251_p6 }
  0x77   : > { %4337 = dma.hbm_to_vmem [thread:$0]  (!%p5245_p5), %s5934_s6, 4096, %s439_s5, [#allocation16], %s5933_s24, %s5933_s24, %s5932_s17  }
  0x78   : > { %p4809_p2 = pneg %p4808_p10  ;;  %p4815_p4 = por %p4814_p7, %p4813_p11 }
  0x7a   : > { %p4816_p9 = pnand %p4815_p4, %p4809_p2 }
  0x7c   : > { %4819 = shalt.err (!%p4816_p9)
}
  0x7d   : > { %s5935_s10 = sld [smem:[#allocation48_spill]]  ;;  %s4831_s14 = scalar_lea.vmem %s487_s16, 2048 }
  0x7e   : > { %p4832_p13 = scmp.ne.s32.totalorder %s487_s16, %s4831_s14  ;;  %p4839_p10 = scmp.lt.s32.totalorder %s487_s16, %s487_s16 }
  0x7f   : > { %p4840_p11 = scmp.lt.s32.totalorder %s4831_s14, %s4831_s14 }
  0x80   : > { %p4834_p1 = pnand %p4832_p13, %p5251_p6 }
  0x81   : > { %p4841_p2 = por %p4840_p11, %p4839_p10 }
  0x82   : > { %p4835_p8 = pneg %p4834_p1 }
  0x83   : > { %4343 = dma.hbm_to_vmem [thread:$0]  (!%p5245_p5), %s5935_s10, 2048, %s471_s13, [#allocation19], %s5900_s4, %s5900_s4, %s5901_s3  }
  0x84   : > { %p4842_p7 = pnand %p4841_p2, %p4835_p8 }
  0x86   : > { %4845 = shalt.err (!%p4842_p7)
}
  0x87   : > { %s5936_s12 = sld [smem:[#allocation50_spill]]  ;;  %s3630_s20 = sshll.u32 %s5294_s11, 4 }
  0x88   : > { %s3850_s9 = sshll.u32 %s5070_s22, 8  ;;  %s5937_s0 = sld [smem:[#allocation38_spill]] }
  0x89   : > { %s507_s7 = scalar_lea.vmem [#allocation6], %s3630_s20  ;;  %s3636_s14 = sshll.u32 %s5070_s22, 4 }
  0x8a   : > { %s514_s28 = sshll.u32 %s507_s7, 4  ;;  %s504_s4 = scalar_lea.sflag [#allocation7], %s5294_s11  ;;  %s515_s28 = int_to_ptr.vmem [resolvable:$true] %s514_s28 }
  0x8b   : > { %s4859_s3 = scalar_lea.vmem %s515_s28, 256  ;;  %p5938_p4 = pneg %p5300_p0 }
  0x8c   : > { %p4860_p6 = scmp.ne.s32.totalorder %s515_s28, %s4859_s3  ;;  %s5089_s26 = smov [#allocation6]  }
  0x8d   : > { %4346 = dma.hbm_to_vmem [thread:$0]  (!%p5245_p5), %s5936_s12, 2048, %s487_s16, [#allocation22], %s5933_s24, %s5933_s24, %s5932_s17  }
  0x8e   : > { %s513_s5 = scalar_lea.hbm %s5937_s0, %s3850_s9  ;;  %p4862_p9 = pnand %p4860_p6, %p5938_p4 }
  0x8f   : > { %s4864_s27 = sshll.u32 %s5089_s26, 4  ;;  %s4865_s27 = int_to_ptr.vmem [resolvable:$false] %s4864_s27 }
  0x90   : > { %p4863_p13 = pneg %p4862_p9  ;;  %s4866_s17 = scalar_lea.vmem %s4865_s27, 512 }
  0x91   : > { %p4867_p5 = scmp.lt.s32.totalorder %s515_s28, %s4865_s27  ;;  %p4868_p1 = scmp.lt.s32.totalorder %s4866_s17, %s4859_s3 }
  0x93   : > { %p4869_p8 = por %p4868_p1, %p4867_p5 }
  0x95   : > { %p4870_p10 = pnand %p4869_p8, %p4863_p13 }
  0x97   : > { %4873 = shalt.err (!%p4870_p10)
}
  0x98   : > { %s5939_s24 = smov 8   ;;  %s5940_s16 = smov 128  }
  0x99   : > { %4350 = dma.hbm_to_vmem [thread:$0]  (!%p5300_p0), %s513_s5, 256, %s515_s28, %s504_s4, %s5940_s16, %s5940_s16, %s5939_s24  }
  0x9a   : > { %s5941_s2 = sld [smem:[#allocation40_spill]]  ;;  %s548_s25 = scalar_lea.vmem [#allocation11], %s5294_s11 }
  0x9b   : > { %s555_s7 = sshll.u32 %s548_s25, 4  ;;  %p5942_p2 = pmov %p5938_p4  ;;  %s556_s7 = int_to_ptr.vmem [resolvable:$true] %s555_s7 }
  0x9c   : > { %s4887_s26 = scalar_lea.vmem %s556_s7, 16  ;;  %s5090_s3 = smov [#allocation11]  }
  0x9d   : > { %p4888_p11 = scmp.ne.s32.totalorder %s556_s7, %s4887_s26  ;;  %s4892_s27 = sshll.u32 %s5090_s3, 4  ;;  %s4893_s27 = int_to_ptr.vmem [resolvable:$false] %s4892_s27 }
  0x9e   : > { %s4894_s17 = scalar_lea.vmem %s4893_s27, 32  ;;  %p4895_p4 = scmp.lt.s32.totalorder %s556_s7, %s4893_s27 }
  0x9f   : > { %p4890_p7 = pnand %p4888_p11, %p5942_p2  ;;  %p4896_p9 = scmp.lt.s32.totalorder %s4894_s17, %s4887_s26 }
  0xa0   : > { %s553_s13 = scalar_lea.hbm %s5941_s2, %s3636_s14 }
  0xa1   : > { %p4891_p6 = pneg %p4890_p7  ;;  %p4897_p13 = por %p4896_p9, %p4895_p4 }
  0xa3   : > { %p4898_p5 = pnand %p4897_p13, %p4891_p6 }
  0xa5   : > { %4901 = shalt.err (!%p4898_p5)
}
  0xa6   : > { %s5943_s11 = sld [smem:[#allocation35_spill]]  ;;  %s3621_s4 = sadd.s32 4294967294, %s5074_s23  }
  0xa7   : > { %4356 = dma.hbm_to_vmem [thread:$0]  (!%p5300_p0), %s553_s13, 16, %s556_s7, %s5310_s8  }
  0xa8   : > { %s48_s5 = sadd.s32 1, %s5066_s21  ;;  %s51_s28 = sadd.s32 1, %s5070_s22 }
  0xa9   : > { %p49_p1 = scmp.ge.s32.totalorder %s48_s5, 2  ;;  %s58_s19 = sadd.s32 1, %s5054_s18 }
  0xaa   : > { %s138_s14 = sadd.s32 1, %s5042_s15  ;;  %p145_p8 = scmp.ne.s32.totalorder %s5042_s15, %s5038_s30 }
  0xab   : > { %s5988_s5 = smov (%p49_p1, %s48_s5), 0  ;;  %s5990_s28 = smov (!%p49_p1, %s51_s28), %s5070_s22 }
  0xac   : > { %s134_s24 = ssub.s32 %s5066_s21, %s5988_s5  ;;  %p5944_p10 = scmp.eq.s32.totalorder %s5074_s23, 0 }
  0xad   : > { %p53_p0 = scmp.ge.s32.totalorder %s5990_s28, 2  ;;  %p151_p2 = scmp.ne.s32.totalorder %s5038_s30, %s5034_s29 }
  0xae   : > { %p5392_p11 = por %p145_p8, %p5944_p10  ;;  %p387_p7 = scmp.eq.s32.totalorder %s5943_s11, 3 }
  0xaf   : > { %p393_p6 = scmp.eq.s32.totalorder %s3621_s4, 3  ;;  %s5992_s28 = smov (%p53_p0, %s5990_s28), 0 }
  0xb0   : > { %p5946_p4 = scmp.eq.s32.totalorder %s5943_s11, 0  ;;  %p5407_p13 = por %p387_p7, %p145_p8 }
  0xb1   : > { %s55_s9 = ssub.s32 %s5070_s22, %s5992_s28  ;;  %p5413_p5 = por %p393_p6, %p151_p2 }
  0xb2   : > { %p5403_p9 = por %p151_p2, %p5946_p4  ;;  %p56_p1 = scmp.eq.s32.totalorder %s55_s9, 0 }
  0xb3   : > { %s5949_s13 = scalar_select %p5413_p5, 1, 0 }
  0xb4   : > { %s135_s25 = sor.u32 %s134_s24, %s55_s9  ;;  %s564_s3 = sand.u32 1, %s5042_s15  }
  0xb5   : > { %p136_p10 = scmp.eq.s32.totalorder %s135_s25, 0  ;;  %s3638_s27 = sshll.u32 %s5070_s22, 1 }
  0xb6   : > { %s5418_s7 = scalar_select %p56_p1, %s5054_s18, %s58_s19  }
  0xb7   : > { %s5421_s26 = scalar_select %p136_p10, %s5042_s15, %s138_s14  }
  0xb8   : > { %s3637_s17 = sshll.u32 %s564_s3, 3  ;;  %s571_s11 = sadd.s32 %s5066_s21, %s3638_s27 }
  0xb9   : > { %s3639_s4 = sshll.u32 %s571_s11, 7  ;;  %s5950_s2 = sld [smem:[#allocation41_spill]] }
  0xba   : > { %s566_s10 = scalar_lea.vmem [#allocation12], %s3637_s17  ;;  %p5951_p8 = scmp.lt.s32.totalorder %s5074_s23, 4 }
  0xbb   : > { %s575_s12 = sshll.u32 %s566_s10, 4  ;;  %s5953_s19 = sand.u32 1, %s5074_s23   ;;  %s576_s12 = int_to_ptr.vmem [resolvable:$true] %s575_s12 }
  0xbc   : > { %p5433_p0 = pnand %p5951_p8, %p5392_p11  ;;  %s563_s14 = scalar_lea.sflag [#allocation13], %s5953_s19 }
  0xbd   : > { %s4915_s9 = scalar_lea.vmem %s576_s12, 128  ;;  %s5091_s0 = smov [#allocation12]  }
  0xbe   : > { %p4904_p2 = pneg %p5433_p0  ;;  %p4916_p7 = scmp.ne.s32.totalorder %s576_s12, %s4915_s9 }
  0xbf   : > { %s573_s6 = scalar_lea.hbm %s5950_s2, %s3639_s4  ;;  %s4920_s1 = sshll.u32 %s5091_s0, 4  ;;  %s4921_s1 = int_to_ptr.vmem [resolvable:$false] %s4920_s1 }
  0xc0   : > { %p4918_p6 = pnand %p4916_p7, %p4904_p2  ;;  %s4922_s2 = scalar_lea.vmem %s4921_s1, 256 }
  0xc1   : > { %p4923_p1 = scmp.lt.s32.totalorder %s576_s12, %s4921_s1  ;;  %p4924_p10 = scmp.lt.s32.totalorder %s4922_s2, %s4915_s9 }
  0xc2   : > { %p4919_p4 = pneg %p4918_p6 }
  0xc3   : > { %p4925_p5 = por %p4924_p10, %p4923_p1 }
  0xc5   : > { %p4926_p11 = pnand %p4925_p5, %p4919_p4 }
  0xc7   : > { %4929 = shalt.err (!%p4926_p11)
}
  0xc8   : > { %4359 = dma.hbm_to_vmem [thread:$0]  (!%p5433_p0), %s573_s6, 128, %s576_s12, %s563_s14  }
  0xc9   : > { %584 = sbr.rel (%p5237_p3) target bundleno = 6492 (0x195c), region = 76  ;;  %s5955_s8 = sld [smem:[#allocation32_spill]] (!%p5237_p3) }
  0xcf   : > { %s5446_s3 = sand.u32 1, %s5955_s8  }
  0xd0   : > { %s3641_s27 = sshll.u32 %s5446_s3, 4  ;;  %s587_s17 = scalar_lea.sflag [#allocation7], %s5446_s3 }
  0xd1   : > { %s5450_s11 = scalar_lea.vmem [#allocation6], %s3641_s27 }
  0xd2   : > { %5001 = dma.done.wait (%p5288_p12), %s587_s17, 256  }
  0xd3   : > { %5003 = vsyncadd (%p5288_p12), %s587_s17, 4294967040  ;;  %s5957_s4 = sld [smem:[#allocation35_spill]]  ;;  %s3642_s12 = sshll.u32 %s5446_s3, 5 }
  0xd4   : > { %s5458_s19 = scalar_lea.vmem [#allocation9], %s3642_s12 }
  0xd9   : > { %s595_s6 = sand.u32 1, %s5957_s4  }
  0xda   : > { %s596_s24 = scalar_lea.sflag [#allocation10], %s595_s6 }
  0xdb   : > { %5005 = dma.done.wait (%p5288_p12), %s596_s24, 528  }
  0xdc   : > { %5007 = vsyncadd (%p5288_p12), %s596_s24, 4294966768  ;;  %s614_s14 = sand.u32 1, %s5038_s30   ;;  %s607_s0 = scalar_lea.vmem [#allocation11], %s5446_s3 }
  0xdd   : > { %s5467_s9 = sshll.u32 %s614_s14, 3  ;;  %s613_s1 = scalar_lea.sflag [#allocation13], %s595_s6 }
  0xde   : > { %s616_s2 = scalar_lea.vmem [#allocation12], %s5467_s9 }
  0xdf   : > { %5009 = dma.done.wait (%p5403_p9), %s613_s1, 128  }
  0xe0   : > { %5011 = vsyncadd (%p5403_p9), %s613_s1, 4294967168  ;;  %p5958_p3 = scmp.eq.s32.totalorder %s5957_s4, 0 }
  0xe2   : > { %5013 = dma.done.wait (%p5958_p3), [#allocation13], 48   ;;  %p5959_p12 = pmov %p5958_p3 }
  0xe3   : > { %p5960_p5 = pmov %p5958_p3 }
  0xe4   : > { %5015 = vsyncadd (%p5959_p12), [#allocation13], 4294967248 }
  0xe5   : > { %5017 = dma.done.wait (%p5960_p5), [#allocation16], 4144   ;;  %p5961_p8 = pmov %p5958_p3 }
  0xe6   : > { %p5962_p0 = pmov %p5958_p3 }
  0xe7   : > { %5019 = vsyncadd (%p5961_p8), [#allocation16], 4294963152 }
  0xe8   : > { %5021 = dma.done.wait (%p5962_p0), [#allocation19], 6144   ;;  %p5963_p2 = pmov %p5962_p0 }
  0xe9   : > { %p5964_p9 = pmov %p5962_p0 }
  0xea   : > { %5023 = vsyncadd (%p5963_p2), [#allocation19], 4294961152 }
  0xeb   : > { %5025 = dma.done.wait (%p5964_p9), [#allocation22], 2048   ;;  %p5965_p7 = pmov %p5962_p0 }
  0xec   : > { %s698_s16 = scalar_lea.vmem [#allocation23], %s5467_s9  ;;  %s5966_s10 = sld [smem:[#allocation33_spill]] }
  0xed   : > { %5027 = vsyncadd (%p5965_p7), [#allocation22], 4294965248 }
  0xf2   : > { %p3651_p6 = scmp.ne.s32.totalorder %s5966_s10, 0 }
  0xf3   : > { %s5967_s27 = sld [smem:[#allocation45_spill]] (!%p3651_p6) }
  0xf4   : > { %703 = sbr.rel (%p3651_p6) target bundleno = 943 (0x3af), region = 120  ;;  %s5968_s24 = sld [smem:[#allocation47_spill]] (!%p3651_p6) }
  0xf9   : > { %v704_v0 = vld [vmem:[%s5450_s11] sm:$0xff]  ;;  %v705_v1 = vld [vmem:[%s5450_s11 + $0x8] sm:$0xff]  ;;  %v5092_v11 = vmov 0.0   ;;  %vm5093_vm0 = vmmov 0   ;;  %vm950_vm5 = vcmask 125952   ;;  %vm1293_vm6 = vcmask 257024  }
  0xfa   : > { %708 = vadd.xlane.f32.xlu0 %v704_v0  ;;  %v4487_v10 = vld [vmem:[#allocation17 + $0x78] sm:$0xff]   ;;  %4014 = vmatprep.subr.bf16.mxu0 %v5092_v11  ;;  %v4489_v13 = vld [vmem:[#allocation17 + $0x70] sm:$0xff]   ;;  %v4491_v15 = vld [vmem:[#allocation17 + $0x68] sm:$0xff]  }
  0xfb   : > { %4034 = vmatprep.subr.bf16.mxu1 %v5092_v11  ;;  %v4488_v12 = vld [vmem:[#allocation17 + $0xb8] sm:$0xff]   ;;  %4015 = vmatpush3.bf16.msra.mxu0 %v4487_v10  ;;  %v4490_v14 = vld [vmem:[#allocation17 + $0xb0] sm:$0xff]   ;;  %v4492_v16 = vld [vmem:[#allocation17 + $0xa8] sm:$0xff]  }
  0xfc   : > { %4035 = vmatpush3.bf16.msra.mxu1 %v4488_v12  ;;  %4016 = vmatprep.subr.bf16.mxu0 %v5092_v11  ;;  %v4493_v17 = vld [vmem:[#allocation17 + $0x60] sm:$0xff]   ;;  %v4495_v19 = vld [vmem:[#allocation17 + $0x58] sm:$0xff]   ;;  %v4497_v21 = vld [vmem:[#allocation17 + $0x50] sm:$0xff]  }
  0xfd   : > { %4036 = vmatprep.subr.bf16.mxu1 %v5092_v11  ;;  %v4494_v18 = vld [vmem:[#allocation17 + $0xa0] sm:$0xff]   ;;  %v4496_v20 = vld [vmem:[#allocation17 + $0x98] sm:$0xff]   ;;  %4030 = vmatprep.mubr.msk.bf16.mxu0 %vm5093_vm0, %v5092_v11  ;;  %v4498_v22 = vld [vmem:[#allocation17 + $0x90] sm:$0xff]  }
  0xfe   : > { %710 = vadd.xlane.f32.xlu0 %v705_v1  ;;  %4050 = vmatprep.mubr.msk.bf16.mxu1 %vm5093_vm0, %v5092_v11  ;;  %v4499_v23 = vld [vmem:[#allocation17 + $0x48] sm:$0xff]   ;;  %v4501_v25 = vld [vmem:[#allocation17 + $0x40] sm:$0xff]   ;;  %v4503_v27 = vld [vmem:[#allocation18 + $0x78] sm:$0xff]  }
  0xff   : > { %4017 = vmatpush3.bf16.msra.mxu0 %v4489_v13  ;;  %v4500_v24 = vld [vmem:[#allocation17 + $0x88] sm:$0xff]   ;;  %v4502_v26 = vld [vmem:[#allocation17 + $0x80] sm:$0xff]   ;;  %v4511_v28 = vld [vmem:[#allocation18 + $0xb8] sm:$0xff]  }
 0x100   : > { %4037 = vmatpush3.bf16.msra.mxu1 %v4490_v14  ;;  %4018 = vmatprep.subr.bf16.mxu0 %v5092_v11  ;;  %v3652_v45 = vld [vmem:[#allocation14] ss:$0 sm:$0xff]  ;;  %v3653_v51 = vld [vmem:[#allocation15] ss:$0 sm:$0xff]  ;;  %v1091_v53 = vld [vmem:[%s5458_s19] sm:$0xff] }
 0x101   : > { %4038 = vmatprep.subr.bf16.mxu1 %v5092_v11  ;;  %v1092_v54 = vld [vmem:[%s5458_s19 + $0x8] sm:$0xff]  ;;  %v4506_v63 = vld [vmem:[#allocation18 + $0x60] sm:$0xff]  }
 0x102   : > { %v1095_v57 = vpack.c.bf16 %v1092_v54, %v1091_v53  ;;  %v4504_v59 = vld [vmem:[#allocation18 + $0x70] sm:$0xff]   ;;  %v4505_v61 = vld [vmem:[#allocation18 + $0x68] sm:$0xff]   ;;  %v1094_v10 = vld [vmem:[%s5458_s19 + $0x18] sm:$0xff] }
 0x103   : > { %4019 = vmatpush3.bf16.msra.mxu0 %v4491_v15  ;;  %v4512_v60 = vld [vmem:[#allocation18 + $0xb0] sm:$0xff]   ;;  %v4513_v62 = vld [vmem:[#allocation18 + $0xa8] sm:$0xff]  }
 0x104   : > { %4039 = vmatpush3.bf16.msra.mxu1 %v4492_v16  ;;  %4020 = vmatprep.subr.bf16.mxu0 %v5092_v11  ;;  %v3655_v14 = vld [vmem:[%s5967_s27 + $0x1] ss:$0 sm:$0xff]  ;;  %v3681_v15 = vld [vmem:[%s5967_s27 + $0x2] ss:$0 sm:$0xff] }
 0x105   : > { %4040 = vmatprep.subr.bf16.mxu1 %v5092_v11 }
 0x107   : > { %4021 = vmatpush3.bf16.msra.mxu0 %v4493_v17 }
 0x108   : > { %4041 = vmatpush3.bf16.msra.mxu1 %v4494_v18  ;;  %4022 = vmatprep.subr.bf16.mxu0 %v5092_v11 }
 0x109   : > { %4042 = vmatprep.subr.bf16.mxu1 %v5092_v11 }
 0x10b   : > { %4023 = vmatpush3.bf16.msra.mxu0 %v4495_v19 }
 0x10c   : > { %4043 = vmatpush3.bf16.msra.mxu1 %v4496_v20  ;;  %4024 = vmatprep.subr.bf16.mxu0 %v5092_v11 }
 0x10d   : > { %4044 = vmatprep.subr.bf16.mxu1 %v5092_v11 }
 0x10f   : > { %4025 = vmatpush3.bf16.msra.mxu0 %v4497_v21 }
 0x110   : > { %4045 = vmatpush3.bf16.msra.mxu1 %v4498_v22  ;;  %4026 = vmatprep.subr.bf16.mxu0 %v5092_v11 }
 0x111   : > { %4046 = vmatprep.subr.bf16.mxu1 %v5092_v11 }
 0x113   : > { %4027 = vmatpush3.bf16.msra.mxu0 %v4499_v23 }
 0x114   : > { %4047 = vmatpush3.bf16.msra.mxu1 %v4500_v24  ;;  %4028 = vmatprep.subr.bf16.mxu0 %v5092_v11 }
 0x115   : > { %4048 = vmatprep.subr.bf16.mxu1 %v5092_v11 }
 0x117   : > { %4029 = vmatpush3.bf16.msra.mxu0 %v4501_v25 }
 0x118   : > { %4049 = vmatpush3.bf16.msra.mxu1 %v4502_v26  ;;  %4054 = vmatprep.subr.bf16.mxu0 %v4503_v27 }
 0x119   : > { %4074 = vmatprep.subr.bf16.mxu1 %v4511_v28 }
 0x183   : > { %v709_v2 = vpop.xlane.xlu0 %708 }
 0x184   : > { %v713_v3 = vmul.f32 0.0078125, %v709_v2  ;;  %v4515_v2 = vld [vmem:[#allocation18 + $0x98] sm:$0xff]  }
 0x186   : > { %v5495_v4 = vsub.f32 %v704_v0, %v713_v3  ;;  %v4514_v0 = vld [vmem:[#allocation18 + $0xa0] sm:$0xff]   ;;  %v4508_v3 = vld [vmem:[#allocation18 + $0x50] sm:$0xff]  }
 0x187   : > { %v711_v5 = vpop.xlane.xlu0 %710 }
 0x188   : > { %v714_v6 = vmul.f32 0.0078125, %v711_v5  ;;  %v717_v7 = vmul.f32 %v5495_v4, %v5495_v4  ;;  %v732_v47 = vmul.f32 %v3652_v45, %v5495_v4  ;;  %v4516_v4 = vld [vmem:[#allocation18 + $0x90] sm:$0xff]   ;;  %v4509_v5 = vld [vmem:[#allocation18 + $0x48] sm:$0xff]  }
 0x18a   : > { %v5499_v8 = vsub.f32 %v705_v1, %v714_v6  ;;  %719 = vadd.xlane.f32.xlu1 %v717_v7  ;;  %v4507_v1 = vld [vmem:[#allocation18 + $0x58] sm:$0xff]   ;;  %v4517_v6 = vld [vmem:[#allocation18 + $0x88] sm:$0xff]   ;;  %v4510_v7 = vld [vmem:[#allocation18 + $0x40] sm:$0xff]  }
 0x18c   : > { %v718_v9 = vmul.f32 %v5499_v8, %v5499_v8  ;;  %v733_v48 = vmul.f32 %v3652_v45, %v5499_v8  ;;  %v4518_v8 = vld [vmem:[#allocation18 + $0x80] sm:$0xff]  }
 0x18e   : > { %721 = vadd.xlane.f32.xlu1 %v718_v9  ;;  %v1093_v9 = vld [vmem:[%s5458_s19 + $0x10] sm:$0xff] }
 0x18f   : > { %v1096_v11 = vpack.c.bf16 %v1094_v10, %v1093_v9 }
 0x213   : > { %v720_v29 = vpop.xlane.xlu1 %719 }
 0x214   : > { %v724_v30 = vmul.f32 0.007874016, %v720_v29 }
 0x216   : > { %4519 = vrsqrt.f32 %v724_v30  ;;  %vm736_vm1 = vcmp.eq.f32.partialorder %v724_v30, inf  ;;  %v739_v35 = vand.u32 2147483648, %v724_v30  ;;  %vm738_vm2 = vcmp.eq.f32.partialorder %v724_v30, 0.0 }
 0x217   : > { %v722_v31 = vpop.xlane.xlu1 %721 }
 0x218   : > { %v725_v32 = vmul.f32 0.007874016, %v722_v31 }
 0x21a   : > { %4521 = vrsqrt.f32 %v725_v32  ;;  %vm743_vm3 = vcmp.eq.f32.partialorder %v725_v32, inf  ;;  %v746_v41 = vand.u32 2147483648, %v725_v32  ;;  %vm745_vm4 = vcmp.eq.f32.partialorder %v725_v32, 0.0 }
 0x223   : > { %v4520_v33 = vpop.eup %4519 }
 0x224   : > { %v735_v34 = vmul.f32 %v4520_v33, %v724_v30 }
 0x226   : > { %v737_v36 = vsel %vm736_vm1, %v724_v30, %v735_v34  ;;  %v3719_v30 = vld [vmem:[%s5968_s24 + $0x2] ss:$0 sm:$0xff] }
 0x227   : > { %v4522_v37 = vpop.eup %4521  ;;  %v740_v38 = vsel %vm738_vm2, %v739_v35, %v737_v36  ;;  %v3693_v36 = vld [vmem:[%s5968_s24 + $0x1] ss:$0 sm:$0xff] }
 0x228   : > { %v748_v39 = vadd.f32 1e-06, %v740_v38  ;;  %v742_v40 = vmul.f32 %v4522_v37, %v725_v32 }
 0x22a   : > { %4523 = vrcp.f32 %v748_v39  ;;  %v744_v42 = vsel %vm743_vm3, %v725_v32, %v742_v40 }
 0x22b   : > { %v747_v43 = vsel %vm745_vm4, %v746_v41, %v744_v42 }
 0x22c   : > { %v749_v44 = vadd.f32 1e-06, %v747_v43 }
 0x22e   : > { %4525 = vrcp.f32 %v749_v44 }
 0x237   : > { %v4524_v46 = vpop.eup %4523 }
 0x238   : > { %v751_v49 = vmul.f32 %v4524_v46, %v732_v47 }
 0x23a   : > { %v760_v55 = vadd.f32 %v3653_v51, %v751_v49 }
 0x23b   : > { %v4526_v50 = vpop.eup %4525 }
 0x23c   : > { %v753_v52 = vmul.f32 %v4526_v50, %v733_v48 }
 0x23e   : > { %v761_v56 = vadd.f32 %v3653_v51, %v753_v52 }
 0x240   : > { %v762_v58 = vpack.c.bf16 %v761_v56, %v760_v55 }
 0x242   : > { %4031 = vmatmul.mubr.bf16.vlgmr.msra.gmra.mxu0 %v762_v58  ;;  %4051 = vmatmul.mubr.bf16.vlgmr.msra.gmra.mxu1 %v762_v58 }
 0x243   : > { %4055 = vmatpush3.bf16.msra.mxu0 %v4503_v27  ;;  %4070 = vmatprep.mubr.bf16.mxu0 %v1095_v57 }
 0x244   : > { %4056 = vmatprep.subr.bf16.mxu0 %v4504_v59  ;;  %4075 = vmatpush3.bf16.msra.mxu1 %v4511_v28 }
 0x245   : > { %4076 = vmatprep.subr.bf16.mxu1 %v4512_v60  ;;  %4090 = vmatprep.mubr.bf16.mxu1 %v1095_v57 }
 0x247   : > { %4057 = vmatpush3.bf16.msra.mxu0 %v4504_v59 }
 0x248   : > { %4058 = vmatprep.subr.bf16.mxu0 %v4505_v61  ;;  %4077 = vmatpush3.bf16.msra.mxu1 %v4512_v60 }
 0x249   : > { %4078 = vmatprep.subr.bf16.mxu1 %v4513_v62 }
 0x24b   : > { %4059 = vmatpush3.bf16.msra.mxu0 %v4505_v61 }
 0x24c   : > { %4060 = vmatprep.subr.bf16.mxu0 %v4506_v63  ;;  %4079 = vmatpush3.bf16.msra.mxu1 %v4513_v62 }
 0x24d   : > { %4080 = vmatprep.subr.bf16.mxu1 %v4514_v0 }
 0x24f   : > { %4061 = vmatpush3.bf16.msra.mxu0 %v4506_v63 }
 0x250   : > { %4062 = vmatprep.subr.bf16.mxu0 %v4507_v1  ;;  %4081 = vmatpush3.bf16.msra.mxu1 %v4514_v0 }
 0x251   : > { %4082 = vmatprep.subr.bf16.mxu1 %v4515_v2 }
 0x253   : > { %4063 = vmatpush3.bf16.msra.mxu0 %v4507_v1 }
 0x254   : > { %4064 = vmatprep.subr.bf16.mxu0 %v4508_v3  ;;  %4083 = vmatpush3.bf16.msra.mxu1 %v4515_v2 }
 0x255   : > { %4084 = vmatprep.subr.bf16.mxu1 %v4516_v4 }
 0x257   : > { %4065 = vmatpush3.bf16.msra.mxu0 %v4508_v3 }
 0x258   : > { %4066 = vmatprep.subr.bf16.mxu0 %v4509_v5  ;;  %4085 = vmatpush3.bf16.msra.mxu1 %v4516_v4 }
 0x259   : > { %4086 = vmatprep.subr.bf16.mxu1 %v4517_v6 }
 0x25b   : > { %4067 = vmatpush3.bf16.msra.mxu0 %v4509_v5 }
 0x25c   : > { %4068 = vmatprep.subr.bf16.mxu0 %v4510_v7  ;;  %4087 = vmatpush3.bf16.msra.mxu1 %v4517_v6 }
 0x25d   : > { %4088 = vmatprep.subr.bf16.mxu1 %v4518_v8 }
 0x25f   : > { %4069 = vmatpush3.bf16.msra.mxu0 %v4510_v7 }
 0x260   : > { %4089 = vmatpush3.bf16.msra.mxu1 %v4518_v8 }
 0x262   : > { %4071 = vmatmul.mubr.bf16.vlgmr.msra.gmra.mxu0 %v1096_v11 }
 0x263   : > { %4091 = vmatmul.mubr.bf16.vlgmr.msra.gmra.mxu1 %v1096_v11 }
 0x302   : > { %v870_v12 = vpop.f32.mrf.mxu0  ;;  %v1074_v13 = vpop.f32.mrf.mxu1 }
 0x303   : > { %v871_v20 = vadd.f32 %v3655_v14, %v870_v12  ;;  %v1075_v21 = vadd.f32 %v3681_v15, %v1074_v13 }
 0x304   : > { %v4032_v16 = vpop.f32.mrf.mxu0  ;;  %v4052_v17 = vpop.f32.mrf.mxu1 }
 0x306   : > { %v873_v18 = vpop.f32.mrf.mxu0  ;;  %v1077_v19 = vpop.f32.mrf.mxu1 }
 0x307   : > { %v874_v22 = vadd.f32 %v3655_v14, %v873_v18  ;;  %v1078_v23 = vadd.f32 %v3681_v15, %v1077_v19 }
 0x308   : > { %v4033_v24 = vpop.f32.mrf.mxu0  ;;  %v4053_v25 = vpop.f32.mrf.mxu1 }
 0x309   : > { %v3861_v26 = vpack.c.bf16 %v1078_v23, %v1075_v21  ;;  %v877_v27 = vpack.c.bf16 %v874_v22, %v871_v20 }
 0x30b   : > { %3862 = vst [vmem:[#allocation3] sm:$0xff] %v3861_v26   ;;  %878 = vxpose.xlu0.c.b16.start.end [1/1] (short) %v877_v27, 128 }
 0x322   : > { %v4072_v28 = vpop.f32.mrf.mxu0 }
 0x323   : > { %v4092_v29 = vpop.f32.mrf.mxu1  ;;  %v1213_v48 = vadd.f32 %v4072_v28, %v3693_v36 }
 0x324   : > { %v1204_v31 = vpop.f32.mrf.mxu0  ;;  %v1426_v34 = vadd.f32 %v4092_v29, %v3719_v30 }
 0x325   : > { %v1417_v32 = vpop.f32.mrf.mxu1  ;;  %v1205_v40 = vadd.f32 %v3693_v36, %v1204_v31 }
 0x326   : > { %v4073_v33 = vpop.f32.mrf.mxu0  ;;  %v1418_v38 = vadd.f32 %v3719_v30, %v1417_v32 }
 0x327   : > { %v4093_v35 = vpop.f32.mrf.mxu1  ;;  %v1216_v45 = vadd.f32 %v4073_v33, %v3693_v36 }
 0x328   : > { %v1207_v37 = vpop.f32.mrf.mxu0  ;;  %v1429_v39 = vadd.f32 %v4093_v35, %v3719_v30 }
 0x329   : > { %v1208_v41 = vadd.f32 %v3693_v36, %v1207_v37  ;;  %v1420_v42 = vpop.f32.mrf.mxu1  ;;  %v1220_v49 = vpack.c.bf16 %v1216_v45, %v1213_v48 }
 0x32a   : > { %v3871_v43 = vpack.c.bf16 %v1429_v39, %v1426_v34  ;;  %v1421_v44 = vadd.f32 %v3719_v30, %v1420_v42 }
 0x32b   : > { %v1219_v46 = vpack.c.bf16 %v1208_v41, %v1205_v40 }
 0x32c   : > { %3873 = vst [vmem:[#allocation5 + $0x8] sm:$0xff] %v3871_v43   ;;  %v3866_v47 = vpack.c.bf16 %v1421_v44, %v1418_v38 }
 0x32d   : > { %1221 = vxpose.xlu1.c.b16.start [1/2] (short) %v1219_v46, 128 }
 0x32e   : > { %3867 = vst [vmem:[#allocation5] sm:$0xff] %v3866_v47  }
 0x331   : > { %1222 = vxpose.xlu1.c.b16.end [2/2] (short) %v1220_v49, 128 }
 0x36d   : > { %v886_v50 = vpop.trf.xlu0 }
 0x36e   : > { %v3664_v51 = vcombine.low %v886_v50, %v886_v50  ;;  %v3665_v52 = vcombine.high %v886_v50, %v886_v50 }
 0x370   : > { %951 = vst.msk [vmem:[#allocation2] sm:$0xf] %vm950_vm5, %v3664_v51  ;;  %952 = vst.msk [vmem:[#allocation2 + $0x4] sm:$0xf] %vm950_vm5, %v3665_v52 }
 0x371   : > { %v887_v53 = vpop.trf.xlu0 }
 0x372   : > { %v3666_v54 = vcombine.low %v887_v53, %v887_v53  ;;  %v3667_v55 = vcombine.high %v887_v53, %v887_v53 }
 0x374   : > { %953 = vst.msk [vmem:[#allocation2 + $0x8] sm:$0xf] %vm950_vm5, %v3666_v54  ;;  %954 = vst.msk [vmem:[#allocation2 + $0xc] sm:$0xf] %vm950_vm5, %v3667_v55 }
 0x375   : > { %v888_v56 = vpop.trf.xlu0 }
 0x376   : > { %v3668_v57 = vcombine.low %v888_v56, %v888_v56  ;;  %v3669_v58 = vcombine.high %v888_v56, %v888_v56 }
 0x378   : > { %955 = vst.msk [vmem:[#allocation2 + $0x10] sm:$0xf] %vm950_vm5, %v3668_v57  ;;  %956 = vst.msk [vmem:[#allocation2 + $0x14] sm:$0xf] %vm950_vm5, %v3669_v58 }
 0x379   : > { %v889_v59 = vpop.trf.xlu0 }
 0x37a   : > { %v3670_v60 = vcombine.low %v889_v59, %v889_v59  ;;  %v3671_v61 = vcombine.high %v889_v59, %v889_v59 }
 0x37c   : > { %957 = vst.msk [vmem:[#allocation2 + $0x18] sm:$0xf] %vm950_vm5, %v3670_v60  ;;  %958 = vst.msk [vmem:[#allocation2 + $0x1c] sm:$0xf] %vm950_vm5, %v3671_v61 }
 0x37d   : > { %v890_v62 = vpop.trf.xlu0 }
 0x37e   : > { %v3672_v63 = vcombine.low %v890_v62, %v890_v62  ;;  %v3673_v0 = vcombine.high %v890_v62, %v890_v62 }
 0x380   : > { %959 = vst.msk [vmem:[#allocation2 + $0x20] sm:$0xf] %vm950_vm5, %v3672_v63  ;;  %960 = vst.msk [vmem:[#allocation2 + $0x24] sm:$0xf] %vm950_vm5, %v3673_v0 }
 0x381   : > { %v891_v1 = vpop.trf.xlu0 }
 0x382   : > { %v3674_v2 = vcombine.low %v891_v1, %v891_v1  ;;  %v3675_v3 = vcombine.high %v891_v1, %v891_v1 }
 0x384   : > { %961 = vst.msk [vmem:[#allocation2 + $0x28] sm:$0xf] %vm950_vm5, %v3674_v2  ;;  %962 = vst.msk [vmem:[#allocation2 + $0x2c] sm:$0xf] %vm950_vm5, %v3675_v3 }
 0x385   : > { %v892_v4 = vpop.trf.xlu0 }
 0x386   : > { %v3676_v5 = vcombine.low %v892_v4, %v892_v4  ;;  %v3677_v6 = vcombine.high %v892_v4, %v892_v4 }
 0x388   : > { %963 = vst.msk [vmem:[#allocation2 + $0x30] sm:$0xf] %vm950_vm5, %v3676_v5  ;;  %964 = vst.msk [vmem:[#allocation2 + $0x34] sm:$0xf] %vm950_vm5, %v3677_v6 }
 0x389   : > { %v893_v7 = vpop.trf.xlu0 }
 0x38a   : > { %v3678_v8 = vcombine.low %v893_v7, %v893_v7  ;;  %v3679_v9 = vcombine.high %v893_v7, %v893_v7 }
 0x38c   : > { %965 = vst.msk [vmem:[#allocation2 + $0x38] sm:$0xf] %vm950_vm5, %v3678_v8  ;;  %966 = vst.msk [vmem:[#allocation2 + $0x3c] sm:$0xf] %vm950_vm5, %v3679_v9 }
 0x38f   : > { %v1229_v10 = vpop.trf.xlu1 }
 0x390   : > { %v3702_v11 = vcombine.low %v1229_v10, %v1229_v10  ;;  %v3703_v12 = vcombine.high %v1229_v10, %v1229_v10 }
 0x392   : > { %1294 = vst.msk [vmem:[#allocation4] sm:$0xf] %vm1293_vm6, %v3702_v11  ;;  %1295 = vst.msk [vmem:[#allocation4 + $0x4] sm:$0xf] %vm1293_vm6, %v3703_v12 }
 0x393   : > { %v1230_v13 = vpop.trf.xlu1 }
 0x394   : > { %v3704_v14 = vcombine.low %v1230_v13, %v1230_v13  ;;  %v3705_v15 = vcombine.high %v1230_v13, %v1230_v13 }
 0x396   : > { %1296 = vst.msk [vmem:[#allocation4 + $0x8] sm:$0xf] %vm1293_vm6, %v3704_v14  ;;  %1297 = vst.msk [vmem:[#allocation4 + $0xc] sm:$0xf] %vm1293_vm6, %v3705_v15 }
 0x397   : > { %v1231_v16 = vpop.trf.xlu1 }
 0x398   : > { %v3706_v17 = vcombine.low %v1231_v16, %v1231_v16  ;;  %v3707_v18 = vcombine.high %v1231_v16, %v1231_v16 }
 0x39a   : > { %1298 = vst.msk [vmem:[#allocation4 + $0x10] sm:$0xf] %vm1293_vm6, %v3706_v17  ;;  %1299 = vst.msk [vmem:[#allocation4 + $0x14] sm:$0xf] %vm1293_vm6, %v3707_v18 }
 0x39b   : > { %v1232_v19 = vpop.trf.xlu1 }
 0x39c   : > { %v3708_v20 = vcombine.low %v1232_v19, %v1232_v19  ;;  %v3709_v21 = vcombine.high %v1232_v19, %v1232_v19 }
 0x39e   : > { %1300 = vst.msk [vmem:[#allocation4 + $0x18] sm:$0xf] %vm1293_vm6, %v3708_v20  ;;  %1301 = vst.msk [vmem:[#allocation4 + $0x1c] sm:$0xf] %vm1293_vm6, %v3709_v21 }
 0x39f   : > { %v1233_v22 = vpop.trf.xlu1 }
 0x3a0   : > { %v3710_v23 = vcombine.low %v1233_v22, %v1233_v22  ;;  %v3711_v24 = vcombine.high %v1233_v22, %v1233_v22 }
 0x3a2   : > { %1302 = vst.msk [vmem:[#allocation4 + $0x20] sm:$0xf] %vm1293_vm6, %v3710_v23  ;;  %1303 = vst.msk [vmem:[#allocation4 + $0x24] sm:$0xf] %vm1293_vm6, %v3711_v24 }
 0x3a3   : > { %v1234_v25 = vpop.trf.xlu1 }
 0x3a4   : > { %v3712_v26 = vcombine.low %v1234_v25, %v1234_v25  ;;  %v3713_v27 = vcombine.high %v1234_v25, %v1234_v25 }
 0x3a6   : > { %1304 = vst.msk [vmem:[#allocation4 + $0x28] sm:$0xf] %vm1293_vm6, %v3712_v26  ;;  %1305 = vst.msk [vmem:[#allocation4 + $0x2c] sm:$0xf] %vm1293_vm6, %v3713_v27 }
 0x3a7   : > { %v1235_v28 = vpop.trf.xlu1 }
 0x3a8   : > { %v3714_v29 = vcombine.low %v1235_v28, %v1235_v28  ;;  %v3715_v30 = vcombine.high %v1235_v28, %v1235_v28 }
 0x3aa   : > { %1306 = vst.msk [vmem:[#allocation4 + $0x30] sm:$0xf] %vm1293_vm6, %v3714_v29  ;;  %1307 = vst.msk [vmem:[#allocation4 + $0x34] sm:$0xf] %vm1293_vm6, %v3715_v30 }
 0x3ab   : > { %v1236_v31 = vpop.trf.xlu1 }
 0x3ac   : > { %v3716_v32 = vcombine.low %v1236_v31, %v1236_v31  ;;  %v3717_v33 = vcombine.high %v1236_v31, %v1236_v31 }
 0x3ae   : > { %1308 = vst.msk [vmem:[#allocation4 + $0x38] sm:$0xf] %vm1293_vm6, %v3716_v32  ;;  %1309 = vst.msk [vmem:[#allocation4 + $0x3c] sm:$0xf] %vm1293_vm6, %v3717_v33 }
 0x3af PF: > { %s5969_s10 = sld [smem:[#allocation33_spill]]  ;;  %v4527_v39 = vld [vmem:[#allocation17 + $0x38] sm:$0xff]   ;;  %v5094_v40 = vmov 0.0   ;;  %v4528_v41 = vld [vmem:[#allocation17 + $0x30] sm:$0xff]   ;;  %v4529_v42 = vld [vmem:[#allocation17 + $0x28] sm:$0xff]   ;;  %vm5095_vm7 = vmmov 0  }
 0x3b0   : > { %4094 = vmatprep.subr.bf16.mxu0 %v5094_v40  ;;  %4114 = vmatprep.subr.bf16.mxu1 %v5094_v40  ;;  %v4530_v43 = vld [vmem:[#allocation17 + $0x20] sm:$0xff]   ;;  %v4531_v44 = vld [vmem:[#allocation17 + $0x18] sm:$0xff]   ;;  %v4532_v45 = vld [vmem:[#allocation17 + $0x10] sm:$0xff]   ;;  %s5970_s17 = sld [smem:[#allocation45_spill]]  ;;  %vm1624_vm10 = vcmask 261120   ;;  %s5096_s4 = smov 96  }
 0x3b1   : > { %4095 = vmatpush3.bf16.msra.mxu0 %v4527_v39  ;;  %4110 = vmatprep.mubr.msk.bf16.mxu0 %vm5095_vm7, %v5094_v40  ;;  %v4533_v46 = vld [vmem:[#allocation17 + $0x8] sm:$0xff]   ;;  %v4534_v47 = vld [vmem:[#allocation17] sm:$0xff]   ;;  %v4535_v48 = vld [vmem:[#allocation2 + $0x8] sm:$0xff]   ;;  %s5097_s6 = smov 64   ;;  %vm1670_vm12 = vcmask 130048   ;;  %vm2114_vm13 = vcmask 523264  }
 0x3b2   : > { %4096 = vmatprep.subr.bf16.mxu0 %v5094_v40  ;;  %4118 = vmatprep.mubr.msk.bf16.mxu1 %vm5095_vm7, %v5094_v40  ;;  %v3733_v57 = vld [vmem:[#allocation14] ss:$0 sm:$0xff]  ;;  %v3734_v60 = vld [vmem:[#allocation15] ss:$0 sm:$0xff]  ;;  %v4536_v0 = vld [vmem:[#allocation2] sm:$0xff]   ;;  %vm2117_vm14 = vcmask 785408  }
 0x3b3   : > { %4115 = vmatpush3.bf16.msra.mxu1 %v4535_v48  ;;  %v5592_v8 = vld [vmem:[%s616_s2] sm:$0xff]  ;;  %v4539_v27 = vld [vmem:[#allocation2 + $0x10] sm:$0xff]   ;;  %s5098_s2 = smov 32   ;;  %s5972_s27 = sld [smem:[#allocation49_spill]] }
 0x3b4   : > { %4116 = vmatprep.subr.bf16.mxu1 %v5094_v40  ;;  %vm1453_vm11 = vcmp.ne.s32.totalorder %v5592_v8, 0  ;;  %v5599_v21 = vld [vmem:[#allocation3] sm:$0xff]   ;;  %v4538_v25 = vld [vmem:[#allocation2 + $0x18] sm:$0xff]   ;;  %s5974_s24 = sld [smem:[#allocation51_spill]]  ;;  %s3413_s1 = sshll.u32 %s698_s16, 4  ;;  %s3414_s1 = int_to_ptr.vmem [resolvable:$true] %s3413_s1 }
 0x3b5   : > { %s3732_s8 = sshll.u32 %s5969_s10, 3  ;;  %4097 = vmatpush3.bf16.msra.mxu0 %v4528_v41 }
 0x3b6   : > { %s1457_s25 = scalar_lea.vmem %s5450_s11, %s3732_s8 [#allocation6]  ;;  %4098 = vmatprep.subr.bf16.mxu0 %v5094_v40  ;;  %v3735_v1 = vld [vmem:[%s5970_s17] ss:$0 sm:$0xff]  ;;  %s5971_s8 = sld [smem:[#allocation47_spill]] }
 0x3b7   : > { %v5555_v34 = vld [vmem:[%s1457_s25] sm:$0xff]  ;;  %4117 = vmatpush3.bf16.msra.mxu1 %v4536_v0  ;;  %s4930_s11 = scalar_lea.vmem %s3414_s1, 128 }
 0x3b8   : > { %1461 = vadd.xlane.f32.xlu0 %v5555_v34  ;;  %4122 = vmatprep.subr.bf16.mxu1 %v5094_v40  ;;  %p4931_p4 = scmp.ne.s32.totalorder %s3414_s1, %s4930_s11 }
 0x3b9   : > { %4099 = vmatpush3.bf16.msra.mxu0 %v4529_v42 }
 0x3ba   : > { %4100 = vmatprep.subr.bf16.mxu0 %v5094_v40  ;;  %p4932_p1 = pnand %p4931_p4, %p5407_p13 }
 0x3bc   : > { %p4933_p10 = pneg %p4932_p1 }
 0x3bd   : > { %4101 = vmatpush3.bf16.msra.mxu0 %v4530_v43 }
 0x3be   : > { %4102 = vmatprep.subr.bf16.mxu0 %v5094_v40 }
 0x3c1   : > { %4103 = vmatpush3.bf16.msra.mxu0 %v4531_v44 }
 0x3c2   : > { %4104 = vmatprep.subr.bf16.mxu0 %v5094_v40 }
 0x3c5   : > { %4105 = vmatpush3.bf16.msra.mxu0 %v4532_v45 }
 0x3c6   : > { %4106 = vmatprep.subr.bf16.mxu0 %v5094_v40 }
 0x3c9   : > { %4107 = vmatpush3.bf16.msra.mxu0 %v4533_v46 }
 0x3ca   : > { %4108 = vmatprep.subr.bf16.mxu0 %v5094_v40 }
 0x3cd   : > { %4109 = vmatpush3.bf16.msra.mxu0 %v4534_v47 }
 0x3ce   : > { %4170 = vmatprep.subr.bf16.mxu0 %v5094_v40 }
 0x441   : > { %v1462_v35 = vpop.xlane.xlu0 %1461 }
 0x442   : > { %v1464_v36 = vmul.f32 0.0078125, %v1462_v35 }
 0x444   : > { %v1465_v37 = vsub.f32 %v5555_v34, %v1464_v36 }
 0x446   : > { %v1466_v38 = vmul.f32 %v1465_v37, %v1465_v37  ;;  %v1477_v58 = vmul.f32 %v3733_v57, %v1465_v37 }
 0x448   : > { %1467 = vadd.xlane.f32.xlu0 %v1466_v38 }
 0x4d1   : > { %v1468_v49 = vpop.xlane.xlu0 %1467 }
 0x4d2   : > { %v1470_v50 = vmul.f32 0.007874016, %v1468_v49 }
 0x4d4   : > { %4618 = vrsqrt.f32 %v1470_v50  ;;  %vm1480_vm8 = vcmp.eq.f32.partialorder %v1470_v50, inf  ;;  %v1483_v53 = vand.u32 2147483648, %v1470_v50  ;;  %vm1482_vm9 = vcmp.eq.f32.partialorder %v1470_v50, 0.0 }
 0x4e1   : > { %v4619_v51 = vpop.eup %4618 }
 0x4e2   : > { %v1479_v52 = vmul.f32 %v4619_v51, %v1470_v50  ;;  %v4540_v51 = vld [vmem:[#allocation2 + $0x28] sm:$0xff]  }
 0x4e4   : > { %v1481_v54 = vsel %vm1480_vm8, %v1470_v50, %v1479_v52 }
 0x4e5   : > { %v1484_v55 = vsel %vm1482_vm9, %v1483_v53, %v1481_v54  ;;  %v4541_v53 = vld [vmem:[#allocation2 + $0x20] sm:$0xff]  }
 0x4e6   : > { %v1485_v56 = vadd.f32 1e-06, %v1484_v55 }
 0x4e8   : > { %4620 = vrcp.f32 %v1485_v56 }
 0x4f5   : > { %v4621_v59 = vpop.eup %4620 }
 0x4f6   : > { %v1487_v61 = vmul.f32 %v4621_v59, %v1477_v58 }
 0x4f8   : > { %v1494_v62 = vadd.f32 %v3734_v60, %v1487_v61 }
 0x4fa   : > { %v1495_v63 = vpack.c.bf16 %v1494_v62, %v1494_v62 }
 0x4fc   : > { %4111 = vmatmul.mubr.bf16.vlgmr.msra.gmra.mxu0 %v1495_v63 }
 0x4fd   : > { %4186 = vmatprep.mubr.msk.bf16.mxu0 %vm5095_vm7, %v5094_v40 }
 0x5bc   : > { %v1601_v2 = vpop.f32.mrf.mxu0 }
 0x5bd   : > { %v1602_v3 = vadd.f32 %v3735_v1, %v1601_v2 }
 0x5be   : > { %v4112_v4 = vpop.f32.mrf.mxu0 }
 0x5bf   : > { %v5580_v5 = vpack.c.bf16 %v1602_v3, %v1602_v3 }
 0x5c0   : > { %v1604_v6 = vpop.f32.mrf.mxu0 }
 0x5c1   : > { %1740 = vrot.lane.b32.xlu0 %v5580_v5, %s5096_s4  ;;  %4119 = vmatmul.mubr.msk.bf16.vlgmr.msra.gmra.mxu1 %vm1624_vm10, %v5580_v5 }
 0x5c2   : > { %v4113_v7 = vpop.f32.mrf.mxu0  ;;  %4124 = vmatprep.mubr.msk.bf16.mxu1 %vm5095_vm7, %v5094_v40  ;;  %4123 = vmatpush3.bf16.msra.mxu1 %v5599_v21 }
 0x5c3   : > { %4128 = vmatprep.subr.bf16.mxu1 %v5094_v40 }
 0x5c5   : > { %1862 = vrot.lane.b32.xlu0 %v5580_v5, %s5097_s6 }
 0x633   : > { %v1741_v28 = vpop.permute.xlu0 %1740 }
 0x637   : > { %v1863_v54 = vpop.permute.xlu0 %1862 }
 0x681   : > { %v1662_v9 = vpop.f32.mrf.mxu1 }
 0x682   : > { %v1668_v10 = vmul.f32 0.17677669, %v1662_v9 }
 0x683   : > { %v4120_v11 = vpop.f32.mrf.mxu1 }
 0x684   : > { %v1669_v12 = vsel %vm1453_vm11, %v1668_v10, -1e+09 }
 0x685   : > { %v1665_v13 = vpop.f32.mrf.mxu1  ;;  %v1671_v14 = vsel %vm1670_vm12, %v1669_v12, -inf }
 0x686   : > { %1672 = vmax.xlane.f32.xlu1 %v1671_v14  ;;  %v4543_v14 = vld [vmem:[#allocation2 + $0x30] sm:$0xff]  }
 0x687   : > { %v4121_v15 = vpop.f32.mrf.mxu1 }
 0x70f   : > { %v1673_v16 = vpop.xlane.xlu1 %1672 }
 0x710   : > { %v1674_v17 = vsub.f32 %v1669_v12, %v1673_v16 }
 0x712   : > { %v1675_v18 = vmul.f32 1.442695, %v1674_v17 }
 0x714   : > { %4622 = vpow2.f32 %v1675_v18 }
 0x721   : > { %v4623_v19 = vpop.eup %4622 }
 0x722   : > { %v1677_v20 = vsel %vm1670_vm12, %v4623_v19, 0.0 }
 0x723   : > { %1678 = vadd.xlane.f32.xlu1 %v1677_v20 }
 0x7ac   : > { %v1679_v22 = vpop.xlane.xlu1 %1678 }
 0x7ad   : > { %4624 = vrcp.f32 %v1679_v22 }
 0x7ba   : > { %v4625_v23 = vpop.eup %4624 }
 0x7bb   : > { %v1681_v24 = vmul.f32 %v4625_v23, %v4623_v19 }
 0x7bd   : > { %v1682_v26 = vpack.c.bf16 %v1681_v24, %v1681_v24 }
 0x7bf   : > { %4125 = vmatmul.mubr.msk.bf16.vlgmr.msra.gmra.mxu1 %vm1670_vm12, %v1682_v26 }
 0x7c0   : > { %4129 = vmatpush3.bf16.msra.mxu1 %v4538_v25  ;;  %4132 = vmatprep.mubr.msk.bf16.mxu1 %vm5095_vm7, %v5094_v40 }
 0x7c1   : > { %4130 = vmatprep.subr.bf16.mxu1 %v5094_v40 }
 0x7c4   : > { %4131 = vmatpush3.bf16.msra.mxu1 %v4539_v27 }
 0x7c5   : > { %4136 = vmatprep.subr.bf16.mxu1 %v5094_v40 }
 0x7c7   : > { %4133 = vmatmul.mubr.msk.bf16.vlgmr.msra.gmra.mxu1 %vm1624_vm10, %v1741_v28 }
 0x7c8   : > { %4138 = vmatprep.mubr.msk.bf16.mxu1 %vm5095_vm7, %v5094_v40 }
 0x87f   : > { %v5611_v29 = vpop.f32.mrf.mxu1 }
 0x881   : > { %v4126_v30 = vpop.f32.mrf.mxu1 }
 0x883   : > { %v1731_v31 = vpop.f32.mrf.mxu1 }
 0x885   : > { %v4127_v32 = vpop.f32.mrf.mxu1 }
 0x887   : > { %v1791_v33 = vpop.f32.mrf.mxu1 }
 0x888   : > { %v1797_v35 = vmul.f32 0.17677669, %v1791_v33 }
 0x889   : > { %v4134_v36 = vpop.f32.mrf.mxu1 }
 0x88a   : > { %v1798_v37 = vsel %vm1453_vm11, %v1797_v35, -1e+09 }
 0x88b   : > { %v1794_v38 = vpop.f32.mrf.mxu1  ;;  %v1799_v39 = vsel %vm1670_vm12, %v1798_v37, -inf }
 0x88c   : > { %1800 = vmax.xlane.f32.xlu1 %v1799_v39 }
 0x88d   : > { %v4135_v41 = vpop.f32.mrf.mxu1 }
 0x915   : > { %v1801_v42 = vpop.xlane.xlu1 %1800 }
 0x916   : > { %v1802_v43 = vsub.f32 %v1798_v37, %v1801_v42  ;;  %v4544_v42 = vld [vmem:[#allocation17 + $0xf8] sm:$0xff]  }
 0x917   : > { %4171 = vmatpush3.bf16.msra.mxu0 %v4544_v42 }
 0x918   : > { %v1803_v44 = vmul.f32 1.442695, %v1802_v43  ;;  %v4545_v43 = vld [vmem:[#allocation17 + $0xf0] sm:$0xff]   ;;  %4172 = vmatprep.subr.bf16.mxu0 %v5094_v40 }
 0x91a   : > { %4626 = vpow2.f32 %v1803_v44  ;;  %v4547_v44 = vld [vmem:[#allocation17 + $0xe0] sm:$0xff]  }
 0x91b   : > { %4173 = vmatpush3.bf16.msra.mxu0 %v4545_v43  ;;  %v4563_v43 = vld [vmem:[#allocation4 + $0x10] sm:$0xff]  }
 0x91c   : > { %4174 = vmatprep.subr.bf16.mxu0 %v5094_v40 }
 0x927   : > { %v4627_v45 = vpop.eup %4626 }
 0x928   : > { %v1805_v46 = vsel %vm1670_vm12, %v4627_v45, 0.0 }
 0x929   : > { %1806 = vadd.xlane.f32.xlu1 %v1805_v46  ;;  %v4549_v46 = vld [vmem:[#allocation17 + $0xd0] sm:$0xff]  }
 0x93a   : > { %1811 = vrot.lane.b32.xlu1 %v5599_v21, %s5096_s4 }
 0x9b2   : > { %v1807_v47 = vpop.xlane.xlu1 %1806 }
 0x9b3   : > { %4628 = vrcp.f32 %v1807_v47  ;;  %v4550_v47 = vld [vmem:[#allocation17 + $0xc8] sm:$0xff]  }
 0x9b6   : > { %v1812_v48 = vpop.permute.xlu1 %1811 }
 0x9b7   : > { %4137 = vmatpush3.bf16.msra.mxu1 %v1812_v48  ;;  %v4551_v48 = vld [vmem:[#allocation17 + $0xc0] sm:$0xff]  }
 0x9b8   : > { %4142 = vmatprep.subr.bf16.mxu1 %v5094_v40 }
 0x9c0   : > { %v4629_v49 = vpop.eup %4628 }
 0x9c1   : > { %v1809_v50 = vmul.f32 %v4629_v49, %v4627_v45  ;;  %v4548_v45 = vld [vmem:[#allocation17 + $0xd8] sm:$0xff]  }
 0x9c3   : > { %v1810_v52 = vpack.c.bf16 %v1809_v50, %v1809_v50 }
 0x9c5   : > { %4139 = vmatmul.mubr.msk.bf16.vlgmr.msra.gmra.mxu1 %vm1670_vm12, %v1810_v52 }
 0x9c6   : > { %4143 = vmatpush3.bf16.msra.mxu1 %v4540_v51  ;;  %4146 = vmatprep.mubr.msk.bf16.mxu1 %vm5095_vm7, %v5094_v40 }
 0x9c7   : > { %4144 = vmatprep.subr.bf16.mxu1 %v5094_v40 }
 0x9ca   : > { %4145 = vmatpush3.bf16.msra.mxu1 %v4541_v53 }
 0x9cb   : > { %4150 = vmatprep.subr.bf16.mxu1 %v5094_v40 }
 0x9cd   : > { %4147 = vmatmul.mubr.msk.bf16.vlgmr.msra.gmra.mxu1 %vm1624_vm10, %v1863_v54 }
 0x9ce   : > { %4152 = vmatprep.mubr.msk.bf16.mxu1 %vm5095_vm7, %v5094_v40 }
 0xa85   : > { %v1851_v55 = vpop.f32.mrf.mxu1 }
 0xa86   : > { %v1857_v28 = vpack.c.bf16 %v1851_v55, %v1851_v55  ;;  %v1734_v55 = vpack.c.bf16 %v5611_v29, %v5611_v29 }
 0xa87   : > { %v4140_v56 = vpop.f32.mrf.mxu1 }
 0xa89   : > { %v1854_v57 = vpop.f32.mrf.mxu1 }
 0xa8b   : > { %v4141_v58 = vpop.f32.mrf.mxu1 }
 0xa8d   : > { %v1913_v59 = vpop.f32.mrf.mxu1 }
 0xa8e   : > { %v1919_v60 = vmul.f32 0.17677669, %v1913_v59 }
 0xa8f   : > { %v4148_v61 = vpop.f32.mrf.mxu1 }
 0xa90   : > { %v1920_v62 = vsel %vm1453_vm11, %v1919_v60, -1e+09  ;;  %v3762_v61 = vld [vmem:[%s5970_s17 + $0x3] ss:$0 sm:$0xff]  ;;  %s5973_s17 = sld [smem:[#allocation34_spill]] }
 0xa91   : > { %v1916_v63 = vpop.f32.mrf.mxu1  ;;  %v1921_v0 = vsel %vm1670_vm12, %v1920_v62, -inf }
 0xa92   : > { %1922 = vmax.xlane.f32.xlu1 %v1921_v0 }
 0xa93   : > { %v4149_v1 = vpop.f32.mrf.mxu1 }
 0xaa3   : > { %1984 = vrot.lane.b32.xlu1 %v5580_v5, %s5098_s2  ;;  %v4542_v5 = vld [vmem:[#allocation2 + $0x38] sm:$0xff]  }
 0xb1b   : > { %v1923_v2 = vpop.xlane.xlu1 %1922 }
 0xb1c   : > { %v1924_v3 = vsub.f32 %v1920_v62, %v1923_v2 }
 0xb1e   : > { %v1925_v4 = vmul.f32 1.442695, %v1924_v3 }
 0xb1f   : > { %v1985_v15 = vpop.permute.xlu1 %1984 }
 0xb20   : > { %4630 = vpow2.f32 %v1925_v4 }
 0xb2d   : > { %v4631_v6 = vpop.eup %4630 }
 0xb2e   : > { %v1927_v7 = vsel %vm1670_vm12, %v4631_v6, 0.0 }
 0xb2f   : > { %1928 = vadd.xlane.f32.xlu0 %v1927_v7 }
 0xb45   : > { %1933 = vrot.lane.b32.xlu0 %v5599_v21, %s5097_s6 }
 0xbb8   : > { %v1929_v9 = vpop.xlane.xlu0 %1928 }
 0xbb9   : > { %4632 = vrcp.f32 %v1929_v9  ;;  %v4552_v9 = vld [vmem:[#allocation18 + $0x38] sm:$0xff]  }
 0xbbc   : > { %v1934_v10 = vpop.permute.xlu0 %1933 }
 0xbbd   : > { %4151 = vmatpush3.bf16.msra.mxu1 %v1934_v10  ;;  %v4553_v10 = vld [vmem:[#allocation18 + $0x30] sm:$0xff]  }
 0xbbe   : > { %4156 = vmatprep.subr.bf16.mxu1 %v5094_v40 }
 0xbc6   : > { %v4633_v11 = vpop.eup %4632 }
 0xbc7   : > { %v1931_v12 = vmul.f32 %v4633_v11, %v4631_v6  ;;  %v4555_v11 = vld [vmem:[#allocation18 + $0x20] sm:$0xff]  }
 0xbc9   : > { %v1932_v13 = vpack.c.bf16 %v1931_v12, %v1931_v12  ;;  %v4556_v12 = vld [vmem:[#allocation18 + $0x18] sm:$0xff]  }
 0xbcb   : > { %4153 = vmatmul.mubr.msk.bf16.vlgmr.msra.gmra.mxu1 %vm1670_vm12, %v1932_v13  ;;  %v4558_v13 = vld [vmem:[#allocation18 + $0x8] sm:$0xff]  }
 0xbcc   : > { %4157 = vmatpush3.bf16.msra.mxu1 %v4542_v5  ;;  %4160 = vmatprep.mubr.msk.bf16.mxu1 %vm5095_vm7, %v5094_v40  ;;  %v4557_v5 = vld [vmem:[#allocation18 + $0x10] sm:$0xff]  }
 0xbcd   : > { %4158 = vmatprep.subr.bf16.mxu1 %v5094_v40 }
 0xbd0   : > { %4159 = vmatpush3.bf16.msra.mxu1 %v4543_v14  ;;  %v4559_v14 = vld [vmem:[#allocation18] sm:$0xff]  }
 0xbd1   : > { %4164 = vmatprep.subr.bf16.mxu1 %v5094_v40 }
 0xbd3   : > { %4161 = vmatmul.mubr.msk.bf16.vlgmr.msra.gmra.mxu1 %vm1624_vm10, %v1985_v15  ;;  %v4560_v15 = vld [vmem:[#allocation4 + $0x8] sm:$0xff]  }
 0xbd4   : > { %4166 = vmatprep.mubr.msk.bf16.mxu1 %vm5095_vm7, %v5094_v40 }
 0xc8b   : > { %v1973_v16 = vpop.f32.mrf.mxu1 }
 0xc8c   : > { %v1979_v30 = vpack.c.bf16 %v1973_v16, %v1973_v16 }
 0xc8d   : > { %v4154_v17 = vpop.f32.mrf.mxu1 }
 0xc8f   : > { %v1976_v18 = vpop.f32.mrf.mxu1 }
 0xc91   : > { %v4155_v19 = vpop.f32.mrf.mxu1 }
 0xc93   : > { %v2035_v20 = vpop.f32.mrf.mxu1 }
 0xc94   : > { %v2041_v22 = vmul.f32 0.17677669, %v2035_v20 }
 0xc95   : > { %v4162_v23 = vpop.f32.mrf.mxu1 }
 0xc96   : > { %v2042_v24 = vsel %vm1453_vm11, %v2041_v22, -1e+09 }
 0xc97   : > { %v2038_v25 = vpop.f32.mrf.mxu1  ;;  %v2043_v26 = vsel %vm1670_vm12, %v2042_v24, -inf }
 0xc98   : > { %2044 = vmax.xlane.f32.xlu1 %v2043_v26  ;;  %v3771_v25 = vld [vmem:[#allocation14 + $0x1] ss:$0 sm:$0xff] }
 0xc99   : > { %v4163_v27 = vpop.f32.mrf.mxu1 }
 0xca9   : > { %2103 = vrot.lane.b32.xlu1 %v1857_v28, %s5098_s2  ;;  %v3772_v28 = vld [vmem:[#allocation15 + $0x1] ss:$0 sm:$0xff] }
 0xcad   : > { %2106 = vrot.lane.b32.xlu1 %v1979_v30, %s5097_s6 }
 0xd21   : > { %v2045_v31 = vpop.xlane.xlu1 %2044 }
 0xd22   : > { %v2046_v32 = vsub.f32 %v2042_v24, %v2045_v31 }
 0xd24   : > { %v2047_v33 = vmul.f32 1.442695, %v2046_v32 }
 0xd25   : > { %v2104_v54 = vpop.permute.xlu1 %2103 }
 0xd26   : > { %4634 = vpow2.f32 %v2047_v33  ;;  %v2113_v57 = vsel %vm1624_vm10, %v1734_v55, %v2104_v54  ;;  %v4561_v33 = vld [vmem:[#allocation4] sm:$0xff]   ;;  %v5099_v54 = vmov 0  }
 0xd29   : > { %v2107_v56 = vpop.permute.xlu1 %2106 }
 0xd2a   : > { %v2116_v58 = vsel %vm2114_vm13, %v2113_v57, %v2107_v56 }
 0xd33   : > { %v4635_v35 = vpop.eup %4634 }
 0xd34   : > { %v2049_v36 = vsel %vm1670_vm12, %v4635_v35, 0.0 }
 0xd35   : > { %2050 = vadd.xlane.f32.xlu0 %v2049_v36 }
 0xd4b   : > { %2055 = vrot.lane.b32.xlu0 %v5599_v21, %s5098_s2  ;;  %v4546_v21 = vld [vmem:[#allocation17 + $0xe8] sm:$0xff]  }
 0xd4c   : > { %4175 = vmatpush3.bf16.msra.mxu0 %v4546_v21  ;;  %v4564_v21 = vld [vmem:[#allocation4 + $0x28] sm:$0xff]  }
 0xd4d   : > { %4176 = vmatprep.subr.bf16.mxu0 %v5094_v40 }
 0xd50   : > { %4177 = vmatpush3.bf16.msra.mxu0 %v4547_v44 }
 0xd51   : > { %4178 = vmatprep.subr.bf16.mxu0 %v5094_v40 }
 0xd54   : > { %4179 = vmatpush3.bf16.msra.mxu0 %v4548_v45  ;;  %v4565_v45 = vld [vmem:[#allocation4 + $0x20] sm:$0xff]  }
 0xd55   : > { %4180 = vmatprep.subr.bf16.mxu0 %v5094_v40 }
 0xd58   : > { %4181 = vmatpush3.bf16.msra.mxu0 %v4549_v46  ;;  %v4566_v46 = vld [vmem:[#allocation4 + $0x38] sm:$0xff]  }
 0xd59   : > { %4182 = vmatprep.subr.bf16.mxu0 %v5094_v40 }
 0xd5c   : > { %4183 = vmatpush3.bf16.msra.mxu0 %v4550_v47 }
 0xd5d   : > { %4184 = vmatprep.subr.bf16.mxu0 %v5094_v40 }
 0xd60   : > { %4185 = vmatpush3.bf16.msra.mxu0 %v4551_v48  ;;  %v4567_v48 = vld [vmem:[#allocation4 + $0x30] sm:$0xff]  }
 0xd61   : > { %4210 = vmatprep.subr.bf16.mxu0 %v5094_v40 }
 0xdbe   : > { %v2051_v8 = vpop.xlane.xlu0 %2050 }
 0xdbf   : > { %4636 = vrcp.f32 %v2051_v8 }
 0xdc2   : > { %v2056_v37 = vpop.permute.xlu0 %2055 }
 0xdc3   : > { %4165 = vmatpush3.bf16.msra.mxu1 %v2056_v37 }
 0xdc4   : > { %4190 = vmatprep.subr.bf16.mxu1 %v5094_v40 }
 0xdcc   : > { %v4637_v38 = vpop.eup %4636 }
 0xdcd   : > { %v2053_v39 = vmul.f32 %v4637_v38, %v4635_v35  ;;  %v3773_v35 = vld [vmem:[%s5971_s8] ss:$0 sm:$0xff] }
 0xdcf   : > { %v2054_v41 = vpack.c.bf16 %v2053_v39, %v2053_v39  ;;  %v4562_v39 = vld [vmem:[#allocation4 + $0x18] sm:$0xff]  }
 0xdd1   : > { %4167 = vmatmul.mubr.msk.bf16.vlgmr.msra.gmra.mxu1 %vm1670_vm12, %v2054_v41 }
 0xdd2   : > { %4206 = vmatprep.mubr.msk.bf16.mxu1 %vm5095_vm7, %v5094_v40  ;;  %4191 = vmatpush3.bf16.msra.mxu1 %v4552_v9 }
 0xdd3   : > { %4192 = vmatprep.subr.bf16.mxu1 %v5094_v40 }
 0xdd6   : > { %4193 = vmatpush3.bf16.msra.mxu1 %v4553_v10 }
 0xdd7   : > { %4194 = vmatprep.subr.bf16.mxu1 %v5094_v40 }
 0xe91   : > { %v2095_v49 = vpop.f32.mrf.mxu1 }
 0xe92   : > { %v2101_v50 = vpack.c.bf16 %v2095_v49, %v2095_v49 }
 0xe93   : > { %v4168_v51 = vpop.f32.mrf.mxu1 }
 0xe94   : > { %2109 = vrot.lane.b32.xlu0 %v2101_v50, %s5096_s4  ;;  %v2445_v50 = vlaneseq  ;;  %v1454_v51 = vld [vmem:[%s607_s0] sm:$0x1]  ;;  %s5975_s0 = sld [smem:[#allocation52_spill]] }
 0xe95   : > { %v2098_v52 = vpop.f32.mrf.mxu1  ;;  %vm1455_vm1 = vcmp.ne.s32.totalorder %v1454_v51, 0 }
 0xe96   : > { %v5719_v52 = vshrl.u32 %v2445_v50, 7  ;;  %v2444_v55 = vsel %vm1455_vm1, 1, %v5099_v54 }
 0xe97   : > { %v4169_v53 = vpop.f32.mrf.mxu1 }
 0xe98   : > { %v2447_v53 = vsub.s32 0, %v5719_v52 }
 0xe9a   : > { %v2448_v56 = vrot.slane %v2444_v55, %v2447_v53 }
 0xe9c   : > { %vm2449_vm2 = vcmp.eq.s32.totalorder %v2448_v56, 1 }
 0xf06   : > { %v2110_v59 = vpop.permute.xlu0 %2109 }
 0xf07   : > { %v2119_v60 = vsel %vm2117_vm14, %v2116_v58, %v2110_v59 }
 0xf08   : > { %4187 = vmatmul.mubr.bf16.vlgmr.msra.gmra.mxu0 %v2119_v60 }
 0xf09   : > { %4214 = vmatprep.mubr.msk.bf16.mxu0 %vm5095_vm7, %v5094_v40  ;;  %4211 = vmatpush3.bf16.msra.mxu0 %v4560_v15 }
 0xf0a   : > { %4212 = vmatprep.subr.bf16.mxu0 %v5094_v40 }
 0xf0d   : > { %4213 = vmatpush3.bf16.msra.mxu0 %v4561_v33 }
 0xf0e   : > { %4226 = vmatprep.subr.bf16.mxu0 %v5094_v40 }
 0xfc8   : > { %v2228_v62 = vpop.f32.mrf.mxu0 }
 0xfc9   : > { %v2229_v29 = vadd.f32 %v3762_v61, %v2228_v62 }
 0xfca   : > { %v4188_v63 = vpop.f32.mrf.mxu0 }
 0xfcb   : > { %v5677_v0 = vadd.f32 %v2229_v29, %v5555_v34  ;;  %v4554_v34 = vld [vmem:[#allocation18 + $0x28] sm:$0xff]   ;;  %v4568_v63 = vld [vmem:[#allocation5 + $0x8] sm:$0xff]  }
 0xfcc   : > { %v2231_v1 = vpop.f32.mrf.mxu0  ;;  %4195 = vmatpush3.bf16.msra.mxu1 %v4554_v34 }
 0xfcd   : > { %2239 = vadd.xlane.f32.xlu1 %v5677_v0  ;;  %4196 = vmatprep.subr.bf16.mxu1 %v5094_v40  ;;  %v5728_v1 = vld [vmem:[#allocation5] sm:$0xff]  }
 0xfce   : > { %v4189_v2 = vpop.f32.mrf.mxu0 }
 0xfd0   : > { %4197 = vmatpush3.bf16.msra.mxu1 %v4555_v11 }
 0xfd1   : > { %4198 = vmatprep.subr.bf16.mxu1 %v5094_v40 }
 0xfd4   : > { %4199 = vmatpush3.bf16.msra.mxu1 %v4556_v12 }
 0xfd5   : > { %4200 = vmatprep.subr.bf16.mxu1 %v5094_v40 }
 0xfd8   : > { %4201 = vmatpush3.bf16.msra.mxu1 %v4557_v5 }
 0xfd9   : > { %4202 = vmatprep.subr.bf16.mxu1 %v5094_v40 }
 0xfdc   : > { %4203 = vmatpush3.bf16.msra.mxu1 %v4558_v13 }
 0xfdd   : > { %4204 = vmatprep.subr.bf16.mxu1 %v5094_v40 }
 0xfe0   : > { %4205 = vmatpush3.bf16.msra.mxu1 %v4559_v14 }
 0xfe1   : > { %4218 = vmatprep.subr.bf16.mxu1 %v5094_v40 }
0x1056   : > { %v2240_v3 = vpop.xlane.xlu1 %2239 }
0x1057   : > { %v2241_v4 = vmul.f32 0.0078125, %v2240_v3 }
0x1059   : > { %v2242_v6 = vsub.f32 %v5677_v0, %v2241_v4 }
0x105b   : > { %v2243_v7 = vmul.f32 %v2242_v6, %v2242_v6  ;;  %v2253_v26 = vmul.f32 %v3771_v25, %v2242_v6 }
0x105d   : > { %2244 = vadd.xlane.f32.xlu0 %v2243_v7 }
0x10e6   : > { %v2245_v16 = vpop.xlane.xlu0 %2244 }
0x10e7   : > { %v2246_v17 = vmul.f32 0.007874016, %v2245_v16 }
0x10e9   : > { %4638 = vrsqrt.f32 %v2246_v17  ;;  %vm2256_vm15 = vcmp.eq.f32.partialorder %v2246_v17, inf  ;;  %v2259_v20 = vand.u32 2147483648, %v2246_v17  ;;  %vm2258_vm0 = vcmp.eq.f32.partialorder %v2246_v17, 0.0 }
0x10f6   : > { %v4639_v18 = vpop.eup %4638 }
0x10f7   : > { %v2255_v19 = vmul.f32 %v4639_v18, %v2246_v17 }
0x10f9   : > { %v2257_v22 = vsel %vm2256_vm15, %v2246_v17, %v2255_v19 }
0x10fa   : > { %v2260_v23 = vsel %vm2258_vm0, %v2259_v20, %v2257_v22 }
0x10fb   : > { %v2261_v24 = vadd.f32 1e-06, %v2260_v23 }
0x10fd   : > { %4640 = vrcp.f32 %v2261_v24 }
0x110a   : > { %v4641_v27 = vpop.eup %4640 }
0x110b   : > { %v2263_v30 = vmul.f32 %v4641_v27, %v2253_v26 }
0x110d   : > { %v2270_v31 = vadd.f32 %v3772_v28, %v2263_v30 }
0x110f   : > { %v2271_v32 = vpack.c.bf16 %v2270_v31, %v2270_v31 }
0x1111   : > { %4207 = vmatmul.mubr.bf16.vlgmr.msra.gmra.mxu1 %v2271_v32 }
0x1112   : > { %4222 = vmatprep.mubr.msk.bf16.mxu1 %vm5095_vm7, %v5094_v40  ;;  %4219 = vmatpush3.bf16.msra.mxu1 %v4568_v63 }
0x1113   : > { %4220 = vmatprep.subr.bf16.mxu1 %v5094_v40 }
0x1116   : > { %4221 = vmatpush3.bf16.msra.mxu1 %v5728_v1 }
0x1117   : > { %4234 = vmatprep.subr.bf16.mxu1 %v5094_v40 }
0x11d1   : > { %v2377_v36 = vpop.f32.mrf.mxu1 }
0x11d2   : > { %v2378_v8 = vadd.f32 %v3773_v35, %v2377_v36 }
0x11d3   : > { %v4208_v37 = vpop.f32.mrf.mxu1 }
0x11d4   : > { %v2383_v38 = vpack.c.bf16 %v2378_v8, %v2378_v8 }
0x11d5   : > { %v2380_v41 = vpop.f32.mrf.mxu1 }
0x11d6   : > { %2653 = vrot.lane.b32.xlu1 %v2383_v38, %s5097_s6  ;;  %2528 = vrot.lane.b32.xlu0 %v2383_v38, %s5096_s4 }
0x11d7   : > { %4215 = vmatmul.mubr.msk.bf16.vlgmr.msra.gmra.mxu0 %vm1624_vm10, %v2383_v38  ;;  %v4209_v42 = vpop.f32.mrf.mxu1 }
0x11d8   : > { %4227 = vmatpush3.bf16.msra.mxu0 %v4562_v39  ;;  %4230 = vmatprep.mubr.msk.bf16.mxu0 %vm5095_vm7, %v5094_v40 }
0x11d9   : > { %4228 = vmatprep.subr.bf16.mxu0 %v5094_v40 }
0x11da   : > { %2778 = vrot.lane.b32.xlu1 %v2383_v38, %s5098_s2 }
0x11dc   : > { %4229 = vmatpush3.bf16.msra.mxu0 %v4563_v43 }
0x11dd   : > { %4242 = vmatprep.subr.bf16.mxu0 %v5094_v40 }
0x1248   : > { %v2529_v44 = vpop.permute.xlu0 %2528  ;;  %v2654_v47 = vpop.permute.xlu1 %2653 }
0x1249   : > { %4231 = vmatmul.mubr.msk.bf16.vlgmr.msra.gmra.mxu0 %vm1624_vm10, %v2529_v44 }
0x124a   : > { %4243 = vmatpush3.bf16.msra.mxu0 %v4564_v21  ;;  %4246 = vmatprep.mubr.msk.bf16.mxu0 %vm5095_vm7, %v5094_v40 }
0x124b   : > { %4244 = vmatprep.subr.bf16.mxu0 %v5094_v40 }
0x124c   : > { %v2779_v49 = vpop.permute.xlu1 %2778 }
0x124e   : > { %4245 = vmatpush3.bf16.msra.mxu0 %v4565_v45 }
0x124f   : > { %4258 = vmatprep.subr.bf16.mxu0 %v5094_v40 }
0x1251   : > { %4247 = vmatmul.mubr.msk.bf16.vlgmr.msra.gmra.mxu0 %vm1624_vm10, %v2654_v47 }
0x1252   : > { %4259 = vmatpush3.bf16.msra.mxu0 %v4566_v46  ;;  %4262 = vmatprep.mubr.msk.bf16.mxu0 %vm5095_vm7, %v5094_v40 }
0x1253   : > { %4260 = vmatprep.subr.bf16.mxu0 %v5094_v40 }
0x1256   : > { %4261 = vmatpush3.bf16.msra.mxu0 %v4567_v48 }
0x1257   : > { %4274 = vmatprep.subr.bf16.mxu0 %v5094_v40 }
0x1259   : > { %4263 = vmatmul.mubr.msk.bf16.vlgmr.msra.gmra.mxu0 %vm1624_vm10, %v2779_v49 }
0x125a   : > { %4290 = vmatprep.mubr.msk.bf16.mxu0 %vm5095_vm7, %v5094_v40 }
0x1297   : > { %v2437_v57 = vpop.f32.mrf.mxu0 }
0x1298   : > { %v2443_v58 = vmul.f32 0.17677669, %v2437_v57 }
0x1299   : > { %v4216_v59 = vpop.f32.mrf.mxu0 }
0x129a   : > { %v2450_v60 = vsel %vm2449_vm2, %v2443_v58, -1e+09 }
0x129b   : > { %v2440_v61 = vpop.f32.mrf.mxu0  ;;  %v2451_v62 = vsel %vm1624_vm10, %v2450_v60, -inf }
0x129c   : > { %2452 = vmax.xlane.f32.xlu0 %v2451_v62 }
0x129d   : > { %v4217_v29 = vpop.f32.mrf.mxu0 }
0x1309   : > { %v2579_v2 = vpop.f32.mrf.mxu0 }
0x130a   : > { %v2585_v3 = vmul.f32 0.17677669, %v2579_v2 }
0x130b   : > { %v4232_v4 = vpop.f32.mrf.mxu0 }
0x130c   : > { %v2586_v6 = vsel %vm2449_vm2, %v2585_v3, -1e+09 }
0x130d   : > { %v2582_v7 = vpop.f32.mrf.mxu0  ;;  %v2587_v9 = vsel %vm1624_vm10, %v2586_v6, -inf }
0x130e   : > { %2588 = vmax.xlane.f32.xlu1 %v2587_v9 }
0x130f   : > { %v4233_v10 = vpop.f32.mrf.mxu0 }
0x1311   : > { %v2704_v34 = vpop.f32.mrf.mxu0 }
0x1312   : > { %v2710_v11 = vmul.f32 0.17677669, %v2704_v34 }
0x1313   : > { %v4248_v12 = vpop.f32.mrf.mxu0 }
0x1314   : > { %v2711_v5 = vsel %vm2449_vm2, %v2710_v11, -1e+09  ;;  %v4570_v11 = vld [vmem:[#allocation18 + $0xf8] sm:$0xff]  }
0x1315   : > { %v2707_v13 = vpop.f32.mrf.mxu0  ;;  %v2712_v14 = vsel %vm1624_vm10, %v2711_v5, -inf  ;;  %4275 = vmatpush3.bf16.msra.mxu0 %v4570_v11  ;;  %v4607_v11 = vld [vmem:[#allocation21 + $0x28] sm:$0xff]  }
0x1316   : > { %2713 = vmax.xlane.f32.xlu0 %v2712_v14  ;;  %4276 = vmatprep.subr.bf16.mxu0 %v5094_v40 }
0x1317   : > { %v4249_v15 = vpop.f32.mrf.mxu0 }
0x1319   : > { %v2829_v16 = vpop.f32.mrf.mxu0 }
0x131a   : > { %v2835_v17 = vmul.f32 0.17677669, %v2829_v16  ;;  %v4572_v16 = vld [vmem:[#allocation18 + $0xe8] sm:$0xff]  }
0x131b   : > { %v4264_v18 = vpop.f32.mrf.mxu0 }
0x131c   : > { %v2836_v19 = vsel %vm2449_vm2, %v2835_v17, -1e+09  ;;  %v4573_v18 = vld [vmem:[#allocation18 + $0xe0] sm:$0xff]  }
0x131d   : > { %v2832_v20 = vpop.f32.mrf.mxu0  ;;  %v2837_v22 = vsel %vm1624_vm10, %v2836_v19, -inf }
0x131e   : > { %2838 = vmax.xlane.f32.xlu0 %v2837_v22 }
0x131f   : > { %v4265_v23 = vpop.f32.mrf.mxu0  ;;  %2599 = vrot.lane.b32.xlu1 %v5728_v1, %s5096_s4 }
0x1320   : > { %v4574_v23 = vld [vmem:[#allocation18 + $0xd8] sm:$0xff]  }
0x1323   : > { %2726 = vrot.lane.b32.xlu1 %v4568_v63, %s5097_s6 }
0x1325   : > { %v2453_v24 = vpop.xlane.xlu0 %2452 }
0x1326   : > { %v2454_v25 = vsub.f32 %v2450_v60, %v2453_v24 }
0x1328   : > { %v2455_v26 = vmul.f32 1.442695, %v2454_v25  ;;  %v4575_v25 = vld [vmem:[#allocation18 + $0xd0] sm:$0xff]  }
0x132a   : > { %4642 = vpow2.f32 %v2455_v26  ;;  %v4576_v26 = vld [vmem:[#allocation18 + $0xc8] sm:$0xff]  }
0x1337   : > { %v4643_v27 = vpop.eup %4642 }
0x1338   : > { %v2457_v28 = vsel %vm1624_vm10, %v4643_v27, 0.0 }
0x1339   : > { %2458 = vadd.xlane.f32.xlu0 %v2457_v28 }
0x134f   : > { %2601 = vrot.lane.b32.xlu0 %v4568_v63, %s5096_s4 }
0x1397   : > { %v2589_v30 = vpop.xlane.xlu1 %2588 }
0x1398   : > { %v2590_v31 = vsub.f32 %v2586_v6, %v2589_v30 }
0x139a   : > { %v2591_v32 = vmul.f32 1.442695, %v2590_v31 }
0x139b   : > { %v2600_v48 = vpop.permute.xlu1 %2599 }
0x139c   : > { %4644 = vpow2.f32 %v2591_v32 }
0x139f   : > { %v2714_v33 = vpop.xlane.xlu0 %2713  ;;  %v2727_v51 = vpop.permute.xlu1 %2726 }
0x13a0   : > { %v2715_v35 = vsub.f32 %v2711_v5, %v2714_v33  ;;  %v4571_v5 = vld [vmem:[#allocation18 + $0xf0] sm:$0xff]  }
0x13a1   : > { %4277 = vmatpush3.bf16.msra.mxu0 %v4571_v5  ;;  %v4609_v5 = vld [vmem:[#allocation21 + $0x20] sm:$0xff]  }
0x13a2   : > { %v2716_v36 = vmul.f32 1.442695, %v2715_v35  ;;  %4278 = vmatprep.subr.bf16.mxu0 %v5094_v40 }
0x13a4   : > { %4646 = vpow2.f32 %v2716_v36 }
0x13a5   : > { %4279 = vmatpush3.bf16.msra.mxu0 %v4572_v16  ;;  %v4613_v16 = vld [vmem:[#allocation21 + $0x10] sm:$0xff]  }
0x13a6   : > { %4280 = vmatprep.subr.bf16.mxu0 %v5094_v40 }
0x13a7   : > { %v2839_v41 = vpop.xlane.xlu0 %2838 }
0x13a8   : > { %v2840_v43 = vsub.f32 %v2836_v19, %v2839_v41 }
0x13a9   : > { %v4645_v8 = vpop.eup %4644  ;;  %4281 = vmatpush3.bf16.msra.mxu0 %v4573_v18 }
0x13aa   : > { %v2593_v37 = vsel %vm1624_vm10, %v4645_v8, 0.0  ;;  %v2841_v21 = vmul.f32 1.442695, %v2840_v43  ;;  %4282 = vmatprep.subr.bf16.mxu0 %v5094_v40 }
0x13ab   : > { %2594 = vadd.xlane.f32.xlu1 %v2593_v37 }
0x13ad   : > { %4283 = vmatpush3.bf16.msra.mxu0 %v4574_v23 }
0x13ae   : > { %4284 = vmatprep.subr.bf16.mxu0 %v5094_v40 }
0x13b1   : > { %v4647_v38 = vpop.eup %4646  ;;  %4285 = vmatpush3.bf16.msra.mxu0 %v4575_v25  ;;  %v3810_v25 = vld [vmem:[#allocation14 + $0x2] ss:$0 sm:$0xff] }
0x13b2   : > { %v2718_v39 = vsel %vm1624_vm10, %v4647_v38, 0.0  ;;  %4286 = vmatprep.subr.bf16.mxu0 %v5094_v40 }
0x13b3   : > { %2719 = vadd.xlane.f32.xlu0 %v2718_v39 }
0x13b5   : > { %4287 = vmatpush3.bf16.msra.mxu0 %v4576_v26 }
0x13b6   : > { %4288 = vmatprep.subr.bf16.mxu0 %v5094_v40 }
0x13bc   : > { %2724 = vrot.lane.b32.xlu1 %v5728_v1, %s5097_s6 }
0x13c2   : > { %v2459_v42 = vpop.xlane.xlu0 %2458 }
0x13c3   : > { %4648 = vrcp.f32 %v2459_v42 }
0x13c4   : > { %4650 = vpow2.f32 %v2841_v21 }
0x13c6   : > { %v2602_v47 = vpop.permute.xlu0 %2601 }
0x13c9   : > { %2851 = vrot.lane.b32.xlu0 %v4568_v63, %s5098_s2 }
0x13d0   : > { %v4649_v44 = vpop.eup %4648 }
0x13d1   : > { %v2461_v45 = vmul.f32 %v4649_v44, %v4643_v27  ;;  %v4651_v49 = vpop.eup %4650  ;;  %v4577_v27 = vld [vmem:[#allocation18 + $0xc0] sm:$0xff]  }
0x13d2   : > { %v2843_v50 = vsel %vm1624_vm10, %v4651_v49, 0.0  ;;  %4289 = vmatpush3.bf16.msra.mxu0 %v4577_v27 }
0x13d3   : > { %v2462_v46 = vpack.c.bf16 %v2461_v45, %v2461_v45 }
0x13d5   : > { %4223 = vmatmul.mubr.msk.bf16.vlgmr.msra.gmra.mxu1 %vm1624_vm10, %v2462_v46 }
0x13d6   : > { %4235 = vmatpush3.bf16.msra.mxu1 %v2602_v47  ;;  %4238 = vmatprep.mubr.msk.bf16.mxu1 %vm5095_vm7, %v5094_v40 }
0x13d7   : > { %4236 = vmatprep.subr.bf16.mxu1 %v5094_v40 }
0x13da   : > { %4237 = vmatpush3.bf16.msra.mxu1 %v2600_v48 }
0x13db   : > { %4250 = vmatprep.subr.bf16.mxu1 %v5094_v40 }
0x13e0   : > { %2844 = vadd.xlane.f32.xlu1 %v2843_v50 }
0x13f1   : > { %2849 = vrot.lane.b32.xlu1 %v5728_v1, %s5098_s2 }
0x1434   : > { %v2595_v55 = vpop.xlane.xlu1 %2594 }
0x1435   : > { %4652 = vrcp.f32 %v2595_v55  ;;  %v4578_v55 = vld [vmem:[#allocation20 + $0x70] ss:$8 sps:$4 sm:$0xff]  }
0x1438   : > { %v2725_v61 = vpop.permute.xlu1 %2724 }
0x143c   : > { %v2720_v56 = vpop.xlane.xlu0 %2719 }
0x143d   : > { %4654 = vrcp.f32 %v2720_v56  ;;  %v4583_v56 = vld [vmem:[#allocation20 + $0x64] ss:$8 sps:$4 sm:$0xff]  }
0x1440   : > { %v2852_v63 = vpop.permute.xlu0 %2851 }
0x1442   : > { %v4653_v57 = vpop.eup %4652 }
0x1443   : > { %v2597_v58 = vmul.f32 %v4653_v57, %v4645_v8  ;;  %v4586_v57 = vld [vmem:[#allocation20 + $0x54] ss:$8 sps:$4 sm:$0xff]  }
0x1445   : > { %v2598_v59 = vpack.c.bf16 %v2597_v58, %v2597_v58  ;;  %v4584_v58 = vld [vmem:[#allocation20 + $0x50] ss:$8 sps:$4 sm:$0xff]  }
0x1447   : > { %4239 = vmatmul.mubr.msk.bf16.vlgmr.msra.gmra.mxu1 %vm1624_vm10, %v2598_v59  ;;  %v4589_v59 = vld [vmem:[#allocation20 + $0x44] ss:$8 sps:$4 sm:$0xff]  }
0x1448   : > { %4251 = vmatpush3.bf16.msra.mxu1 %v2727_v51  ;;  %4254 = vmatprep.mubr.msk.bf16.mxu1 %vm5095_vm7, %v5094_v40  ;;  %v4580_v51 = vld [vmem:[#allocation20 + $0x74] ss:$8 sps:$4 sm:$0xff]  }
0x1449   : > { %4252 = vmatprep.subr.bf16.mxu1 %v5094_v40 }
0x144a   : > { %v4655_v60 = vpop.eup %4654 }
0x144b   : > { %v2722_v62 = vmul.f32 %v4655_v60, %v4647_v38  ;;  %v4587_v60 = vld [vmem:[#allocation20 + $0x40] ss:$8 sps:$4 sm:$0xff]  }
0x144c   : > { %4253 = vmatpush3.bf16.msra.mxu1 %v2725_v61  ;;  %v4592_v61 = vld [vmem:[#allocation20 + $0x34] ss:$8 sps:$4 sm:$0xff]  }
0x144d   : > { %v2723_v29 = vpack.c.bf16 %v2722_v62, %v2722_v62  ;;  %4266 = vmatprep.subr.bf16.mxu1 %v5094_v40  ;;  %v4590_v62 = vld [vmem:[#allocation20 + $0x30] ss:$8 sps:$4 sm:$0xff]  }
0x144f   : > { %4255 = vmatmul.mubr.msk.bf16.vlgmr.msra.gmra.mxu1 %vm1624_vm10, %v2723_v29  ;;  %v4595_v29 = vld [vmem:[#allocation20 + $0x24] ss:$8 sps:$4 sm:$0xff]  }
0x1450   : > { %4267 = vmatpush3.bf16.msra.mxu1 %v2852_v63  ;;  %4270 = vmatprep.mubr.msk.bf16.mxu1 %vm5095_vm7, %v5094_v40  ;;  %v4593_v63 = vld [vmem:[#allocation20 + $0x20] ss:$8 sps:$4 sm:$0xff]  }
0x1451   : > { %4268 = vmatprep.subr.bf16.mxu1 %v5094_v40  ;;  %v3801_v40 = vld [vmem:[%s5971_s8 + $0x3] ss:$0 sm:$0xff] }
0x1469   : > { %v2845_v1 = vpop.xlane.xlu1 %2844 }
0x146a   : > { %4656 = vrcp.f32 %v2845_v1  ;;  %v4598_v1 = vld [vmem:[#allocation20 + $0x14] ss:$8 sps:$4 sm:$0xff]  }
0x146d   : > { %v2850_v2 = vpop.permute.xlu1 %2849 }
0x146e   : > { %4269 = vmatpush3.bf16.msra.mxu1 %v2850_v2  ;;  %v4596_v2 = vld [vmem:[#allocation20 + $0x10] ss:$8 sps:$4 sm:$0xff]  }
0x146f   : > { %3175 = vmatprep.subr.bf16.mxu1 %v4580_v51 }
0x1477   : > { %v4657_v3 = vpop.eup %4656 }
0x1478   : > { %v2847_v4 = vmul.f32 %v4657_v3, %v4651_v49  ;;  %v4601_v3 = vld [vmem:[#allocation20 + $0x4] ss:$8 sps:$4 sm:$0xff]  }
0x147a   : > { %v2848_v6 = vpack.c.bf16 %v2847_v4, %v2847_v4  ;;  %v4599_v4 = vld [vmem:[#allocation20] ss:$8 sps:$4 sm:$0xff]  }
0x147c   : > { %4271 = vmatmul.mubr.msk.bf16.vlgmr.msra.gmra.mxu1 %vm1624_vm10, %v2848_v6  ;;  %v4602_v6 = vld [vmem:[#allocation21 + $0x78] sm:$0xff]  }
0x147d   : > { %3207 = vmatprep.mubr.bf16.mxu1 %v5099_v54  ;;  %3176 = vmatpush1.bf16.msra.mxu1 %v4578_v55 }
0x147e   : > { %3177 = vmatprep.subr.bf16.mxu1 %v4583_v56  ;;  %3992 = vmatprep.subr.bf16.mxu0 %v4602_v6 }
0x1495   : > { %v2516_v7 = vpop.f32.mrf.mxu1 }
0x1496   : > { %v2522_v36 = vpack.c.bf16 %v2516_v7, %v2516_v7  ;;  %v4603_v7 = vld [vmem:[#allocation21 + $0x38] sm:$0xff]  }
0x1497   : > { %v4224_v9 = vpop.f32.mrf.mxu1 }
0x1498   : > { %v4604_v9 = vld [vmem:[#allocation21 + $0x70] sm:$0xff]  }
0x1499   : > { %v2519_v10 = vpop.f32.mrf.mxu1 }
0x149a   : > { %v4605_v10 = vld [vmem:[#allocation21 + $0x30] sm:$0xff]  }
0x149b   : > { %v4225_v34 = vpop.f32.mrf.mxu1 }
0x149c   : > { %v4606_v34 = vld [vmem:[#allocation21 + $0x68] sm:$0xff]  }
0x1507   : > { %v2642_v12 = vpop.f32.mrf.mxu1 }
0x1508   : > { %v2648_v13 = vpack.c.bf16 %v2642_v12, %v2642_v12  ;;  %v4608_v12 = vld [vmem:[#allocation21 + $0x60] sm:$0xff]  }
0x1509   : > { %v4240_v14 = vpop.f32.mrf.mxu1 }
0x150a   : > { %2900 = vrot.lane.b32.xlu0 %v2648_v13, %s5098_s2  ;;  %v4610_v13 = vld [vmem:[#allocation21 + $0x58] sm:$0xff]  }
0x150b   : > { %v2645_v15 = vpop.f32.mrf.mxu1  ;;  %v4611_v14 = vld [vmem:[#allocation21 + $0x18] sm:$0xff]  }
0x150c   : > { %v4612_v15 = vld [vmem:[#allocation21 + $0x50] sm:$0xff]  }
0x150d   : > { %v4241_v54 = vpop.f32.mrf.mxu1 }
0x150f   : > { %v2767_v17 = vpop.f32.mrf.mxu1 }
0x1510   : > { %v2773_v19 = vpack.c.bf16 %v2767_v17, %v2767_v17 }
0x1511   : > { %v4256_v20 = vpop.f32.mrf.mxu1 }
0x1512   : > { %2903 = vrot.lane.b32.xlu1 %v2773_v19, %s5097_s6 }
0x1513   : > { %v2770_v22 = vpop.f32.mrf.mxu1 }
0x1515   : > { %v4257_v24 = vpop.f32.mrf.mxu1 }
0x153c   : > { %v2892_v28 = vpop.f32.mrf.mxu1 }
0x153d   : > { %v2898_v30 = vpack.c.bf16 %v2892_v28, %v2892_v28  ;;  %v3811_v28 = vld [vmem:[#allocation15 + $0x2] ss:$0 sm:$0xff] }
0x153e   : > { %v4272_v31 = vpop.f32.mrf.mxu1 }
0x153f   : > { %2906 = vrot.lane.b32.xlu0 %v2898_v30, %s5096_s4  ;;  %s3846_s4 = sshll.u32 %s5973_s17, 1 }
0x1540   : > { %v2895_v32 = vpop.f32.mrf.mxu1  ;;  %s3409_s6 = sadd.s32 %s5969_s10, %s3846_s4  ;;  %s3398_s10 = scalar_lea.sflag [#allocation8], %s614_s14 }
0x1541   : > { %s3847_s19 = sshll.u32 %s3409_s6, 7 }
0x1542   : > { %v4273_v33 = vpop.f32.mrf.mxu1  ;;  %s3411_s25 = scalar_lea.hbm %s5975_s0, %s3847_s19 }
0x1543   : > { %v4614_v33 = vld [vmem:[#allocation21 + $0x48] sm:$0xff]  }
0x157c   : > { %v2901_v35 = vpop.permute.xlu0 %2900 }
0x157d   : > { %v2910_v37 = vsel %vm1624_vm10, %v2522_v36, %v2901_v35  ;;  %v4615_v35 = vld [vmem:[#allocation21 + $0x8] sm:$0xff]   ;;  %v4616_v36 = vld [vmem:[#allocation21 + $0x40] sm:$0xff]  }
0x1584   : > { %v2904_v8 = vpop.permute.xlu1 %2903 }
0x1585   : > { %v2912_v38 = vsel %vm2114_vm13, %v2910_v37, %v2904_v8  ;;  %v4617_v8 = vld [vmem:[#allocation21] sm:$0xff]   ;;  %v3083_v37 = vld [vmem:[%s5972_s27] sm:$0x3]  ;;  %s5100_s27 = smov [#allocation23]  }
0x1586   : > { %s4934_s17 = sshll.u32 %s5100_s27, 4  ;;  %s4935_s17 = int_to_ptr.vmem [resolvable:$false] %s4934_s17 }
0x1587   : > { %s4936_s4 = scalar_lea.vmem %s4935_s17, 256  ;;  %p4937_p11 = scmp.lt.s32.totalorder %s3414_s1, %s4935_s17 }
0x1588   : > { %p4938_p3 = scmp.lt.s32.totalorder %s4936_s4, %s4930_s11 }
0x158a   : > { %p4939_p12 = por %p4938_p3, %p4937_p11 }
0x158c   : > { %p4940_p5 = pnand %p4939_p12, %p4933_p10 }
0x15b1   : > { %v2907_v39 = vpop.permute.xlu0 %2906 }
0x15b2   : > { %v2914_v41 = vsel %vm2117_vm14, %v2912_v38, %v2907_v39  ;;  %v3091_v38 = vsub.s32 1, %v5719_v52  ;;  %v3088_v39 = vrot.slane %v3083_v37, %v2447_v53  ;;  %v3828_v53 = vld [vmem:[%s5974_s24] ss:$0 sm:$0xff] }
0x15b3   : > { %4291 = vmatmul.mubr.bf16.vlgmr.msra.gmra.mxu0 %v2914_v41 }
0x15b4   : > { %3993 = vmatpush3.bf16.msra.mxu0 %v4603_v7  ;;  %v3092_v41 = vrot.slane %v3083_v37, %v3091_v38 }
0x15b5   : > { %3994 = vmatprep.subr.bf16.mxu0 %v4604_v9 }
0x15b8   : > { %3995 = vmatpush3.bf16.msra.mxu0 %v4605_v10 }
0x15b9   : > { %3996 = vmatprep.subr.bf16.mxu0 %v4606_v34 }
0x15bc   : > { %3997 = vmatpush3.bf16.msra.mxu0 %v4607_v11 }
0x15bd   : > { %3998 = vmatprep.subr.bf16.mxu0 %v4608_v12 }
0x15c0   : > { %3999 = vmatpush3.bf16.msra.mxu0 %v4609_v5 }
0x15c1   : > { %4000 = vmatprep.subr.bf16.mxu0 %v4610_v13 }
0x15c4   : > { %4001 = vmatpush3.bf16.msra.mxu0 %v4611_v14 }
0x15c5   : > { %4002 = vmatprep.subr.bf16.mxu0 %v4612_v15 }
0x15c8   : > { %4003 = vmatpush3.bf16.msra.mxu0 %v4613_v16 }
0x15c9   : > { %4004 = vmatprep.subr.bf16.mxu0 %v4614_v33 }
0x15cc   : > { %4005 = vmatpush3.bf16.msra.mxu0 %v4615_v35 }
0x15cd   : > { %4006 = vmatprep.subr.bf16.mxu0 %v4616_v36 }
0x15d0   : > { %4007 = vmatpush3.bf16.msra.mxu0 %v4617_v8 }
0x1673   : > { %v3023_v42 = vpop.f32.mrf.mxu0 }
0x1674   : > { %v3024_v43 = vadd.f32 %v3801_v40, %v3023_v42 }
0x1675   : > { %v4292_v21 = vpop.f32.mrf.mxu0 }
0x1676   : > { %v5784_v44 = vadd.f32 %v3024_v43, %v5677_v0  ;;  %v4581_v0 = vld [vmem:[#allocation20 + $0x60] ss:$8 sps:$4 sm:$0xff]  }
0x1677   : > { %v3026_v45 = vpop.f32.mrf.mxu0  ;;  %3178 = vmatpush1.bf16.msra.mxu1 %v4581_v0 }
0x1678   : > { %3034 = vadd.xlane.f32.xlu1 %v5784_v44  ;;  %3179 = vmatprep.subr.bf16.mxu1 %v4586_v57 }
0x1679   : > { %v4293_v46 = vpop.f32.mrf.mxu0 }
0x167b   : > { %3180 = vmatpush1.bf16.msra.mxu1 %v4584_v58 }
0x167c   : > { %3181 = vmatprep.subr.bf16.mxu1 %v4589_v59 }
0x167f   : > { %3182 = vmatpush1.bf16.msra.mxu1 %v4587_v60 }
0x1680   : > { %3183 = vmatprep.subr.bf16.mxu1 %v4592_v61 }
0x1683   : > { %3184 = vmatpush1.bf16.msra.mxu1 %v4590_v62 }
0x1684   : > { %3185 = vmatprep.subr.bf16.mxu1 %v4595_v29 }
0x1687   : > { %3186 = vmatpush1.bf16.msra.mxu1 %v4593_v63 }
0x1688   : > { %3187 = vmatprep.subr.bf16.mxu1 %v4598_v1 }
0x168b   : > { %3188 = vmatpush1.bf16.msra.mxu1 %v4596_v2 }
0x168c   : > { %3189 = vmatprep.subr.bf16.mxu1 %v4601_v3 }
0x168f   : > { %3190 = vmatpush1.bf16.msra.mxu1 %v4599_v4 }
0x1701   : > { %v3035_v47 = vpop.xlane.xlu1 %3034 }
0x1702   : > { %v3036_v48 = vmul.f32 0.0078125, %v3035_v47 }
0x1704   : > { %v5788_v49 = vsub.f32 %v5784_v44, %v3036_v48 }
0x1706   : > { %v3038_v50 = vmul.f32 %v5788_v49, %v5788_v49  ;;  %v3048_v26 = vmul.f32 %v3810_v25, %v5788_v49 }
0x1708   : > { %3039 = vadd.xlane.f32.xlu0 %v3038_v50 }
0x1791   : > { %v3040_v54 = vpop.xlane.xlu0 %3039 }
0x1792   : > { %v3041_v17 = vmul.f32 0.007874016, %v3040_v54 }
0x1794   : > { %4658 = vrsqrt.f32 %v3041_v17  ;;  %vm3051_vm3 = vcmp.eq.f32.partialorder %v3041_v17, inf  ;;  %v3054_v20 = vand.u32 2147483648, %v3041_v17  ;;  %vm3053_vm4 = vcmp.eq.f32.partialorder %v3041_v17, 0.0 }
0x17a1   : > { %v4659_v18 = vpop.eup %4658 }
0x17a2   : > { %v3050_v19 = vmul.f32 %v4659_v18, %v3041_v17 }
0x17a4   : > { %v3052_v22 = vsel %vm3051_vm3, %v3041_v17, %v3050_v19 }
0x17a5   : > { %v3055_v23 = vsel %vm3053_vm4, %v3054_v20, %v3052_v22 }
0x17a6   : > { %v3056_v24 = vadd.f32 1e-06, %v3055_v23 }
0x17a8   : > { %4660 = vrcp.f32 %v3056_v24 }
0x17b5   : > { %v4661_v27 = vpop.eup %4660 }
0x17b6   : > { %v3058_v30 = vmul.f32 %v4661_v27, %v3048_v26 }
0x17b8   : > { %v3065_v31 = vadd.f32 %v3811_v28, %v3058_v30 }
0x17ba   : > { %v3066_v32 = vpack.c.bf16 %v3065_v31, %v3065_v31 }
0x17bc   : > { %3208 = vmatmul.mubr.bf16.vlgmr.msra.gmra.mxu1 %v3066_v32 }
0x187c   : > { %v3209_v40 = vpop.f32.mrf.mxu1 }
0x187d   : > { %v3210_v42 = vadd.f32 %v3209_v40, %v3088_v39 }
0x187e   : > { %v3211_v43 = vpop.f32.mrf.mxu1 }
0x187f   : > { %v3212_v21 = vadd.f32 %v3211_v43, %v3092_v41  ;;  %v3216_v45 = vmax.f32 %v3210_v42, 0.0 }
0x1880   : > { %v3213_v46 = vpop.f32.mrf.mxu1 }
0x1881   : > { %v3217_v47 = vmax.f32 %v3212_v21, 0.0  ;;  %v3218_v50 = vpack.c.bf16 %v3216_v45, %v3216_v45 }
0x1882   : > { %v3214_v48 = vpop.f32.mrf.mxu1 }
0x1883   : > { %v3219_v49 = vpack.c.bf16 %v3217_v47, %v3217_v47 }
0x1885   : > { %3387 = vmatprep.mubr.bf16.mxu0 %v3219_v49 }
0x1886   : > { %3388 = vmatmul.mubr.bf16.vlgmr.msra.gmra.mxu0 %v3218_v50 }
0x1946   : > { %v4008_v52 = vpop.f32.mrf.mxu0 }
0x1948   : > { %v4009_v51 = vpop.f32.mrf.mxu0 }
0x1949   : > { %v4010_v55 = vadd.f32 %v4009_v51, %v4008_v52 }
0x194a   : > { %v4011_v56 = vpop.f32.mrf.mxu0 }
0x194b   : > { %v3390_v0 = vadd.f32 %v4010_v55, %v3828_v53 }
0x194c   : > { %v4012_v57 = vpop.f32.mrf.mxu0 }
0x194d   : > { %v3395_v58 = vadd.f32 %v3390_v0, %v5784_v44 }
0x194f   : > { %3396 = vst [vmem:[%s698_s16] sm:$0xff] %v3395_v58 }
0x1950   : > { %4943 = shalt.err (!%p4940_p5)
}
0x1951   : > { %s4944_s6 = scalar_lea.hbm %s3411_s25, 128  ;;  %s4948_s16 = scalar_lea.hbm %s5975_s0, 512 }
0x1952   : > { %p4945_p8 = scmp.ne.s32.totalorder %s3411_s25, %s4944_s6  ;;  %p4949_p9 = scmp.lt.s32.totalorder %s3411_s25, %s5975_s0 }
0x1953   : > { %p4950_p7 = scmp.lt.s32.totalorder %s4948_s16, %s4944_s6 }
0x1954   : > { %p4946_p0 = pnand %p4945_p8, %p5407_p13 }
0x1955   : > { %p4951_p6 = por %p4950_p7, %p4949_p9 }
0x1956   : > { %p4947_p2 = pneg %p4946_p0 }
0x1958   : > { %p4952_p4 = pnand %p4951_p6, %p4947_p2 }
0x195a   : > { %4955 = shalt.err (!%p4952_p4)
}
0x195b   : > { %4326 = dma.vmem_to_hbm [thread:$0]  (%p5407_p13), %s3414_s1, 128, %s3411_s25, %s3398_s10  }
0x195c PF: > { %p4377_p1 = scmp.ge.s32.totalorder %s5074_s23, 2  ;;  %s3425_s24 = sand.u32 1, %s5034_s29  }
0x195d   : > { %p5976_p10 = scmp.ne.s32.totalorder %s5949_s13, 0  ;;  %s3426_s19 = scalar_lea.sflag [#allocation8], %s3425_s24 }
0x195f   : > { %p4361_p11 = pnand %p4377_p1, %p5976_p10 }
0x1961   : > { %p4362_p3 = pneg %p4361_p11 }
0x1963   : > { %5029 = dma.done.wait (%p4362_p3), %s3426_s19, 128  }
0x1964   : > { %5031 = vsyncadd (%p4362_p3), %s3426_s19, 4294967168  ;;  %s39_s23 = sadd.s32 1, %s5074_s23   ;;  %s5977_s16 = sld [smem:[#allocation32_spill]] }
0x1965   : > { %p36_p12 = scmp.ge.s32.totalorder %s39_s23, 6   ;;  %s5978_s29 = smov %s5038_s30 }
0x1966   : > { %s5979_s30 = smov %s5042_s15  ;;  %s5980_s15 = smov %s5421_s26 }
0x1967   : > { %s5981_s17 = smov %s5054_s18  ;;  %s5982_s18 = smov %s5418_s7 }
0x1968   : > { %s5983_s19 = smov %s5066_s21  ;;  %s5984_s20 = smov %s5070_s22 }
0x1969   : > { %s5985_s21 = smov %s5988_s5  ;;  %s5986_s22 = smov %s5992_s28 }
0x196a   :  { %38 = sbr.rel (!%p36_p12) target bundleno = 32 (0x20), region = 203 }
0x196f   :  { %3431 = vsyncpa [#allocation7], 1 }
0x1970   :  { %3433 = vsyncpa [#allocation7 + $0x1], 1 }
0x1971   :  { %3434 = vsyncpa [#allocation10], 1 }
0x1972   :  { %3436 = vsyncpa [#allocation10 + $0x1], 1 }
0x1973   :  { %3437 = vsyncpa [#allocation13], 1 }
0x1974   :  { %3439 = vsyncpa [#allocation13 + $0x1], 1 }
0x1975   :  { %3440 = vsyncpa [#allocation16], 1 }
0x1976   :  { %3441 = vsyncpa [#allocation19], 1 }
0x1977   :  { %3442 = vsyncpa [#allocation22], 1 }
0x1978   :  { %3443 = vsyncpa [#allocation8], 1 }
0x1979   :  { %3445 = vsyncpa [#allocation8 + $0x1], 1 }

</bundles_post_ra>
